<compile_context>
chip_gen: v7x
topology: tpu7x:2x2x1
jax: 0.10.0
libtpu: 0.0.40
codegen_flags: <defaults>
</compile_context>

<pallas_src>
import functools

import jax
import jax.numpy as jnp
from jax.experimental import pallas as pl
from jax.experimental.pallas import tpu as pltpu


# ------------------------------ Pallas kernel ------------------------------ #
def fused_hypernet_kernel(x_ref, xb_ref, w_ref, bw_ref, o_ref, *, D, R):
    """One grid step = R rows of the generated base weight + their outputs.

    x_ref : (1, D)      f32   flattened input (resident across the grid)
    xb_ref: (1, D)      bf16  pre-cast copy of x (MXU operand, cast hoisted)
    w_ref : (R*D, D)    bf16  this step's tile of hyper_weight_W
    bw_ref: (1, R*D)    f32   this step's tile of hyper_weight_b
    o_ref : (8, 128)    f32   padded output block; y values land at [0:R, 0]
    """
    # One long MXU op for the whole tile: gen_w rows [j*R, j*R+R) flattened.
    # TODO(synk): on v7x, if the bundle dump shows the M=1 MXU weight-push rate
    # (not HBM) is the binding slot, reformulate this GEMV on the VPU/XLU.
    gen_w = (
        jax.lax.dot_general(
            xb_ref[...], w_ref[...],
            dimension_numbers=(((1,), (1,)), ((), ())),   # x @ W_tile.T
            preferred_element_type=jnp.float32,
        )
        + bw_ref[...]                                     # (1, R*D) f32
    )

    x = x_ref[...]                                        # (1, D) f32

    # Deterministic padding for the unused part of the (8, 128) output block.
    o_ref[...] = jnp.zeros_like(o_ref)

    # Base-model contraction in f32: y[j*R + r] = sum_d x[d] * gen_w[r*D + d].
    # R static lane-chunk reductions (VPU mult + XLU reduce) + masked scalar
    # stores -- free under the DMA/MXU slack of the weight stream.
    for r in range(R):
        chunk = gen_w[:, r * D:(r + 1) * D]               # (1, D) f32, static view
        y_r = jnp.sum(chunk * x, axis=-1, keepdims=True)  # (1, 1) f32
        o_ref[r:r + 1, 0:1] = y_r


# ------------------------- DenseHypernetwork forward ----------------------- #
def dense_hypernetwork_forward(x, params, *, D, H):
    # TODO(synk): the generic named_parameters()/module-tree traversal and
    # __dict__ attribute patching have no Pallas equivalent; the base model is
    # fixed to nn.Linear(D, H) at build time, which reproduces the same math.
    B = x.shape[0]
    assert B == 1, "torch.reshape(hypernet(x), param.size()) only works for batch 1"
    xf = x.reshape(B, -1)                   # torch.flatten(x, 1, -1) -> (1, D)
    assert xf.shape[1] == D
    assert D % 128 == 0, "D must be lane-aligned (multiple of 128) for this kernel"

    # R rows of gen_w per grid step.  R=4 -> 8 MiB bf16 tile (16 MiB double-
    # buffered) and G = H/R grid steps (>= 2 per TensorCore on v7x for H=16).
    R = max(r for r in (4, 2, 1) if H % r == 0)
    G = H // R

    xb = xf.astype(jnp.bfloat16)            # hoisted MXU-operand cast (done once)
    w_flat = params["hyper_weight_W"]       # (H*D, D) bf16
    bw_row = params["hyper_weight_b"].reshape(1, H * D)   # metadata-only reshape

    y_padded = pl.pallas_call(
        functools.partial(fused_hypernet_kernel, D=D, R=R),
        out_shape=jax.ShapeDtypeStruct((G * 8, 128), jnp.float32),
        grid_spec=pltpu.PrefetchScalarGridSpec(
            num_scalar_prefetch=0,
            grid=(G,),
            in_specs=[
                pl.BlockSpec((1, D), lambda j: (0, 0)),        # x (f32): resident
                pl.BlockSpec((1, D), lambda j: (0, 0)),        # x (bf16): resident
                pl.BlockSpec((R * D, D), lambda j: (j, 0)),    # weight tile (8 MiB bf16)
                pl.BlockSpec((1, R * D), lambda j: (0, j)),    # weight-hypernet bias tile
            ],
            out_specs=pl.BlockSpec((8, 128), lambda j: (j, 0)),  # per-step padded y block
        ),
        compiler_params=pltpu.CompilerParams(
            dimension_semantics=("parallel",),      # independent steps -> 2-TC split on v7x
            vmem_limit_bytes=32 * 1024 * 1024,      # 16 MiB weights double-buffered + slack
        ),
    )(xf, xb, w_flat, bw_row)

    # Un-pad: step j, sublanes [0:R], lane 0 hold y_nobias[j*R : j*R+R].
    y_nobias = y_padded.reshape(G, 8, 128)[:, :R, 0].reshape(B, H)

    # Tiny (<=64 KiB) gen_b hypernetwork + bias add: plain XLA under the same jit.
    gen_b = jnp.dot(xf, params["hyper_bias_W"].T) + params["hyper_bias_b"]
    return y_nobias + gen_b                 # (1, H)


def reference_forward(x, params, *, D, H):
    xf = x.reshape(x.shape[0], -1)
    w = params["hyper_weight_W"]
    gen_w_flat = (
        jnp.dot(xf.astype(w.dtype), w.T, preferred_element_type=jnp.float32)
        + params["hyper_weight_b"]
    )
    gen_w = gen_w_flat.reshape(H, D)
    gen_b = (jnp.dot(xf, params["hyper_bias_W"].T) + params["hyper_bias_b"]).reshape(H)
    return jnp.dot(xf, gen_w.T) + gen_b


# ---------------------------------- main ----------------------------------- #
if __name__ == "__main__":
    C, Hs, Ws = 4, 16, 16
    D = C * Hs * Ws          # 1024 = in_features of every hypernetwork Linear
    H = 16                   # base model: nn.Linear(D, H)

    key = jax.random.PRNGKey(0)
    k_ww, k_wb, k_bw, k_bb, k_x = jax.random.split(key, 5)

    bound = 1.0 / float(jnp.sqrt(D))  # PyTorch nn.Linear default init scale
    params = {
        # bf16 storage for the dominant (H*D, D) weight: halves the HBM stream.
        # (Deliberate precision trade vs the strictly-f32 PyTorch module.)
        "hyper_weight_W": jax.random.uniform(
            k_ww, (H * D, D), jnp.float32, -bound, bound
        ).astype(jnp.bfloat16),
        "hyper_weight_b": jax.random.uniform(k_wb, (H * D,), jnp.float32, -bound, bound),
        "hyper_bias_W": jax.random.uniform(k_bw, (H, D), jnp.float32, -bound, bound),
        "hyper_bias_b": jax.random.uniform(k_bb, (H,), jnp.float32, -bound, bound),
    }

    # Batch must be 1: torch.reshape(hypernet(x), parameter.size()) in the module
    # only type-checks for a single example.
    x = jax.random.normal(k_x, (1, C, Hs, Ws), jnp.float32)

    fwd = jax.jit(functools.partial(dense_hypernetwork_forward, D=D, H=H))
    out = jax.block_until_ready(fwd(x, params))

    ref = reference_forward(x, params, D=D, H=H)
    assert out.shape == (1, H), out.shape
    assert jnp.allclose(out, ref, rtol=1e-2, atol=1e-2), "mismatch vs reference"

    print("KERNEL_OK")
</pallas_src>

<mosaic_0001>
module attributes {stable_mosaic.version = 11 : i64} {
  func.func @fused_hypernet_kernel(%arg0: i32, %arg1: memref<1x1024xf32, #tpu.memory_space<vmem>>, %arg2: memref<1x1024xbf16, #tpu.memory_space<vmem>>, %arg3: memref<4096x1024xbf16, #tpu.memory_space<vmem>>, %arg4: memref<1x4096xf32, #tpu.memory_space<vmem>>, %arg5: memref<8x128xf32, #tpu.memory_space<vmem>>) attributes {dimension_semantics = [#tpu.dimension_semantics<parallel>], iteration_bounds = array<i64: 4>, scalar_prefetch = 0 : i64, scratch_operands = 0 : i64, tpu.core_type = #tpu.core_type<tc>, window_params = [{pipeline_mode = #tpu.pipeline_mode<synchronous>, transform_indices = @transform_0, window_bounds = array<i64: 1, 1024>}, {pipeline_mode = #tpu.pipeline_mode<synchronous>, transform_indices = @transform_1, window_bounds = array<i64: 1, 1024>}, {transform_indices = @transform_2, window_bounds = array<i64: 4096, 1024>}, {transform_indices = @transform_3, window_bounds = array<i64: 1, 4096>}, {transform_indices = @transform_4, window_bounds = array<i64: 8, 128>}]} {
    %c0 = arith.constant 0 : index
    %c0_0 = arith.constant 0 : index
    %0 = vector.load %arg2[%c0, %c0_0] : memref<1x1024xbf16, #tpu.memory_space<vmem>>, vector<1x1024xbf16>
    %c0_1 = arith.constant 0 : index
    %c0_2 = arith.constant 0 : index
    %1 = vector.load %arg3[%c0_1, %c0_2] : memref<4096x1024xbf16, #tpu.memory_space<vmem>>, vector<4096x1024xbf16>
    %cst = arith.constant dense<0.000000e+00> : vector<1x4096xf32>
    %2 = tpu.matmul %0, %1, %cst {dimension_numbers = #tpu.dot_dimension_numbers<[1], [1], [0], [0], [0, 0, 1, 0], [], []>} : vector<1x1024xbf16>, vector<4096x1024xbf16>, vector<1x4096xf32> -> vector<1x4096xf32>
    %c0_3 = arith.constant 0 : index
    %c0_4 = arith.constant 0 : index
    %3 = vector.load %arg4[%c0_3, %c0_4] : memref<1x4096xf32, #tpu.memory_space<vmem>>, vector<1x4096xf32>
    %4 = arith.addf %2, %3 : vector<1x4096xf32>
    %c0_5 = arith.constant 0 : index
    %c0_6 = arith.constant 0 : index
    %5 = vector.load %arg1[%c0_5, %c0_6] : memref<1x1024xf32, #tpu.memory_space<vmem>>, vector<1x1024xf32>
    %cst_7 = arith.constant 0.000000e+00 : f32
    %6 = vector.broadcast %cst_7 : f32 to vector<8x128xf32>
    %c0_8 = arith.constant 0 : index
    %c0_9 = arith.constant 0 : index
    %7 = vector.load %arg5[%c0_8, %c0_9] : memref<8x128xf32, #tpu.memory_space<vmem>>, vector<8x128xf32>
    tpu.vector_store %arg5[%c0_8, %c0_9], %6 {strides = array<i32>} : memref<8x128xf32, #tpu.memory_space<vmem>>, vector<8x128xf32>,
    %8 = vector.extract_strided_slice %4 {offsets = [0, 0], sizes = [1, 1024], strides = [1, 1]} : vector<1x4096xf32> to vector<1x1024xf32>
    %9 = arith.mulf %8, %5 : vector<1x1024xf32>
    %cst_10 = arith.constant dense<0.000000e+00> : vector<1xf32>
    %10 = vector.multi_reduction <add>, %9, %cst_10 [1] : vector<1x1024xf32> to vector<1xf32>
    %11 = vector.shape_cast %10 : vector<1xf32> to vector<1x1xf32>
    %c0_11 = arith.constant 0 : index
    %c0_12 = arith.constant 0 : index
    %12 = vector.load %arg5[%c0_11, %c0_12] : memref<8x128xf32, #tpu.memory_space<vmem>>, vector<1x1xf32>
    tpu.vector_store %arg5[%c0_11, %c0_12], %11 {strides = array<i32>} : memref<8x128xf32, #tpu.memory_space<vmem>>, vector<1x1xf32>,
    %13 = vector.extract_strided_slice %4 {offsets = [0, 1024], sizes = [1, 1024], strides = [1, 1]} : vector<1x4096xf32> to vector<1x1024xf32>
    %14 = arith.mulf %13, %5 : vector<1x1024xf32>
    %cst_13 = arith.constant dense<0.000000e+00> : vector<1xf32>
    %15 = vector.multi_reduction <add>, %14, %cst_13 [1] : vector<1x1024xf32> to vector<1xf32>
    %16 = vector.shape_cast %15 : vector<1xf32> to vector<1x1xf32>
    %c1 = arith.constant 1 : index
    %c0_14 = arith.constant 0 : index
    %17 = vector.load %arg5[%c1, %c0_14] : memref<8x128xf32, #tpu.memory_space<vmem>>, vector<1x1xf32>
    tpu.vector_store %arg5[%c1, %c0_14], %16 {strides = array<i32>} : memref<8x128xf32, #tpu.memory_space<vmem>>, vector<1x1xf32>,
    %18 = vector.extract_strided_slice %4 {offsets = [0, 2048], sizes = [1, 1024], strides = [1, 1]} : vector<1x4096xf32> to vector<1x1024xf32>
    %19 = arith.mulf %18, %5 : vector<1x1024xf32>
    %cst_15 = arith.constant dense<0.000000e+00> : vector<1xf32>
    %20 = vector.multi_reduction <add>, %19, %cst_15 [1] : vector<1x1024xf32> to vector<1xf32>
    %21 = vector.shape_cast %20 : vector<1xf32> to vector<1x1xf32>
    %c2 = arith.constant 2 : index
    %c0_16 = arith.constant 0 : index
    %22 = vector.load %arg5[%c2, %c0_16] : memref<8x128xf32, #tpu.memory_space<vmem>>, vector<1x1xf32>
    tpu.vector_store %arg5[%c2, %c0_16], %21 {strides = array<i32>} : memref<8x128xf32, #tpu.memory_space<vmem>>, vector<1x1xf32>,
    %23 = vector.extract_strided_slice %4 {offsets = [0, 3072], sizes = [1, 1024], strides = [1, 1]} : vector<1x4096xf32> to vector<1x1024xf32>
    %24 = arith.mulf %23, %5 : vector<1x1024xf32>
    %cst_17 = arith.constant dense<0.000000e+00> : vector<1xf32>
    %25 = vector.multi_reduction <add>, %24, %cst_17 [1] : vector<1x1024xf32> to vector<1xf32>
    %26 = vector.shape_cast %25 : vector<1xf32> to vector<1x1xf32>
    %c3 = arith.constant 3 : index
    %c0_18 = arith.constant 0 : index
    %27 = vector.load %arg5[%c3, %c0_18] : memref<8x128xf32, #tpu.memory_space<vmem>>, vector<1x1xf32>
    tpu.vector_store %arg5[%c3, %c0_18], %26 {strides = array<i32>} : memref<8x128xf32, #tpu.memory_space<vmem>>, vector<1x1xf32>,
    return
  }
  func.func @transform_0(%arg0: i32) -> (i32, i32) {
    %c0_i32 = arith.constant 0 : i32
    %c0_i32_0 = arith.constant 0 : i32
    %c0_i32_1 = arith.constant 0 : i32
    return %c0_i32, %c0_i32_0 : i32, i32
  }
  func.func @transform_1(%arg0: i32) -> (i32, i32) {
    %c0_i32 = arith.constant 0 : i32
    %c0_i32_0 = arith.constant 0 : i32
    %c0_i32_1 = arith.constant 0 : i32
    return %c0_i32, %c0_i32_0 : i32, i32
  }
  func.func @transform_2(%arg0: i32) -> (i32, i32) {
    %c0_i32 = arith.constant 0 : i32
    %c0_i32_0 = arith.constant 0 : i32
    return %arg0, %c0_i32 : i32, i32
  }
  func.func @transform_3(%arg0: i32) -> (i32, i32) {
    %c0_i32 = arith.constant 0 : i32
    %c0_i32_0 = arith.constant 0 : i32
    return %c0_i32, %arg0 : i32, i32
  }
  func.func @transform_4(%arg0: i32) -> (i32, i32) {
    %c0_i32 = arith.constant 0 : i32
    %c0_i32_0 = arith.constant 0 : i32
    return %arg0, %c0_i32 : i32, i32
  }
}

</mosaic_0001>

<bundles_post_ra>
// kernel: dense_hypernetwork_forward.1
= control target key start
LH: loop header
LB: loop body
LE: loop exit
PB: predicated region body
PF: predicated region fallthrough
CT: control target
= control target key end

     0   :  { %9 = vsyncpa [#allocation3], 0  ;;  %s20679_s0 = inlined_call_operand.vmem [shape: f32[1,1024], index: 0, kind: input, shape index: {}]   ;;  %s20680_s1 = inlined_call_operand.vmem [shape: bf16[1,1024], index: 1, kind: input, shape index: {}]   ;;  %s20681_s2 = inlined_call_operand.hbm [shape: bf16[16384,1024], index: 2, kind: input, shape index: {}]   ;;  %s20682_s3 = inlined_call_operand.hbm [shape: f32[1,16384], index: 3, kind: input, shape index: {}]   ;;  %s20683_s4 = inlined_call_operand.vmem [shape: f32[32,128], index: 4, kind: output, shape index: {}]  }
   0x1   :  { %11 = vsyncpa [#allocation3 + $0x1], 0 }
   0x2   :  { %12 = vsyncpa [#allocation5], 0 }
   0x3   :  { %14 = vsyncpa [#allocation5 + $0x1], 0  ;;  %s18108_s15 = smov 0   ;;  %s18110_s16 = smov 0  }
   0x4   :  { %s18112_s17 = smov 0   ;;  %s18114_s18 = smov 0  }
   0x5 LB: > { %s18127_s19 = sadd.s32 4294967295, %s18075_s18   ;;  %s18130_s20 = sadd.s32 1, %s18075_s18   ;;  %s18075_s18 = sphi %s18114_s18, %s20694_s18   ;;  %s18071_s17 = sphi %s18112_s17, %s20693_s17   ;;  %s18067_s16 = sphi %s18110_s16, %s20692_s16   ;;  %s18063_s15 = sphi %s18108_s15, %s20691_s15  }
   0x6   : > { %s66_s21 = ssub.s32 %s18075_s18, %s18130_s20  ;;  %s69_s22 = sadd.s32 1, %s18071_s17 }
   0x7   : > { %p67_p0 = scmp.eq.s32.totalorder %s66_s21, 0  ;;  %p76_p1 = scmp.ne.s32.totalorder %s18071_s17, %s18067_s16 }
   0x8   : > { %p77_p2 = scmp.eq.s32.totalorder %s18075_s18, 0  ;;  %p82_p3 = scmp.ne.s32.totalorder %s18067_s16, %s18063_s15 }
   0x9   : > { %s18140_s23 = scalar_select %p67_p0, %s18071_s17, %s69_s22  }
   0xa   : > { %p78_p4 = por %p77_p2, %p76_p1  ;;  %p83_p5 = scmp.eq.s32.totalorder %s18127_s19, 0 }
   0xb   : > { %p17935_p6 = scmp.lt.s32.totalorder %s18075_s18, 4  ;;  %s18149_s25 = sand.u32 1, %s18071_s17  }
   0xc   : > { %p18144_p7 = por %p83_p5, %p82_p3  ;;  %s15636_s26 = sshll.u32 %s18149_s25, 14 }
   0xd   : > { %s17698_s27 = sshll.u32 %s18075_s18, 18  ;;  %s168_s5 = scalar_lea.vmem [#allocation2], %s15636_s26 }
   0xe   : > { %s20685_s24 = scalar_select %p18144_p7, 1, 0 }
   0xf   : > { %s18156_s30 = scalar_lea.hbm %s20681_s2, %s17698_s27  ;;  %s176_s6 = sshll.u32 %s168_s5, 4  ;;  %s18158_s6 = int_to_ptr.vmem [resolvable:$true] %s176_s6 }
  0x10   : > { %p18160_p8 = pnand %p17935_p6, %p78_p4  ;;  %s165_s8 = scalar_lea.sflag [#allocation3], %s18149_s25 }
  0x11   : > { %s17977_s9 = scalar_lea.hbm %s18156_s30, 262144  ;;  %s17982_s12 = scalar_lea.hbm %s20681_s2, 1048576 }
  0x12   : > { %p17978_p10 = scmp.ne.s32.totalorder %s18156_s30, %s17977_s9  ;;  %p17979_p11 = pneg %p18160_p8 }
  0x13   : > { %p17983_p0 = scmp.lt.u32.totalorder %s18156_s30, %s20681_s2  ;;  %p17984_p1 = scmp.lt.u32.totalorder %s17982_s12, %s17977_s9 }
  0x14   : > { %p17980_p12 = pnand %p17979_p11, %p17978_p10  ;;  %p17986_p3 = scmp.lt.u32.totalorder %s17977_s9, %s18156_s30 }
  0x15   : > { %p17985_p2 = por %p17984_p1, %p17983_p0 }
  0x16   : > { %p17981_p13 = pneg %p17980_p12 }
  0x17   : > { %p17987_p4 = por %p17986_p3, %p17985_p2 }
  0x19   : > { %p17988_p5 = pnand %p17987_p4, %p17981_p13 }
  0x1b   : > { %17991 = shalt.err (!%p17988_p5)
}
  0x1c   : > { %s17992_s15 = scalar_lea.vmem %s18158_s6, 262144  ;;  %s18077_s21 = smov [#allocation2]  }
  0x1d   : > { %p17993_p6 = scmp.ne.s32.totalorder %s18158_s6, %s17992_s15  ;;  %s17997_s22 = sshll.u32 %s18077_s21, 4  ;;  %s17998_s22 = int_to_ptr.vmem [resolvable:$false] %s17997_s22 }
  0x1e   : > { %s17999_s26 = scalar_lea.vmem %s17998_s22, 524288  ;;  %p18000_p9 = scmp.lt.s32.totalorder %s18158_s6, %s17998_s22 }
  0x1f   : > { %p17995_p10 = pnand %p17993_p6, %p17979_p11  ;;  %p18001_p0 = scmp.lt.s32.totalorder %s17999_s26, %s17992_s15 }
  0x21   : > { %p17996_p12 = pneg %p17995_p10  ;;  %p18002_p1 = por %p18001_p0, %p18000_p9 }
  0x23   : > { %p18003_p2 = pnand %p18002_p1, %p17996_p12 }
  0x25   : > { %18006 = shalt.err (!%p18003_p2)
}
  0x26   : > { %s18078_s27 = smov 512   ;;  %s18079_s28 = smov 32  }
  0x27   : > { %17931 = dma.hbm_to_vmem [thread:$0]  (!%p18160_p8), %s18156_s30, 262144, %s18158_s6, %s165_s8, %s18078_s27, %s18078_s27, %s18079_s28  }
  0x28   : > { %p203_p13 = scmp.lt.s32.totalorder %s18075_s18, 5  ;;  %s15640_s29 = sshll.u32 %s18149_s25, 5 }
  0x29   : > { %s17699_s5 = sshll.u32 %s18075_s18, 9  ;;  %p20687_p9 = scmp.ge.s32.totalorder %s18075_s18, 1 }
  0x2a   : > { %s18205_s12 = scalar_lea.hbm %s20682_s3, %s17699_s5  ;;  %s190_s13 = scalar_lea.vmem [#allocation4], %s15640_s29 }
  0x2b   : > { %p18198_p3 = pnand %p20687_p9, %p203_p13  ;;  %s198_s14 = sshll.u32 %s190_s13, 4  ;;  %s199_s14 = int_to_ptr.vmem [resolvable:$true] %s198_s14 }
  0x2c   : > { %s187_s30 = scalar_lea.sflag [#allocation5], %s18149_s25  ;;  %s18007_s6 = scalar_lea.hbm %s18205_s12, 512 }
  0x2d   : > { %s20688_s9 = scalar_select %p18198_p3, 1, 0 }
  0x2e   : > { %p18008_p4 = scmp.ne.s32.totalorder %s18205_s12, %s18007_s6  ;;  %s18012_s15 = scalar_lea.hbm %s20682_s3, 2048 }
  0x2f   : > { %p18013_p10 = scmp.lt.u32.totalorder %s18205_s12, %s20682_s3  ;;  %p18014_p12 = scmp.lt.u32.totalorder %s18012_s15, %s18007_s6 }
  0x30   : > { %p18010_p5 = pnand %p18008_p4, %p17979_p11  ;;  %p18016_p1 = scmp.lt.u32.totalorder %s18007_s6, %s18205_s12 }
  0x31   : > { %p18015_p0 = por %p18014_p12, %p18013_p10 }
  0x32   : > { %p18011_p6 = pneg %p18010_p5 }
  0x33   : > { %p18017_p2 = por %p18016_p1, %p18015_p0 }
  0x35   : > { %p18018_p13 = pnand %p18017_p2, %p18011_p6 }
  0x37   : > { %18021 = shalt.err (!%p18018_p13)
}
  0x38   : > { %s18022_s25 = scalar_lea.vmem %s199_s14, 512  ;;  %s18080_s26 = smov [#allocation4]  }
  0x39   : > { %p18023_p9 = scmp.ne.s32.totalorder %s199_s14, %s18022_s25  ;;  %s18027_s27 = sshll.u32 %s18080_s26, 4  ;;  %s18028_s27 = int_to_ptr.vmem [resolvable:$false] %s18027_s27 }
  0x3a   : > { %s18029_s28 = scalar_lea.vmem %s18028_s27, 1024  ;;  %p18030_p7 = scmp.lt.s32.totalorder %s199_s14, %s18028_s27 }
  0x3b   : > { %p18025_p4 = pnand %p18023_p9, %p17979_p11  ;;  %p18031_p3 = scmp.lt.s32.totalorder %s18029_s28, %s18022_s25 }
  0x3d   : > { %p18026_p5 = pneg %p18025_p4  ;;  %p18032_p10 = por %p18031_p3, %p18030_p7 }
  0x3f   : > { %p18033_p12 = pnand %p18032_p10, %p18026_p5 }
  0x41   : > { %18036 = shalt.err (!%p18033_p12)
}
  0x42   : > { %17934 = dma.hbm_to_vmem [thread:$0]  (!%p18160_p8), %s18205_s12, 512, %s199_s14, %s187_s30  }
  0x43   : > { %p20689_p6 = scmp.ne.s32.totalorder %s20688_s9, 0 }
  0x44   : > { %s209_s29 = sand.u32 (!%p20689_p6), 1, %s18067_s16   ;;  %p20690_p11 = scmp.ne.s32.totalorder (!%p20689_p6), %s20685_s24, 0 }
  0x45   : > { %207 = sbr.rel (%p20689_p6) target bundleno = 4548 (0x11c4), region = 36  ;;  %s15644_s5 = sshll.u32 (!%p20689_p6), %s209_s29, 14 }
  0x46   : > { %s210_s10 = scalar_lea.sflag (!%p20689_p6), [#allocation3], %s209_s29  ;;  %s18230_s11 = scalar_lea.vmem (!%p20689_p6), [#allocation2], %s15644_s5 }
  0x4c   : > { %18054 = dma.done.wait (%p20690_p11), %s210_s10, 262144  }
  0x4d   : > { %18056 = vsyncadd (%p20690_p11), %s210_s10, 4294705152  ;;  %s15645_s13 = sshll.u32 %s209_s29, 5  ;;  %s219_s7 = scalar_lea.sflag [#allocation5], %s209_s29 }
  0x4e   : > { %s18236_s6 = scalar_lea.vmem [#allocation4], %s15645_s13 }
  0x4f   : > { %18058 = dma.done.wait (%p20690_p11), %s219_s7, 512  }
  0x50   : > { %18060 = vsyncadd (%p20690_p11), %s219_s7, 4294966784  ;;  %v258_v0 = vld [vmem:[%s18230_s11] sm:$0xff]  ;;  %v18081_v22 = vmov 1966171168   ;;  %v2315_v24 = vlaneseq  ;;  %vm15447_vm0 = vcmask 1040384   ;;  %p253_p7 = scmp.lt.s32.totalorder %s18127_s19, 3 }
  0x51   : > { %v262_v1 = vld [vmem:[%s18230_s11 + $0x20] sm:$0xff]  ;;  %v2313_v23 = vunpack.c.l.s4 %v18081_v22  ;;  %vm15465_vm1 = vcmask 0  }
  0x52   : > { %v386_v2 = vld [vmem:[%s18230_s11 + $0x400] sm:$0xff]  ;;  %v15648_v3 = vcombine.high %v258_v0, %v262_v1  ;;  %v15647_v5 = vcombine.low %v258_v0, %v262_v1  ;;  %v18256_v28 = vshrl.u32 %v2315_v24, 7  ;;  %s20696_s19 = smov (!%p253_p7, %s18127_s19), 3 }
  0x53   : > { %v390_v4 = vld [vmem:[%s18230_s11 + $0x420] sm:$0xff]  ;;  %v2314_v27 = vunpack.c.0.s8 %v2313_v23  ;;  %s15646_s8 = sshll.u32 %s20696_s19, 3 }
  0x54   : > { %v266_v6 = vld [vmem:[%s18230_s11 + $0x40] sm:$0xff]  ;;  %v15776_v8 = vcombine.high %v386_v2, %v390_v4  ;;  %v15775_v9 = vcombine.low %v386_v2, %v390_v4  ;;  %12772 = vmatprep.subr.bf16.mxu0 %v15648_v3  ;;  %s19061_s22 = scalar_lea.vmem %s20683_s4, %s15646_s8 }
  0x55   : > { %v270_v7 = vld [vmem:[%s18230_s11 + $0x60] sm:$0xff]  ;;  %12773 = vmatpush1.bf16.xpose.msra.mxu0 %v15647_v5  ;;  %v18261_v35 = vsub.s32 %v2314_v27, %v18256_v28 }
  0x56   : > { %v15656_v10 = vcombine.high %v266_v6, %v270_v7  ;;  %v394_v11 = vld [vmem:[%s18230_s11 + $0x440] sm:$0xff]  ;;  %12936 = vmatprep.subr.bf16.mxu1 %v15776_v8  ;;  %v15655_v18 = vcombine.low %v266_v6, %v270_v7 }
  0x57   : > { %v398_v12 = vld [vmem:[%s18230_s11 + $0x460] sm:$0xff]  ;;  %12937 = vmatpush1.bf16.xpose.msra.mxu1 %v15775_v9 }
  0x58   : > { %v15784_v13 = vcombine.high %v394_v11, %v398_v12  ;;  %12774 = vmatprep.subr.bf16.mxu0 %v15656_v10  ;;  %v274_v14 = vld [vmem:[%s18230_s11 + $0x80] sm:$0xff]  ;;  %v15783_v19 = vcombine.low %v394_v11, %v398_v12 }
  0x59   : > { %v278_v15 = vld [vmem:[%s18230_s11 + $0xa0] sm:$0xff] }
  0x5a   : > { %12938 = vmatprep.subr.bf16.mxu1 %v15784_v13  ;;  %v402_v16 = vld [vmem:[%s18230_s11 + $0x480] sm:$0xff]  ;;  %v15664_v20 = vcombine.high %v274_v14, %v278_v15  ;;  %v15663_v31 = vcombine.low %v274_v14, %v278_v15 }
  0x5b   : > { %v406_v17 = vld [vmem:[%s18230_s11 + $0x4a0] sm:$0xff] }
  0x5c   : > { %v15792_v21 = vcombine.high %v402_v16, %v406_v17  ;;  %v282_v25 = vld [vmem:[%s18230_s11 + $0xc0] sm:$0xff]  ;;  %v15791_v32 = vcombine.low %v402_v16, %v406_v17 }
  0x5d   : > { %12775 = vmatpush1.bf16.xpose.msra.mxu0 %v15655_v18  ;;  %v286_v26 = vld [vmem:[%s18230_s11 + $0xe0] sm:$0xff] }
  0x5e   : > { %12776 = vmatprep.subr.bf16.mxu0 %v15664_v20  ;;  %v410_v29 = vld [vmem:[%s18230_s11 + $0x4c0] sm:$0xff]  ;;  %v15672_v33 = vcombine.high %v282_v25, %v286_v26  ;;  %v15671_v42 = vcombine.low %v282_v25, %v286_v26 }
  0x5f   : > { %12939 = vmatpush1.bf16.xpose.msra.mxu1 %v15783_v19  ;;  %v414_v30 = vld [vmem:[%s18230_s11 + $0x4e0] sm:$0xff] }
  0x60   : > { %12940 = vmatprep.subr.bf16.mxu1 %v15792_v21  ;;  %v15800_v34 = vcombine.high %v410_v29, %v414_v30  ;;  %v18266_v36 = vld [vmem:[%s20680_s1] sm:$0xff]  ;;  %v15799_v44 = vcombine.low %v410_v29, %v414_v30 }
  0x61   : > { %v290_v37 = vld [vmem:[%s18230_s11 + $0x100] sm:$0xff]  ;;  %v18272_v39 = vrot.slane %v18266_v36, %v18261_v35 }
  0x62   : > { %v294_v38 = vld [vmem:[%s18230_s11 + $0x120] sm:$0xff] }
  0x63   : > { %v418_v40 = vld [vmem:[%s18230_s11 + $0x500] sm:$0xff]  ;;  %v2326_v43 = vcombine.high %v18272_v39, %v18272_v39  ;;  %v15680_v45 = vcombine.high %v290_v37, %v294_v38  ;;  %v15679_v52 = vcombine.low %v290_v37, %v294_v38 }
  0x64   : > { %v422_v41 = vld [vmem:[%s18230_s11 + $0x520] sm:$0xff] }
  0x65   : > { %12777 = vmatpush1.bf16.xpose.msra.mxu0 %v15663_v31  ;;  %v15808_v46 = vcombine.high %v418_v40, %v422_v41  ;;  %v18279_v47 = vrot.slane %v2326_v43, %v18261_v35  ;;  %v298_v48 = vld [vmem:[%s18230_s11 + $0x140] sm:$0xff]  ;;  %v15807_v53 = vcombine.low %v418_v40, %v422_v41 }
  0x66   : > { %12778 = vmatprep.subr.bf16.mxu0 %v15672_v33  ;;  %v302_v49 = vld [vmem:[%s18230_s11 + $0x160] sm:$0xff] }
  0x67   : > { %12941 = vmatpush1.bf16.xpose.msra.mxu1 %v15791_v32  ;;  %12804 = vmatprep.mubr.bf16.mxu0 %v18279_v47  ;;  %v426_v50 = vld [vmem:[%s18230_s11 + $0x540] sm:$0xff]  ;;  %v15688_v54 = vcombine.high %v298_v48, %v302_v49  ;;  %v15687_v60 = vcombine.low %v298_v48, %v302_v49 }
  0x68   : > { %12942 = vmatprep.subr.bf16.mxu1 %v15800_v34  ;;  %12968 = vmatprep.mubr.bf16.mxu1 %v18279_v47  ;;  %v430_v51 = vld [vmem:[%s18230_s11 + $0x560] sm:$0xff] }
  0x69   : > { %v15816_v55 = vcombine.high %v426_v50, %v430_v51  ;;  %v306_v56 = vld [vmem:[%s18230_s11 + $0x180] sm:$0xff]  ;;  %v15815_v61 = vcombine.low %v426_v50, %v430_v51 }
  0x6a   : > { %v310_v57 = vld [vmem:[%s18230_s11 + $0x1a0] sm:$0xff] }
  0x6b   : > { %v434_v58 = vld [vmem:[%s18230_s11 + $0x580] sm:$0xff]  ;;  %v15696_v62 = vcombine.high %v306_v56, %v310_v57  ;;  %v15695_v4 = vcombine.low %v306_v56, %v310_v57 }
  0x6c   : > { %v438_v59 = vld [vmem:[%s18230_s11 + $0x5a0] sm:$0xff] }
  0x6d   : > { %12779 = vmatpush1.bf16.xpose.msra.mxu0 %v15671_v42  ;;  %v15824_v63 = vcombine.high %v434_v58, %v438_v59  ;;  %v314_v0 = vld [vmem:[%s18230_s11 + $0x1c0] sm:$0xff]  ;;  %v15823_v5 = vcombine.low %v434_v58, %v438_v59 }
  0x6e   : > { %12780 = vmatprep.subr.bf16.mxu0 %v15680_v45  ;;  %v318_v1 = vld [vmem:[%s18230_s11 + $0x1e0] sm:$0xff] }
  0x6f   : > { %12943 = vmatpush1.bf16.xpose.msra.mxu1 %v15799_v44  ;;  %v442_v2 = vld [vmem:[%s18230_s11 + $0x5c0] sm:$0xff]  ;;  %v15704_v6 = vcombine.high %v314_v0, %v318_v1  ;;  %v15703_v12 = vcombine.low %v314_v0, %v318_v1 }
  0x70   : > { %12944 = vmatprep.subr.bf16.mxu1 %v15808_v46  ;;  %v446_v3 = vld [vmem:[%s18230_s11 + $0x5e0] sm:$0xff] }
  0x71   : > { %v15832_v7 = vcombine.high %v442_v2, %v446_v3  ;;  %v322_v8 = vld [vmem:[%s18230_s11 + $0x200] sm:$0xff]  ;;  %v15831_v13 = vcombine.low %v442_v2, %v446_v3 }
  0x72   : > { %v326_v9 = vld [vmem:[%s18230_s11 + $0x220] sm:$0xff] }
  0x73   : > { %v450_v10 = vld [vmem:[%s18230_s11 + $0x600] sm:$0xff]  ;;  %v15712_v14 = vcombine.high %v322_v8, %v326_v9  ;;  %v15711_v20 = vcombine.low %v322_v8, %v326_v9 }
  0x74   : > { %v454_v11 = vld [vmem:[%s18230_s11 + $0x620] sm:$0xff] }
  0x75   : > { %12781 = vmatpush1.bf16.xpose.msra.mxu0 %v15679_v52  ;;  %v15840_v15 = vcombine.high %v450_v10, %v454_v11  ;;  %v330_v16 = vld [vmem:[%s18230_s11 + $0x240] sm:$0xff]  ;;  %v15839_v21 = vcombine.low %v450_v10, %v454_v11 }
  0x76   : > { %12782 = vmatprep.subr.bf16.mxu0 %v15688_v54  ;;  %v334_v17 = vld [vmem:[%s18230_s11 + $0x260] sm:$0xff] }
  0x77   : > { %12945 = vmatpush1.bf16.xpose.msra.mxu1 %v15807_v53  ;;  %v458_v18 = vld [vmem:[%s18230_s11 + $0x640] sm:$0xff]  ;;  %v15720_v22 = vcombine.high %v330_v16, %v334_v17  ;;  %v15719_v29 = vcombine.low %v330_v16, %v334_v17  ;;  %v391_v16 = vld [vmem:[%s18230_s11 + $0x428] sm:$0xff] }
  0x78   : > { %12946 = vmatprep.subr.bf16.mxu1 %v15816_v55  ;;  %v462_v19 = vld [vmem:[%s18230_s11 + $0x660] sm:$0xff] }
  0x79   : > { %v15848_v23 = vcombine.high %v458_v18, %v462_v19  ;;  %v338_v24 = vld [vmem:[%s18230_s11 + $0x280] sm:$0xff]  ;;  %v15847_v30 = vcombine.low %v458_v18, %v462_v19 }
  0x7a   : > { %v342_v25 = vld [vmem:[%s18230_s11 + $0x2a0] sm:$0xff] }
  0x7b   : > { %v466_v26 = vld [vmem:[%s18230_s11 + $0x680] sm:$0xff]  ;;  %v15728_v31 = vcombine.high %v338_v24, %v342_v25  ;;  %v15727_v40 = vcombine.low %v338_v24, %v342_v25  ;;  %v395_v24 = vld [vmem:[%s18230_s11 + $0x448] sm:$0xff] }
  0x7c   : > { %v470_v27 = vld [vmem:[%s18230_s11 + $0x6a0] sm:$0xff]  ;;  %v399_v25 = vld [vmem:[%s18230_s11 + $0x468] sm:$0xff] }
  0x7d   : > { %12783 = vmatpush1.bf16.xpose.msra.mxu0 %v15687_v60  ;;  %v15856_v32 = vcombine.high %v466_v26, %v470_v27  ;;  %v346_v33 = vld [vmem:[%s18230_s11 + $0x2c0] sm:$0xff]  ;;  %v15855_v41 = vcombine.low %v466_v26, %v470_v27 }
  0x7e   : > { %12784 = vmatprep.subr.bf16.mxu0 %v15696_v62  ;;  %v350_v34 = vld [vmem:[%s18230_s11 + $0x2e0] sm:$0xff] }
  0x7f   : > { %12947 = vmatpush1.bf16.xpose.msra.mxu1 %v15815_v61  ;;  %v474_v37 = vld [vmem:[%s18230_s11 + $0x6c0] sm:$0xff]  ;;  %v15736_v42 = vcombine.high %v346_v33, %v350_v34  ;;  %v15735_v49 = vcombine.low %v346_v33, %v350_v34  ;;  %v403_v33 = vld [vmem:[%s18230_s11 + $0x488] sm:$0xff] }
  0x80   : > { %12948 = vmatprep.subr.bf16.mxu1 %v15824_v63  ;;  %v478_v38 = vld [vmem:[%s18230_s11 + $0x6e0] sm:$0xff]  ;;  %v407_v34 = vld [vmem:[%s18230_s11 + $0x4a8] sm:$0xff] }
  0x81   : > { %v15864_v43 = vcombine.high %v474_v37, %v478_v38  ;;  %v354_v44 = vld [vmem:[%s18230_s11 + $0x300] sm:$0xff]  ;;  %v15863_v50 = vcombine.low %v474_v37, %v478_v38  ;;  %v15785_v38 = vcombine.low %v395_v24, %v399_v25 }
  0x82   : > { %v358_v45 = vld [vmem:[%s18230_s11 + $0x320] sm:$0xff] }
  0x83   : > { %v482_v46 = vld [vmem:[%s18230_s11 + $0x700] sm:$0xff]  ;;  %v15744_v51 = vcombine.high %v354_v44, %v358_v45  ;;  %v15743_v57 = vcombine.low %v354_v44, %v358_v45  ;;  %v411_v44 = vld [vmem:[%s18230_s11 + $0x4c8] sm:$0xff] }
  0x84   : > { %v486_v48 = vld [vmem:[%s18230_s11 + $0x720] sm:$0xff]  ;;  %v415_v45 = vld [vmem:[%s18230_s11 + $0x4e8] sm:$0xff] }
  0x85   : > { %12785 = vmatpush1.bf16.xpose.msra.mxu0 %v15695_v4  ;;  %v15872_v52 = vcombine.high %v482_v46, %v486_v48  ;;  %v362_v53 = vld [vmem:[%s18230_s11 + $0x340] sm:$0xff]  ;;  %v15871_v58 = vcombine.low %v482_v46, %v486_v48  ;;  %v15793_v48 = vcombine.low %v403_v33, %v407_v34 }
  0x86   : > { %12786 = vmatprep.subr.bf16.mxu0 %v15704_v6  ;;  %v366_v54 = vld [vmem:[%s18230_s11 + $0x360] sm:$0xff] }
  0x87   : > { %12949 = vmatpush1.bf16.xpose.msra.mxu1 %v15823_v5  ;;  %v490_v55 = vld [vmem:[%s18230_s11 + $0x740] sm:$0xff]  ;;  %v15752_v59 = vcombine.high %v362_v53, %v366_v54  ;;  %v15751_v1 = vcombine.low %v362_v53, %v366_v54  ;;  %v419_v53 = vld [vmem:[%s18230_s11 + $0x508] sm:$0xff] }
  0x88   : > { %12950 = vmatprep.subr.bf16.mxu1 %v15832_v7  ;;  %v494_v56 = vld [vmem:[%s18230_s11 + $0x760] sm:$0xff]  ;;  %v423_v54 = vld [vmem:[%s18230_s11 + $0x528] sm:$0xff] }
  0x89   : > { %v15880_v60 = vcombine.high %v490_v55, %v494_v56  ;;  %v370_v61 = vld [vmem:[%s18230_s11 + $0x380] sm:$0xff]  ;;  %v15879_v2 = vcombine.low %v490_v55, %v494_v56  ;;  %v15801_v56 = vcombine.low %v411_v44, %v415_v45 }
  0x8a   : > { %v374_v62 = vld [vmem:[%s18230_s11 + $0x3a0] sm:$0xff] }
  0x8b   : > { %v498_v63 = vld [vmem:[%s18230_s11 + $0x780] sm:$0xff]  ;;  %v15760_v3 = vcombine.high %v370_v61, %v374_v62  ;;  %v15759_v9 = vcombine.low %v370_v61, %v374_v62  ;;  %v427_v61 = vld [vmem:[%s18230_s11 + $0x548] sm:$0xff] }
  0x8c   : > { %v502_v0 = vld [vmem:[%s18230_s11 + $0x7a0] sm:$0xff]  ;;  %v431_v62 = vld [vmem:[%s18230_s11 + $0x568] sm:$0xff] }
  0x8d   : > { %12787 = vmatpush1.bf16.xpose.msra.mxu0 %v15703_v12  ;;  %v15888_v4 = vcombine.high %v498_v63, %v502_v0  ;;  %v378_v5 = vld [vmem:[%s18230_s11 + $0x3c0] sm:$0xff]  ;;  %v15887_v10 = vcombine.low %v498_v63, %v502_v0  ;;  %v15809_v0 = vcombine.low %v419_v53, %v423_v54 }
  0x8e   : > { %12788 = vmatprep.subr.bf16.mxu0 %v15712_v14  ;;  %v382_v6 = vld [vmem:[%s18230_s11 + $0x3e0] sm:$0xff]  ;;  %v263_v14 = vld [vmem:[%s18230_s11 + $0x28] sm:$0xff] }
  0x8f   : > { %12951 = vmatpush1.bf16.xpose.msra.mxu1 %v15831_v13  ;;  %v506_v7 = vld [vmem:[%s18230_s11 + $0x7c0] sm:$0xff]  ;;  %v15768_v11 = vcombine.high %v378_v5, %v382_v6  ;;  %v259_v13 = vld [vmem:[%s18230_s11 + $0x8] sm:$0xff]  ;;  %v15767_v17 = vcombine.low %v378_v5, %v382_v6 }
  0x90   : > { %12952 = vmatprep.subr.bf16.mxu1 %v15840_v15  ;;  %v510_v8 = vld [vmem:[%s18230_s11 + $0x7e0] sm:$0xff]  ;;  %v387_v15 = vld [vmem:[%s18230_s11 + $0x408] sm:$0xff]  ;;  %v15650_v19 = vcombine.high %v259_v13, %v263_v14  ;;  %v15649_v26 = vcombine.low %v259_v13, %v263_v14 }
  0x91   : > { %v15896_v12 = vcombine.high %v506_v7, %v510_v8  ;;  %v15895_v18 = vcombine.low %v506_v7, %v510_v8  ;;  %v15777_v27 = vcombine.low %v387_v15, %v391_v16  ;;  %v435_v5 = vld [vmem:[%s18230_s11 + $0x588] sm:$0xff]  ;;  %v15817_v8 = vcombine.low %v427_v61, %v431_v62 }
  0x92   : > { %v439_v6 = vld [vmem:[%s18230_s11 + $0x5a8] sm:$0xff] }
  0x93   : > { %v443_v13 = vld [vmem:[%s18230_s11 + $0x5c8] sm:$0xff] }
  0x94   : > { %v447_v14 = vld [vmem:[%s18230_s11 + $0x5e8] sm:$0xff] }
  0x95   : > { %12789 = vmatpush1.bf16.xpose.msra.mxu0 %v15711_v20  ;;  %v15778_v20 = vcombine.high %v387_v15, %v391_v16  ;;  %v15825_v16 = vcombine.low %v435_v5, %v439_v6 }
  0x96   : > { %12790 = vmatprep.subr.bf16.mxu0 %v15720_v22  ;;  %v271_v22 = vld [vmem:[%s18230_s11 + $0x68] sm:$0xff] }
  0x97   : > { %12953 = vmatpush1.bf16.xpose.msra.mxu1 %v15839_v21  ;;  %v267_v21 = vld [vmem:[%s18230_s11 + $0x48] sm:$0xff] }
  0x98   : > { %12954 = vmatprep.subr.bf16.mxu1 %v15848_v23  ;;  %v18335_v23 = vrot.slane %v18272_v39, %v18261_v35  ;;  %v275_v39 = vld [vmem:[%s18230_s11 + $0x88] sm:$0xff]  ;;  %v15657_v37 = vcombine.low %v267_v21, %v271_v22 }
  0x9d   : > { %12791 = vmatpush1.bf16.xpose.msra.mxu0 %v15719_v29  ;;  %v15658_v29 = vcombine.high %v267_v21, %v271_v22  ;;  %v451_v21 = vld [vmem:[%s18230_s11 + $0x608] sm:$0xff] }
  0x9e   : > { %12792 = vmatprep.subr.bf16.mxu0 %v15728_v31  ;;  %v18341_v31 = vcombine.high %v18279_v47, %v18279_v47  ;;  %v455_v22 = vld [vmem:[%s18230_s11 + $0x628] sm:$0xff] }
  0x9f   : > { %12955 = vmatpush1.bf16.xpose.msra.mxu1 %v15847_v30  ;;  %v15786_v30 = vcombine.high %v395_v24, %v399_v25  ;;  %v15833_v25 = vcombine.low %v443_v13, %v447_v14 }
  0xa0   : > { %12956 = vmatprep.subr.bf16.mxu1 %v15856_v32  ;;  %v279_v32 = vld [vmem:[%s18230_s11 + $0xa8] sm:$0xff] }
  0xa1   : > { %v15665_v46 = vcombine.low %v275_v39, %v279_v32 }
  0xa5   : > { %12793 = vmatpush1.bf16.xpose.msra.mxu0 %v15727_v40  ;;  %v15666_v40 = vcombine.high %v275_v39, %v279_v32  ;;  %v459_v39 = vld [vmem:[%s18230_s11 + $0x648] sm:$0xff] }
  0xa6   : > { %12794 = vmatprep.subr.bf16.mxu0 %v15736_v42  ;;  %v283_v42 = vld [vmem:[%s18230_s11 + $0xc8] sm:$0xff] }
  0xa7   : > { %12957 = vmatpush1.bf16.xpose.msra.mxu1 %v15855_v41  ;;  %v15794_v41 = vcombine.high %v403_v33, %v407_v34  ;;  %v463_v32 = vld [vmem:[%s18230_s11 + $0x668] sm:$0xff]  ;;  %v15841_v34 = vcombine.low %v451_v21, %v455_v22 }
  0xa8   : > { %12958 = vmatprep.subr.bf16.mxu1 %v15864_v43  ;;  %v287_v43 = vld [vmem:[%s18230_s11 + $0xe8] sm:$0xff] }
  0xa9   : > { %v15673_v55 = vcombine.low %v283_v42, %v287_v43 }
  0xad   : > { %12795 = vmatpush1.bf16.xpose.msra.mxu0 %v15735_v49  ;;  %v15674_v49 = vcombine.high %v283_v42, %v287_v43  ;;  %v467_v42 = vld [vmem:[%s18230_s11 + $0x688] sm:$0xff] }
  0xae   : > { %12796 = vmatprep.subr.bf16.mxu0 %v15744_v51  ;;  %v291_v51 = vld [vmem:[%s18230_s11 + $0x108] sm:$0xff] }
  0xaf   : > { %12959 = vmatpush1.bf16.xpose.msra.mxu1 %v15863_v50  ;;  %v15802_v50 = vcombine.high %v411_v44, %v415_v45  ;;  %v471_v43 = vld [vmem:[%s18230_s11 + $0x6a8] sm:$0xff]  ;;  %v15849_v45 = vcombine.low %v459_v39, %v463_v32 }
  0xb0   : > { %12960 = vmatprep.subr.bf16.mxu1 %v15872_v52  ;;  %v295_v52 = vld [vmem:[%s18230_s11 + $0x128] sm:$0xff] }
  0xb1   : > { %v15681_v63 = vcombine.low %v291_v51, %v295_v52 }
  0xb5   : > { %12797 = vmatpush1.bf16.xpose.msra.mxu0 %v15743_v57  ;;  %v15682_v57 = vcombine.high %v291_v51, %v295_v52  ;;  %v475_v51 = vld [vmem:[%s18230_s11 + $0x6c8] sm:$0xff] }
  0xb6   : > { %12798 = vmatprep.subr.bf16.mxu0 %v15752_v59  ;;  %v299_v59 = vld [vmem:[%s18230_s11 + $0x148] sm:$0xff] }
  0xb7   : > { %12961 = vmatpush1.bf16.xpose.msra.mxu1 %v15871_v58  ;;  %v15810_v58 = vcombine.high %v419_v53, %v423_v54  ;;  %v479_v52 = vld [vmem:[%s18230_s11 + $0x6e8] sm:$0xff]  ;;  %v15857_v54 = vcombine.low %v467_v42, %v471_v43 }
  0xb8   : > { %12962 = vmatprep.subr.bf16.mxu1 %v15880_v60  ;;  %v303_v60 = vld [vmem:[%s18230_s11 + $0x168] sm:$0xff] }
  0xb9   : > { %v15689_v7 = vcombine.low %v299_v59, %v303_v60 }
  0xbd   : > { %12799 = vmatpush1.bf16.xpose.msra.mxu0 %v15751_v1  ;;  %v15690_v1 = vcombine.high %v299_v59, %v303_v60  ;;  %v483_v59 = vld [vmem:[%s18230_s11 + $0x708] sm:$0xff] }
  0xbe   : > { %12800 = vmatprep.subr.bf16.mxu0 %v15760_v3  ;;  %v307_v3 = vld [vmem:[%s18230_s11 + $0x188] sm:$0xff] }
  0xbf   : > { %12963 = vmatpush1.bf16.xpose.msra.mxu1 %v15879_v2  ;;  %v15818_v2 = vcombine.high %v427_v61, %v431_v62  ;;  %v487_v60 = vld [vmem:[%s18230_s11 + $0x728] sm:$0xff]  ;;  %v15865_v62 = vcombine.low %v475_v51, %v479_v52 }
  0xc0   : > { %12964 = vmatprep.subr.bf16.mxu1 %v15888_v4  ;;  %v311_v4 = vld [vmem:[%s18230_s11 + $0x1a8] sm:$0xff] }
  0xc1   : > { %v15697_v15 = vcombine.low %v307_v3, %v311_v4 }
  0xc5   : > { %12801 = vmatpush1.bf16.xpose.msra.mxu0 %v15759_v9  ;;  %v15698_v9 = vcombine.high %v307_v3, %v311_v4  ;;  %v491_v3 = vld [vmem:[%s18230_s11 + $0x748] sm:$0xff] }
  0xc6   : > { %12802 = vmatprep.subr.bf16.mxu0 %v15768_v11  ;;  %v315_v11 = vld [vmem:[%s18230_s11 + $0x1c8] sm:$0xff] }
  0xc7   : > { %12965 = vmatpush1.bf16.xpose.msra.mxu1 %v15887_v10  ;;  %v15826_v10 = vcombine.high %v435_v5, %v439_v6  ;;  %v495_v4 = vld [vmem:[%s18230_s11 + $0x768] sm:$0xff]  ;;  %v15873_v6 = vcombine.low %v483_v59, %v487_v60 }
  0xc8   : > { %12966 = vmatprep.subr.bf16.mxu1 %v15896_v12  ;;  %v319_v12 = vld [vmem:[%s18230_s11 + $0x1e8] sm:$0xff] }
  0xc9   : > { %v15705_v24 = vcombine.low %v315_v11, %v319_v12 }
  0xcd   : > { %12803 = vmatpush1.bf16.xpose.msra.mxu0 %v15767_v17  ;;  %v15706_v17 = vcombine.high %v315_v11, %v319_v12  ;;  %v499_v11 = vld [vmem:[%s18230_s11 + $0x788] sm:$0xff] }
  0xce   : > { %12813 = vmatprep.subr.bf16.mxu0 %v15650_v19  ;;  %v323_v19 = vld [vmem:[%s18230_s11 + $0x208] sm:$0xff] }
  0xcf   : > { %12967 = vmatpush1.bf16.xpose.msra.mxu1 %v15895_v18  ;;  %v15834_v18 = vcombine.high %v443_v13, %v447_v14  ;;  %v503_v12 = vld [vmem:[%s18230_s11 + $0x7a8] sm:$0xff]  ;;  %v15881_v14 = vcombine.low %v491_v3, %v495_v4 }
  0xd0   : > { %12977 = vmatprep.subr.bf16.mxu1 %v15778_v20  ;;  %v327_v20 = vld [vmem:[%s18230_s11 + $0x228] sm:$0xff] }
  0xd1   : > { %v15713_v33 = vcombine.low %v323_v19, %v327_v20 }
  0xd4   : > { %12805 = vmatmul.mubr.bf16.vlgmr.msra.gmra.mrb[0].mxu0 %v18335_v23 }
  0xd5   : > { %12814 = vmatpush1.bf16.xpose.msra.mxu0 %v15649_v26  ;;  %12845 = vmatprep.mubr.bf16.mxu0 %v18341_v31  ;;  %v15714_v26 = vcombine.high %v323_v19, %v327_v20  ;;  %v507_v19 = vld [vmem:[%s18230_s11 + $0x7c8] sm:$0xff] }
  0xd6   : > { %12969 = vmatmul.mubr.bf16.vlgmr.msra.gmra.mrb[0].mxu1 %v18335_v23  ;;  %12815 = vmatprep.subr.bf16.mxu0 %v15658_v29  ;;  %v331_v29 = vld [vmem:[%s18230_s11 + $0x248] sm:$0xff] }
  0xd7   : > { %12978 = vmatpush1.bf16.xpose.msra.mxu1 %v15777_v27  ;;  %13009 = vmatprep.mubr.bf16.mxu1 %v18341_v31  ;;  %v15842_v27 = vcombine.high %v451_v21, %v455_v22  ;;  %v511_v20 = vld [vmem:[%s18230_s11 + $0x7e8] sm:$0xff]  ;;  %v15889_v22 = vcombine.low %v499_v11, %v503_v12 }
  0xd8   : > { %12979 = vmatprep.subr.bf16.mxu1 %v15786_v30  ;;  %v335_v30 = vld [vmem:[%s18230_s11 + $0x268] sm:$0xff] }
  0xd9   : > { %v15721_v44 = vcombine.low %v331_v29, %v335_v30 }
  0xdd   : > { %12816 = vmatpush1.bf16.xpose.msra.mxu0 %v15657_v37  ;;  %v15722_v37 = vcombine.high %v331_v29, %v335_v30  ;;  %v388_v29 = vld [vmem:[%s18230_s11 + $0x410] sm:$0xff] }
  0xde   : > { %12817 = vmatprep.subr.bf16.mxu0 %v15666_v40  ;;  %v339_v40 = vld [vmem:[%s18230_s11 + $0x288] sm:$0xff]  ;;  %v392_v30 = vld [vmem:[%s18230_s11 + $0x430] sm:$0xff] }
  0xdf   : > { %12980 = vmatpush1.bf16.xpose.msra.mxu1 %v15785_v38  ;;  %v15850_v38 = vcombine.high %v459_v39, %v463_v32  ;;  %v15897_v32 = vcombine.low %v507_v19, %v511_v20 }
  0xe0   : > { %12981 = vmatprep.subr.bf16.mxu1 %v15794_v41  ;;  %v343_v41 = vld [vmem:[%s18230_s11 + $0x2a8] sm:$0xff] }
  0xe1   : > { %v15729_v53 = vcombine.low %v339_v40, %v343_v41 }
  0xe5   : > { %12818 = vmatpush1.bf16.xpose.msra.mxu0 %v15665_v46  ;;  %v15730_v46 = vcombine.high %v339_v40, %v343_v41  ;;  %v272_v40 = vld [vmem:[%s18230_s11 + $0x70] sm:$0xff] }
  0xe6   : > { %12819 = vmatprep.subr.bf16.mxu0 %v15674_v49  ;;  %v347_v49 = vld [vmem:[%s18230_s11 + $0x2c8] sm:$0xff] }
  0xe7   : > { %12982 = vmatpush1.bf16.xpose.msra.mxu1 %v15793_v48  ;;  %v15858_v48 = vcombine.high %v467_v42, %v471_v43  ;;  %v18416_v42 = vcombine.high %v18335_v23, %v18335_v23  ;;  %v396_v43 = vld [vmem:[%s18230_s11 + $0x450] sm:$0xff] }
  0xe8   : > { %12983 = vmatprep.subr.bf16.mxu1 %v15802_v50  ;;  %v351_v50 = vld [vmem:[%s18230_s11 + $0x2e8] sm:$0xff] }
  0xe9   : > { %v15737_v61 = vcombine.low %v347_v49, %v351_v50 }
  0xed   : > { %12820 = vmatpush1.bf16.xpose.msra.mxu0 %v15673_v55  ;;  %v15738_v55 = vcombine.high %v347_v49, %v351_v50 }
  0xee   : > { %12821 = vmatprep.subr.bf16.mxu0 %v15682_v57  ;;  %v355_v57 = vld [vmem:[%s18230_s11 + $0x308] sm:$0xff] }
  0xef   : > { %12984 = vmatpush1.bf16.xpose.msra.mxu1 %v15801_v56  ;;  %v15866_v56 = vcombine.high %v475_v51, %v479_v52  ;;  %v276_v51 = vld [vmem:[%s18230_s11 + $0x90] sm:$0xff] }
  0xf0   : > { %12985 = vmatprep.subr.bf16.mxu1 %v15810_v58  ;;  %v359_v58 = vld [vmem:[%s18230_s11 + $0x328] sm:$0xff]  ;;  %v280_v52 = vld [vmem:[%s18230_s11 + $0xb0] sm:$0xff] }
  0xf1   : > { %v15745_v5 = vcombine.low %v355_v57, %v359_v58 }
  0xf5   : > { %12822 = vmatpush1.bf16.xpose.msra.mxu0 %v15681_v63  ;;  %v15746_v63 = vcombine.high %v355_v57, %v359_v58  ;;  %v15668_v57 = vcombine.high %v276_v51, %v280_v52 }
  0xf6   : > { %12823 = vmatprep.subr.bf16.mxu0 %v15690_v1  ;;  %v363_v1 = vld [vmem:[%s18230_s11 + $0x348] sm:$0xff] }
  0xf7   : > { %12986 = vmatpush1.bf16.xpose.msra.mxu1 %v15809_v0  ;;  %v15874_v0 = vcombine.high %v483_v59, %v487_v60  ;;  %v284_v59 = vld [vmem:[%s18230_s11 + $0xd0] sm:$0xff] }
  0xf8   : > { %12987 = vmatprep.subr.bf16.mxu1 %v15818_v2  ;;  %v367_v2 = vld [vmem:[%s18230_s11 + $0x368] sm:$0xff]  ;;  %v288_v60 = vld [vmem:[%s18230_s11 + $0xf0] sm:$0xff] }
  0xf9   : > { %v15753_v13 = vcombine.low %v363_v1, %v367_v2 }
  0xfd   : > { %12824 = vmatpush1.bf16.xpose.msra.mxu0 %v15689_v7  ;;  %v15754_v7 = vcombine.high %v363_v1, %v367_v2  ;;  %v15676_v1 = vcombine.high %v284_v59, %v288_v60 }
  0xfe   : > { %12825 = vmatprep.subr.bf16.mxu0 %v15698_v9  ;;  %v371_v9 = vld [vmem:[%s18230_s11 + $0x388] sm:$0xff] }
  0xff   : > { %12988 = vmatpush1.bf16.xpose.msra.mxu1 %v15817_v8  ;;  %v15882_v8 = vcombine.high %v491_v3, %v495_v4  ;;  %v292_v3 = vld [vmem:[%s18230_s11 + $0x110] sm:$0xff] }
 0x100   : > { %12989 = vmatprep.subr.bf16.mxu1 %v15826_v10  ;;  %v375_v10 = vld [vmem:[%s18230_s11 + $0x3a8] sm:$0xff]  ;;  %v296_v4 = vld [vmem:[%s18230_s11 + $0x130] sm:$0xff] }
 0x101   : > { %v15761_v21 = vcombine.low %v371_v9, %v375_v10 }
 0x105   : > { %12826 = vmatpush1.bf16.xpose.msra.mxu0 %v15697_v15  ;;  %v15762_v15 = vcombine.high %v371_v9, %v375_v10  ;;  %v15684_v9 = vcombine.high %v292_v3, %v296_v4 }
 0x106   : > { %12827 = vmatprep.subr.bf16.mxu0 %v15706_v17  ;;  %v379_v17 = vld [vmem:[%s18230_s11 + $0x3c8] sm:$0xff] }
 0x107   : > { %12990 = vmatpush1.bf16.xpose.msra.mxu1 %v15825_v16  ;;  %v15890_v16 = vcombine.high %v499_v11, %v503_v12  ;;  %v300_v11 = vld [vmem:[%s18230_s11 + $0x150] sm:$0xff] }
 0x108   : > { %12991 = vmatprep.subr.bf16.mxu1 %v15834_v18  ;;  %v383_v18 = vld [vmem:[%s18230_s11 + $0x3e8] sm:$0xff]  ;;  %v304_v12 = vld [vmem:[%s18230_s11 + $0x170] sm:$0xff] }
 0x109   : > { %v15769_v39 = vcombine.low %v379_v17, %v383_v18 }
 0x10d   : > { %12828 = vmatpush1.bf16.xpose.msra.mxu0 %v15705_v24  ;;  %v15770_v24 = vcombine.high %v379_v17, %v383_v18  ;;  %v15692_v17 = vcombine.high %v300_v11, %v304_v12 }
 0x10e   : > { %12829 = vmatprep.subr.bf16.mxu0 %v15714_v26  ;;  %v260_v26 = vld [vmem:[%s18230_s11 + $0x10] sm:$0xff] }
 0x10f   : > { %12992 = vmatpush1.bf16.xpose.msra.mxu1 %v15833_v25  ;;  %v15898_v25 = vcombine.high %v507_v19, %v511_v20  ;;  %v308_v19 = vld [vmem:[%s18230_s11 + $0x190] sm:$0xff] }
 0x110   : > { %12993 = vmatprep.subr.bf16.mxu1 %v15842_v27  ;;  %v264_v27 = vld [vmem:[%s18230_s11 + $0x30] sm:$0xff] }
 0x111   : > { %v312_v20 = vld [vmem:[%s18230_s11 + $0x1b0] sm:$0xff] }
 0x115   : > { %12830 = vmatpush1.bf16.xpose.msra.mxu0 %v15713_v33  ;;  %v15652_v33 = vcombine.high %v260_v26, %v264_v27 }
 0x116   : > { %12831 = vmatprep.subr.bf16.mxu0 %v15722_v37  ;;  %v2311_v37 = vcombine.high %v18266_v36, %v18266_v36 }
 0x117   : > { %12994 = vmatpush1.bf16.xpose.msra.mxu1 %v15841_v34  ;;  %v15780_v34 = vcombine.high %v388_v29, %v392_v30 }
 0x118   : > { %12995 = vmatprep.subr.bf16.mxu1 %v15850_v38  ;;  %v268_v38 = vld [vmem:[%s18230_s11 + $0x50] sm:$0xff]  ;;  %v18412_v41 = vrot.slane %v2311_v37, %v18261_v35 }
 0x11a   : > { %v2327_v36 = vcombine.high %v18412_v41, %v18412_v41 }
 0x11c   : > { %v18423_v50 = vrot.slane %v2327_v36, %v18261_v35 }
 0x11d   : > { %12832 = vmatpush1.bf16.xpose.msra.mxu0 %v15721_v44  ;;  %v400_v44 = vld [vmem:[%s18230_s11 + $0x470] sm:$0xff] }
 0x11e   : > { %12833 = vmatprep.subr.bf16.mxu0 %v15730_v46  ;;  %v15779_v46 = vcombine.low %v388_v29, %v392_v30  ;;  %v15788_v49 = vcombine.high %v396_v43, %v400_v44  ;;  %v316_v29 = vld [vmem:[%s18230_s11 + $0x1d0] sm:$0xff] }
 0x11f   : > { %12996 = vmatpush1.bf16.xpose.msra.mxu1 %v15849_v45  ;;  %v15651_v45 = vcombine.low %v260_v26, %v264_v27  ;;  %v15700_v26 = vcombine.high %v308_v19, %v312_v20  ;;  %v320_v30 = vld [vmem:[%s18230_s11 + $0x1f0] sm:$0xff] }
 0x120   : > { %12997 = vmatprep.subr.bf16.mxu1 %v15858_v48  ;;  %v15660_v48 = vcombine.high %v268_v38, %v272_v40  ;;  %v15708_v37 = vcombine.high %v316_v29, %v320_v30  ;;  %v15707_v36 = vcombine.low %v316_v29, %v320_v30  ;;  %v372_v29 = vld [vmem:[%s18230_s11 + $0x390] sm:$0xff] }
 0x121   : > { %v376_v30 = vld [vmem:[%s18230_s11 + $0x3b0] sm:$0xff] }
 0x125   : > { %12834 = vmatpush1.bf16.xpose.msra.mxu0 %v15729_v53  ;;  %v404_v53 = vld [vmem:[%s18230_s11 + $0x490] sm:$0xff] }
 0x126   : > { %12835 = vmatprep.subr.bf16.mxu0 %v15738_v55  ;;  %v15659_v55 = vcombine.low %v268_v38, %v272_v40  ;;  %v324_v40 = vld [vmem:[%s18230_s11 + $0x210] sm:$0xff] }
 0x127   : > { %12998 = vmatpush1.bf16.xpose.msra.mxu1 %v15857_v54  ;;  %v408_v54 = vld [vmem:[%s18230_s11 + $0x4b0] sm:$0xff] }
 0x128   : > { %12999 = vmatprep.subr.bf16.mxu1 %v15866_v56  ;;  %v15787_v56 = vcombine.low %v396_v43, %v400_v44  ;;  %v15796_v58 = vcombine.high %v404_v53, %v408_v54  ;;  %v328_v43 = vld [vmem:[%s18230_s11 + $0x230] sm:$0xff] }
 0x129   : > { %v452_v44 = vld [vmem:[%s18230_s11 + $0x610] sm:$0xff] }
 0x12d   : > { %12836 = vmatpush1.bf16.xpose.msra.mxu0 %v15737_v61  ;;  %v412_v61 = vld [vmem:[%s18230_s11 + $0x4d0] sm:$0xff] }
 0x12e   : > { %12837 = vmatprep.subr.bf16.mxu0 %v15746_v63  ;;  %v15667_v63 = vcombine.low %v276_v51, %v280_v52  ;;  %v332_v51 = vld [vmem:[%s18230_s11 + $0x250] sm:$0xff] }
 0x12f   : > { %13000 = vmatpush1.bf16.xpose.msra.mxu1 %v15865_v62  ;;  %v416_v62 = vld [vmem:[%s18230_s11 + $0x4f0] sm:$0xff] }
 0x130   : > { %13001 = vmatprep.subr.bf16.mxu1 %v15874_v0  ;;  %v15795_v0 = vcombine.low %v404_v53, %v408_v54  ;;  %v15804_v2 = vcombine.high %v412_v61, %v416_v62  ;;  %v336_v52 = vld [vmem:[%s18230_s11 + $0x270] sm:$0xff] }
 0x131   : > { %v460_v53 = vld [vmem:[%s18230_s11 + $0x650] sm:$0xff] }
 0x132   : > { %v464_v54 = vld [vmem:[%s18230_s11 + $0x670] sm:$0xff] }
 0x135   : > { %12838 = vmatpush1.bf16.xpose.msra.mxu0 %v15745_v5  ;;  %v420_v5 = vld [vmem:[%s18230_s11 + $0x510] sm:$0xff] }
 0x136   : > { %12839 = vmatprep.subr.bf16.mxu0 %v15754_v7  ;;  %v15675_v7 = vcombine.low %v284_v59, %v288_v60  ;;  %v340_v59 = vld [vmem:[%s18230_s11 + $0x290] sm:$0xff] }
 0x137   : > { %13002 = vmatpush1.bf16.xpose.msra.mxu1 %v15873_v6  ;;  %v424_v6 = vld [vmem:[%s18230_s11 + $0x530] sm:$0xff] }
 0x138   : > { %13003 = vmatprep.subr.bf16.mxu1 %v15882_v8  ;;  %v15803_v8 = vcombine.low %v412_v61, %v416_v62  ;;  %v15812_v10 = vcombine.high %v420_v5, %v424_v6  ;;  %v344_v60 = vld [vmem:[%s18230_s11 + $0x2b0] sm:$0xff] }
 0x139   : > { %v468_v61 = vld [vmem:[%s18230_s11 + $0x690] sm:$0xff] }
 0x13a   : > { %v472_v62 = vld [vmem:[%s18230_s11 + $0x6b0] sm:$0xff] }
 0x13d   : > { %12840 = vmatpush1.bf16.xpose.msra.mxu0 %v15753_v13  ;;  %v428_v13 = vld [vmem:[%s18230_s11 + $0x550] sm:$0xff] }
 0x13e   : > { %12841 = vmatprep.subr.bf16.mxu0 %v15762_v15  ;;  %v15683_v15 = vcombine.low %v292_v3, %v296_v4  ;;  %v348_v3 = vld [vmem:[%s18230_s11 + $0x2d0] sm:$0xff] }
 0x13f   : > { %13004 = vmatpush1.bf16.xpose.msra.mxu1 %v15881_v14  ;;  %v432_v14 = vld [vmem:[%s18230_s11 + $0x570] sm:$0xff] }
 0x140   : > { %13005 = vmatprep.subr.bf16.mxu1 %v15890_v16  ;;  %v15811_v16 = vcombine.low %v420_v5, %v424_v6  ;;  %v15820_v18 = vcombine.high %v428_v13, %v432_v14  ;;  %v352_v4 = vld [vmem:[%s18230_s11 + $0x2f0] sm:$0xff] }
 0x141   : > { %v476_v5 = vld [vmem:[%s18230_s11 + $0x6d0] sm:$0xff] }
 0x142   : > { %v480_v6 = vld [vmem:[%s18230_s11 + $0x6f0] sm:$0xff] }
 0x145   : > { %12842 = vmatpush1.bf16.xpose.msra.mxu0 %v15761_v21  ;;  %v436_v21 = vld [vmem:[%s18230_s11 + $0x590] sm:$0xff] }
 0x146   : > { %12843 = vmatprep.subr.bf16.mxu0 %v15770_v24  ;;  %v15691_v24 = vcombine.low %v300_v11, %v304_v12  ;;  %v356_v11 = vld [vmem:[%s18230_s11 + $0x310] sm:$0xff] }
 0x147   : > { %13006 = vmatpush1.bf16.xpose.msra.mxu1 %v15889_v22  ;;  %v440_v22 = vld [vmem:[%s18230_s11 + $0x5b0] sm:$0xff] }
 0x148   : > { %13007 = vmatprep.subr.bf16.mxu1 %v15898_v25  ;;  %v15819_v25 = vcombine.low %v428_v13, %v432_v14  ;;  %v15828_v27 = vcombine.high %v436_v21, %v440_v22  ;;  %v360_v12 = vld [vmem:[%s18230_s11 + $0x330] sm:$0xff] }
 0x149   : > { %v484_v13 = vld [vmem:[%s18230_s11 + $0x710] sm:$0xff] }
 0x14a   : > { %v488_v14 = vld [vmem:[%s18230_s11 + $0x730] sm:$0xff] }
 0x14d   : > { %12844 = vmatpush1.bf16.xpose.msra.mxu0 %v15769_v39  ;;  %v444_v39 = vld [vmem:[%s18230_s11 + $0x5d0] sm:$0xff] }
 0x14e   : > { %12854 = vmatprep.subr.bf16.mxu0 %v15652_v33  ;;  %v15699_v33 = vcombine.low %v308_v19, %v312_v20  ;;  %v364_v19 = vld [vmem:[%s18230_s11 + $0x350] sm:$0xff] }
 0x14f   : > { %13008 = vmatpush1.bf16.xpose.msra.mxu1 %v15897_v32  ;;  %v448_v32 = vld [vmem:[%s18230_s11 + $0x5f0] sm:$0xff] }
 0x150   : > { %13018 = vmatprep.subr.bf16.mxu1 %v15780_v34  ;;  %v15827_v34 = vcombine.low %v436_v21, %v440_v22  ;;  %v15836_v38 = vcombine.high %v444_v39, %v448_v32  ;;  %v368_v20 = vld [vmem:[%s18230_s11 + $0x370] sm:$0xff] }
 0x151   : > { %v492_v21 = vld [vmem:[%s18230_s11 + $0x750] sm:$0xff] }
 0x152   : > { %v496_v22 = vld [vmem:[%s18230_s11 + $0x770] sm:$0xff] }
 0x154   : > { %12846 = vmatmul.mubr.bf16.vlgmr.msra.gmra.mrb[0].mxu0 %v18416_v42 }
 0x155   : > { %12855 = vmatpush1.bf16.xpose.msra.mxu0 %v15651_v45  ;;  %12886 = vmatprep.mubr.bf16.mxu0 %v18423_v50  ;;  %v456_v45 = vld [vmem:[%s18230_s11 + $0x630] sm:$0xff] }
 0x156   : > { %13010 = vmatmul.mubr.bf16.vlgmr.msra.gmra.mrb[0].mxu1 %v18416_v42  ;;  %12856 = vmatprep.subr.bf16.mxu0 %v15660_v48  ;;  %v15716_v48 = vcombine.high %v324_v40, %v328_v43 }
 0x157   : > { %13019 = vmatpush1.bf16.xpose.msra.mxu1 %v15779_v46  ;;  %13050 = vmatprep.mubr.bf16.mxu1 %v18423_v50  ;;  %v15835_v46 = vcombine.low %v444_v39, %v448_v32  ;;  %v500_v39 = vld [vmem:[%s18230_s11 + $0x790] sm:$0xff] }
 0x158   : > { %13020 = vmatprep.subr.bf16.mxu1 %v15788_v49  ;;  %v15844_v49 = vcombine.high %v452_v44, %v456_v45  ;;  %v504_v32 = vld [vmem:[%s18230_s11 + $0x7b0] sm:$0xff] }
 0x15d   : > { %12857 = vmatpush1.bf16.xpose.msra.mxu0 %v15659_v55  ;;  %v15715_v55 = vcombine.low %v324_v40, %v328_v43  ;;  %v380_v40 = vld [vmem:[%s18230_s11 + $0x3d0] sm:$0xff] }
 0x15e   : > { %12858 = vmatprep.subr.bf16.mxu0 %v15668_v57  ;;  %v15724_v57 = vcombine.high %v332_v51, %v336_v52  ;;  %v384_v43 = vld [vmem:[%s18230_s11 + $0x3f0] sm:$0xff] }
 0x15f   : > { %13021 = vmatpush1.bf16.xpose.msra.mxu1 %v15787_v56  ;;  %v15843_v56 = vcombine.low %v452_v44, %v456_v45  ;;  %v508_v44 = vld [vmem:[%s18230_s11 + $0x7d0] sm:$0xff] }
 0x160   : > { %13022 = vmatprep.subr.bf16.mxu1 %v15796_v58  ;;  %v15852_v58 = vcombine.high %v460_v53, %v464_v54  ;;  %v512_v45 = vld [vmem:[%s18230_s11 + $0x7f0] sm:$0xff] }
 0x165   : > { %12859 = vmatpush1.bf16.xpose.msra.mxu0 %v15667_v63  ;;  %v15723_v63 = vcombine.low %v332_v51, %v336_v52  ;;  %v261_v51 = vld [vmem:[%s18230_s11 + $0x18] sm:$0xff] }
 0x166   : > { %12860 = vmatprep.subr.bf16.mxu0 %v15676_v1  ;;  %v15732_v1 = vcombine.high %v340_v59, %v344_v60  ;;  %v265_v52 = vld [vmem:[%s18230_s11 + $0x38] sm:$0xff] }
 0x167   : > { %13023 = vmatpush1.bf16.xpose.msra.mxu1 %v15795_v0  ;;  %v15851_v0 = vcombine.low %v460_v53, %v464_v54  ;;  %v389_v53 = vld [vmem:[%s18230_s11 + $0x418] sm:$0xff] }
 0x168   : > { %13024 = vmatprep.subr.bf16.mxu1 %v15804_v2  ;;  %v15860_v2 = vcombine.high %v468_v61, %v472_v62  ;;  %v393_v54 = vld [vmem:[%s18230_s11 + $0x438] sm:$0xff] }
 0x16d   : > { %12861 = vmatpush1.bf16.xpose.msra.mxu0 %v15675_v7  ;;  %v15731_v7 = vcombine.low %v340_v59, %v344_v60  ;;  %v269_v59 = vld [vmem:[%s18230_s11 + $0x58] sm:$0xff] }
 0x16e   : > { %12862 = vmatprep.subr.bf16.mxu0 %v15684_v9  ;;  %v15740_v9 = vcombine.high %v348_v3, %v352_v4  ;;  %v273_v60 = vld [vmem:[%s18230_s11 + $0x78] sm:$0xff] }
 0x16f   : > { %13025 = vmatpush1.bf16.xpose.msra.mxu1 %v15803_v8  ;;  %v15859_v8 = vcombine.low %v468_v61, %v472_v62  ;;  %v18493_v61 = vrot.slane %v18412_v41, %v18261_v35  ;;  %v397_v62 = vld [vmem:[%s18230_s11 + $0x458] sm:$0xff] }
 0x170   : > { %13026 = vmatprep.subr.bf16.mxu1 %v15812_v10  ;;  %v15868_v10 = vcombine.high %v476_v5, %v480_v6  ;;  %v277_v35 = vld [vmem:[%s18230_s11 + $0x98] sm:$0xff] }
 0x171   : > { %v281_v41 = vld [vmem:[%s18230_s11 + $0xb8] sm:$0xff] }
 0x175   : > { %12863 = vmatpush1.bf16.xpose.msra.mxu0 %v15683_v15  ;;  %v15739_v15 = vcombine.low %v348_v3, %v352_v4  ;;  %v18499_v4 = vcombine.high %v18423_v50, %v18423_v50 }
 0x176   : > { %12864 = vmatprep.subr.bf16.mxu0 %v15692_v17  ;;  %v15748_v17 = vcombine.high %v356_v11, %v360_v12 }
 0x177   : > { %13027 = vmatpush1.bf16.xpose.msra.mxu1 %v15811_v16  ;;  %v15867_v16 = vcombine.low %v476_v5, %v480_v6  ;;  %v405_v5 = vld [vmem:[%s18230_s11 + $0x498] sm:$0xff] }
 0x178   : > { %13028 = vmatprep.subr.bf16.mxu1 %v15820_v18  ;;  %v15876_v18 = vcombine.high %v484_v13, %v488_v14  ;;  %v409_v6 = vld [vmem:[%s18230_s11 + $0x4b8] sm:$0xff] }
 0x17d   : > { %12865 = vmatpush1.bf16.xpose.msra.mxu0 %v15691_v24  ;;  %v15747_v24 = vcombine.low %v356_v11, %v360_v12  ;;  %v285_v11 = vld [vmem:[%s18230_s11 + $0xd8] sm:$0xff] }
 0x17e   : > { %12866 = vmatprep.subr.bf16.mxu0 %v15700_v26  ;;  %v15756_v26 = vcombine.high %v364_v19, %v368_v20  ;;  %v289_v12 = vld [vmem:[%s18230_s11 + $0xf8] sm:$0xff] }
 0x17f   : > { %13029 = vmatpush1.bf16.xpose.msra.mxu1 %v15819_v25  ;;  %v15875_v25 = vcombine.low %v484_v13, %v488_v14  ;;  %v413_v13 = vld [vmem:[%s18230_s11 + $0x4d8] sm:$0xff] }
 0x180   : > { %13030 = vmatprep.subr.bf16.mxu1 %v15828_v27  ;;  %v15884_v27 = vcombine.high %v492_v21, %v496_v22  ;;  %v417_v14 = vld [vmem:[%s18230_s11 + $0x4f8] sm:$0xff] }
 0x185   : > { %12867 = vmatpush1.bf16.xpose.msra.mxu0 %v15699_v33  ;;  %v15755_v33 = vcombine.low %v364_v19, %v368_v20  ;;  %v293_v19 = vld [vmem:[%s18230_s11 + $0x118] sm:$0xff] }
 0x186   : > { %12868 = vmatprep.subr.bf16.mxu0 %v15708_v37  ;;  %v15764_v37 = vcombine.high %v372_v29, %v376_v30  ;;  %v297_v20 = vld [vmem:[%s18230_s11 + $0x138] sm:$0xff] }
 0x187   : > { %13031 = vmatpush1.bf16.xpose.msra.mxu1 %v15827_v34  ;;  %v15883_v34 = vcombine.low %v492_v21, %v496_v22  ;;  %v421_v21 = vld [vmem:[%s18230_s11 + $0x518] sm:$0xff] }
 0x188   : > { %13032 = vmatprep.subr.bf16.mxu1 %v15836_v38  ;;  %v15892_v38 = vcombine.high %v500_v39, %v504_v32  ;;  %v425_v22 = vld [vmem:[%s18230_s11 + $0x538] sm:$0xff] }
 0x18d   : > { %12869 = vmatpush1.bf16.xpose.msra.mxu0 %v15707_v36  ;;  %v15763_v36 = vcombine.low %v372_v29, %v376_v30  ;;  %v301_v29 = vld [vmem:[%s18230_s11 + $0x158] sm:$0xff] }
 0x18e   : > { %12870 = vmatprep.subr.bf16.mxu0 %v15716_v48  ;;  %v15772_v48 = vcombine.high %v380_v40, %v384_v43  ;;  %v305_v30 = vld [vmem:[%s18230_s11 + $0x178] sm:$0xff] }
 0x18f   : > { %13033 = vmatpush1.bf16.xpose.msra.mxu1 %v15835_v46  ;;  %v15891_v46 = vcombine.low %v500_v39, %v504_v32  ;;  %v429_v39 = vld [vmem:[%s18230_s11 + $0x558] sm:$0xff] }
 0x190   : > { %13034 = vmatprep.subr.bf16.mxu1 %v15844_v49  ;;  %v15900_v49 = vcombine.high %v508_v44, %v512_v45  ;;  %v433_v32 = vld [vmem:[%s18230_s11 + $0x578] sm:$0xff] }
 0x195   : > { %12871 = vmatpush1.bf16.xpose.msra.mxu0 %v15715_v55  ;;  %v15771_v55 = vcombine.low %v380_v40, %v384_v43  ;;  %v309_v40 = vld [vmem:[%s18230_s11 + $0x198] sm:$0xff] }
 0x196   : > { %12872 = vmatprep.subr.bf16.mxu0 %v15724_v57  ;;  %v15654_v57 = vcombine.high %v261_v51, %v265_v52  ;;  %v313_v43 = vld [vmem:[%s18230_s11 + $0x1b8] sm:$0xff] }
 0x197   : > { %13035 = vmatpush1.bf16.xpose.msra.mxu1 %v15843_v56  ;;  %v15899_v56 = vcombine.low %v508_v44, %v512_v45  ;;  %v437_v44 = vld [vmem:[%s18230_s11 + $0x598] sm:$0xff] }
 0x198   : > { %13036 = vmatprep.subr.bf16.mxu1 %v15852_v58  ;;  %v15782_v58 = vcombine.high %v389_v53, %v393_v54  ;;  %v441_v45 = vld [vmem:[%s18230_s11 + $0x5b8] sm:$0xff] }
 0x19d   : > { %12873 = vmatpush1.bf16.xpose.msra.mxu0 %v15723_v63  ;;  %v401_v63 = vld [vmem:[%s18230_s11 + $0x478] sm:$0xff] }
 0x19e   : > { %12874 = vmatprep.subr.bf16.mxu0 %v15732_v1  ;;  %v15781_v1 = vcombine.low %v389_v53, %v393_v54  ;;  %v15790_v3 = vcombine.high %v397_v62, %v401_v63  ;;  %v445_v53 = vld [vmem:[%s18230_s11 + $0x5d8] sm:$0xff] }
 0x19f   : > { %13037 = vmatpush1.bf16.xpose.msra.mxu1 %v15851_v0  ;;  %v15653_v0 = vcombine.low %v261_v51, %v265_v52  ;;  %v317_v51 = vld [vmem:[%s18230_s11 + $0x1d8] sm:$0xff] }
 0x1a0   : > { %13038 = vmatprep.subr.bf16.mxu1 %v15860_v2  ;;  %v15662_v2 = vcombine.high %v269_v59, %v273_v60  ;;  %v321_v52 = vld [vmem:[%s18230_s11 + $0x1f8] sm:$0xff] }
 0x1a1   : > { %v449_v54 = vld [vmem:[%s18230_s11 + $0x5f8] sm:$0xff] }
 0x1a5   : > { %12875 = vmatpush1.bf16.xpose.msra.mxu0 %v15731_v7  ;;  %v15661_v7 = vcombine.low %v269_v59, %v273_v60  ;;  %v325_v59 = vld [vmem:[%s18230_s11 + $0x218] sm:$0xff] }
 0x1a6   : > { %12876 = vmatprep.subr.bf16.mxu0 %v15740_v9  ;;  %v15670_v9 = vcombine.high %v277_v35, %v281_v41  ;;  %v329_v60 = vld [vmem:[%s18230_s11 + $0x238] sm:$0xff] }
 0x1a7   : > { %13039 = vmatpush1.bf16.xpose.msra.mxu1 %v15859_v8  ;;  %v15789_v8 = vcombine.low %v397_v62, %v401_v63  ;;  %v453_v62 = vld [vmem:[%s18230_s11 + $0x618] sm:$0xff] }
 0x1a8   : > { %13040 = vmatprep.subr.bf16.mxu1 %v15868_v10  ;;  %v15798_v10 = vcombine.high %v405_v5, %v409_v6  ;;  %v457_v63 = vld [vmem:[%s18230_s11 + $0x638] sm:$0xff] }
 0x1ad   : > { %12877 = vmatpush1.bf16.xpose.msra.mxu0 %v15739_v15  ;;  %v15669_v15 = vcombine.low %v277_v35, %v281_v41  ;;  %v333_v35 = vld [vmem:[%s18230_s11 + $0x258] sm:$0xff] }
 0x1ae   : > { %12878 = vmatprep.subr.bf16.mxu0 %v15748_v17  ;;  %v15678_v17 = vcombine.high %v285_v11, %v289_v12  ;;  %v337_v41 = vld [vmem:[%s18230_s11 + $0x278] sm:$0xff] }
 0x1af   : > { %13041 = vmatpush1.bf16.xpose.msra.mxu1 %v15867_v16  ;;  %v15797_v16 = vcombine.low %v405_v5, %v409_v6  ;;  %v461_v5 = vld [vmem:[%s18230_s11 + $0x658] sm:$0xff] }
 0x1b0   : > { %13042 = vmatprep.subr.bf16.mxu1 %v15876_v18  ;;  %v15806_v18 = vcombine.high %v413_v13, %v417_v14  ;;  %v465_v6 = vld [vmem:[%s18230_s11 + $0x678] sm:$0xff] }
 0x1b5   : > { %12879 = vmatpush1.bf16.xpose.msra.mxu0 %v15747_v24  ;;  %v15677_v24 = vcombine.low %v285_v11, %v289_v12  ;;  %v341_v11 = vld [vmem:[%s18230_s11 + $0x298] sm:$0xff] }
 0x1b6   : > { %12880 = vmatprep.subr.bf16.mxu0 %v15756_v26  ;;  %v15686_v26 = vcombine.high %v293_v19, %v297_v20  ;;  %v345_v12 = vld [vmem:[%s18230_s11 + $0x2b8] sm:$0xff] }
 0x1b7   : > { %13043 = vmatpush1.bf16.xpose.msra.mxu1 %v15875_v25  ;;  %v15805_v25 = vcombine.low %v413_v13, %v417_v14  ;;  %v469_v13 = vld [vmem:[%s18230_s11 + $0x698] sm:$0xff] }
 0x1b8   : > { %13044 = vmatprep.subr.bf16.mxu1 %v15884_v27  ;;  %v15814_v27 = vcombine.high %v421_v21, %v425_v22  ;;  %v473_v14 = vld [vmem:[%s18230_s11 + $0x6b8] sm:$0xff] }
 0x1bd   : > { %12881 = vmatpush1.bf16.xpose.msra.mxu0 %v15755_v33  ;;  %v15685_v33 = vcombine.low %v293_v19, %v297_v20  ;;  %v349_v19 = vld [vmem:[%s18230_s11 + $0x2d8] sm:$0xff] }
 0x1be   : > { %12882 = vmatprep.subr.bf16.mxu0 %v15764_v37  ;;  %v15694_v37 = vcombine.high %v301_v29, %v305_v30  ;;  %v353_v20 = vld [vmem:[%s18230_s11 + $0x2f8] sm:$0xff] }
 0x1bf   : > { %13045 = vmatpush1.bf16.xpose.msra.mxu1 %v15883_v34  ;;  %v15813_v34 = vcombine.low %v421_v21, %v425_v22  ;;  %v477_v21 = vld [vmem:[%s18230_s11 + $0x6d8] sm:$0xff] }
 0x1c0   : > { %13046 = vmatprep.subr.bf16.mxu1 %v15892_v38  ;;  %v15822_v38 = vcombine.high %v429_v39, %v433_v32  ;;  %v481_v22 = vld [vmem:[%s18230_s11 + $0x6f8] sm:$0xff] }
 0x1c5   : > { %12883 = vmatpush1.bf16.xpose.msra.mxu0 %v15763_v36  ;;  %v15693_v36 = vcombine.low %v301_v29, %v305_v30  ;;  %v357_v29 = vld [vmem:[%s18230_s11 + $0x318] sm:$0xff] }
 0x1c6   : > { %12884 = vmatprep.subr.bf16.mxu0 %v15772_v48  ;;  %v15702_v48 = vcombine.high %v309_v40, %v313_v43  ;;  %v361_v30 = vld [vmem:[%s18230_s11 + $0x338] sm:$0xff] }
 0x1c7   : > { %13047 = vmatpush1.bf16.xpose.msra.mxu1 %v15891_v46  ;;  %v15821_v46 = vcombine.low %v429_v39, %v433_v32  ;;  %v485_v39 = vld [vmem:[%s18230_s11 + $0x718] sm:$0xff] }
 0x1c8   : > { %13048 = vmatprep.subr.bf16.mxu1 %v15900_v49  ;;  %v15830_v49 = vcombine.high %v437_v44, %v441_v45  ;;  %v489_v32 = vld [vmem:[%s18230_s11 + $0x738] sm:$0xff] }
 0x1cd   : > { %12885 = vmatpush1.bf16.xpose.msra.mxu0 %v15771_v55  ;;  %v15701_v55 = vcombine.low %v309_v40, %v313_v43  ;;  %v365_v40 = vld [vmem:[%s18230_s11 + $0x358] sm:$0xff] }
 0x1ce   : > { %12895 = vmatprep.subr.bf16.mxu0 %v15654_v57  ;;  %v15710_v57 = vcombine.high %v317_v51, %v321_v52  ;;  %v369_v43 = vld [vmem:[%s18230_s11 + $0x378] sm:$0xff] }
 0x1cf   : > { %13049 = vmatpush1.bf16.xpose.msra.mxu1 %v15899_v56  ;;  %v15829_v56 = vcombine.low %v437_v44, %v441_v45  ;;  %v493_v44 = vld [vmem:[%s18230_s11 + $0x758] sm:$0xff] }
 0x1d0   : > { %13059 = vmatprep.subr.bf16.mxu1 %v15782_v58  ;;  %v15838_v58 = vcombine.high %v445_v53, %v449_v54  ;;  %v497_v45 = vld [vmem:[%s18230_s11 + $0x778] sm:$0xff] }
 0x1d4   : > { %12887 = vmatmul.mubr.bf16.vlgmr.msra.gmra.mrb[0].mxu0 %v18493_v61 }
 0x1d5   : > { %12896 = vmatpush1.bf16.xpose.msra.mxu0 %v15653_v0  ;;  %12927 = vmatprep.mubr.bf16.mxu0 %v18499_v4  ;;  %v15709_v0 = vcombine.low %v317_v51, %v321_v52  ;;  %v373_v51 = vld [vmem:[%s18230_s11 + $0x398] sm:$0xff] }
 0x1d6   : > { %13051 = vmatmul.mubr.bf16.vlgmr.msra.gmra.mrb[0].mxu1 %v18493_v61  ;;  %12897 = vmatprep.subr.bf16.mxu0 %v15662_v2  ;;  %v15718_v2 = vcombine.high %v325_v59, %v329_v60  ;;  %v377_v52 = vld [vmem:[%s18230_s11 + $0x3b8] sm:$0xff] }
 0x1d7   : > { %13060 = vmatpush1.bf16.xpose.msra.mxu1 %v15781_v1  ;;  %13091 = vmatprep.mubr.bf16.mxu1 %v18499_v4  ;;  %v15837_v1 = vcombine.low %v445_v53, %v449_v54  ;;  %v501_v53 = vld [vmem:[%s18230_s11 + $0x798] sm:$0xff] }
 0x1d8   : > { %13061 = vmatprep.subr.bf16.mxu1 %v15790_v3  ;;  %v15846_v3 = vcombine.high %v453_v62, %v457_v63  ;;  %v505_v54 = vld [vmem:[%s18230_s11 + $0x7b8] sm:$0xff] }
 0x1dd   : > { %12898 = vmatpush1.bf16.xpose.msra.mxu0 %v15661_v7  ;;  %v15717_v7 = vcombine.low %v325_v59, %v329_v60  ;;  %v381_v59 = vld [vmem:[%s18230_s11 + $0x3d8] sm:$0xff] }
 0x1de   : > { %12899 = vmatprep.subr.bf16.mxu0 %v15670_v9  ;;  %v15726_v9 = vcombine.high %v333_v35, %v337_v41  ;;  %v385_v60 = vld [vmem:[%s18230_s11 + $0x3f8] sm:$0xff] }
 0x1df   : > { %13062 = vmatpush1.bf16.xpose.msra.mxu1 %v15789_v8  ;;  %v15845_v8 = vcombine.low %v453_v62, %v457_v63  ;;  %v509_v62 = vld [vmem:[%s18230_s11 + $0x7d8] sm:$0xff] }
 0x1e0   : > { %13063 = vmatprep.subr.bf16.mxu1 %v15798_v10  ;;  %v15854_v10 = vcombine.high %v461_v5, %v465_v6  ;;  %v513_v63 = vld [vmem:[%s18230_s11 + $0x7f8] sm:$0xff] }
 0x1e5   : > { %12900 = vmatpush1.bf16.xpose.msra.mxu0 %v15669_v15  ;;  %v15725_v15 = vcombine.low %v333_v35, %v337_v41  ;;  %v514_v35 = vld [vmem:[%s18230_s11 + $0x800] sm:$0xff] }
 0x1e6   : > { %12901 = vmatprep.subr.bf16.mxu0 %v15678_v17  ;;  %v15734_v17 = vcombine.high %v341_v11, %v345_v12  ;;  %v518_v41 = vld [vmem:[%s18230_s11 + $0x820] sm:$0xff] }
 0x1e7   : > { %13064 = vmatpush1.bf16.xpose.msra.mxu1 %v15797_v16  ;;  %v15853_v16 = vcombine.low %v461_v5, %v465_v6  ;;  %v642_v5 = vld [vmem:[%s18230_s11 + $0xc00] sm:$0xff] }
 0x1e8   : > { %13065 = vmatprep.subr.bf16.mxu1 %v15806_v18  ;;  %v15862_v18 = vcombine.high %v469_v13, %v473_v14  ;;  %v646_v6 = vld [vmem:[%s18230_s11 + $0xc20] sm:$0xff] }
 0x1ed   : > { %12902 = vmatpush1.bf16.xpose.msra.mxu0 %v15677_v24  ;;  %v15733_v24 = vcombine.low %v341_v11, %v345_v12  ;;  %v522_v11 = vld [vmem:[%s18230_s11 + $0x840] sm:$0xff] }
 0x1ee   : > { %12903 = vmatprep.subr.bf16.mxu0 %v15686_v26  ;;  %v15742_v26 = vcombine.high %v349_v19, %v353_v20  ;;  %v526_v12 = vld [vmem:[%s18230_s11 + $0x860] sm:$0xff] }
 0x1ef   : > { %13066 = vmatpush1.bf16.xpose.msra.mxu1 %v15805_v25  ;;  %v15861_v25 = vcombine.low %v469_v13, %v473_v14  ;;  %v18569_v13 = vcombine.high %v18493_v61, %v18493_v61  ;;  %v650_v14 = vld [vmem:[%s18230_s11 + $0xc40] sm:$0xff] }
 0x1f0   : > { %13067 = vmatprep.subr.bf16.mxu1 %v15814_v27  ;;  %v15870_v27 = vcombine.high %v477_v21, %v481_v22 }
 0x1f5   : > { %12904 = vmatpush1.bf16.xpose.msra.mxu0 %v15685_v33  ;;  %v15741_v33 = vcombine.low %v349_v19, %v353_v20  ;;  %v530_v20 = vld [vmem:[%s18230_s11 + $0x880] sm:$0xff] }
 0x1f6   : > { %12905 = vmatprep.subr.bf16.mxu0 %v15694_v37  ;;  %v15750_v37 = vcombine.high %v357_v29, %v361_v30 }
 0x1f7   : > { %13068 = vmatpush1.bf16.xpose.msra.mxu1 %v15813_v34  ;;  %v15869_v34 = vcombine.low %v477_v21, %v481_v22  ;;  %v534_v21 = vld [vmem:[%s18230_s11 + $0x8a0] sm:$0xff] }
 0x1f8   : > { %13069 = vmatprep.subr.bf16.mxu1 %v15822_v38  ;;  %v15878_v38 = vcombine.high %v485_v39, %v489_v32  ;;  %v658_v22 = vld [vmem:[%s18230_s11 + $0xc80] sm:$0xff] }
 0x1fd   : > { %12906 = vmatpush1.bf16.xpose.msra.mxu0 %v15693_v36  ;;  %v15749_v36 = vcombine.low %v357_v29, %v361_v30  ;;  %v538_v30 = vld [vmem:[%s18230_s11 + $0x8c0] sm:$0xff] }
 0x1fe   : > { %12907 = vmatprep.subr.bf16.mxu0 %v15702_v48  ;;  %v15758_v48 = vcombine.high %v365_v40, %v369_v43 }
 0x1ff   : > { %13070 = vmatpush1.bf16.xpose.msra.mxu1 %v15821_v46  ;;  %v15877_v46 = vcombine.low %v485_v39, %v489_v32  ;;  %v542_v39 = vld [vmem:[%s18230_s11 + $0x8e0] sm:$0xff] }
 0x200   : > { %13071 = vmatprep.subr.bf16.mxu1 %v15830_v49  ;;  %v15886_v49 = vcombine.high %v493_v44, %v497_v45  ;;  %v666_v32 = vld [vmem:[%s18230_s11 + $0xcc0] sm:$0xff] }
 0x205   : > { %12908 = vmatpush1.bf16.xpose.msra.mxu0 %v15701_v55  ;;  %v15757_v55 = vcombine.low %v365_v40, %v369_v43  ;;  %v546_v43 = vld [vmem:[%s18230_s11 + $0x900] sm:$0xff] }
 0x206   : > { %12909 = vmatprep.subr.bf16.mxu0 %v15710_v57  ;;  %v15766_v57 = vcombine.high %v373_v51, %v377_v52 }
 0x207   : > { %13072 = vmatpush1.bf16.xpose.msra.mxu1 %v15829_v56  ;;  %v15885_v56 = vcombine.low %v493_v44, %v497_v45  ;;  %v550_v44 = vld [vmem:[%s18230_s11 + $0x920] sm:$0xff] }
 0x208   : > { %13073 = vmatprep.subr.bf16.mxu1 %v15838_v58  ;;  %v15894_v58 = vcombine.high %v501_v53, %v505_v54  ;;  %v674_v45 = vld [vmem:[%s18230_s11 + $0xd00] sm:$0xff] }
 0x20d   : > { %12910 = vmatpush1.bf16.xpose.msra.mxu0 %v15709_v0  ;;  %v15765_v0 = vcombine.low %v373_v51, %v377_v52  ;;  %v554_v52 = vld [vmem:[%s18230_s11 + $0x940] sm:$0xff] }
 0x20e   : > { %12911 = vmatprep.subr.bf16.mxu0 %v15718_v2  ;;  %v15774_v2 = vcombine.high %v381_v59, %v385_v60 }
 0x20f   : > { %13074 = vmatpush1.bf16.xpose.msra.mxu1 %v15837_v1  ;;  %v15893_v1 = vcombine.low %v501_v53, %v505_v54  ;;  %v558_v53 = vld [vmem:[%s18230_s11 + $0x960] sm:$0xff] }
 0x210   : > { %13075 = vmatprep.subr.bf16.mxu1 %v15846_v3  ;;  %v15902_v3 = vcombine.high %v509_v62, %v513_v63  ;;  %v682_v54 = vld [vmem:[%s18230_s11 + $0xd40] sm:$0xff] }
 0x215   : > { %12912 = vmatpush1.bf16.xpose.msra.mxu0 %v15717_v7  ;;  %v15773_v7 = vcombine.low %v381_v59, %v385_v60  ;;  %v562_v60 = vld [vmem:[%s18230_s11 + $0x980] sm:$0xff] }
 0x216   : > { %12913 = vmatprep.subr.bf16.mxu0 %v15726_v9  ;;  %v15904_v9 = vcombine.high %v514_v35, %v518_v41 }
 0x217   : > { %13076 = vmatpush1.bf16.xpose.msra.mxu1 %v15845_v8  ;;  %v15901_v8 = vcombine.low %v509_v62, %v513_v63  ;;  %v566_v62 = vld [vmem:[%s18230_s11 + $0x9a0] sm:$0xff] }
 0x218   : > { %13077 = vmatprep.subr.bf16.mxu1 %v15854_v10  ;;  %v16032_v10 = vcombine.high %v642_v5, %v646_v6  ;;  %v690_v63 = vld [vmem:[%s18230_s11 + $0xd80] sm:$0xff] }
 0x21d   : > { %12914 = vmatpush1.bf16.xpose.msra.mxu0 %v15725_v15  ;;  %v654_v15 = vld [vmem:[%s18230_s11 + $0xc60] sm:$0xff] }
 0x21e   : > { %12915 = vmatprep.subr.bf16.mxu0 %v15734_v17  ;;  %v16031_v17 = vcombine.low %v642_v5, %v646_v6  ;;  %v16040_v19 = vcombine.high %v650_v14, %v654_v15  ;;  %v574_v5 = vld [vmem:[%s18230_s11 + $0x9e0] sm:$0xff] }
 0x21f   : > { %13078 = vmatpush1.bf16.xpose.msra.mxu1 %v15853_v16  ;;  %v15903_v16 = vcombine.low %v514_v35, %v518_v41  ;;  %v570_v41 = vld [vmem:[%s18230_s11 + $0x9c0] sm:$0xff] }
 0x220   : > { %13079 = vmatprep.subr.bf16.mxu1 %v15862_v18  ;;  %v15912_v18 = vcombine.high %v522_v11, %v526_v12  ;;  %v698_v6 = vld [vmem:[%s18230_s11 + $0xdc0] sm:$0xff] }
 0x225   : > { %12916 = vmatpush1.bf16.xpose.msra.mxu0 %v15733_v24  ;;  %v662_v24 = vld [vmem:[%s18230_s11 + $0xca0] sm:$0xff] }
 0x226   : > { %12917 = vmatprep.subr.bf16.mxu0 %v15742_v26  ;;  %v16039_v26 = vcombine.low %v650_v14, %v654_v15  ;;  %v16048_v29 = vcombine.high %v658_v22, %v662_v24  ;;  %v582_v14 = vld [vmem:[%s18230_s11 + $0xa20] sm:$0xff] }
 0x227   : > { %13080 = vmatpush1.bf16.xpose.msra.mxu1 %v15861_v25  ;;  %v15911_v25 = vcombine.low %v522_v11, %v526_v12  ;;  %v578_v12 = vld [vmem:[%s18230_s11 + $0xa00] sm:$0xff] }
 0x228   : > { %13081 = vmatprep.subr.bf16.mxu1 %v15870_v27  ;;  %v15920_v27 = vcombine.high %v530_v20, %v534_v21  ;;  %v706_v15 = vld [vmem:[%s18230_s11 + $0xe00] sm:$0xff] }
 0x22d   : > { %12918 = vmatpush1.bf16.xpose.msra.mxu0 %v15741_v33  ;;  %v670_v33 = vld [vmem:[%s18230_s11 + $0xce0] sm:$0xff] }
 0x22e   : > { %12919 = vmatprep.subr.bf16.mxu0 %v15750_v37  ;;  %v16047_v37 = vcombine.low %v658_v22, %v662_v24  ;;  %v16056_v40 = vcombine.high %v666_v32, %v670_v33  ;;  %v590_v22 = vld [vmem:[%s18230_s11 + $0xa60] sm:$0xff] }
 0x22f   : > { %13082 = vmatpush1.bf16.xpose.msra.mxu1 %v15869_v34  ;;  %v15919_v34 = vcombine.low %v530_v20, %v534_v21  ;;  %v586_v21 = vld [vmem:[%s18230_s11 + $0xa40] sm:$0xff] }
 0x230   : > { %13083 = vmatprep.subr.bf16.mxu1 %v15878_v38  ;;  %v15928_v38 = vcombine.high %v538_v30, %v542_v39  ;;  %v714_v24 = vld [vmem:[%s18230_s11 + $0xe40] sm:$0xff] }
 0x235   : > { %12920 = vmatpush1.bf16.xpose.msra.mxu0 %v15749_v36  ;;  %v678_v36 = vld [vmem:[%s18230_s11 + $0xd20] sm:$0xff] }
 0x236   : > { %12921 = vmatprep.subr.bf16.mxu0 %v15758_v48  ;;  %v16055_v48 = vcombine.low %v666_v32, %v670_v33  ;;  %v16064_v51 = vcombine.high %v674_v45, %v678_v36  ;;  %v598_v32 = vld [vmem:[%s18230_s11 + $0xaa0] sm:$0xff] }
 0x237   : > { %13084 = vmatpush1.bf16.xpose.msra.mxu1 %v15877_v46  ;;  %v15927_v46 = vcombine.low %v538_v30, %v542_v39  ;;  %v594_v39 = vld [vmem:[%s18230_s11 + $0xa80] sm:$0xff] }
 0x238   : > { %13085 = vmatprep.subr.bf16.mxu1 %v15886_v49  ;;  %v15936_v49 = vcombine.high %v546_v43, %v550_v44  ;;  %v722_v33 = vld [vmem:[%s18230_s11 + $0xe80] sm:$0xff] }
 0x23d   : > { %12922 = vmatpush1.bf16.xpose.msra.mxu0 %v15757_v55  ;;  %v686_v55 = vld [vmem:[%s18230_s11 + $0xd60] sm:$0xff] }
 0x23e   : > { %12923 = vmatprep.subr.bf16.mxu0 %v15766_v57  ;;  %v16063_v57 = vcombine.low %v674_v45, %v678_v36  ;;  %v16072_v59 = vcombine.high %v682_v54, %v686_v55  ;;  %v606_v45 = vld [vmem:[%s18230_s11 + $0xae0] sm:$0xff] }
 0x23f   : > { %13086 = vmatpush1.bf16.xpose.msra.mxu1 %v15885_v56  ;;  %v15935_v56 = vcombine.low %v546_v43, %v550_v44  ;;  %v602_v44 = vld [vmem:[%s18230_s11 + $0xac0] sm:$0xff] }
 0x240   : > { %13087 = vmatprep.subr.bf16.mxu1 %v15894_v58  ;;  %v15944_v58 = vcombine.high %v554_v52, %v558_v53  ;;  %v730_v36 = vld [vmem:[%s18230_s11 + $0xec0] sm:$0xff] }
 0x245   : > { %12924 = vmatpush1.bf16.xpose.msra.mxu0 %v15765_v0  ;;  %v694_v0 = vld [vmem:[%s18230_s11 + $0xda0] sm:$0xff] }
 0x246   : > { %12925 = vmatprep.subr.bf16.mxu0 %v15774_v2  ;;  %v16071_v2 = vcombine.low %v682_v54, %v686_v55  ;;  %v16080_v35 = vcombine.high %v690_v63, %v694_v0  ;;  %v614_v54 = vld [vmem:[%s18230_s11 + $0xb20] sm:$0xff] }
 0x247   : > { %13088 = vmatpush1.bf16.xpose.msra.mxu1 %v15893_v1  ;;  %v15943_v1 = vcombine.low %v554_v52, %v558_v53  ;;  %v610_v53 = vld [vmem:[%s18230_s11 + $0xb00] sm:$0xff] }
 0x248   : > { %13089 = vmatprep.subr.bf16.mxu1 %v15902_v3  ;;  %v15952_v3 = vcombine.high %v562_v60, %v566_v62  ;;  %v738_v55 = vld [vmem:[%s18230_s11 + $0xf00] sm:$0xff] }
 0x24d   : > { %12926 = vmatpush1.bf16.xpose.msra.mxu0 %v15773_v7  ;;  %v702_v7 = vld [vmem:[%s18230_s11 + $0xde0] sm:$0xff] }
 0x24e   : > { %13100 = vmatprep.subr.bf16.mxu0 %v15904_v9  ;;  %v16079_v9 = vcombine.low %v690_v63, %v694_v0  ;;  %v16088_v11 = vcombine.high %v698_v6, %v702_v7  ;;  %v622_v63 = vld [vmem:[%s18230_s11 + $0xb60] sm:$0xff] }
 0x24f   : > { %13090 = vmatpush1.bf16.xpose.msra.mxu1 %v15901_v8  ;;  %v15951_v8 = vcombine.low %v562_v60, %v566_v62  ;;  %v618_v62 = vld [vmem:[%s18230_s11 + $0xb40] sm:$0xff] }
 0x250   : > { %13264 = vmatprep.subr.bf16.mxu1 %v16032_v10  ;;  %v15960_v10 = vcombine.high %v570_v41, %v574_v5  ;;  %v746_v0 = vld [vmem:[%s18230_s11 + $0xf40] sm:$0xff] }
 0x254   : > { %12928 = vmatmul.mubr.bf16.vlgmr.msra.gmra.mrb[0].mxu0 %v18569_v13 }
 0x255   : > { %13101 = vmatpush1.bf16.xpose.msra.mxu0 %v15903_v16  ;;  %13132 = vmatprep.mubr.bf16.mxu0 %v18279_v47  ;;  %v710_v16 = vld [vmem:[%s18230_s11 + $0xe20] sm:$0xff] }
 0x256   : > { %13092 = vmatmul.mubr.bf16.vlgmr.msra.gmra.mrb[0].mxu1 %v18569_v13  ;;  %13102 = vmatprep.subr.bf16.mxu0 %v15912_v18  ;;  %v16087_v18 = vcombine.low %v698_v6, %v702_v7  ;;  %v16096_v20 = vcombine.high %v706_v15, %v710_v16  ;;  %v630_v6 = vld [vmem:[%s18230_s11 + $0xba0] sm:$0xff] }
 0x257   : > { %13265 = vmatpush1.bf16.xpose.msra.mxu1 %v16031_v17  ;;  %13296 = vmatprep.mubr.bf16.mxu1 %v18279_v47  ;;  %v15959_v17 = vcombine.low %v570_v41, %v574_v5  ;;  %v626_v5 = vld [vmem:[%s18230_s11 + $0xb80] sm:$0xff] }
 0x258   : > { %13266 = vmatprep.subr.bf16.mxu1 %v16040_v19  ;;  %v15968_v19 = vcombine.high %v578_v12, %v582_v14  ;;  %v754_v7 = vld [vmem:[%s18230_s11 + $0xf80] sm:$0xff] }
 0x25d   : > { %13103 = vmatpush1.bf16.xpose.msra.mxu0 %v15911_v25  ;;  %v718_v25 = vld [vmem:[%s18230_s11 + $0xe60] sm:$0xff] }
 0x25e   : > { %13104 = vmatprep.subr.bf16.mxu0 %v15920_v27  ;;  %v16095_v27 = vcombine.low %v706_v15, %v710_v16  ;;  %v16104_v30 = vcombine.high %v714_v24, %v718_v25  ;;  %v638_v15 = vld [vmem:[%s18230_s11 + $0xbe0] sm:$0xff] }
 0x25f   : > { %13267 = vmatpush1.bf16.xpose.msra.mxu1 %v16039_v26  ;;  %v15967_v26 = vcombine.low %v578_v12, %v582_v14  ;;  %v634_v14 = vld [vmem:[%s18230_s11 + $0xbc0] sm:$0xff] }
 0x260   : > { %13268 = vmatprep.subr.bf16.mxu1 %v16048_v29  ;;  %v15976_v29 = vcombine.high %v586_v21, %v590_v22  ;;  %v762_v16 = vld [vmem:[%s18230_s11 + $0xfc0] sm:$0xff] }
 0x265   : > { %13105 = vmatpush1.bf16.xpose.msra.mxu0 %v15919_v34  ;;  %v726_v34 = vld [vmem:[%s18230_s11 + $0xea0] sm:$0xff] }
 0x266   : > { %13106 = vmatprep.subr.bf16.mxu0 %v15928_v38  ;;  %v16103_v38 = vcombine.low %v714_v24, %v718_v25  ;;  %v16112_v43 = vcombine.high %v722_v33, %v726_v34  ;;  %v519_v24 = vld [vmem:[%s18230_s11 + $0x828] sm:$0xff] }
 0x267   : > { %13269 = vmatpush1.bf16.xpose.msra.mxu1 %v16047_v37  ;;  %v15975_v37 = vcombine.low %v586_v21, %v590_v22  ;;  %v515_v22 = vld [vmem:[%s18230_s11 + $0x808] sm:$0xff] }
 0x268   : > { %13270 = vmatprep.subr.bf16.mxu1 %v16056_v40  ;;  %v15984_v40 = vcombine.high %v594_v39, %v598_v32  ;;  %v643_v25 = vld [vmem:[%s18230_s11 + $0xc08] sm:$0xff] }
 0x26d   : > { %13107 = vmatpush1.bf16.xpose.msra.mxu0 %v15927_v46  ;;  %v734_v46 = vld [vmem:[%s18230_s11 + $0xee0] sm:$0xff] }
 0x26e   : > { %13108 = vmatprep.subr.bf16.mxu0 %v15936_v49  ;;  %v16111_v49 = vcombine.low %v722_v33, %v726_v34  ;;  %v16120_v52 = vcombine.high %v730_v36, %v734_v46  ;;  %v527_v33 = vld [vmem:[%s18230_s11 + $0x868] sm:$0xff] }
 0x26f   : > { %13271 = vmatpush1.bf16.xpose.msra.mxu1 %v16055_v48  ;;  %v15983_v48 = vcombine.low %v594_v39, %v598_v32  ;;  %v523_v32 = vld [vmem:[%s18230_s11 + $0x848] sm:$0xff] }
 0x270   : > { %13272 = vmatprep.subr.bf16.mxu1 %v16064_v51  ;;  %v15992_v51 = vcombine.high %v602_v44, %v606_v45  ;;  %v651_v34 = vld [vmem:[%s18230_s11 + $0xc48] sm:$0xff] }
 0x275   : > { %13109 = vmatpush1.bf16.xpose.msra.mxu0 %v15935_v56  ;;  %v742_v56 = vld [vmem:[%s18230_s11 + $0xf20] sm:$0xff] }
 0x276   : > { %13110 = vmatprep.subr.bf16.mxu0 %v15944_v58  ;;  %v16119_v58 = vcombine.low %v730_v36, %v734_v46  ;;  %v16128_v60 = vcombine.high %v738_v55, %v742_v56  ;;  %v535_v36 = vld [vmem:[%s18230_s11 + $0x8a8] sm:$0xff] }
 0x277   : > { %13273 = vmatpush1.bf16.xpose.msra.mxu1 %v16063_v57  ;;  %v15991_v57 = vcombine.low %v602_v44, %v606_v45  ;;  %v531_v45 = vld [vmem:[%s18230_s11 + $0x888] sm:$0xff] }
 0x278   : > { %13274 = vmatprep.subr.bf16.mxu1 %v16072_v59  ;;  %v16000_v59 = vcombine.high %v610_v53, %v614_v54  ;;  %v659_v46 = vld [vmem:[%s18230_s11 + $0xc88] sm:$0xff] }
 0x27d   : > { %13111 = vmatpush1.bf16.xpose.msra.mxu0 %v15943_v1  ;;  %v750_v1 = vld [vmem:[%s18230_s11 + $0xf60] sm:$0xff] }
 0x27e   : > { %13112 = vmatprep.subr.bf16.mxu0 %v15952_v3  ;;  %v16127_v3 = vcombine.low %v738_v55, %v742_v56  ;;  %v16136_v41 = vcombine.high %v746_v0, %v750_v1  ;;  %v543_v55 = vld [vmem:[%s18230_s11 + $0x8e8] sm:$0xff] }
 0x27f   : > { %13275 = vmatpush1.bf16.xpose.msra.mxu1 %v16071_v2  ;;  %v15999_v2 = vcombine.low %v610_v53, %v614_v54  ;;  %v539_v54 = vld [vmem:[%s18230_s11 + $0x8c8] sm:$0xff] }
 0x280   : > { %13276 = vmatprep.subr.bf16.mxu1 %v16080_v35  ;;  %v16008_v35 = vcombine.high %v618_v62, %v622_v63  ;;  %v667_v56 = vld [vmem:[%s18230_s11 + $0xcc8] sm:$0xff] }
 0x285   : > { %13113 = vmatpush1.bf16.xpose.msra.mxu0 %v15951_v8  ;;  %v758_v8 = vld [vmem:[%s18230_s11 + $0xfa0] sm:$0xff] }
 0x286   : > { %13114 = vmatprep.subr.bf16.mxu0 %v15960_v10  ;;  %v16135_v10 = vcombine.low %v746_v0, %v750_v1  ;;  %v16144_v12 = vcombine.high %v754_v7, %v758_v8  ;;  %v551_v0 = vld [vmem:[%s18230_s11 + $0x928] sm:$0xff] }
 0x287   : > { %13277 = vmatpush1.bf16.xpose.msra.mxu1 %v16079_v9  ;;  %v16007_v9 = vcombine.low %v618_v62, %v622_v63  ;;  %v547_v63 = vld [vmem:[%s18230_s11 + $0x908] sm:$0xff] }
 0x288   : > { %13278 = vmatprep.subr.bf16.mxu1 %v16088_v11  ;;  %v16016_v11 = vcombine.high %v626_v5, %v630_v6  ;;  %v675_v1 = vld [vmem:[%s18230_s11 + $0xd08] sm:$0xff] }
 0x28d   : > { %13115 = vmatpush1.bf16.xpose.msra.mxu0 %v15959_v17  ;;  %v766_v17 = vld [vmem:[%s18230_s11 + $0xfe0] sm:$0xff] }
 0x28e   : > { %13116 = vmatprep.subr.bf16.mxu0 %v15968_v19  ;;  %v16143_v19 = vcombine.low %v754_v7, %v758_v8  ;;  %v16152_v21 = vcombine.high %v762_v16, %v766_v17  ;;  %v559_v7 = vld [vmem:[%s18230_s11 + $0x968] sm:$0xff] }
 0x28f   : > { %13279 = vmatpush1.bf16.xpose.msra.mxu1 %v16087_v18  ;;  %v16015_v18 = vcombine.low %v626_v5, %v630_v6  ;;  %v555_v6 = vld [vmem:[%s18230_s11 + $0x948] sm:$0xff] }
 0x290   : > { %13280 = vmatprep.subr.bf16.mxu1 %v16096_v20  ;;  %v16024_v20 = vcombine.high %v634_v14, %v638_v15  ;;  %v683_v8 = vld [vmem:[%s18230_s11 + $0xd48] sm:$0xff] }
 0x295   : > { %13117 = vmatpush1.bf16.xpose.msra.mxu0 %v15967_v26  ;;  %v647_v26 = vld [vmem:[%s18230_s11 + $0xc28] sm:$0xff] }
 0x296   : > { %13118 = vmatprep.subr.bf16.mxu0 %v15976_v29  ;;  %v16151_v29 = vcombine.low %v762_v16, %v766_v17  ;;  %v16034_v39 = vcombine.high %v643_v25, %v647_v26  ;;  %v567_v16 = vld [vmem:[%s18230_s11 + $0x9a8] sm:$0xff] }
 0x297   : > { %13281 = vmatpush1.bf16.xpose.msra.mxu1 %v16095_v27  ;;  %v16023_v27 = vcombine.low %v634_v14, %v638_v15  ;;  %v563_v15 = vld [vmem:[%s18230_s11 + $0x988] sm:$0xff] }
 0x298   : > { %13282 = vmatprep.subr.bf16.mxu1 %v16104_v30  ;;  %v15906_v30 = vcombine.high %v515_v22, %v519_v24  ;;  %v691_v17 = vld [vmem:[%s18230_s11 + $0xd88] sm:$0xff] }
 0x29d   : > { %13119 = vmatpush1.bf16.xpose.msra.mxu0 %v15975_v37  ;;  %v655_v37 = vld [vmem:[%s18230_s11 + $0xc68] sm:$0xff] }
 0x29e   : > { %13120 = vmatprep.subr.bf16.mxu0 %v15984_v40  ;;  %v16033_v40 = vcombine.low %v643_v25, %v647_v26  ;;  %v16042_v44 = vcombine.high %v651_v34, %v655_v37  ;;  %v575_v25 = vld [vmem:[%s18230_s11 + $0x9e8] sm:$0xff] }
 0x29f   : > { %13283 = vmatpush1.bf16.xpose.msra.mxu1 %v16103_v38  ;;  %v15905_v38 = vcombine.low %v515_v22, %v519_v24  ;;  %v571_v24 = vld [vmem:[%s18230_s11 + $0x9c8] sm:$0xff] }
 0x2a0   : > { %13284 = vmatprep.subr.bf16.mxu1 %v16112_v43  ;;  %v15914_v43 = vcombine.high %v523_v32, %v527_v33  ;;  %v699_v26 = vld [vmem:[%s18230_s11 + $0xdc8] sm:$0xff] }
 0x2a5   : > { %13121 = vmatpush1.bf16.xpose.msra.mxu0 %v15983_v48  ;;  %v663_v48 = vld [vmem:[%s18230_s11 + $0xca8] sm:$0xff] }
 0x2a6   : > { %13122 = vmatprep.subr.bf16.mxu0 %v15992_v51  ;;  %v16041_v51 = vcombine.low %v651_v34, %v655_v37  ;;  %v16050_v53 = vcombine.high %v659_v46, %v663_v48  ;;  %v583_v34 = vld [vmem:[%s18230_s11 + $0xa28] sm:$0xff] }
 0x2a7   : > { %13285 = vmatpush1.bf16.xpose.msra.mxu1 %v16111_v49  ;;  %v15913_v49 = vcombine.low %v523_v32, %v527_v33  ;;  %v579_v33 = vld [vmem:[%s18230_s11 + $0xa08] sm:$0xff] }
 0x2a8   : > { %13286 = vmatprep.subr.bf16.mxu1 %v16120_v52  ;;  %v15922_v52 = vcombine.high %v531_v45, %v535_v36  ;;  %v707_v37 = vld [vmem:[%s18230_s11 + $0xe08] sm:$0xff] }
 0x2ad   : > { %13123 = vmatpush1.bf16.xpose.msra.mxu0 %v15991_v57  ;;  %v671_v57 = vld [vmem:[%s18230_s11 + $0xce8] sm:$0xff] }
 0x2ae   : > { %13124 = vmatprep.subr.bf16.mxu0 %v16000_v59  ;;  %v16049_v59 = vcombine.low %v659_v46, %v663_v48  ;;  %v16058_v62 = vcombine.high %v667_v56, %v671_v57  ;;  %v591_v46 = vld [vmem:[%s18230_s11 + $0xa68] sm:$0xff] }
 0x2af   : > { %13287 = vmatpush1.bf16.xpose.msra.mxu1 %v16119_v58  ;;  %v15921_v58 = vcombine.low %v531_v45, %v535_v36  ;;  %v587_v36 = vld [vmem:[%s18230_s11 + $0xa48] sm:$0xff] }
 0x2b0   : > { %13288 = vmatprep.subr.bf16.mxu1 %v16128_v60  ;;  %v15930_v60 = vcombine.high %v539_v54, %v543_v55  ;;  %v715_v48 = vld [vmem:[%s18230_s11 + $0xe48] sm:$0xff] }
 0x2b5   : > { %13125 = vmatpush1.bf16.xpose.msra.mxu0 %v15999_v2  ;;  %v679_v2 = vld [vmem:[%s18230_s11 + $0xd28] sm:$0xff] }
 0x2b6   : > { %13126 = vmatprep.subr.bf16.mxu0 %v16008_v35  ;;  %v16057_v35 = vcombine.low %v667_v56, %v671_v57  ;;  %v16066_v5 = vcombine.high %v675_v1, %v679_v2  ;;  %v599_v56 = vld [vmem:[%s18230_s11 + $0xaa8] sm:$0xff] }
 0x2b7   : > { %13289 = vmatpush1.bf16.xpose.msra.mxu1 %v16127_v3  ;;  %v15929_v3 = vcombine.low %v539_v54, %v543_v55  ;;  %v595_v55 = vld [vmem:[%s18230_s11 + $0xa88] sm:$0xff] }
 0x2b8   : > { %13290 = vmatprep.subr.bf16.mxu1 %v16136_v41  ;;  %v15938_v41 = vcombine.high %v547_v63, %v551_v0  ;;  %v723_v57 = vld [vmem:[%s18230_s11 + $0xe88] sm:$0xff] }
 0x2bd   : > { %13127 = vmatpush1.bf16.xpose.msra.mxu0 %v16007_v9  ;;  %v687_v9 = vld [vmem:[%s18230_s11 + $0xd68] sm:$0xff] }
 0x2be   : > { %13128 = vmatprep.subr.bf16.mxu0 %v16016_v11  ;;  %v16065_v11 = vcombine.low %v675_v1, %v679_v2  ;;  %v16074_v14 = vcombine.high %v683_v8, %v687_v9  ;;  %v607_v1 = vld [vmem:[%s18230_s11 + $0xae8] sm:$0xff]  ;;  %v18684_v2 = vsub.s32 0, %v18256_v28 }
 0x2bf   : > { %13291 = vmatpush1.bf16.xpose.msra.mxu1 %v16135_v10  ;;  %v15937_v10 = vcombine.low %v547_v63, %v551_v0  ;;  %v603_v0 = vld [vmem:[%s18230_s11 + $0xac8] sm:$0xff] }
 0x2c0   : > { %13292 = vmatprep.subr.bf16.mxu1 %v16144_v12  ;;  %v15946_v12 = vcombine.high %v555_v6, %v559_v7 }
 0x2c5   : > { %13129 = vmatpush1.bf16.xpose.msra.mxu0 %v16015_v18  ;;  %v695_v18 = vld [vmem:[%s18230_s11 + $0xda8] sm:$0xff] }
 0x2c6   : > { %13130 = vmatprep.subr.bf16.mxu0 %v16024_v20  ;;  %v16073_v20 = vcombine.low %v683_v8, %v687_v9  ;;  %v16082_v22 = vcombine.high %v691_v17, %v695_v18  ;;  %v18696_v9 = vsub.s32 3, %v18256_v28 }
 0x2c7   : > { %13293 = vmatpush1.bf16.xpose.msra.mxu1 %v16143_v19  ;;  %v15945_v19 = vcombine.low %v555_v6, %v559_v7  ;;  %v18690_v6 = vsub.s32 2, %v18256_v28  ;;  %v18693_v7 = vsub.s32 1, %v18256_v28 }
 0x2c8   : > { %13294 = vmatprep.subr.bf16.mxu1 %v16152_v21  ;;  %v15954_v21 = vcombine.high %v563_v15, %v567_v16 }
 0x2cd   : > { %13131 = vmatpush1.bf16.xpose.msra.mxu0 %v16023_v27  ;;  %v703_v27 = vld [vmem:[%s18230_s11 + $0xde8] sm:$0xff] }
 0x2ce   : > { %13141 = vmatprep.subr.bf16.mxu0 %v15906_v30  ;;  %v16081_v30 = vcombine.low %v691_v17, %v695_v18  ;;  %v16090_v32 = vcombine.high %v699_v26, %v703_v27 }
 0x2cf   : > { %13295 = vmatpush1.bf16.xpose.msra.mxu1 %v16151_v29  ;;  %v15953_v29 = vcombine.low %v563_v15, %v567_v16 }
 0x2d0   : > { %13305 = vmatprep.subr.bf16.mxu1 %v16034_v39  ;;  %v15962_v39 = vcombine.high %v571_v24, %v575_v25 }
 0x2d4   : > { %13133 = vmatmul.mubr.bf16.vlgmr.msra.gmra.mrb[4].mxu0 %v18335_v23 }
 0x2d5   : > { %13142 = vmatpush1.bf16.xpose.msra.mxu0 %v15905_v38  ;;  %13173 = vmatprep.mubr.bf16.mxu0 %v18341_v31  ;;  %v711_v38 = vld [vmem:[%s18230_s11 + $0xe28] sm:$0xff] }
 0x2d6   : > { %13297 = vmatmul.mubr.bf16.vlgmr.msra.gmra.mrb[4].mxu1 %v18335_v23  ;;  %13143 = vmatprep.subr.bf16.mxu0 %v15914_v43  ;;  %v16089_v43 = vcombine.low %v699_v26, %v703_v27  ;;  %v16098_v45 = vcombine.high %v707_v37, %v711_v38 }
 0x2d7   : > { %13306 = vmatpush1.bf16.xpose.msra.mxu1 %v16033_v40  ;;  %13337 = vmatprep.mubr.bf16.mxu1 %v18341_v31  ;;  %v15961_v40 = vcombine.low %v571_v24, %v575_v25  ;;  %v615_v24 = vld [vmem:[%s18230_s11 + $0xb28] sm:$0xff] }
 0x2d8   : > { %13307 = vmatprep.subr.bf16.mxu1 %v16042_v44  ;;  %v15970_v44 = vcombine.high %v579_v33, %v583_v34 }
 0x2dd   : > { %13144 = vmatpush1.bf16.xpose.msra.mxu0 %v15913_v49  ;;  %v719_v49 = vld [vmem:[%s18230_s11 + $0xe68] sm:$0xff] }
 0x2de   : > { %13145 = vmatprep.subr.bf16.mxu0 %v15922_v52  ;;  %v16097_v52 = vcombine.low %v707_v37, %v711_v38  ;;  %v16106_v54 = vcombine.high %v715_v48, %v719_v49  ;;  %v15993_v38 = vcombine.low %v603_v0, %v607_v1 }
 0x2df   : > { %13308 = vmatpush1.bf16.xpose.msra.mxu1 %v16041_v51  ;;  %v15969_v51 = vcombine.low %v579_v33, %v583_v34 }
 0x2e0   : > { %13309 = vmatprep.subr.bf16.mxu1 %v16050_v53  ;;  %v15978_v53 = vcombine.high %v587_v36, %v591_v46 }
 0x2e5   : > { %13146 = vmatpush1.bf16.xpose.msra.mxu0 %v15921_v58  ;;  %v727_v58 = vld [vmem:[%s18230_s11 + $0xea8] sm:$0xff] }
 0x2e6   : > { %13147 = vmatprep.subr.bf16.mxu0 %v15930_v60  ;;  %v16105_v60 = vcombine.low %v715_v48, %v719_v49  ;;  %v16114_v63 = vcombine.high %v723_v57, %v727_v58  ;;  %v16113_v8 = vcombine.low %v723_v57, %v727_v58  ;;  %v619_v58 = vld [vmem:[%s18230_s11 + $0xb48] sm:$0xff] }
 0x2e7   : > { %13310 = vmatpush1.bf16.xpose.msra.mxu1 %v16049_v59  ;;  %v15977_v59 = vcombine.low %v587_v36, %v591_v46 }
 0x2e8   : > { %13311 = vmatprep.subr.bf16.mxu1 %v16058_v62  ;;  %v15986_v62 = vcombine.high %v595_v55, %v599_v56 }
 0x2ed   : > { %13148 = vmatpush1.bf16.xpose.msra.mxu0 %v15929_v3  ;;  %v731_v3 = vld [vmem:[%s18230_s11 + $0xec8] sm:$0xff] }
 0x2ee   : > { %13149 = vmatprep.subr.bf16.mxu0 %v15938_v41  ;;  %v15985_v41 = vcombine.low %v595_v55, %v599_v56 }
 0x2ef   : > { %13312 = vmatpush1.bf16.xpose.msra.mxu1 %v16057_v35  ;;  %v735_v35 = vld [vmem:[%s18230_s11 + $0xee8] sm:$0xff] }
 0x2f0   : > { %13313 = vmatprep.subr.bf16.mxu1 %v16066_v5  ;;  %v2306_v5 = vld [vmem:[%s18236_s6] sm:$0xff]  ;;  %v16121_v36 = vcombine.low %v731_v3, %v735_v35 }
 0x2f1   : > { %v12623_v15 = vrot.slane %v2306_v5, %v18690_v6  ;;  %v12619_v16 = vrot.slane %v2306_v5, %v18693_v7  ;;  %v12627_v18 = vrot.slane %v2306_v5, %v18696_v9 }
 0x2f5   : > { %13150 = vmatpush1.bf16.xpose.msra.mxu0 %v15937_v10  ;;  %v15994_v10 = vcombine.high %v603_v0, %v607_v1 }
 0x2f6   : > { %13151 = vmatprep.subr.bf16.mxu0 %v15946_v12  ;;  %v16122_v12 = vcombine.high %v731_v3, %v735_v35 }
 0x2f7   : > { %13314 = vmatpush1.bf16.xpose.msra.mxu1 %v16065_v11  ;;  %v15396_v11 = vld [vmem:[%s20679_s0] sm:$0xff] }
 0x2f8   : > { %13315 = vmatprep.subr.bf16.mxu1 %v16074_v14  ;;  %v12615_v14 = vrot.slane %v2306_v5, %v18684_v2  ;;  %v18705_v17 = vrot.slane %v15396_v11, %v18684_v2  ;;  %v18719_v34 = vrot.slane %v15396_v11, %v18696_v9 }
 0x2fd   : > { %13152 = vmatpush1.bf16.xpose.msra.mxu0 %v15945_v19 }
 0x2fe   : > { %13153 = vmatprep.subr.bf16.mxu0 %v15954_v21  ;;  %v18712_v21 = vrot.slane %v15396_v11, %v18693_v7 }
 0x2ff   : > { %13316 = vmatpush1.bf16.xpose.msra.mxu1 %v16073_v20  ;;  %v18709_v20 = vrot.slane %v15396_v11, %v18690_v6  ;;  %v755_v11 = vld [vmem:[%s18230_s11 + $0xf88] sm:$0xff] }
 0x300   : > { %13317 = vmatprep.subr.bf16.mxu1 %v16082_v22  ;;  %v611_v22 = vld [vmem:[%s18230_s11 + $0xb08] sm:$0xff] }
 0x301   : > { %v16002_v46 = vcombine.high %v611_v22, %v615_v24  ;;  %v16001_v1 = vcombine.low %v611_v22, %v615_v24  ;;  %v639_v22 = vld [vmem:[%s18230_s11 + $0xbe8] sm:$0xff] }
 0x302   : > { %v763_v24 = vld [vmem:[%s18230_s11 + $0xfc8] sm:$0xff] }
 0x305   : > { %13154 = vmatpush1.bf16.xpose.msra.mxu0 %v15953_v29  ;;  %v739_v29 = vld [vmem:[%s18230_s11 + $0xf08] sm:$0xff] }
 0x306   : > { %13155 = vmatprep.subr.bf16.mxu0 %v15962_v39 }
 0x307   : > { %13318 = vmatpush1.bf16.xpose.msra.mxu1 %v16081_v30  ;;  %v743_v30 = vld [vmem:[%s18230_s11 + $0xf28] sm:$0xff] }
 0x308   : > { %13319 = vmatprep.subr.bf16.mxu1 %v16090_v32  ;;  %v16129_v35 = vcombine.low %v739_v29, %v743_v30 }
 0x30d   : > { %13156 = vmatpush1.bf16.xpose.msra.mxu0 %v15961_v40 }
 0x30e   : > { %13157 = vmatprep.subr.bf16.mxu0 %v15970_v44 }
 0x30f   : > { %13320 = vmatpush1.bf16.xpose.msra.mxu1 %v16089_v43 }
 0x310   : > { %13321 = vmatprep.subr.bf16.mxu1 %v16098_v45 }
 0x315   : > { %13158 = vmatpush1.bf16.xpose.msra.mxu0 %v15969_v51 }
 0x316   : > { %13159 = vmatprep.subr.bf16.mxu0 %v15978_v53 }
 0x317   : > { %13322 = vmatpush1.bf16.xpose.msra.mxu1 %v16097_v52  ;;  %v16130_v52 = vcombine.high %v739_v29, %v743_v30 }
 0x318   : > { %13323 = vmatprep.subr.bf16.mxu1 %v16106_v54 }
 0x31d   : > { %13160 = vmatpush1.bf16.xpose.msra.mxu0 %v15977_v59  ;;  %v623_v59 = vld [vmem:[%s18230_s11 + $0xb68] sm:$0xff] }
 0x31e   : > { %13161 = vmatprep.subr.bf16.mxu0 %v15986_v62  ;;  %v747_v62 = vld [vmem:[%s18230_s11 + $0xf48] sm:$0xff] }
 0x31f   : > { %13324 = vmatpush1.bf16.xpose.msra.mxu1 %v16105_v60 }
 0x320   : > { %13325 = vmatprep.subr.bf16.mxu1 %v16114_v63  ;;  %v751_v63 = vld [vmem:[%s18230_s11 + $0xf68] sm:$0xff] }
 0x321   : > { %v16138_v5 = vcombine.high %v747_v62, %v751_v63 }
 0x325   : > { %13162 = vmatpush1.bf16.xpose.msra.mxu0 %v15985_v41  ;;  %v16010_v41 = vcombine.high %v619_v58, %v623_v59 }
 0x326   : > { %13163 = vmatprep.subr.bf16.mxu0 %v15994_v10  ;;  %v631_v10 = vld [vmem:[%s18230_s11 + $0xba8] sm:$0xff] }
 0x327   : > { %13326 = vmatpush1.bf16.xpose.msra.mxu1 %v16113_v8  ;;  %v12929_v19 = vpop.f32.mrb[0].mxu0  ;;  %v627_v8 = vld [vmem:[%s18230_s11 + $0xb88] sm:$0xff] }
 0x328   : > { %13327 = vmatprep.subr.bf16.mxu1 %v16122_v12  ;;  %v17700_v25 = vadd.f32 %v12929_v19, %v12615_v14  ;;  %v12931_v27 = vpop.f32.mrb[1].mxu0  ;;  %v759_v12 = vld [vmem:[%s18230_s11 + $0xfa8] sm:$0xff]  ;;  %v16009_v14 = vcombine.low %v619_v58, %v623_v59 }
 0x329   : > { %v13093_v26 = vpop.f32.mrb[0].mxu1  ;;  %v17701_v32 = vadd.f32 %v12931_v27, %v12619_v16  ;;  %v12933_v37 = vpop.f32.mrb[2].mxu0  ;;  %v16018_v16 = vcombine.high %v627_v8, %v631_v10  ;;  %v635_v19 = vld [vmem:[%s18230_s11 + $0xbc8] sm:$0xff]  ;;  %v16145_v27 = vcombine.low %v755_v11, %v759_v12 }
 0x32a   : > { %v17702_v39 = vadd.f32 %v13093_v26, %v12623_v15  ;;  %v13095_v33 = vpop.f32.mrb[1].mxu1  ;;  %v15439_v40 = vmul.f32 %v17700_v25, %v18705_v17  ;;  %v12934_v45 = vpop.f32.mrb[3].mxu0  ;;  %v16137_v15 = vcombine.low %v747_v62, %v751_v63  ;;  %v767_v25 = vld [vmem:[%s18230_s11 + $0xfe8] sm:$0xff]  ;;  %v16017_v26 = vcombine.low %v627_v8, %v631_v10  ;;  %v648_v37 = vld [vmem:[%s18230_s11 + $0xc30] sm:$0xff] }
 0x32b   : > { %v17703_v43 = vadd.f32 %v13095_v33, %v12627_v18  ;;  %v13097_v44 = vpop.f32.mrb[2].mxu1  ;;  %v15440_v49 = vmul.f32 %v17701_v32, %v18712_v21  ;;  %v16146_v18 = vcombine.high %v755_v11, %v759_v12  ;;  %v16026_v29 = vcombine.high %v635_v19, %v639_v22  ;;  %v520_v32 = vld [vmem:[%s18230_s11 + $0x830] sm:$0xff] }
 0x32c   : > { %v15441_v48 = vmul.f32 %v17702_v39, %v18709_v20  ;;  %v13098_v51 = vpop.f32.mrb[3].mxu1  ;;  %v15448_v53 = vsel %vm15447_vm0, %v15439_v40, 0.0  ;;  %v16154_v30 = vcombine.high %v763_v24, %v767_v25  ;;  %v516_v39 = vld [vmem:[%s18230_s11 + $0x810] sm:$0xff]  ;;  %v16153_v40 = vcombine.low %v763_v24, %v767_v25 }
 0x32d   : > { %v15449_v54 = vsel %vm15447_vm0, %v15440_v49, 0.0  ;;  %v15442_v55 = vmul.f32 %v17703_v43, %v18719_v34  ;;  %13164 = vmatpush1.bf16.xpose.msra.mxu0 %v15993_v38  ;;  %v644_v33 = vld [vmem:[%s18230_s11 + $0xc10] sm:$0xff]  ;;  %v16025_v38 = vcombine.low %v635_v19, %v639_v22  ;;  %v15908_v43 = vcombine.high %v516_v39, %v520_v32 }
 0x32e   : > { %v15450_v56 = vadd.f32 %v15449_v54, %v15448_v53  ;;  %13165 = vmatprep.subr.bf16.mxu0 %v16002_v46  ;;  %v15451_v57 = vsel %vm15447_vm0, %v15441_v48, 0.0  ;;  %v16036_v44 = vcombine.high %v644_v33, %v648_v37  ;;  %v524_v45 = vld [vmem:[%s18230_s11 + $0x850] sm:$0xff]  ;;  %v15907_v49 = vcombine.low %v516_v39, %v520_v32 }
 0x32f   : > { %13328 = vmatpush1.bf16.xpose.msra.mxu1 %v16121_v36  ;;  %v15453_v0 = vsel %vm15447_vm0, %v15442_v55, 0.0  ;;  %v528_v36 = vld [vmem:[%s18230_s11 + $0x870] sm:$0xff]  ;;  %v16035_v51 = vcombine.low %v644_v33, %v648_v37 }
 0x330   : > { %13329 = vmatprep.subr.bf16.mxu1 %v16130_v52  ;;  %v15452_v60 = vadd.f32 %v15451_v57, %v15450_v56  ;;  %v652_v46 = vld [vmem:[%s18230_s11 + $0xc50] sm:$0xff]  ;;  %v15916_v52 = vcombine.high %v524_v45, %v528_v36  ;;  %v15915_v58 = vcombine.low %v524_v45, %v528_v36 }
 0x331   : > { %v656_v48 = vld [vmem:[%s18230_s11 + $0xc70] sm:$0xff] }
 0x332   : > { %v18733_v3 = vadd.f32 %v15453_v0, %v15452_v60  ;;  %v16044_v53 = vcombine.high %v652_v46, %v656_v48  ;;  %v532_v54 = vld [vmem:[%s18230_s11 + $0x890] sm:$0xff]  ;;  %v16043_v59 = vcombine.low %v652_v46, %v656_v48 }
 0x333   : > { %v536_v55 = vld [vmem:[%s18230_s11 + $0x8b0] sm:$0xff] }
 0x334   : > { %v660_v56 = vld [vmem:[%s18230_s11 + $0xc90] sm:$0xff]  ;;  %v15924_v60 = vcombine.high %v532_v54, %v536_v55 }
 0x335   : > { %13166 = vmatpush1.bf16.xpose.msra.mxu0 %v16001_v1  ;;  %v664_v57 = vld [vmem:[%s18230_s11 + $0xcb0] sm:$0xff] }
 0x336   : > { %13167 = vmatprep.subr.bf16.mxu0 %v16010_v41  ;;  %v16052_v62 = vcombine.high %v660_v56, %v664_v57  ;;  %v540_v63 = vld [vmem:[%s18230_s11 + $0x8d0] sm:$0xff]  ;;  %v15923_v41 = vcombine.low %v532_v54, %v536_v55 }
 0x337   : > { %13330 = vmatpush1.bf16.xpose.msra.mxu1 %v16129_v35  ;;  %v544_v0 = vld [vmem:[%s18230_s11 + $0x8f0] sm:$0xff] }
 0x338   : > { %13331 = vmatprep.subr.bf16.mxu1 %v16138_v5  ;;  %v668_v1 = vld [vmem:[%s18230_s11 + $0xcd0] sm:$0xff]  ;;  %v16051_v5 = vcombine.low %v660_v56, %v664_v57  ;;  %v15932_v8 = vcombine.high %v540_v63, %v544_v0 }
 0x339   : > { %v672_v35 = vld [vmem:[%s18230_s11 + $0xcf0] sm:$0xff] }
 0x33a   : > { %v16060_v10 = vcombine.high %v668_v1, %v672_v35  ;;  %v548_v11 = vld [vmem:[%s18230_s11 + $0x910] sm:$0xff] }
 0x33b   : > { %v552_v12 = vld [vmem:[%s18230_s11 + $0x930] sm:$0xff] }
 0x33c   : > { %v15940_v19 = vcombine.high %v548_v11, %v552_v12  ;;  %v556_v24 = vld [vmem:[%s18230_s11 + $0x950] sm:$0xff] }
 0x33d   : > { %13168 = vmatpush1.bf16.xpose.msra.mxu0 %v16009_v14  ;;  %v676_v14 = vld [vmem:[%s18230_s11 + $0xd10] sm:$0xff] }
 0x33e   : > { %13169 = vmatprep.subr.bf16.mxu0 %v16018_v16  ;;  %v15931_v16 = vcombine.low %v540_v63, %v544_v0  ;;  %v560_v25 = vld [vmem:[%s18230_s11 + $0x970] sm:$0xff] }
 0x33f   : > { %13332 = vmatpush1.bf16.xpose.msra.mxu1 %v16137_v15  ;;  %v680_v15 = vld [vmem:[%s18230_s11 + $0xd30] sm:$0xff]  ;;  %v15948_v39 = vcombine.high %v556_v24, %v560_v25 }
 0x340   : > { %13333 = vmatprep.subr.bf16.mxu1 %v16146_v18  ;;  %v16059_v18 = vcombine.low %v668_v1, %v672_v35  ;;  %v16068_v22 = vcombine.high %v676_v14, %v680_v15  ;;  %v564_v33 = vld [vmem:[%s18230_s11 + $0x990] sm:$0xff] }
 0x341   : > { %v568_v37 = vld [vmem:[%s18230_s11 + $0x9b0] sm:$0xff] }
 0x342   : > { %v15956_v45 = vcombine.high %v564_v33, %v568_v37  ;;  %v572_v46 = vld [vmem:[%s18230_s11 + $0x9d0] sm:$0xff] }
 0x343   : > { %v576_v48 = vld [vmem:[%s18230_s11 + $0x9f0] sm:$0xff] }
 0x344   : > { %v15964_v54 = vcombine.high %v572_v46, %v576_v48  ;;  %v580_v56 = vld [vmem:[%s18230_s11 + $0xa10] sm:$0xff] }
 0x345   : > { %13170 = vmatpush1.bf16.xpose.msra.mxu0 %v16017_v26  ;;  %v684_v26 = vld [vmem:[%s18230_s11 + $0xd50] sm:$0xff] }
 0x346   : > { %13171 = vmatprep.subr.bf16.mxu0 %v16026_v29  ;;  %v15939_v29 = vcombine.low %v548_v11, %v552_v12  ;;  %v584_v57 = vld [vmem:[%s18230_s11 + $0xa30] sm:$0xff] }
 0x347   : > { %13334 = vmatpush1.bf16.xpose.msra.mxu1 %v16145_v27  ;;  %v688_v27 = vld [vmem:[%s18230_s11 + $0xd70] sm:$0xff]  ;;  %v15972_v63 = vcombine.high %v580_v56, %v584_v57 }
 0x348   : > { %13335 = vmatprep.subr.bf16.mxu1 %v16154_v30  ;;  %v16067_v30 = vcombine.low %v676_v14, %v680_v15  ;;  %v16076_v32 = vcombine.high %v684_v26, %v688_v27  ;;  %v588_v1 = vld [vmem:[%s18230_s11 + $0xa50] sm:$0xff] }
 0x349   : > { %v592_v35 = vld [vmem:[%s18230_s11 + $0xa70] sm:$0xff] }
 0x34a   : > { %v15980_v11 = vcombine.high %v588_v1, %v592_v35  ;;  %v596_v14 = vld [vmem:[%s18230_s11 + $0xa90] sm:$0xff] }
 0x34b   : > { %v600_v15 = vld [vmem:[%s18230_s11 + $0xab0] sm:$0xff] }
 0x34d   : > { %13172 = vmatpush1.bf16.xpose.msra.mxu0 %v16025_v38  ;;  %v692_v38 = vld [vmem:[%s18230_s11 + $0xd90] sm:$0xff] }
 0x34e   : > { %13182 = vmatprep.subr.bf16.mxu0 %v15908_v43  ;;  %v15947_v43 = vcombine.low %v556_v24, %v560_v25  ;;  %v15988_v24 = vcombine.high %v596_v14, %v600_v15 }
 0x34f   : > { %13336 = vmatpush1.bf16.xpose.msra.mxu1 %v16153_v40  ;;  %v696_v40 = vld [vmem:[%s18230_s11 + $0xdb0] sm:$0xff] }
 0x350   : > { %13346 = vmatprep.subr.bf16.mxu1 %v16036_v44  ;;  %v16075_v44 = vcombine.low %v684_v26, %v688_v27  ;;  %v16084_v36 = vcombine.high %v692_v38, %v696_v40  ;;  %v604_v26 = vld [vmem:[%s18230_s11 + $0xad0] sm:$0xff] }
 0x351   : > { %v608_v27 = vld [vmem:[%s18230_s11 + $0xaf0] sm:$0xff] }
 0x354   : > { %13174 = vmatmul.mubr.bf16.vlgmr.msra.gmra.mrb[4].mxu0 %v18416_v42 }
 0x355   : > { %13183 = vmatpush1.bf16.xpose.msra.mxu0 %v15907_v49  ;;  %13214 = vmatprep.mubr.bf16.mxu0 %v18423_v50  ;;  %v700_v49 = vld [vmem:[%s18230_s11 + $0xdd0] sm:$0xff] }
 0x356   : > { %13338 = vmatmul.mubr.bf16.vlgmr.msra.gmra.mrb[4].mxu1 %v18416_v42  ;;  %13184 = vmatprep.subr.bf16.mxu0 %v15916_v52  ;;  %v15955_v52 = vcombine.low %v564_v33, %v568_v37  ;;  %v15996_v33 = vcombine.high %v604_v26, %v608_v27 }
 0x357   : > { %13347 = vmatpush1.bf16.xpose.msra.mxu1 %v16035_v51  ;;  %13378 = vmatprep.mubr.bf16.mxu1 %v18423_v50  ;;  %v704_v51 = vld [vmem:[%s18230_s11 + $0xdf0] sm:$0xff] }
 0x358   : > { %13348 = vmatprep.subr.bf16.mxu1 %v16044_v53  ;;  %v16083_v53 = vcombine.low %v692_v38, %v696_v40  ;;  %v16092_v55 = vcombine.high %v700_v49, %v704_v51  ;;  %v612_v38 = vld [vmem:[%s18230_s11 + $0xb10] sm:$0xff] }
 0x359   : > { %v616_v40 = vld [vmem:[%s18230_s11 + $0xb30] sm:$0xff] }
 0x35d   : > { %13185 = vmatpush1.bf16.xpose.msra.mxu0 %v15915_v58  ;;  %v708_v58 = vld [vmem:[%s18230_s11 + $0xe10] sm:$0xff] }
 0x35e   : > { %13186 = vmatprep.subr.bf16.mxu0 %v15924_v60  ;;  %v15963_v60 = vcombine.low %v572_v46, %v576_v48  ;;  %v16004_v46 = vcombine.high %v612_v38, %v616_v40 }
 0x35f   : > { %13349 = vmatpush1.bf16.xpose.msra.mxu1 %v16043_v59  ;;  %v712_v59 = vld [vmem:[%s18230_s11 + $0xe30] sm:$0xff] }
 0x360   : > { %13350 = vmatprep.subr.bf16.mxu1 %v16052_v62  ;;  %v16091_v62 = vcombine.low %v700_v49, %v704_v51  ;;  %v16100_v0 = vcombine.high %v708_v58, %v712_v59  ;;  %v620_v49 = vld [vmem:[%s18230_s11 + $0xb50] sm:$0xff] }
 0x361   : > { %v624_v51 = vld [vmem:[%s18230_s11 + $0xb70] sm:$0xff] }
 0x365   : > { %13187 = vmatpush1.bf16.xpose.msra.mxu0 %v15923_v41  ;;  %v716_v41 = vld [vmem:[%s18230_s11 + $0xe50] sm:$0xff] }
 0x366   : > { %13188 = vmatprep.subr.bf16.mxu0 %v15932_v8  ;;  %v15971_v8 = vcombine.low %v580_v56, %v584_v57  ;;  %v16012_v56 = vcombine.high %v620_v49, %v624_v51 }
 0x367   : > { %13351 = vmatpush1.bf16.xpose.msra.mxu1 %v16051_v5  ;;  %v720_v5 = vld [vmem:[%s18230_s11 + $0xe70] sm:$0xff] }
 0x368   : > { %13352 = vmatprep.subr.bf16.mxu1 %v16060_v10  ;;  %v16099_v10 = vcombine.low %v708_v58, %v712_v59  ;;  %v16108_v12 = vcombine.high %v716_v41, %v720_v5  ;;  %v628_v58 = vld [vmem:[%s18230_s11 + $0xb90] sm:$0xff] }
 0x369   : > { %v632_v59 = vld [vmem:[%s18230_s11 + $0xbb0] sm:$0xff] }
 0x36d   : > { %13189 = vmatpush1.bf16.xpose.msra.mxu0 %v15931_v16  ;;  %v724_v16 = vld [vmem:[%s18230_s11 + $0xe90] sm:$0xff] }
 0x36e   : > { %13190 = vmatprep.subr.bf16.mxu0 %v15940_v19  ;;  %v15979_v19 = vcombine.low %v588_v1, %v592_v35  ;;  %v16020_v1 = vcombine.high %v628_v58, %v632_v59 }
 0x36f   : > { %13353 = vmatpush1.bf16.xpose.msra.mxu1 %v16059_v18  ;;  %v728_v18 = vld [vmem:[%s18230_s11 + $0xeb0] sm:$0xff] }
 0x370   : > { %13354 = vmatprep.subr.bf16.mxu1 %v16068_v22  ;;  %v16107_v22 = vcombine.low %v716_v41, %v720_v5  ;;  %v16116_v25 = vcombine.high %v724_v16, %v728_v18  ;;  %v636_v41 = vld [vmem:[%s18230_s11 + $0xbd0] sm:$0xff] }
 0x371   : > { %v640_v5 = vld [vmem:[%s18230_s11 + $0xbf0] sm:$0xff] }
 0x375   : > { %13191 = vmatpush1.bf16.xpose.msra.mxu0 %v15939_v29  ;;  %v732_v29 = vld [vmem:[%s18230_s11 + $0xed0] sm:$0xff] }
 0x376   : > { %13192 = vmatprep.subr.bf16.mxu0 %v15948_v39  ;;  %v15987_v39 = vcombine.low %v596_v14, %v600_v15  ;;  %v16028_v14 = vcombine.high %v636_v41, %v640_v5 }
 0x377   : > { %13355 = vmatpush1.bf16.xpose.msra.mxu1 %v16067_v30  ;;  %v736_v30 = vld [vmem:[%s18230_s11 + $0xef0] sm:$0xff] }
 0x378   : > { %13356 = vmatprep.subr.bf16.mxu1 %v16076_v32  ;;  %v16115_v32 = vcombine.low %v724_v16, %v728_v18  ;;  %v16124_v37 = vcombine.high %v732_v29, %v736_v30  ;;  %v517_v16 = vld [vmem:[%s18230_s11 + $0x818] sm:$0xff] }
 0x379   : > { %v521_v18 = vld [vmem:[%s18230_s11 + $0x838] sm:$0xff] }
 0x37d   : > { %13193 = vmatpush1.bf16.xpose.msra.mxu0 %v15947_v43  ;;  %v740_v43 = vld [vmem:[%s18230_s11 + $0xf10] sm:$0xff] }
 0x37e   : > { %13194 = vmatprep.subr.bf16.mxu0 %v15956_v45  ;;  %v15995_v45 = vcombine.low %v604_v26, %v608_v27  ;;  %v15910_v26 = vcombine.high %v517_v16, %v521_v18 }
 0x37f   : > { %13357 = vmatpush1.bf16.xpose.msra.mxu1 %v16075_v44  ;;  %v744_v44 = vld [vmem:[%s18230_s11 + $0xf30] sm:$0xff] }
 0x380   : > { %13358 = vmatprep.subr.bf16.mxu1 %v16084_v36  ;;  %v16123_v36 = vcombine.low %v732_v29, %v736_v30  ;;  %v16132_v48 = vcombine.high %v740_v43, %v744_v44  ;;  %v525_v29 = vld [vmem:[%s18230_s11 + $0x858] sm:$0xff] }
 0x381   : > { %v529_v30 = vld [vmem:[%s18230_s11 + $0x878] sm:$0xff] }
 0x385   : > { %13195 = vmatpush1.bf16.xpose.msra.mxu0 %v15955_v52  ;;  %v748_v52 = vld [vmem:[%s18230_s11 + $0xf50] sm:$0xff] }
 0x386   : > { %13196 = vmatprep.subr.bf16.mxu0 %v15964_v54  ;;  %v16003_v54 = vcombine.low %v612_v38, %v616_v40  ;;  %v15918_v38 = vcombine.high %v525_v29, %v529_v30 }
 0x387   : > { %13359 = vmatpush1.bf16.xpose.msra.mxu1 %v16083_v53  ;;  %v752_v53 = vld [vmem:[%s18230_s11 + $0xf70] sm:$0xff] }
 0x388   : > { %13360 = vmatprep.subr.bf16.mxu1 %v16092_v55  ;;  %v16131_v55 = vcombine.low %v740_v43, %v744_v44  ;;  %v16140_v57 = vcombine.high %v748_v52, %v752_v53  ;;  %v533_v43 = vld [vmem:[%s18230_s11 + $0x898] sm:$0xff] }
 0x389   : > { %v537_v44 = vld [vmem:[%s18230_s11 + $0x8b8] sm:$0xff] }
 0x38d   : > { %13197 = vmatpush1.bf16.xpose.msra.mxu0 %v15963_v60  ;;  %v756_v60 = vld [vmem:[%s18230_s11 + $0xf90] sm:$0xff] }
 0x38e   : > { %13198 = vmatprep.subr.bf16.mxu0 %v15972_v63  ;;  %v16011_v63 = vcombine.low %v620_v49, %v624_v51  ;;  %v15926_v49 = vcombine.high %v533_v43, %v537_v44 }
 0x38f   : > { %13361 = vmatpush1.bf16.xpose.msra.mxu1 %v16091_v62  ;;  %v760_v62 = vld [vmem:[%s18230_s11 + $0xfb0] sm:$0xff] }
 0x390   : > { %13362 = vmatprep.subr.bf16.mxu1 %v16100_v0  ;;  %v16139_v0 = vcombine.low %v748_v52, %v752_v53  ;;  %v16148_v35 = vcombine.high %v756_v60, %v760_v62  ;;  %v541_v52 = vld [vmem:[%s18230_s11 + $0x8d8] sm:$0xff] }
 0x391   : > { %v545_v53 = vld [vmem:[%s18230_s11 + $0x8f8] sm:$0xff] }
 0x395   : > { %13199 = vmatpush1.bf16.xpose.msra.mxu0 %v15971_v8  ;;  %v764_v8 = vld [vmem:[%s18230_s11 + $0xfd0] sm:$0xff] }
 0x396   : > { %13200 = vmatprep.subr.bf16.mxu0 %v15980_v11  ;;  %v16019_v11 = vcombine.low %v628_v58, %v632_v59  ;;  %v15934_v58 = vcombine.high %v541_v52, %v545_v53 }
 0x397   : > { %13363 = vmatpush1.bf16.xpose.msra.mxu1 %v16099_v10  ;;  %v768_v10 = vld [vmem:[%s18230_s11 + $0xff0] sm:$0xff] }
 0x398   : > { %13364 = vmatprep.subr.bf16.mxu1 %v16108_v12  ;;  %v16147_v12 = vcombine.low %v756_v60, %v760_v62  ;;  %v16156_v15 = vcombine.high %v764_v8, %v768_v10  ;;  %v549_v60 = vld [vmem:[%s18230_s11 + $0x918] sm:$0xff] }
 0x399   : > { %v553_v62 = vld [vmem:[%s18230_s11 + $0x938] sm:$0xff] }
 0x39d   : > { %13201 = vmatpush1.bf16.xpose.msra.mxu0 %v15979_v19  ;;  %v645_v19 = vld [vmem:[%s18230_s11 + $0xc18] sm:$0xff] }
 0x39e   : > { %13202 = vmatprep.subr.bf16.mxu0 %v15988_v24  ;;  %v16027_v24 = vcombine.low %v636_v41, %v640_v5  ;;  %v15942_v41 = vcombine.high %v549_v60, %v553_v62 }
 0x39f   : > { %13365 = vmatpush1.bf16.xpose.msra.mxu1 %v16107_v22  ;;  %v649_v22 = vld [vmem:[%s18230_s11 + $0xc38] sm:$0xff] }
 0x3a0   : > { %13366 = vmatprep.subr.bf16.mxu1 %v16116_v25  ;;  %v16155_v25 = vcombine.low %v764_v8, %v768_v10  ;;  %v16038_v27 = vcombine.high %v645_v19, %v649_v22  ;;  %v557_v8 = vld [vmem:[%s18230_s11 + $0x958] sm:$0xff] }
 0x3a1   : > { %v561_v10 = vld [vmem:[%s18230_s11 + $0x978] sm:$0xff] }
 0x3a5   : > { %13203 = vmatpush1.bf16.xpose.msra.mxu0 %v15987_v39  ;;  %v653_v39 = vld [vmem:[%s18230_s11 + $0xc58] sm:$0xff] }
 0x3a6   : > { %13204 = vmatprep.subr.bf16.mxu0 %v15996_v33  ;;  %v15909_v33 = vcombine.low %v517_v16, %v521_v18  ;;  %v15950_v16 = vcombine.high %v557_v8, %v561_v10 }
 0x3a7   : > { %13367 = vmatpush1.bf16.xpose.msra.mxu1 %v16115_v32  ;;  %v657_v32 = vld [vmem:[%s18230_s11 + $0xc78] sm:$0xff] }
 0x3a8   : > { %13368 = vmatprep.subr.bf16.mxu1 %v16124_v37  ;;  %v16037_v37 = vcombine.low %v645_v19, %v649_v22  ;;  %v16046_v40 = vcombine.high %v653_v39, %v657_v32  ;;  %v565_v19 = vld [vmem:[%s18230_s11 + $0x998] sm:$0xff] }
 0x3a9   : > { %v569_v22 = vld [vmem:[%s18230_s11 + $0x9b8] sm:$0xff] }
 0x3ad   : > { %13205 = vmatpush1.bf16.xpose.msra.mxu0 %v15995_v45  ;;  %v661_v45 = vld [vmem:[%s18230_s11 + $0xc98] sm:$0xff] }
 0x3ae   : > { %13206 = vmatprep.subr.bf16.mxu0 %v16004_v46  ;;  %v15917_v46 = vcombine.low %v525_v29, %v529_v30  ;;  %v15958_v29 = vcombine.high %v565_v19, %v569_v22 }
 0x3af   : > { %13369 = vmatpush1.bf16.xpose.msra.mxu1 %v16123_v36  ;;  %v665_v36 = vld [vmem:[%s18230_s11 + $0xcb8] sm:$0xff] }
 0x3b0   : > { %13370 = vmatprep.subr.bf16.mxu1 %v16132_v48  ;;  %v16045_v48 = vcombine.low %v653_v39, %v657_v32  ;;  %v16054_v51 = vcombine.high %v661_v45, %v665_v36  ;;  %v573_v39 = vld [vmem:[%s18230_s11 + $0x9d8] sm:$0xff] }
 0x3b1   : > { %v577_v32 = vld [vmem:[%s18230_s11 + $0x9f8] sm:$0xff] }
 0x3b5   : > { %13207 = vmatpush1.bf16.xpose.msra.mxu0 %v16003_v54  ;;  %v669_v54 = vld [vmem:[%s18230_s11 + $0xcd8] sm:$0xff] }
 0x3b6   : > { %13208 = vmatprep.subr.bf16.mxu0 %v16012_v56  ;;  %v15925_v56 = vcombine.low %v533_v43, %v537_v44  ;;  %v15966_v43 = vcombine.high %v573_v39, %v577_v32 }
 0x3b7   : > { %13371 = vmatpush1.bf16.xpose.msra.mxu1 %v16131_v55  ;;  %v673_v55 = vld [vmem:[%s18230_s11 + $0xcf8] sm:$0xff] }
 0x3b8   : > { %13372 = vmatprep.subr.bf16.mxu1 %v16140_v57  ;;  %v16053_v57 = vcombine.low %v661_v45, %v665_v36  ;;  %v16062_v59 = vcombine.high %v669_v54, %v673_v55  ;;  %v581_v45 = vld [vmem:[%s18230_s11 + $0xa18] sm:$0xff] }
 0x3b9   : > { %v585_v36 = vld [vmem:[%s18230_s11 + $0xa38] sm:$0xff] }
 0x3bd   : > { %13209 = vmatpush1.bf16.xpose.msra.mxu0 %v16011_v63  ;;  %v677_v63 = vld [vmem:[%s18230_s11 + $0xd18] sm:$0xff] }
 0x3be   : > { %13210 = vmatprep.subr.bf16.mxu0 %v16020_v1  ;;  %v15933_v1 = vcombine.low %v541_v52, %v545_v53  ;;  %v15974_v52 = vcombine.high %v581_v45, %v585_v36 }
 0x3bf   : > { %13373 = vmatpush1.bf16.xpose.msra.mxu1 %v16139_v0  ;;  %v681_v0 = vld [vmem:[%s18230_s11 + $0xd38] sm:$0xff] }
 0x3c0   : > { %13374 = vmatprep.subr.bf16.mxu1 %v16148_v35  ;;  %v16061_v35 = vcombine.low %v669_v54, %v673_v55  ;;  %v16070_v5 = vcombine.high %v677_v63, %v681_v0  ;;  %v589_v54 = vld [vmem:[%s18230_s11 + $0xa58] sm:$0xff] }
 0x3c1   : > { %v593_v55 = vld [vmem:[%s18230_s11 + $0xa78] sm:$0xff] }
 0x3c5   : > { %13211 = vmatpush1.bf16.xpose.msra.mxu0 %v16019_v11  ;;  %v685_v11 = vld [vmem:[%s18230_s11 + $0xd58] sm:$0xff] }
 0x3c6   : > { %13212 = vmatprep.subr.bf16.mxu0 %v16028_v14  ;;  %v15941_v14 = vcombine.low %v549_v60, %v553_v62  ;;  %v15982_v60 = vcombine.high %v589_v54, %v593_v55 }
 0x3c7   : > { %13375 = vmatpush1.bf16.xpose.msra.mxu1 %v16147_v12  ;;  %v689_v12 = vld [vmem:[%s18230_s11 + $0xd78] sm:$0xff] }
 0x3c8   : > { %13376 = vmatprep.subr.bf16.mxu1 %v16156_v15  ;;  %v16069_v15 = vcombine.low %v677_v63, %v681_v0  ;;  %v16078_v18 = vcombine.high %v685_v11, %v689_v12  ;;  %v597_v63 = vld [vmem:[%s18230_s11 + $0xa98] sm:$0xff] }
 0x3c9   : > { %v601_v0 = vld [vmem:[%s18230_s11 + $0xab8] sm:$0xff] }
 0x3cd   : > { %13213 = vmatpush1.bf16.xpose.msra.mxu0 %v16027_v24  ;;  %v693_v24 = vld [vmem:[%s18230_s11 + $0xd98] sm:$0xff] }
 0x3ce   : > { %13223 = vmatprep.subr.bf16.mxu0 %v15910_v26  ;;  %v15949_v26 = vcombine.low %v557_v8, %v561_v10  ;;  %v15990_v8 = vcombine.high %v597_v63, %v601_v0 }
 0x3cf   : > { %13377 = vmatpush1.bf16.xpose.msra.mxu1 %v16155_v25  ;;  %v697_v25 = vld [vmem:[%s18230_s11 + $0xdb8] sm:$0xff] }
 0x3d0   : > { %13387 = vmatprep.subr.bf16.mxu1 %v16038_v27  ;;  %v16077_v27 = vcombine.low %v685_v11, %v689_v12  ;;  %v16086_v30 = vcombine.high %v693_v24, %v697_v25  ;;  %v605_v11 = vld [vmem:[%s18230_s11 + $0xad8] sm:$0xff] }
 0x3d1   : > { %v609_v12 = vld [vmem:[%s18230_s11 + $0xaf8] sm:$0xff] }
 0x3d4   : > { %13215 = vmatmul.mubr.bf16.vlgmr.msra.gmra.mrb[4].mxu0 %v18493_v61 }
 0x3d5   : > { %13224 = vmatpush1.bf16.xpose.msra.mxu0 %v15909_v33  ;;  %13255 = vmatprep.mubr.bf16.mxu0 %v18499_v4  ;;  %v701_v33 = vld [vmem:[%s18230_s11 + $0xdd8] sm:$0xff] }
 0x3d6   : > { %13379 = vmatmul.mubr.bf16.vlgmr.msra.gmra.mrb[4].mxu1 %v18493_v61  ;;  %13225 = vmatprep.subr.bf16.mxu0 %v15918_v38  ;;  %v15957_v38 = vcombine.low %v565_v19, %v569_v22  ;;  %v15998_v19 = vcombine.high %v605_v11, %v609_v12 }
 0x3d7   : > { %13388 = vmatpush1.bf16.xpose.msra.mxu1 %v16037_v37  ;;  %13419 = vmatprep.mubr.bf16.mxu1 %v18499_v4  ;;  %v705_v37 = vld [vmem:[%s18230_s11 + $0xdf8] sm:$0xff] }
 0x3d8   : > { %13389 = vmatprep.subr.bf16.mxu1 %v16046_v40  ;;  %v16085_v40 = vcombine.low %v693_v24, %v697_v25  ;;  %v16094_v44 = vcombine.high %v701_v33, %v705_v37  ;;  %v613_v24 = vld [vmem:[%s18230_s11 + $0xb18] sm:$0xff] }
 0x3d9   : > { %v617_v25 = vld [vmem:[%s18230_s11 + $0xb38] sm:$0xff] }
 0x3dd   : > { %13226 = vmatpush1.bf16.xpose.msra.mxu0 %v15917_v46  ;;  %v709_v46 = vld [vmem:[%s18230_s11 + $0xe18] sm:$0xff] }
 0x3de   : > { %13227 = vmatprep.subr.bf16.mxu0 %v15926_v49  ;;  %v15965_v49 = vcombine.low %v573_v39, %v577_v32  ;;  %v16006_v39 = vcombine.high %v613_v24, %v617_v25 }
 0x3df   : > { %13390 = vmatpush1.bf16.xpose.msra.mxu1 %v16045_v48  ;;  %v713_v48 = vld [vmem:[%s18230_s11 + $0xe38] sm:$0xff] }
 0x3e0   : > { %13391 = vmatprep.subr.bf16.mxu1 %v16054_v51  ;;  %v16093_v51 = vcombine.low %v701_v33, %v705_v37  ;;  %v16102_v53 = vcombine.high %v709_v46, %v713_v48  ;;  %v621_v33 = vld [vmem:[%s18230_s11 + $0xb58] sm:$0xff] }
 0x3e1   : > { %v625_v37 = vld [vmem:[%s18230_s11 + $0xb78] sm:$0xff] }
 0x3e5   : > { %13228 = vmatpush1.bf16.xpose.msra.mxu0 %v15925_v56  ;;  %v717_v56 = vld [vmem:[%s18230_s11 + $0xe58] sm:$0xff] }
 0x3e6   : > { %13229 = vmatprep.subr.bf16.mxu0 %v15934_v58  ;;  %v15973_v58 = vcombine.low %v581_v45, %v585_v36  ;;  %v16014_v45 = vcombine.high %v621_v33, %v625_v37 }
 0x3e7   : > { %13392 = vmatpush1.bf16.xpose.msra.mxu1 %v16053_v57  ;;  %v721_v57 = vld [vmem:[%s18230_s11 + $0xe78] sm:$0xff] }
 0x3e8   : > { %13393 = vmatprep.subr.bf16.mxu1 %v16062_v59  ;;  %v16101_v59 = vcombine.low %v709_v46, %v713_v48  ;;  %v16110_v62 = vcombine.high %v717_v56, %v721_v57  ;;  %v629_v46 = vld [vmem:[%s18230_s11 + $0xb98] sm:$0xff] }
 0x3e9   : > { %v633_v48 = vld [vmem:[%s18230_s11 + $0xbb8] sm:$0xff] }
 0x3ed   : > { %13230 = vmatpush1.bf16.xpose.msra.mxu0 %v15933_v1  ;;  %v725_v1 = vld [vmem:[%s18230_s11 + $0xe98] sm:$0xff] }
 0x3ee   : > { %13231 = vmatprep.subr.bf16.mxu0 %v15942_v41  ;;  %v15981_v41 = vcombine.low %v589_v54, %v593_v55  ;;  %v16022_v54 = vcombine.high %v629_v46, %v633_v48 }
 0x3ef   : > { %13394 = vmatpush1.bf16.xpose.msra.mxu1 %v16061_v35  ;;  %v729_v35 = vld [vmem:[%s18230_s11 + $0xeb8] sm:$0xff] }
 0x3f0   : > { %13395 = vmatprep.subr.bf16.mxu1 %v16070_v5  ;;  %v16109_v5 = vcombine.low %v717_v56, %v721_v57  ;;  %v16118_v10 = vcombine.high %v725_v1, %v729_v35  ;;  %v637_v56 = vld [vmem:[%s18230_s11 + $0xbd8] sm:$0xff] }
 0x3f1   : > { %v641_v57 = vld [vmem:[%s18230_s11 + $0xbf8] sm:$0xff] }
 0x3f5   : > { %13232 = vmatpush1.bf16.xpose.msra.mxu0 %v15941_v14  ;;  %v733_v14 = vld [vmem:[%s18230_s11 + $0xed8] sm:$0xff] }
 0x3f6   : > { %13233 = vmatprep.subr.bf16.mxu0 %v15950_v16  ;;  %v15989_v16 = vcombine.low %v597_v63, %v601_v0  ;;  %v16030_v63 = vcombine.high %v637_v56, %v641_v57 }
 0x3f7   : > { %13396 = vmatpush1.bf16.xpose.msra.mxu1 %v16069_v15  ;;  %v737_v15 = vld [vmem:[%s18230_s11 + $0xef8] sm:$0xff] }
 0x3f8   : > { %13397 = vmatprep.subr.bf16.mxu1 %v16078_v18  ;;  %v16117_v18 = vcombine.low %v725_v1, %v729_v35  ;;  %v16126_v22 = vcombine.high %v733_v14, %v737_v15  ;;  %v770_v1 = vld [vmem:[%s18230_s11 + $0x1000] sm:$0xff] }
 0x3f9   : > { %v774_v35 = vld [vmem:[%s18230_s11 + $0x1020] sm:$0xff] }
 0x3fd   : > { %13234 = vmatpush1.bf16.xpose.msra.mxu0 %v15949_v26  ;;  %v741_v26 = vld [vmem:[%s18230_s11 + $0xf18] sm:$0xff] }
 0x3fe   : > { %13235 = vmatprep.subr.bf16.mxu0 %v15958_v29  ;;  %v15997_v29 = vcombine.low %v605_v11, %v609_v12  ;;  %v16160_v11 = vcombine.high %v770_v1, %v774_v35 }
 0x3ff   : > { %13398 = vmatpush1.bf16.xpose.msra.mxu1 %v16077_v27  ;;  %v745_v27 = vld [vmem:[%s18230_s11 + $0xf38] sm:$0xff] }
 0x400   : > { %13399 = vmatprep.subr.bf16.mxu1 %v16086_v30  ;;  %v16125_v30 = vcombine.low %v733_v14, %v737_v15  ;;  %v16134_v32 = vcombine.high %v741_v26, %v745_v27  ;;  %v778_v14 = vld [vmem:[%s18230_s11 + $0x1040] sm:$0xff] }
 0x401   : > { %v782_v15 = vld [vmem:[%s18230_s11 + $0x1060] sm:$0xff] }
 0x405   : > { %13236 = vmatpush1.bf16.xpose.msra.mxu0 %v15957_v38  ;;  %v749_v38 = vld [vmem:[%s18230_s11 + $0xf58] sm:$0xff] }
 0x406   : > { %13237 = vmatprep.subr.bf16.mxu0 %v15966_v43  ;;  %v16005_v43 = vcombine.low %v613_v24, %v617_v25  ;;  %v16168_v24 = vcombine.high %v778_v14, %v782_v15 }
 0x407   : > { %13400 = vmatpush1.bf16.xpose.msra.mxu1 %v16085_v40  ;;  %v753_v40 = vld [vmem:[%s18230_s11 + $0xf78] sm:$0xff] }
 0x408   : > { %13401 = vmatprep.subr.bf16.mxu1 %v16094_v44  ;;  %v16133_v44 = vcombine.low %v741_v26, %v745_v27  ;;  %v16142_v36 = vcombine.high %v749_v38, %v753_v40  ;;  %v786_v26 = vld [vmem:[%s18230_s11 + $0x1080] sm:$0xff] }
 0x409   : > { %v790_v27 = vld [vmem:[%s18230_s11 + $0x10a0] sm:$0xff] }
 0x40d   : > { %13238 = vmatpush1.bf16.xpose.msra.mxu0 %v15965_v49  ;;  %v757_v49 = vld [vmem:[%s18230_s11 + $0xf98] sm:$0xff] }
 0x40e   : > { %13239 = vmatprep.subr.bf16.mxu0 %v15974_v52  ;;  %v16013_v52 = vcombine.low %v621_v33, %v625_v37  ;;  %v16176_v33 = vcombine.high %v786_v26, %v790_v27 }
 0x40f   : > { %13402 = vmatpush1.bf16.xpose.msra.mxu1 %v16093_v51  ;;  %v761_v51 = vld [vmem:[%s18230_s11 + $0xfb8] sm:$0xff] }
 0x410   : > { %13403 = vmatprep.subr.bf16.mxu1 %v16102_v53  ;;  %v16141_v53 = vcombine.low %v749_v38, %v753_v40  ;;  %v16150_v55 = vcombine.high %v757_v49, %v761_v51  ;;  %v794_v38 = vld [vmem:[%s18230_s11 + $0x10c0] sm:$0xff] }
 0x411   : > { %v798_v40 = vld [vmem:[%s18230_s11 + $0x10e0] sm:$0xff] }
 0x415   : > { %13240 = vmatpush1.bf16.xpose.msra.mxu0 %v15973_v58  ;;  %v765_v58 = vld [vmem:[%s18230_s11 + $0xfd8] sm:$0xff] }
 0x416   : > { %13241 = vmatprep.subr.bf16.mxu0 %v15982_v60  ;;  %v16021_v60 = vcombine.low %v629_v46, %v633_v48  ;;  %v16184_v46 = vcombine.high %v794_v38, %v798_v40 }
 0x417   : > { %13404 = vmatpush1.bf16.xpose.msra.mxu1 %v16101_v59  ;;  %v769_v59 = vld [vmem:[%s18230_s11 + $0xff8] sm:$0xff] }
 0x418   : > { %13405 = vmatprep.subr.bf16.mxu1 %v16110_v62  ;;  %v16149_v62 = vcombine.low %v757_v49, %v761_v51  ;;  %v16158_v0 = vcombine.high %v765_v58, %v769_v59  ;;  %v802_v49 = vld [vmem:[%s18230_s11 + $0x1100] sm:$0xff] }
 0x419   : > { %v806_v51 = vld [vmem:[%s18230_s11 + $0x1120] sm:$0xff] }
 0x41d   : > { %13242 = vmatpush1.bf16.xpose.msra.mxu0 %v15981_v41  ;;  %v898_v41 = vld [vmem:[%s18230_s11 + $0x1400] sm:$0xff] }
 0x41e   : > { %13243 = vmatprep.subr.bf16.mxu0 %v15990_v8  ;;  %v16029_v8 = vcombine.low %v637_v56, %v641_v57  ;;  %v16192_v56 = vcombine.high %v802_v49, %v806_v51 }
 0x41f   : > { %13406 = vmatpush1.bf16.xpose.msra.mxu1 %v16109_v5  ;;  %v902_v5 = vld [vmem:[%s18230_s11 + $0x1420] sm:$0xff] }
 0x420   : > { %13407 = vmatprep.subr.bf16.mxu1 %v16118_v10  ;;  %v16157_v10 = vcombine.low %v765_v58, %v769_v59  ;;  %v16288_v12 = vcombine.high %v898_v41, %v902_v5  ;;  %v810_v58 = vld [vmem:[%s18230_s11 + $0x1140] sm:$0xff] }
 0x421   : > { %v814_v59 = vld [vmem:[%s18230_s11 + $0x1160] sm:$0xff] }
 0x425   : > { %13244 = vmatpush1.bf16.xpose.msra.mxu0 %v15989_v16  ;;  %v906_v16 = vld [vmem:[%s18230_s11 + $0x1440] sm:$0xff] }
 0x426   : > { %13245 = vmatprep.subr.bf16.mxu0 %v15998_v19  ;;  %v16159_v19 = vcombine.low %v770_v1, %v774_v35  ;;  %v16200_v1 = vcombine.high %v810_v58, %v814_v59 }
 0x427   : > { %13408 = vmatpush1.bf16.xpose.msra.mxu1 %v16117_v18  ;;  %v910_v18 = vld [vmem:[%s18230_s11 + $0x1460] sm:$0xff] }
 0x428   : > { %13409 = vmatprep.subr.bf16.mxu1 %v16126_v22  ;;  %v16287_v22 = vcombine.low %v898_v41, %v902_v5  ;;  %v16296_v25 = vcombine.high %v906_v16, %v910_v18  ;;  %v818_v41 = vld [vmem:[%s18230_s11 + $0x1180] sm:$0xff] }
 0x429   : > { %v822_v5 = vld [vmem:[%s18230_s11 + $0x11a0] sm:$0xff] }
 0x42d   : > { %13246 = vmatpush1.bf16.xpose.msra.mxu0 %v15997_v29  ;;  %v914_v29 = vld [vmem:[%s18230_s11 + $0x1480] sm:$0xff] }
 0x42e   : > { %13247 = vmatprep.subr.bf16.mxu0 %v16006_v39  ;;  %v16167_v39 = vcombine.low %v778_v14, %v782_v15  ;;  %v16208_v14 = vcombine.high %v818_v41, %v822_v5 }
 0x42f   : > { %13410 = vmatpush1.bf16.xpose.msra.mxu1 %v16125_v30  ;;  %v918_v30 = vld [vmem:[%s18230_s11 + $0x14a0] sm:$0xff] }
 0x430   : > { %13411 = vmatprep.subr.bf16.mxu1 %v16134_v32  ;;  %v16295_v32 = vcombine.low %v906_v16, %v910_v18  ;;  %v16304_v37 = vcombine.high %v914_v29, %v918_v30  ;;  %v826_v16 = vld [vmem:[%s18230_s11 + $0x11c0] sm:$0xff] }
 0x431   : > { %v830_v18 = vld [vmem:[%s18230_s11 + $0x11e0] sm:$0xff] }
 0x435   : > { %13248 = vmatpush1.bf16.xpose.msra.mxu0 %v16005_v43  ;;  %v922_v43 = vld [vmem:[%s18230_s11 + $0x14c0] sm:$0xff] }
 0x436   : > { %13249 = vmatprep.subr.bf16.mxu0 %v16014_v45  ;;  %v16175_v45 = vcombine.low %v786_v26, %v790_v27  ;;  %v16216_v26 = vcombine.high %v826_v16, %v830_v18 }
 0x437   : > { %13412 = vmatpush1.bf16.xpose.msra.mxu1 %v16133_v44  ;;  %v926_v44 = vld [vmem:[%s18230_s11 + $0x14e0] sm:$0xff] }
 0x438   : > { %13413 = vmatprep.subr.bf16.mxu1 %v16142_v36  ;;  %v16303_v36 = vcombine.low %v914_v29, %v918_v30  ;;  %v16312_v48 = vcombine.high %v922_v43, %v926_v44  ;;  %v834_v29 = vld [vmem:[%s18230_s11 + $0x1200] sm:$0xff] }
 0x439   : > { %v838_v30 = vld [vmem:[%s18230_s11 + $0x1220] sm:$0xff] }
 0x43d   : > { %13250 = vmatpush1.bf16.xpose.msra.mxu0 %v16013_v52  ;;  %v930_v52 = vld [vmem:[%s18230_s11 + $0x1500] sm:$0xff] }
 0x43e   : > { %13251 = vmatprep.subr.bf16.mxu0 %v16022_v54  ;;  %v16183_v54 = vcombine.low %v794_v38, %v798_v40  ;;  %v16224_v38 = vcombine.high %v834_v29, %v838_v30 }
 0x43f   : > { %13414 = vmatpush1.bf16.xpose.msra.mxu1 %v16141_v53  ;;  %v934_v53 = vld [vmem:[%s18230_s11 + $0x1520] sm:$0xff] }
 0x440   : > { %13415 = vmatprep.subr.bf16.mxu1 %v16150_v55  ;;  %v16311_v55 = vcombine.low %v922_v43, %v926_v44  ;;  %v16320_v57 = vcombine.high %v930_v52, %v934_v53  ;;  %v842_v43 = vld [vmem:[%s18230_s11 + $0x1240] sm:$0xff] }
 0x441   : > { %v846_v44 = vld [vmem:[%s18230_s11 + $0x1260] sm:$0xff] }
 0x445   : > { %13252 = vmatpush1.bf16.xpose.msra.mxu0 %v16021_v60  ;;  %v938_v60 = vld [vmem:[%s18230_s11 + $0x1540] sm:$0xff] }
 0x446   : > { %13253 = vmatprep.subr.bf16.mxu0 %v16030_v63  ;;  %v16191_v63 = vcombine.low %v802_v49, %v806_v51  ;;  %v16232_v49 = vcombine.high %v842_v43, %v846_v44 }
 0x447   : > { %13416 = vmatpush1.bf16.xpose.msra.mxu1 %v16149_v62  ;;  %v942_v62 = vld [vmem:[%s18230_s11 + $0x1560] sm:$0xff] }
 0x448   : > { %13417 = vmatprep.subr.bf16.mxu1 %v16158_v0  ;;  %v16319_v0 = vcombine.low %v930_v52, %v934_v53  ;;  %v16328_v35 = vcombine.high %v938_v60, %v942_v62  ;;  %v850_v52 = vld [vmem:[%s18230_s11 + $0x1280] sm:$0xff] }
 0x449   : > { %v854_v53 = vld [vmem:[%s18230_s11 + $0x12a0] sm:$0xff] }
 0x44d   : > { %13254 = vmatpush1.bf16.xpose.msra.mxu0 %v16029_v8  ;;  %v946_v8 = vld [vmem:[%s18230_s11 + $0x1580] sm:$0xff] }
 0x44e   : > { %13428 = vmatprep.subr.bf16.mxu0 %v16160_v11  ;;  %v16199_v11 = vcombine.low %v810_v58, %v814_v59  ;;  %v16240_v58 = vcombine.high %v850_v52, %v854_v53 }
 0x44f   : > { %13418 = vmatpush1.bf16.xpose.msra.mxu1 %v16157_v10  ;;  %v950_v10 = vld [vmem:[%s18230_s11 + $0x15a0] sm:$0xff] }
 0x450   : > { %13592 = vmatprep.subr.bf16.mxu1 %v16288_v12  ;;  %v16327_v12 = vcombine.low %v938_v60, %v942_v62  ;;  %v16336_v15 = vcombine.high %v946_v8, %v950_v10  ;;  %v858_v60 = vld [vmem:[%s18230_s11 + $0x12c0] sm:$0xff] }
 0x451   : > { %v862_v62 = vld [vmem:[%s18230_s11 + $0x12e0] sm:$0xff] }
 0x454   : > { %13256 = vmatmul.mubr.bf16.vlgmr.msra.gmra.mrb[4].mxu0 %v18569_v13 }
 0x455   : > { %13429 = vmatpush1.bf16.xpose.msra.mxu0 %v16159_v19  ;;  %13460 = vmatprep.mubr.bf16.mxu0 %v18279_v47  ;;  %v954_v19 = vld [vmem:[%s18230_s11 + $0x15c0] sm:$0xff] }
 0x456   : > { %13420 = vmatmul.mubr.bf16.vlgmr.msra.gmra.mrb[4].mxu1 %v18569_v13  ;;  %13430 = vmatprep.subr.bf16.mxu0 %v16168_v24  ;;  %v16207_v24 = vcombine.low %v818_v41, %v822_v5  ;;  %v16248_v41 = vcombine.high %v858_v60, %v862_v62 }
 0x457   : > { %13593 = vmatpush1.bf16.xpose.msra.mxu1 %v16287_v22  ;;  %13624 = vmatprep.mubr.bf16.mxu1 %v18279_v47  ;;  %v958_v22 = vld [vmem:[%s18230_s11 + $0x15e0] sm:$0xff] }
 0x458   : > { %13594 = vmatprep.subr.bf16.mxu1 %v16296_v25  ;;  %v16335_v25 = vcombine.low %v946_v8, %v950_v10  ;;  %v16344_v27 = vcombine.high %v954_v19, %v958_v22  ;;  %v866_v8 = vld [vmem:[%s18230_s11 + $0x1300] sm:$0xff] }
 0x459   : > { %v870_v10 = vld [vmem:[%s18230_s11 + $0x1320] sm:$0xff] }
 0x45d   : > { %13431 = vmatpush1.bf16.xpose.msra.mxu0 %v16167_v39  ;;  %v962_v39 = vld [vmem:[%s18230_s11 + $0x1600] sm:$0xff] }
 0x45e   : > { %13432 = vmatprep.subr.bf16.mxu0 %v16176_v33  ;;  %v16215_v33 = vcombine.low %v826_v16, %v830_v18  ;;  %v16256_v16 = vcombine.high %v866_v8, %v870_v10 }
 0x45f   : > { %13595 = vmatpush1.bf16.xpose.msra.mxu1 %v16295_v32  ;;  %v966_v32 = vld [vmem:[%s18230_s11 + $0x1620] sm:$0xff] }
 0x460   : > { %13596 = vmatprep.subr.bf16.mxu1 %v16304_v37  ;;  %v16343_v37 = vcombine.low %v954_v19, %v958_v22  ;;  %v16352_v40 = vcombine.high %v962_v39, %v966_v32  ;;  %v874_v19 = vld [vmem:[%s18230_s11 + $0x1340] sm:$0xff] }
 0x461   : > { %v878_v22 = vld [vmem:[%s18230_s11 + $0x1360] sm:$0xff] }
 0x465   : > { %13433 = vmatpush1.bf16.xpose.msra.mxu0 %v16175_v45  ;;  %v970_v45 = vld [vmem:[%s18230_s11 + $0x1640] sm:$0xff] }
 0x466   : > { %13434 = vmatprep.subr.bf16.mxu0 %v16184_v46  ;;  %v16223_v46 = vcombine.low %v834_v29, %v838_v30  ;;  %v16264_v29 = vcombine.high %v874_v19, %v878_v22 }
 0x467   : > { %13597 = vmatpush1.bf16.xpose.msra.mxu1 %v16303_v36  ;;  %v974_v36 = vld [vmem:[%s18230_s11 + $0x1660] sm:$0xff] }
 0x468   : > { %13598 = vmatprep.subr.bf16.mxu1 %v16312_v48  ;;  %v16351_v48 = vcombine.low %v962_v39, %v966_v32  ;;  %v16360_v51 = vcombine.high %v970_v45, %v974_v36  ;;  %v882_v39 = vld [vmem:[%s18230_s11 + $0x1380] sm:$0xff] }
 0x469   : > { %v886_v32 = vld [vmem:[%s18230_s11 + $0x13a0] sm:$0xff] }
 0x46d   : > { %13435 = vmatpush1.bf16.xpose.msra.mxu0 %v16183_v54  ;;  %v978_v54 = vld [vmem:[%s18230_s11 + $0x1680] sm:$0xff] }
 0x46e   : > { %13436 = vmatprep.subr.bf16.mxu0 %v16192_v56  ;;  %v16231_v56 = vcombine.low %v842_v43, %v846_v44  ;;  %v16272_v43 = vcombine.high %v882_v39, %v886_v32 }
 0x46f   : > { %13599 = vmatpush1.bf16.xpose.msra.mxu1 %v16311_v55  ;;  %v982_v55 = vld [vmem:[%s18230_s11 + $0x16a0] sm:$0xff] }
 0x470   : > { %13600 = vmatprep.subr.bf16.mxu1 %v16320_v57  ;;  %v16359_v57 = vcombine.low %v970_v45, %v974_v36  ;;  %v16368_v59 = vcombine.high %v978_v54, %v982_v55  ;;  %v890_v45 = vld [vmem:[%s18230_s11 + $0x13c0] sm:$0xff] }
 0x471   : > { %v894_v36 = vld [vmem:[%s18230_s11 + $0x13e0] sm:$0xff] }
 0x475   : > { %13437 = vmatpush1.bf16.xpose.msra.mxu0 %v16191_v63  ;;  %v986_v63 = vld [vmem:[%s18230_s11 + $0x16c0] sm:$0xff] }
 0x476   : > { %13438 = vmatprep.subr.bf16.mxu0 %v16200_v1  ;;  %v16239_v1 = vcombine.low %v850_v52, %v854_v53  ;;  %v16280_v52 = vcombine.high %v890_v45, %v894_v36 }
 0x477   : > { %13601 = vmatpush1.bf16.xpose.msra.mxu1 %v16319_v0  ;;  %v990_v0 = vld [vmem:[%s18230_s11 + $0x16e0] sm:$0xff] }
 0x478   : > { %13602 = vmatprep.subr.bf16.mxu1 %v16328_v35  ;;  %v16367_v35 = vcombine.low %v978_v54, %v982_v55  ;;  %v16376_v5 = vcombine.high %v986_v63, %v990_v0  ;;  %v771_v54 = vld [vmem:[%s18230_s11 + $0x1008] sm:$0xff] }
 0x479   : > { %v775_v55 = vld [vmem:[%s18230_s11 + $0x1028] sm:$0xff] }
 0x47d   : > { %13439 = vmatpush1.bf16.xpose.msra.mxu0 %v16199_v11  ;;  %v994_v11 = vld [vmem:[%s18230_s11 + $0x1700] sm:$0xff] }
 0x47e   : > { %13440 = vmatprep.subr.bf16.mxu0 %v16208_v14  ;;  %v16247_v14 = vcombine.low %v858_v60, %v862_v62  ;;  %v16162_v60 = vcombine.high %v771_v54, %v775_v55 }
 0x47f   : > { %13603 = vmatpush1.bf16.xpose.msra.mxu1 %v16327_v12  ;;  %v998_v12 = vld [vmem:[%s18230_s11 + $0x1720] sm:$0xff] }
 0x480   : > { %13604 = vmatprep.subr.bf16.mxu1 %v16336_v15  ;;  %v16375_v15 = vcombine.low %v986_v63, %v990_v0  ;;  %v16384_v18 = vcombine.high %v994_v11, %v998_v12  ;;  %v779_v63 = vld [vmem:[%s18230_s11 + $0x1048] sm:$0xff] }
 0x481   : > { %v783_v0 = vld [vmem:[%s18230_s11 + $0x1068] sm:$0xff] }
 0x485   : > { %13441 = vmatpush1.bf16.xpose.msra.mxu0 %v16207_v24  ;;  %v1002_v24 = vld [vmem:[%s18230_s11 + $0x1740] sm:$0xff] }
 0x486   : > { %13442 = vmatprep.subr.bf16.mxu0 %v16216_v26  ;;  %v16255_v26 = vcombine.low %v866_v8, %v870_v10  ;;  %v16170_v8 = vcombine.high %v779_v63, %v783_v0 }
 0x487   : > { %13605 = vmatpush1.bf16.xpose.msra.mxu1 %v16335_v25  ;;  %v1006_v25 = vld [vmem:[%s18230_s11 + $0x1760] sm:$0xff] }
 0x488   : > { %13606 = vmatprep.subr.bf16.mxu1 %v16344_v27  ;;  %v16383_v27 = vcombine.low %v994_v11, %v998_v12  ;;  %v16392_v30 = vcombine.high %v1002_v24, %v1006_v25  ;;  %v787_v11 = vld [vmem:[%s18230_s11 + $0x1088] sm:$0xff] }
 0x489   : > { %v791_v12 = vld [vmem:[%s18230_s11 + $0x10a8] sm:$0xff] }
 0x48d   : > { %13443 = vmatpush1.bf16.xpose.msra.mxu0 %v16215_v33  ;;  %v1010_v33 = vld [vmem:[%s18230_s11 + $0x1780] sm:$0xff] }
 0x48e   : > { %13444 = vmatprep.subr.bf16.mxu0 %v16224_v38  ;;  %v16263_v38 = vcombine.low %v874_v19, %v878_v22  ;;  %v16178_v19 = vcombine.high %v787_v11, %v791_v12 }
 0x48f   : > { %13607 = vmatpush1.bf16.xpose.msra.mxu1 %v16343_v37  ;;  %v1014_v37 = vld [vmem:[%s18230_s11 + $0x17a0] sm:$0xff] }
 0x490   : > { %13608 = vmatprep.subr.bf16.mxu1 %v16352_v40  ;;  %v16391_v40 = vcombine.low %v1002_v24, %v1006_v25  ;;  %v16400_v44 = vcombine.high %v1010_v33, %v1014_v37  ;;  %v795_v24 = vld [vmem:[%s18230_s11 + $0x10c8] sm:$0xff] }
 0x491   : > { %v799_v25 = vld [vmem:[%s18230_s11 + $0x10e8] sm:$0xff] }
 0x495   : > { %13445 = vmatpush1.bf16.xpose.msra.mxu0 %v16223_v46  ;;  %v1018_v46 = vld [vmem:[%s18230_s11 + $0x17c0] sm:$0xff] }
 0x496   : > { %13446 = vmatprep.subr.bf16.mxu0 %v16232_v49  ;;  %v16271_v49 = vcombine.low %v882_v39, %v886_v32  ;;  %v16186_v39 = vcombine.high %v795_v24, %v799_v25 }
 0x497   : > { %13609 = vmatpush1.bf16.xpose.msra.mxu1 %v16351_v48  ;;  %v1022_v48 = vld [vmem:[%s18230_s11 + $0x17e0] sm:$0xff] }
 0x498   : > { %13610 = vmatprep.subr.bf16.mxu1 %v16360_v51  ;;  %v16399_v51 = vcombine.low %v1010_v33, %v1014_v37  ;;  %v16408_v53 = vcombine.high %v1018_v46, %v1022_v48  ;;  %v803_v33 = vld [vmem:[%s18230_s11 + $0x1108] sm:$0xff] }
 0x499   : > { %v807_v37 = vld [vmem:[%s18230_s11 + $0x1128] sm:$0xff] }
 0x49d   : > { %13447 = vmatpush1.bf16.xpose.msra.mxu0 %v16231_v56  ;;  %v899_v56 = vld [vmem:[%s18230_s11 + $0x1408] sm:$0xff] }
 0x49e   : > { %13448 = vmatprep.subr.bf16.mxu0 %v16240_v58  ;;  %v16279_v58 = vcombine.low %v890_v45, %v894_v36  ;;  %v16194_v45 = vcombine.high %v803_v33, %v807_v37 }
 0x49f   : > { %13611 = vmatpush1.bf16.xpose.msra.mxu1 %v16359_v57  ;;  %v903_v57 = vld [vmem:[%s18230_s11 + $0x1428] sm:$0xff] }
 0x4a0   : > { %13612 = vmatprep.subr.bf16.mxu1 %v16368_v59  ;;  %v16407_v59 = vcombine.low %v1018_v46, %v1022_v48  ;;  %v16290_v62 = vcombine.high %v899_v56, %v903_v57  ;;  %v811_v46 = vld [vmem:[%s18230_s11 + $0x1148] sm:$0xff] }
 0x4a1   : > { %v815_v48 = vld [vmem:[%s18230_s11 + $0x1168] sm:$0xff] }
 0x4a5   : > { %13449 = vmatpush1.bf16.xpose.msra.mxu0 %v16239_v1  ;;  %v907_v1 = vld [vmem:[%s18230_s11 + $0x1448] sm:$0xff] }
 0x4a6   : > { %13450 = vmatprep.subr.bf16.mxu0 %v16248_v41  ;;  %v16161_v41 = vcombine.low %v771_v54, %v775_v55  ;;  %v16202_v54 = vcombine.high %v811_v46, %v815_v48 }
 0x4a7   : > { %13613 = vmatpush1.bf16.xpose.msra.mxu1 %v16367_v35  ;;  %v911_v35 = vld [vmem:[%s18230_s11 + $0x1468] sm:$0xff] }
 0x4a8   : > { %13614 = vmatprep.subr.bf16.mxu1 %v16376_v5  ;;  %v16289_v5 = vcombine.low %v899_v56, %v903_v57  ;;  %v16298_v10 = vcombine.high %v907_v1, %v911_v35  ;;  %v819_v56 = vld [vmem:[%s18230_s11 + $0x1188] sm:$0xff] }
 0x4a9   : > { %v823_v57 = vld [vmem:[%s18230_s11 + $0x11a8] sm:$0xff] }
 0x4ad   : > { %13451 = vmatpush1.bf16.xpose.msra.mxu0 %v16247_v14  ;;  %v915_v14 = vld [vmem:[%s18230_s11 + $0x1488] sm:$0xff] }
 0x4ae   : > { %13452 = vmatprep.subr.bf16.mxu0 %v16256_v16  ;;  %v16169_v16 = vcombine.low %v779_v63, %v783_v0  ;;  %v16210_v63 = vcombine.high %v819_v56, %v823_v57 }
 0x4af   : > { %13615 = vmatpush1.bf16.xpose.msra.mxu1 %v16375_v15  ;;  %v919_v15 = vld [vmem:[%s18230_s11 + $0x14a8] sm:$0xff] }
 0x4b0   : > { %13616 = vmatprep.subr.bf16.mxu1 %v16384_v18  ;;  %v16297_v18 = vcombine.low %v907_v1, %v911_v35  ;;  %v16306_v22 = vcombine.high %v915_v14, %v919_v15  ;;  %v827_v1 = vld [vmem:[%s18230_s11 + $0x11c8] sm:$0xff] }
 0x4b1   : > { %v831_v35 = vld [vmem:[%s18230_s11 + $0x11e8] sm:$0xff] }
 0x4b5   : > { %13453 = vmatpush1.bf16.xpose.msra.mxu0 %v16255_v26  ;;  %v923_v26 = vld [vmem:[%s18230_s11 + $0x14c8] sm:$0xff] }
 0x4b6   : > { %13454 = vmatprep.subr.bf16.mxu0 %v16264_v29  ;;  %v16177_v29 = vcombine.low %v787_v11, %v791_v12  ;;  %v16218_v11 = vcombine.high %v827_v1, %v831_v35 }
 0x4b7   : > { %13617 = vmatpush1.bf16.xpose.msra.mxu1 %v16383_v27  ;;  %v927_v27 = vld [vmem:[%s18230_s11 + $0x14e8] sm:$0xff] }
 0x4b8   : > { %13618 = vmatprep.subr.bf16.mxu1 %v16392_v30  ;;  %v16305_v30 = vcombine.low %v915_v14, %v919_v15  ;;  %v16314_v32 = vcombine.high %v923_v26, %v927_v27  ;;  %v835_v14 = vld [vmem:[%s18230_s11 + $0x1208] sm:$0xff] }
 0x4b9   : > { %v839_v15 = vld [vmem:[%s18230_s11 + $0x1228] sm:$0xff] }
 0x4bd   : > { %13455 = vmatpush1.bf16.xpose.msra.mxu0 %v16263_v38  ;;  %v931_v38 = vld [vmem:[%s18230_s11 + $0x1508] sm:$0xff] }
 0x4be   : > { %13456 = vmatprep.subr.bf16.mxu0 %v16272_v43  ;;  %v16185_v43 = vcombine.low %v795_v24, %v799_v25  ;;  %v16226_v24 = vcombine.high %v835_v14, %v839_v15 }
 0x4bf   : > { %13619 = vmatpush1.bf16.xpose.msra.mxu1 %v16391_v40  ;;  %v935_v40 = vld [vmem:[%s18230_s11 + $0x1528] sm:$0xff] }
 0x4c0   : > { %13620 = vmatprep.subr.bf16.mxu1 %v16400_v44  ;;  %v16313_v44 = vcombine.low %v923_v26, %v927_v27  ;;  %v16322_v36 = vcombine.high %v931_v38, %v935_v40  ;;  %v843_v26 = vld [vmem:[%s18230_s11 + $0x1248] sm:$0xff] }
 0x4c1   : > { %v847_v27 = vld [vmem:[%s18230_s11 + $0x1268] sm:$0xff] }
 0x4c5   : > { %13457 = vmatpush1.bf16.xpose.msra.mxu0 %v16271_v49  ;;  %v939_v49 = vld [vmem:[%s18230_s11 + $0x1548] sm:$0xff] }
 0x4c6   : > { %13458 = vmatprep.subr.bf16.mxu0 %v16280_v52  ;;  %v16193_v52 = vcombine.low %v803_v33, %v807_v37  ;;  %v16234_v33 = vcombine.high %v843_v26, %v847_v27 }
 0x4c7   : > { %13621 = vmatpush1.bf16.xpose.msra.mxu1 %v16399_v51  ;;  %v943_v51 = vld [vmem:[%s18230_s11 + $0x1568] sm:$0xff] }
 0x4c8   : > { %13622 = vmatprep.subr.bf16.mxu1 %v16408_v53  ;;  %v16321_v53 = vcombine.low %v931_v38, %v935_v40  ;;  %v16330_v55 = vcombine.high %v939_v49, %v943_v51  ;;  %v851_v38 = vld [vmem:[%s18230_s11 + $0x1288] sm:$0xff] }
 0x4c9   : > { %v855_v40 = vld [vmem:[%s18230_s11 + $0x12a8] sm:$0xff] }
 0x4cd   : > { %13459 = vmatpush1.bf16.xpose.msra.mxu0 %v16279_v58  ;;  %v947_v58 = vld [vmem:[%s18230_s11 + $0x1588] sm:$0xff] }
 0x4ce   : > { %13469 = vmatprep.subr.bf16.mxu0 %v16162_v60  ;;  %v16201_v60 = vcombine.low %v811_v46, %v815_v48  ;;  %v16242_v46 = vcombine.high %v851_v38, %v855_v40 }
 0x4cf   : > { %13623 = vmatpush1.bf16.xpose.msra.mxu1 %v16407_v59  ;;  %v951_v59 = vld [vmem:[%s18230_s11 + $0x15a8] sm:$0xff] }
 0x4d0   : > { %13633 = vmatprep.subr.bf16.mxu1 %v16290_v62  ;;  %v16329_v62 = vcombine.low %v939_v49, %v943_v51  ;;  %v16338_v0 = vcombine.high %v947_v58, %v951_v59  ;;  %v859_v49 = vld [vmem:[%s18230_s11 + $0x12c8] sm:$0xff] }
 0x4d1   : > { %v863_v51 = vld [vmem:[%s18230_s11 + $0x12e8] sm:$0xff] }
 0x4d4   : > { %13461 = vmatmul.mubr.bf16.vlgmr.msra.gmra.mrb[8].mxu0 %v18335_v23 }
 0x4d5   : > { %13470 = vmatpush1.bf16.xpose.msra.mxu0 %v16161_v41  ;;  %13501 = vmatprep.mubr.bf16.mxu0 %v18341_v31  ;;  %v955_v41 = vld [vmem:[%s18230_s11 + $0x15c8] sm:$0xff] }
 0x4d6   : > { %13625 = vmatmul.mubr.bf16.vlgmr.msra.gmra.mrb[8].mxu1 %v18335_v23  ;;  %13471 = vmatprep.subr.bf16.mxu0 %v16170_v8  ;;  %v16209_v8 = vcombine.low %v819_v56, %v823_v57  ;;  %v19003_v56 = vsub.s32 6, %v18256_v28  ;;  %v19006_v57 = vsub.s32 5, %v18256_v28 }
 0x4d7   : > { %13634 = vmatpush1.bf16.xpose.msra.mxu1 %v16289_v5  ;;  %13665 = vmatprep.mubr.bf16.mxu1 %v18341_v31  ;;  %v959_v5 = vld [vmem:[%s18230_s11 + $0x15e8] sm:$0xff] }
 0x4d8   : > { %13635 = vmatprep.subr.bf16.mxu1 %v16298_v10  ;;  %v16337_v10 = vcombine.low %v947_v58, %v951_v59  ;;  %v16346_v12 = vcombine.high %v955_v41, %v959_v5  ;;  %v19009_v59 = vsub.s32 7, %v18256_v28 }
 0x4dd   : > { %13472 = vmatpush1.bf16.xpose.msra.mxu0 %v16169_v16  ;;  %v963_v16 = vld [vmem:[%s18230_s11 + $0x1608] sm:$0xff] }
 0x4de   : > { %13473 = vmatprep.subr.bf16.mxu0 %v16178_v19  ;;  %v16217_v19 = vcombine.low %v827_v1, %v831_v35 }
 0x4df   : > { %13636 = vmatpush1.bf16.xpose.msra.mxu1 %v16297_v18  ;;  %v967_v18 = vld [vmem:[%s18230_s11 + $0x1628] sm:$0xff] }
 0x4e0   : > { %13637 = vmatprep.subr.bf16.mxu1 %v16306_v22  ;;  %v16345_v22 = vcombine.low %v955_v41, %v959_v5  ;;  %v16354_v25 = vcombine.high %v963_v16, %v967_v18 }
 0x4e5   : > { %13474 = vmatpush1.bf16.xpose.msra.mxu0 %v16177_v29  ;;  %v971_v29 = vld [vmem:[%s18230_s11 + $0x1648] sm:$0xff] }
 0x4e6   : > { %13475 = vmatprep.subr.bf16.mxu0 %v16186_v39  ;;  %v16225_v39 = vcombine.low %v835_v14, %v839_v15 }
 0x4e7   : > { %13638 = vmatpush1.bf16.xpose.msra.mxu1 %v16305_v30  ;;  %v975_v30 = vld [vmem:[%s18230_s11 + $0x1668] sm:$0xff] }
 0x4e8   : > { %13639 = vmatprep.subr.bf16.mxu1 %v16314_v32  ;;  %v16353_v32 = vcombine.low %v963_v16, %v967_v18  ;;  %v16362_v37 = vcombine.high %v971_v29, %v975_v30 }
 0x4ed   : > { %13476 = vmatpush1.bf16.xpose.msra.mxu0 %v16185_v43  ;;  %v979_v43 = vld [vmem:[%s18230_s11 + $0x1688] sm:$0xff] }
 0x4ee   : > { %13477 = vmatprep.subr.bf16.mxu0 %v16194_v45  ;;  %v16233_v45 = vcombine.low %v843_v26, %v847_v27 }
 0x4ef   : > { %13640 = vmatpush1.bf16.xpose.msra.mxu1 %v16313_v44  ;;  %v983_v44 = vld [vmem:[%s18230_s11 + $0x16a8] sm:$0xff] }
 0x4f0   : > { %13641 = vmatprep.subr.bf16.mxu1 %v16322_v36  ;;  %v16361_v36 = vcombine.low %v971_v29, %v975_v30  ;;  %v16370_v48 = vcombine.high %v979_v43, %v983_v44  ;;  %v16369_v58 = vcombine.low %v979_v43, %v983_v44  ;;  %v16249_v30 = vcombine.low %v859_v49, %v863_v51 }
 0x4f5   : > { %13478 = vmatpush1.bf16.xpose.msra.mxu0 %v16193_v52  ;;  %v18998_v52 = vsub.s32 4, %v18256_v28  ;;  %v17974_v28 = vld [vmem:[%s20679_s0] sm:$0xff] }
 0x4f6   : > { %13479 = vmatprep.subr.bf16.mxu0 %v16202_v54  ;;  %v991_v54 = vld [vmem:[%s18230_s11 + $0x16e8] sm:$0xff]  ;;  %v19028_v16 = vrot.slane %v17974_v28, %v19003_v56  ;;  %v19033_v27 = vrot.slane %v17974_v28, %v19009_v59 }
 0x4f7   : > { %13642 = vmatpush1.bf16.xpose.msra.mxu1 %v16321_v53  ;;  %v987_v53 = vld [vmem:[%s18230_s11 + $0x16c8] sm:$0xff]  ;;  %v19019_v41 = vrot.slane %v17974_v28, %v18998_v52 }
 0x4f8   : > { %13643 = vmatprep.subr.bf16.mxu1 %v16330_v55  ;;  %v16241_v55 = vcombine.low %v851_v38, %v855_v40  ;;  %v16377_v38 = vcombine.low %v987_v53, %v991_v54 }
 0x4fd   : > { %13480 = vmatpush1.bf16.xpose.msra.mxu0 %v16201_v60  ;;  %v16250_v60 = vcombine.high %v859_v49, %v863_v51 }
 0x4fe   : > { %13481 = vmatprep.subr.bf16.mxu0 %v16210_v63  ;;  %v17973_v63 = vld [vmem:[%s18236_s6] sm:$0xff] }
 0x4ff   : > { %13644 = vmatpush1.bf16.xpose.msra.mxu1 %v16329_v62  ;;  %v16378_v62 = vcombine.high %v987_v53, %v991_v54  ;;  %v12639_v1 = vrot.slane %v17973_v63, %v19003_v56  ;;  %v12635_v35 = vrot.slane %v17973_v63, %v19006_v57  ;;  %v12643_v5 = vrot.slane %v17973_v63, %v19009_v59  ;;  %v875_v54 = vld [vmem:[%s18230_s11 + $0x1348] sm:$0xff] }
 0x500   : > { %13645 = vmatprep.subr.bf16.mxu1 %v16338_v0  ;;  %v12631_v0 = vrot.slane %v17973_v63, %v18998_v52 }
 0x505   : > { %13482 = vmatpush1.bf16.xpose.msra.mxu0 %v16209_v8 }
 0x506   : > { %13483 = vmatprep.subr.bf16.mxu0 %v16218_v11  ;;  %v867_v11 = vld [vmem:[%s18230_s11 + $0x1308] sm:$0xff] }
 0x507   : > { %13646 = vmatpush1.bf16.xpose.msra.mxu1 %v16337_v10  ;;  %v19023_v10 = vrot.slane %v17974_v28, %v19006_v57 }
 0x508   : > { %13647 = vmatprep.subr.bf16.mxu1 %v16346_v12  ;;  %v871_v12 = vld [vmem:[%s18230_s11 + $0x1328] sm:$0xff] }
 0x509   : > { %v16258_v40 = vcombine.high %v867_v11, %v871_v12 }
 0x50d   : > { %13484 = vmatpush1.bf16.xpose.msra.mxu0 %v16217_v19  ;;  %v995_v19 = vld [vmem:[%s18230_s11 + $0x1708] sm:$0xff] }
 0x50e   : > { %13485 = vmatprep.subr.bf16.mxu0 %v16226_v24 }
 0x50f   : > { %13648 = vmatpush1.bf16.xpose.msra.mxu1 %v16345_v22  ;;  %v999_v22 = vld [vmem:[%s18230_s11 + $0x1728] sm:$0xff] }
 0x510   : > { %13649 = vmatprep.subr.bf16.mxu1 %v16354_v25 }
 0x515   : > { %13486 = vmatpush1.bf16.xpose.msra.mxu0 %v16225_v39 }
 0x516   : > { %13487 = vmatprep.subr.bf16.mxu0 %v16234_v33 }
 0x517   : > { %13650 = vmatpush1.bf16.xpose.msra.mxu1 %v16353_v32 }
 0x518   : > { %13651 = vmatprep.subr.bf16.mxu1 %v16362_v37 }
 0x51d   : > { %13488 = vmatpush1.bf16.xpose.msra.mxu0 %v16233_v45  ;;  %v16386_v45 = vcombine.high %v995_v19, %v999_v22 }
 0x51e   : > { %13489 = vmatprep.subr.bf16.mxu0 %v16242_v46 }
 0x51f   : > { %13652 = vmatpush1.bf16.xpose.msra.mxu1 %v16361_v36 }
 0x520   : > { %13653 = vmatprep.subr.bf16.mxu1 %v16370_v48 }
 0x525   : > { %13490 = vmatpush1.bf16.xpose.msra.mxu0 %v16241_v55  ;;  %v879_v55 = vld [vmem:[%s18230_s11 + $0x1368] sm:$0xff] }
 0x526   : > { %13491 = vmatprep.subr.bf16.mxu0 %v16250_v60  ;;  %v1003_v60 = vld [vmem:[%s18230_s11 + $0x1748] sm:$0xff] }
 0x527   : > { %13654 = vmatpush1.bf16.xpose.msra.mxu1 %v16369_v58  ;;  %v13257_v8 = vpop.f32.mrb[4].mxu0 }
 0x528   : > { %13655 = vmatprep.subr.bf16.mxu1 %v16378_v62  ;;  %v17704_v14 = vadd.f32 %v13257_v8, %v12631_v0  ;;  %v13259_v18 = vpop.f32.mrb[5].mxu0  ;;  %v1007_v62 = vld [vmem:[%s18230_s11 + $0x1768] sm:$0xff]  ;;  %v16385_v0 = vcombine.low %v995_v19, %v999_v22 }
 0x529   : > { %v13421_v15 = vpop.f32.mrb[4].mxu1  ;;  %v17705_v25 = vadd.f32 %v13259_v18, %v12635_v35  ;;  %v13261_v29 = vpop.f32.mrb[6].mxu0  ;;  %v16266_v35 = vcombine.high %v875_v54, %v879_v55  ;;  %v883_v8 = vld [vmem:[%s18230_s11 + $0x1388] sm:$0xff]  ;;  %v16393_v18 = vcombine.low %v1003_v60, %v1007_v62 }
 0x52a   : > { %v17706_v24 = vadd.f32 %v13421_v15, %v12639_v1  ;;  %v13423_v26 = vpop.f32.mrb[5].mxu1  ;;  %v15443_v39 = vmul.f32 %v17704_v14, %v19019_v41  ;;  %v13262_v37 = vpop.f32.mrb[7].mxu0  ;;  %v887_v14 = vld [vmem:[%s18230_s11 + $0x13a8] sm:$0xff]  ;;  %v16265_v15 = vcombine.low %v875_v54, %v879_v55  ;;  %v912_v54 = vld [vmem:[%s18230_s11 + $0x1470] sm:$0xff] }
 0x52b   : > { %v17707_v32 = vadd.f32 %v13423_v26, %v12643_v5  ;;  %v13425_v33 = vpop.f32.mrb[6].mxu1  ;;  %v15444_v43 = vmul.f32 %v17705_v25, %v19023_v10  ;;  %v16394_v5 = vcombine.high %v1003_v60, %v1007_v62  ;;  %v16274_v19 = vcombine.high %v883_v8, %v887_v14  ;;  %v895_v25 = vld [vmem:[%s18230_s11 + $0x13e8] sm:$0xff] }
 0x52c   : > { %v13426_v44 = vpop.f32.mrb[7].mxu1  ;;  %v15455_v36 = vsel %vm15447_vm0, %v15443_v39, 0.0  ;;  %v15445_v46 = vmul.f32 %v17706_v24, %v19028_v16  ;;  %v891_v24 = vld [vmem:[%s18230_s11 + $0x13c8] sm:$0xff]  ;;  %v18082_v37 = vmov 0.0  }
 0x52d   : > { %v15456_v48 = vadd.f32 %v15455_v36, %v18733_v3  ;;  %v15457_v49 = vsel %vm15447_vm0, %v15444_v43, 0.0  ;;  %13492 = vmatpush1.bf16.xpose.msra.mxu0 %v16249_v30  ;;  %v15446_v51 = vmul.f32 %v17707_v32, %v19033_v27  ;;  %v16257_v3 = vcombine.low %v867_v11, %v871_v12  ;;  %v1011_v11 = vld [vmem:[%s18230_s11 + $0x1788] sm:$0xff]  ;;  %15397 = vst [vmem:[%s19061_s22] sm:$0xff] %v18082_v37  ;;  %v900_v43 = vld [vmem:[%s18230_s11 + $0x1410] sm:$0xff] }
 0x52e   : > { %13493 = vmatprep.subr.bf16.mxu0 %v16258_v40  ;;  %v15459_v58 = vsel %vm15447_vm0, %v15445_v46, 0.0  ;;  %v1015_v12 = vld [vmem:[%s18230_s11 + $0x17a8] sm:$0xff]  ;;  %v16273_v30 = vcombine.low %v883_v8, %v887_v14  ;;  %v16282_v32 = vcombine.high %v891_v24, %v895_v25  ;;  %v776_v40 = vld [vmem:[%s18230_s11 + $0x1030] sm:$0xff] }
 0x52f   : > { %13656 = vmatpush1.bf16.xpose.msra.mxu1 %v16377_v38  ;;  %v15458_v53 = vadd.f32 %v15457_v49, %v15456_v48  ;;  %v15461_v1 = vsel %vm15447_vm0, %v15446_v51, 0.0  ;;  %v16402_v22 = vcombine.high %v1011_v11, %v1015_v12  ;;  %v1019_v26 = vld [vmem:[%s18230_s11 + $0x17c8] sm:$0xff]  ;;  %v16401_v39 = vcombine.low %v1011_v11, %v1015_v12  ;;  %v772_v38 = vld [vmem:[%s18230_s11 + $0x1010] sm:$0xff] }
 0x530   : > { %13657 = vmatprep.subr.bf16.mxu1 %v16386_v45  ;;  %v1023_v29 = vld [vmem:[%s18230_s11 + $0x17e8] sm:$0xff]  ;;  %v904_v44 = vld [vmem:[%s18230_s11 + $0x1430] sm:$0xff]  ;;  %v16281_v45 = vcombine.low %v891_v24, %v895_v25  ;;  %v16164_v46 = vcombine.high %v772_v38, %v776_v40  ;;  %v16163_v55 = vcombine.low %v772_v38, %v776_v40 }
 0x531   : > { %v15460_v63 = vadd.f32 %v15459_v58, %v15458_v53  ;;  %v16410_v33 = vcombine.high %v1019_v26, %v1023_v29  ;;  %v16409_v36 = vcombine.low %v1019_v26, %v1023_v29  ;;  %v16292_v48 = vcombine.high %v900_v43, %v904_v44  ;;  %v780_v49 = vld [vmem:[%s18230_s11 + $0x1050] sm:$0xff] }
 0x532   : > { %v784_v51 = vld [vmem:[%s18230_s11 + $0x1070] sm:$0xff]  ;;  %v16291_v58 = vcombine.low %v900_v43, %v904_v44 }
 0x533   : > { %v15462_v28 = vadd.f32 %v15461_v1, %v15460_v63  ;;  %v908_v53 = vld [vmem:[%s18230_s11 + $0x1450] sm:$0xff]  ;;  %v16172_v60 = vcombine.high %v780_v49, %v784_v51 }
 0x534   : > { %v16300_v62 = vcombine.high %v908_v53, %v912_v54  ;;  %v792_v63 = vld [vmem:[%s18230_s11 + $0x10b0] sm:$0xff] }
 0x535   : > { %13494 = vmatpush1.bf16.xpose.msra.mxu0 %v16257_v3  ;;  %15463 = vadd.xlane.f32.xlu0 %v15462_v28  ;;  %v788_v3 = vld [vmem:[%s18230_s11 + $0x1090] sm:$0xff]  ;;  %v16299_v28 = vcombine.low %v908_v53, %v912_v54 }
 0x536   : > { %13495 = vmatprep.subr.bf16.mxu0 %v16266_v35  ;;  %v920_v1 = vld [vmem:[%s18230_s11 + $0x14b0] sm:$0xff]  ;;  %v16171_v35 = vcombine.low %v780_v49, %v784_v51 }
 0x537   : > { %13658 = vmatpush1.bf16.xpose.msra.mxu1 %v16385_v0  ;;  %v916_v0 = vld [vmem:[%s18230_s11 + $0x1490] sm:$0xff] }
 0x538   : > { %13659 = vmatprep.subr.bf16.mxu1 %v16394_v5  ;;  %v16180_v5 = vcombine.high %v788_v3, %v792_v63  ;;  %v16308_v8 = vcombine.high %v916_v0, %v920_v1  ;;  %v796_v14 = vld [vmem:[%s18230_s11 + $0x10d0] sm:$0xff] }
 0x539   : > { %v800_v11 = vld [vmem:[%s18230_s11 + $0x10f0] sm:$0xff] }
 0x53a   : > { %v924_v12 = vld [vmem:[%s18230_s11 + $0x14d0] sm:$0xff] }
 0x53b   : > { %v804_v25 = vld [vmem:[%s18230_s11 + $0x1110] sm:$0xff] }
 0x53c   : > { %v808_v26 = vld [vmem:[%s18230_s11 + $0x1130] sm:$0xff] }
 0x53d   : > { %13496 = vmatpush1.bf16.xpose.msra.mxu0 %v16265_v15  ;;  %v928_v15 = vld [vmem:[%s18230_s11 + $0x14f0] sm:$0xff] }
 0x53e   : > { %13497 = vmatprep.subr.bf16.mxu0 %v16274_v19  ;;  %v16307_v19 = vcombine.low %v916_v0, %v920_v1  ;;  %v16316_v24 = vcombine.high %v924_v12, %v928_v15  ;;  %v932_v29 = vld [vmem:[%s18230_s11 + $0x1510] sm:$0xff] }
 0x53f   : > { %13660 = vmatpush1.bf16.xpose.msra.mxu1 %v16393_v18  ;;  %v16179_v18 = vcombine.low %v788_v3, %v792_v63  ;;  %v812_v38 = vld [vmem:[%s18230_s11 + $0x1150] sm:$0xff] }
 0x540   : > { %13661 = vmatprep.subr.bf16.mxu1 %v16402_v22  ;;  %v16188_v22 = vcombine.high %v796_v14, %v800_v11  ;;  %v816_v40 = vld [vmem:[%s18230_s11 + $0x1170] sm:$0xff] }
 0x541   : > { %v940_v43 = vld [vmem:[%s18230_s11 + $0x1550] sm:$0xff] }
 0x542   : > { %v944_v44 = vld [vmem:[%s18230_s11 + $0x1570] sm:$0xff] }
 0x543   : > { %v820_v49 = vld [vmem:[%s18230_s11 + $0x1190] sm:$0xff] }
 0x544   : > { %v824_v51 = vld [vmem:[%s18230_s11 + $0x11b0] sm:$0xff] }
 0x545   : > { %13498 = vmatpush1.bf16.xpose.msra.mxu0 %v16273_v30  ;;  %v936_v30 = vld [vmem:[%s18230_s11 + $0x1530] sm:$0xff] }
 0x546   : > { %13499 = vmatprep.subr.bf16.mxu0 %v16282_v32  ;;  %v16315_v32 = vcombine.low %v924_v12, %v928_v15  ;;  %v16324_v37 = vcombine.high %v932_v29, %v936_v30  ;;  %v948_v53 = vld [vmem:[%s18230_s11 + $0x1590] sm:$0xff] }
 0x547   : > { %13662 = vmatpush1.bf16.xpose.msra.mxu1 %v16401_v39  ;;  %v16187_v39 = vcombine.low %v796_v14, %v800_v11  ;;  %v952_v54 = vld [vmem:[%s18230_s11 + $0x15b0] sm:$0xff] }
 0x548   : > { %13663 = vmatprep.subr.bf16.mxu1 %v16410_v33  ;;  %v16196_v33 = vcombine.high %v804_v25, %v808_v26  ;;  %v828_v3 = vld [vmem:[%s18230_s11 + $0x11d0] sm:$0xff] }
 0x549   : > { %v832_v63 = vld [vmem:[%s18230_s11 + $0x11f0] sm:$0xff] }
 0x54a   : > { %v956_v0 = vld [vmem:[%s18230_s11 + $0x15d0] sm:$0xff] }
 0x54b   : > { %v960_v1 = vld [vmem:[%s18230_s11 + $0x15f0] sm:$0xff] }
 0x54c   : > { %v836_v14 = vld [vmem:[%s18230_s11 + $0x1210] sm:$0xff] }
 0x54d   : > { %13500 = vmatpush1.bf16.xpose.msra.mxu0 %v16281_v45  ;;  %v16195_v45 = vcombine.low %v804_v25, %v808_v26  ;;  %v840_v11 = vld [vmem:[%s18230_s11 + $0x1230] sm:$0xff] }
 0x54e   : > { %13510 = vmatprep.subr.bf16.mxu0 %v16164_v46  ;;  %v16204_v46 = vcombine.high %v812_v38, %v816_v40  ;;  %v964_v12 = vld [vmem:[%s18230_s11 + $0x1610] sm:$0xff] }
 0x54f   : > { %13664 = vmatpush1.bf16.xpose.msra.mxu1 %v16409_v36  ;;  %v16323_v36 = vcombine.low %v932_v29, %v936_v30  ;;  %v968_v15 = vld [vmem:[%s18230_s11 + $0x1630] sm:$0xff] }
 0x550   : > { %13674 = vmatprep.subr.bf16.mxu1 %v16292_v48  ;;  %v16332_v48 = vcombine.high %v940_v43, %v944_v44  ;;  %v844_v25 = vld [vmem:[%s18230_s11 + $0x1250] sm:$0xff] }
 0x551   : > { %v848_v26 = vld [vmem:[%s18230_s11 + $0x1270] sm:$0xff] }
 0x552   : > { %v972_v29 = vld [vmem:[%s18230_s11 + $0x1650] sm:$0xff] }
 0x553   : > { %v976_v30 = vld [vmem:[%s18230_s11 + $0x1670] sm:$0xff] }
 0x554   : > { %13502 = vmatmul.mubr.bf16.vlgmr.msra.gmra.mrb[8].mxu0 %v18416_v42 }
 0x555   : > { %13511 = vmatpush1.bf16.xpose.msra.mxu0 %v16163_v55  ;;  %13542 = vmatprep.mubr.bf16.mxu0 %v18423_v50  ;;  %v16203_v55 = vcombine.low %v812_v38, %v816_v40  ;;  %v852_v38 = vld [vmem:[%s18230_s11 + $0x1290] sm:$0xff] }
 0x556   : > { %13666 = vmatmul.mubr.bf16.vlgmr.msra.gmra.mrb[8].mxu1 %v18416_v42  ;;  %13512 = vmatprep.subr.bf16.mxu0 %v16172_v60  ;;  %v16212_v60 = vcombine.high %v820_v49, %v824_v51  ;;  %v856_v40 = vld [vmem:[%s18230_s11 + $0x12b0] sm:$0xff] }
 0x557   : > { %13675 = vmatpush1.bf16.xpose.msra.mxu1 %v16291_v58  ;;  %13706 = vmatprep.mubr.bf16.mxu1 %v18423_v50  ;;  %v16331_v58 = vcombine.low %v940_v43, %v944_v44  ;;  %v980_v43 = vld [vmem:[%s18230_s11 + $0x1690] sm:$0xff] }
 0x558   : > { %13676 = vmatprep.subr.bf16.mxu1 %v16300_v62  ;;  %v16340_v62 = vcombine.high %v948_v53, %v952_v54  ;;  %v984_v44 = vld [vmem:[%s18230_s11 + $0x16b0] sm:$0xff] }
 0x55d   : > { %13513 = vmatpush1.bf16.xpose.msra.mxu0 %v16171_v35  ;;  %v16211_v35 = vcombine.low %v820_v49, %v824_v51  ;;  %v860_v49 = vld [vmem:[%s18230_s11 + $0x12d0] sm:$0xff] }
 0x55e   : > { %13514 = vmatprep.subr.bf16.mxu0 %v16180_v5  ;;  %v16220_v5 = vcombine.high %v828_v3, %v832_v63  ;;  %v864_v51 = vld [vmem:[%s18230_s11 + $0x12f0] sm:$0xff] }
 0x55f   : > { %13677 = vmatpush1.bf16.xpose.msra.mxu1 %v16299_v28  ;;  %v16339_v28 = vcombine.low %v948_v53, %v952_v54  ;;  %v988_v53 = vld [vmem:[%s18230_s11 + $0x16d0] sm:$0xff] }
 0x560   : > { %13678 = vmatprep.subr.bf16.mxu1 %v16308_v8  ;;  %v16348_v8 = vcombine.high %v956_v0, %v960_v1  ;;  %v992_v54 = vld [vmem:[%s18230_s11 + $0x16f0] sm:$0xff] }
 0x565   : > { %13515 = vmatpush1.bf16.xpose.msra.mxu0 %v16179_v18  ;;  %v16219_v18 = vcombine.low %v828_v3, %v832_v63  ;;  %v868_v3 = vld [vmem:[%s18230_s11 + $0x1310] sm:$0xff] }
 0x566   : > { %13516 = vmatprep.subr.bf16.mxu0 %v16188_v22  ;;  %v16228_v22 = vcombine.high %v836_v14, %v840_v11  ;;  %v872_v63 = vld [vmem:[%s18230_s11 + $0x1330] sm:$0xff] }
 0x567   : > { %13679 = vmatpush1.bf16.xpose.msra.mxu1 %v16307_v19  ;;  %v16347_v19 = vcombine.low %v956_v0, %v960_v1  ;;  %v996_v0 = vld [vmem:[%s18230_s11 + $0x1710] sm:$0xff] }
 0x568   : > { %13680 = vmatprep.subr.bf16.mxu1 %v16316_v24  ;;  %v16356_v24 = vcombine.high %v964_v12, %v968_v15  ;;  %v1000_v1 = vld [vmem:[%s18230_s11 + $0x1730] sm:$0xff] }
 0x56d   : > { %13517 = vmatpush1.bf16.xpose.msra.mxu0 %v16187_v39  ;;  %v16227_v39 = vcombine.low %v836_v14, %v840_v11  ;;  %v876_v14 = vld [vmem:[%s18230_s11 + $0x1350] sm:$0xff] }
 0x56e   : > { %13518 = vmatprep.subr.bf16.mxu0 %v16196_v33  ;;  %v16236_v33 = vcombine.high %v844_v25, %v848_v26  ;;  %v880_v11 = vld [vmem:[%s18230_s11 + $0x1370] sm:$0xff] }
 0x56f   : > { %13681 = vmatpush1.bf16.xpose.msra.mxu1 %v16315_v32  ;;  %v16355_v32 = vcombine.low %v964_v12, %v968_v15  ;;  %v1004_v12 = vld [vmem:[%s18230_s11 + $0x1750] sm:$0xff] }
 0x570   : > { %13682 = vmatprep.subr.bf16.mxu1 %v16324_v37  ;;  %v16364_v37 = vcombine.high %v972_v29, %v976_v30  ;;  %v1008_v15 = vld [vmem:[%s18230_s11 + $0x1770] sm:$0xff] }
 0x575   : > { %13519 = vmatpush1.bf16.xpose.msra.mxu0 %v16195_v45  ;;  %v16235_v45 = vcombine.low %v844_v25, %v848_v26  ;;  %v884_v25 = vld [vmem:[%s18230_s11 + $0x1390] sm:$0xff] }
 0x576   : > { %13520 = vmatprep.subr.bf16.mxu0 %v16204_v46  ;;  %v16244_v46 = vcombine.high %v852_v38, %v856_v40  ;;  %v888_v26 = vld [vmem:[%s18230_s11 + $0x13b0] sm:$0xff] }
 0x577   : > { %13683 = vmatpush1.bf16.xpose.msra.mxu1 %v16323_v36  ;;  %v16363_v36 = vcombine.low %v972_v29, %v976_v30  ;;  %v1012_v29 = vld [vmem:[%s18230_s11 + $0x1790] sm:$0xff] }
 0x578   : > { %13684 = vmatprep.subr.bf16.mxu1 %v16332_v48  ;;  %v16372_v48 = vcombine.high %v980_v43, %v984_v44  ;;  %v1016_v30 = vld [vmem:[%s18230_s11 + $0x17b0] sm:$0xff] }
 0x57d   : > { %13521 = vmatpush1.bf16.xpose.msra.mxu0 %v16203_v55  ;;  %v16243_v55 = vcombine.low %v852_v38, %v856_v40  ;;  %v892_v38 = vld [vmem:[%s18230_s11 + $0x13d0] sm:$0xff] }
 0x57e   : > { %13522 = vmatprep.subr.bf16.mxu0 %v16212_v60  ;;  %v16252_v60 = vcombine.high %v860_v49, %v864_v51  ;;  %v896_v40 = vld [vmem:[%s18230_s11 + $0x13f0] sm:$0xff] }
 0x57f   : > { %13685 = vmatpush1.bf16.xpose.msra.mxu1 %v16331_v58  ;;  %v16371_v58 = vcombine.low %v980_v43, %v984_v44  ;;  %v1020_v43 = vld [vmem:[%s18230_s11 + $0x17d0] sm:$0xff] }
 0x580   : > { %13686 = vmatprep.subr.bf16.mxu1 %v16340_v62  ;;  %v16380_v62 = vcombine.high %v988_v53, %v992_v54  ;;  %v1024_v44 = vld [vmem:[%s18230_s11 + $0x17f0] sm:$0xff] }
 0x585   : > { %13523 = vmatpush1.bf16.xpose.msra.mxu0 %v16211_v35  ;;  %v16251_v35 = vcombine.low %v860_v49, %v864_v51  ;;  %v16412_v49 = vcombine.high %v1020_v43, %v1024_v44  ;;  %v773_v51 = vld [vmem:[%s18230_s11 + $0x1018] sm:$0xff] }
 0x586   : > { %13524 = vmatprep.subr.bf16.mxu0 %v16220_v5  ;;  %v16260_v5 = vcombine.high %v868_v3, %v872_v63 }
 0x587   : > { %13687 = vmatpush1.bf16.xpose.msra.mxu1 %v16339_v28  ;;  %v16379_v28 = vcombine.low %v988_v53, %v992_v54  ;;  %v777_v53 = vld [vmem:[%s18230_s11 + $0x1038] sm:$0xff] }
 0x588   : > { %13688 = vmatprep.subr.bf16.mxu1 %v16348_v8  ;;  %v16388_v8 = vcombine.high %v996_v0, %v1000_v1  ;;  %v901_v54 = vld [vmem:[%s18230_s11 + $0x1418] sm:$0xff] }
 0x58d   : > { %13525 = vmatpush1.bf16.xpose.msra.mxu0 %v16219_v18  ;;  %v16259_v18 = vcombine.low %v868_v3, %v872_v63  ;;  %v781_v63 = vld [vmem:[%s18230_s11 + $0x1058] sm:$0xff] }
 0x58e   : > { %13526 = vmatprep.subr.bf16.mxu0 %v16228_v22  ;;  %v16268_v22 = vcombine.high %v876_v14, %v880_v11 }
 0x58f   : > { %13689 = vmatpush1.bf16.xpose.msra.mxu1 %v16347_v19  ;;  %v16387_v19 = vcombine.low %v996_v0, %v1000_v1  ;;  %v785_v0 = vld [vmem:[%s18230_s11 + $0x1078] sm:$0xff] }
 0x590   : > { %13690 = vmatprep.subr.bf16.mxu1 %v16356_v24  ;;  %v16396_v24 = vcombine.high %v1004_v12, %v1008_v15  ;;  %v909_v1 = vld [vmem:[%s18230_s11 + $0x1458] sm:$0xff] }
 0x595   : > { %13527 = vmatpush1.bf16.xpose.msra.mxu0 %v16227_v39  ;;  %v16267_v39 = vcombine.low %v876_v14, %v880_v11  ;;  %v789_v11 = vld [vmem:[%s18230_s11 + $0x1098] sm:$0xff] }
 0x596   : > { %13528 = vmatprep.subr.bf16.mxu0 %v16236_v33  ;;  %v16276_v33 = vcombine.high %v884_v25, %v888_v26 }
 0x597   : > { %13691 = vmatpush1.bf16.xpose.msra.mxu1 %v16355_v32  ;;  %v16395_v32 = vcombine.low %v1004_v12, %v1008_v15  ;;  %v793_v12 = vld [vmem:[%s18230_s11 + $0x10b8] sm:$0xff] }
 0x598   : > { %13692 = vmatprep.subr.bf16.mxu1 %v16364_v37  ;;  %v16404_v37 = vcombine.high %v1012_v29, %v1016_v30  ;;  %v917_v15 = vld [vmem:[%s18230_s11 + $0x1498] sm:$0xff] }
 0x59d   : > { %13529 = vmatpush1.bf16.xpose.msra.mxu0 %v16235_v45  ;;  %v16275_v45 = vcombine.low %v884_v25, %v888_v26  ;;  %v797_v26 = vld [vmem:[%s18230_s11 + $0x10d8] sm:$0xff] }
 0x59e   : > { %13530 = vmatprep.subr.bf16.mxu0 %v16244_v46  ;;  %v16403_v46 = vcombine.low %v1012_v29, %v1016_v30  ;;  %v801_v29 = vld [vmem:[%s18230_s11 + $0x10f8] sm:$0xff] }
 0x59f   : > { %13693 = vmatpush1.bf16.xpose.msra.mxu1 %v16363_v36  ;;  %v925_v30 = vld [vmem:[%s18230_s11 + $0x14d8] sm:$0xff] }
 0x5a0   : > { %13694 = vmatprep.subr.bf16.mxu1 %v16372_v48  ;;  %v16284_v48 = vcombine.high %v892_v38, %v896_v40 }
 0x5a5   : > { %13531 = vmatpush1.bf16.xpose.msra.mxu0 %v16243_v55  ;;  %v905_v55 = vld [vmem:[%s18230_s11 + $0x1438] sm:$0xff] }
 0x5a6   : > { %13532 = vmatprep.subr.bf16.mxu0 %v16252_v60  ;;  %v16411_v60 = vcombine.low %v1020_v43, %v1024_v44  ;;  %v16294_v3 = vcombine.high %v901_v54, %v905_v55  ;;  %v809_v43 = vld [vmem:[%s18230_s11 + $0x1138] sm:$0xff] }
 0x5a7   : > { %13695 = vmatpush1.bf16.xpose.msra.mxu1 %v16371_v58  ;;  %v16283_v58 = vcombine.low %v892_v38, %v896_v40  ;;  %v805_v40 = vld [vmem:[%s18230_s11 + $0x1118] sm:$0xff] }
 0x5a8   : > { %13696 = vmatprep.subr.bf16.mxu1 %v16380_v62  ;;  %v16166_v62 = vcombine.high %v773_v51, %v777_v53  ;;  %v933_v44 = vld [vmem:[%s18230_s11 + $0x1518] sm:$0xff] }
 0x5ad   : > { %13533 = vmatpush1.bf16.xpose.msra.mxu0 %v16251_v35  ;;  %v913_v35 = vld [vmem:[%s18230_s11 + $0x1478] sm:$0xff] }
 0x5ae   : > { %13534 = vmatprep.subr.bf16.mxu0 %v16260_v5  ;;  %v16293_v5 = vcombine.low %v901_v54, %v905_v55  ;;  %v16302_v14 = vcombine.high %v909_v1, %v913_v35  ;;  %v941_v54 = vld [vmem:[%s18230_s11 + $0x1558] sm:$0xff] }
 0x5af   : > { %13697 = vmatpush1.bf16.xpose.msra.mxu1 %v16379_v28  ;;  %v16165_v28 = vcombine.low %v773_v51, %v777_v53  ;;  %v813_v51 = vld [vmem:[%s18230_s11 + $0x1158] sm:$0xff] }
 0x5b0   : > { %13698 = vmatprep.subr.bf16.mxu1 %v16388_v8  ;;  %v16174_v8 = vcombine.high %v781_v63, %v785_v0  ;;  %v817_v53 = vld [vmem:[%s18230_s11 + $0x1178] sm:$0xff] }
 0x5b1   : > { %v945_v55 = vld [vmem:[%s18230_s11 + $0x1578] sm:$0xff] }
 0x5b5   : > { %13535 = vmatpush1.bf16.xpose.msra.mxu0 %v16259_v18  ;;  %v921_v18 = vld [vmem:[%s18230_s11 + $0x14b8] sm:$0xff] }
 0x5b6   : > { %13536 = vmatprep.subr.bf16.mxu0 %v16268_v22  ;;  %v16301_v22 = vcombine.low %v909_v1, %v913_v35  ;;  %v16310_v25 = vcombine.high %v917_v15, %v921_v18  ;;  %v949_v1 = vld [vmem:[%s18230_s11 + $0x1598] sm:$0xff] }
 0x5b7   : > { %13699 = vmatpush1.bf16.xpose.msra.mxu1 %v16387_v19  ;;  %v16173_v19 = vcombine.low %v781_v63, %v785_v0  ;;  %v821_v63 = vld [vmem:[%s18230_s11 + $0x1198] sm:$0xff] }
 0x5b8   : > { %13700 = vmatprep.subr.bf16.mxu1 %v16396_v24  ;;  %v16182_v24 = vcombine.high %v789_v11, %v793_v12  ;;  %v825_v0 = vld [vmem:[%s18230_s11 + $0x11b8] sm:$0xff] }
 0x5b9   : > { %v953_v35 = vld [vmem:[%s18230_s11 + $0x15b8] sm:$0xff] }
 0x5bd   : > { %13537 = vmatpush1.bf16.xpose.msra.mxu0 %v16267_v39  ;;  %v929_v39 = vld [vmem:[%s18230_s11 + $0x14f8] sm:$0xff] }
 0x5be   : > { %13538 = vmatprep.subr.bf16.mxu0 %v16276_v33  ;;  %v16309_v33 = vcombine.low %v917_v15, %v921_v18  ;;  %v16318_v38 = vcombine.high %v925_v30, %v929_v39  ;;  %v957_v15 = vld [vmem:[%s18230_s11 + $0x15d8] sm:$0xff] }
 0x5bf   : > { %13701 = vmatpush1.bf16.xpose.msra.mxu1 %v16395_v32  ;;  %v16181_v32 = vcombine.low %v789_v11, %v793_v12  ;;  %v829_v11 = vld [vmem:[%s18230_s11 + $0x11d8] sm:$0xff] }
 0x5c0   : > { %13702 = vmatprep.subr.bf16.mxu1 %v16404_v37  ;;  %v16190_v37 = vcombine.high %v797_v26, %v801_v29  ;;  %v833_v12 = vld [vmem:[%s18230_s11 + $0x11f8] sm:$0xff] }
 0x5c1   : > { %v961_v18 = vld [vmem:[%s18230_s11 + $0x15f8] sm:$0xff] }
 0x5c2   : > { %v15464_v36 = vpop.xlane.xlu0 %15463 }
 0x5c3   : > { %15466 = vst.msk [vmem:[%s19061_s22] sm:$0x1] %vm15465_vm1, %v15464_v36  ;;  %v16189_v36 = vcombine.low %v797_v26, %v801_v29  ;;  %v837_v26 = vld [vmem:[%s18230_s11 + $0x1218] sm:$0xff] }
 0x5c4   : > { %v841_v29 = vld [vmem:[%s18230_s11 + $0x1238] sm:$0xff] }
 0x5c5   : > { %13539 = vmatpush1.bf16.xpose.msra.mxu0 %v16275_v45  ;;  %v937_v45 = vld [vmem:[%s18230_s11 + $0x1538] sm:$0xff] }
 0x5c6   : > { %13540 = vmatprep.subr.bf16.mxu0 %v16284_v48  ;;  %v16198_v48 = vcombine.high %v805_v40, %v809_v43 }
 0x5c7   : > { %13703 = vmatpush1.bf16.xpose.msra.mxu1 %v16403_v46  ;;  %v16317_v46 = vcombine.low %v925_v30, %v929_v39  ;;  %v965_v30 = vld [vmem:[%s18230_s11 + $0x1618] sm:$0xff] }
 0x5c8   : > { %13704 = vmatprep.subr.bf16.mxu1 %v16412_v49  ;;  %v16326_v49 = vcombine.high %v933_v44, %v937_v45  ;;  %v969_v39 = vld [vmem:[%s18230_s11 + $0x1638] sm:$0xff] }
 0x5cd   : > { %13541 = vmatpush1.bf16.xpose.msra.mxu0 %v16283_v58  ;;  %v16197_v58 = vcombine.low %v805_v40, %v809_v43  ;;  %v845_v40 = vld [vmem:[%s18230_s11 + $0x1258] sm:$0xff] }
 0x5ce   : > { %13551 = vmatprep.subr.bf16.mxu0 %v16166_v62  ;;  %v16206_v62 = vcombine.high %v813_v51, %v817_v53  ;;  %v849_v43 = vld [vmem:[%s18230_s11 + $0x1278] sm:$0xff] }
 0x5cf   : > { %13705 = vmatpush1.bf16.xpose.msra.mxu1 %v16411_v60  ;;  %v16325_v60 = vcombine.low %v933_v44, %v937_v45  ;;  %v973_v44 = vld [vmem:[%s18230_s11 + $0x1658] sm:$0xff] }
 0x5d0   : > { %13715 = vmatprep.subr.bf16.mxu1 %v16294_v3  ;;  %v16334_v3 = vcombine.high %v941_v54, %v945_v55  ;;  %v977_v45 = vld [vmem:[%s18230_s11 + $0x1678] sm:$0xff] }
 0x5d4   : > { %13543 = vmatmul.mubr.bf16.vlgmr.msra.gmra.mrb[8].mxu0 %v18493_v61 }
 0x5d5   : > { %13552 = vmatpush1.bf16.xpose.msra.mxu0 %v16165_v28  ;;  %13583 = vmatprep.mubr.bf16.mxu0 %v18499_v4  ;;  %v16205_v28 = vcombine.low %v813_v51, %v817_v53  ;;  %v853_v51 = vld [vmem:[%s18230_s11 + $0x1298] sm:$0xff] }
 0x5d6   : > { %13707 = vmatmul.mubr.bf16.vlgmr.msra.gmra.mrb[8].mxu1 %v18493_v61  ;;  %13553 = vmatprep.subr.bf16.mxu0 %v16174_v8  ;;  %v16214_v8 = vcombine.high %v821_v63, %v825_v0  ;;  %v857_v53 = vld [vmem:[%s18230_s11 + $0x12b8] sm:$0xff] }
 0x5d7   : > { %13716 = vmatpush1.bf16.xpose.msra.mxu1 %v16293_v5  ;;  %13747 = vmatprep.mubr.bf16.mxu1 %v18499_v4  ;;  %v16333_v5 = vcombine.low %v941_v54, %v945_v55  ;;  %v981_v54 = vld [vmem:[%s18230_s11 + $0x1698] sm:$0xff] }
 0x5d8   : > { %13717 = vmatprep.subr.bf16.mxu1 %v16302_v14  ;;  %v16342_v14 = vcombine.high %v949_v1, %v953_v35  ;;  %v985_v55 = vld [vmem:[%s18230_s11 + $0x16b8] sm:$0xff] }
 0x5dd   : > { %13554 = vmatpush1.bf16.xpose.msra.mxu0 %v16173_v19  ;;  %v16213_v19 = vcombine.low %v821_v63, %v825_v0  ;;  %v861_v63 = vld [vmem:[%s18230_s11 + $0x12d8] sm:$0xff] }
 0x5de   : > { %13555 = vmatprep.subr.bf16.mxu0 %v16182_v24  ;;  %v16222_v24 = vcombine.high %v829_v11, %v833_v12  ;;  %v865_v0 = vld [vmem:[%s18230_s11 + $0x12f8] sm:$0xff] }
 0x5df   : > { %13718 = vmatpush1.bf16.xpose.msra.mxu1 %v16301_v22  ;;  %v16341_v22 = vcombine.low %v949_v1, %v953_v35  ;;  %v989_v1 = vld [vmem:[%s18230_s11 + $0x16d8] sm:$0xff] }
 0x5e0   : > { %13719 = vmatprep.subr.bf16.mxu1 %v16310_v25  ;;  %v16350_v25 = vcombine.high %v957_v15, %v961_v18  ;;  %v993_v35 = vld [vmem:[%s18230_s11 + $0x16f8] sm:$0xff] }
 0x5e5   : > { %13556 = vmatpush1.bf16.xpose.msra.mxu0 %v16181_v32  ;;  %v16221_v32 = vcombine.low %v829_v11, %v833_v12  ;;  %v869_v11 = vld [vmem:[%s18230_s11 + $0x1318] sm:$0xff] }
 0x5e6   : > { %13557 = vmatprep.subr.bf16.mxu0 %v16190_v37  ;;  %v16230_v37 = vcombine.high %v837_v26, %v841_v29  ;;  %v873_v12 = vld [vmem:[%s18230_s11 + $0x1338] sm:$0xff] }
 0x5e7   : > { %13720 = vmatpush1.bf16.xpose.msra.mxu1 %v16309_v33  ;;  %v16349_v33 = vcombine.low %v957_v15, %v961_v18  ;;  %v997_v15 = vld [vmem:[%s18230_s11 + $0x1718] sm:$0xff] }
 0x5e8   : > { %13721 = vmatprep.subr.bf16.mxu1 %v16318_v38  ;;  %v16358_v38 = vcombine.high %v965_v30, %v969_v39  ;;  %v1001_v18 = vld [vmem:[%s18230_s11 + $0x1738] sm:$0xff] }
 0x5ed   : > { %13558 = vmatpush1.bf16.xpose.msra.mxu0 %v16189_v36  ;;  %v16229_v36 = vcombine.low %v837_v26, %v841_v29  ;;  %v877_v26 = vld [vmem:[%s18230_s11 + $0x1358] sm:$0xff] }
 0x5ee   : > { %13559 = vmatprep.subr.bf16.mxu0 %v16198_v48  ;;  %v16238_v48 = vcombine.high %v845_v40, %v849_v43  ;;  %v881_v29 = vld [vmem:[%s18230_s11 + $0x1378] sm:$0xff] }
 0x5ef   : > { %13722 = vmatpush1.bf16.xpose.msra.mxu1 %v16317_v46  ;;  %v16357_v46 = vcombine.low %v965_v30, %v969_v39  ;;  %v1005_v30 = vld [vmem:[%s18230_s11 + $0x1758] sm:$0xff] }
 0x5f0   : > { %13723 = vmatprep.subr.bf16.mxu1 %v16326_v49  ;;  %v16366_v49 = vcombine.high %v973_v44, %v977_v45  ;;  %v1009_v39 = vld [vmem:[%s18230_s11 + $0x1778] sm:$0xff] }
 0x5f5   : > { %13560 = vmatpush1.bf16.xpose.msra.mxu0 %v16197_v58  ;;  %v16237_v58 = vcombine.low %v845_v40, %v849_v43  ;;  %v885_v40 = vld [vmem:[%s18230_s11 + $0x1398] sm:$0xff] }
 0x5f6   : > { %13561 = vmatprep.subr.bf16.mxu0 %v16206_v62  ;;  %v16246_v62 = vcombine.high %v853_v51, %v857_v53  ;;  %v889_v43 = vld [vmem:[%s18230_s11 + $0x13b8] sm:$0xff] }
 0x5f7   : > { %13724 = vmatpush1.bf16.xpose.msra.mxu1 %v16325_v60  ;;  %v16365_v60 = vcombine.low %v973_v44, %v977_v45  ;;  %v1013_v44 = vld [vmem:[%s18230_s11 + $0x1798] sm:$0xff] }
 0x5f8   : > { %13725 = vmatprep.subr.bf16.mxu1 %v16334_v3  ;;  %v16374_v3 = vcombine.high %v981_v54, %v985_v55  ;;  %v1017_v45 = vld [vmem:[%s18230_s11 + $0x17b8] sm:$0xff] }
 0x5fd   : > { %13562 = vmatpush1.bf16.xpose.msra.mxu0 %v16205_v28  ;;  %v16245_v28 = vcombine.low %v853_v51, %v857_v53  ;;  %v893_v51 = vld [vmem:[%s18230_s11 + $0x13d8] sm:$0xff] }
 0x5fe   : > { %13563 = vmatprep.subr.bf16.mxu0 %v16214_v8  ;;  %v16254_v8 = vcombine.high %v861_v63, %v865_v0  ;;  %v897_v53 = vld [vmem:[%s18230_s11 + $0x13f8] sm:$0xff] }
 0x5ff   : > { %13726 = vmatpush1.bf16.xpose.msra.mxu1 %v16333_v5  ;;  %v16373_v5 = vcombine.low %v981_v54, %v985_v55  ;;  %v1021_v54 = vld [vmem:[%s18230_s11 + $0x17d8] sm:$0xff] }
 0x600   : > { %13727 = vmatprep.subr.bf16.mxu1 %v16342_v14  ;;  %v16382_v14 = vcombine.high %v989_v1, %v993_v35  ;;  %v1025_v55 = vld [vmem:[%s18230_s11 + $0x17f8] sm:$0xff] }
 0x605   : > { %13564 = vmatpush1.bf16.xpose.msra.mxu0 %v16213_v19  ;;  %v16253_v19 = vcombine.low %v861_v63, %v865_v0  ;;  %v1026_v63 = vld [vmem:[%s18230_s11 + $0x1800] sm:$0xff] }
 0x606   : > { %13565 = vmatprep.subr.bf16.mxu0 %v16222_v24  ;;  %v16262_v24 = vcombine.high %v869_v11, %v873_v12  ;;  %v1030_v0 = vld [vmem:[%s18230_s11 + $0x1820] sm:$0xff] }
 0x607   : > { %13728 = vmatpush1.bf16.xpose.msra.mxu1 %v16341_v22  ;;  %v16381_v22 = vcombine.low %v989_v1, %v993_v35  ;;  %v1154_v1 = vld [vmem:[%s18230_s11 + $0x1c00] sm:$0xff] }
 0x608   : > { %13729 = vmatprep.subr.bf16.mxu1 %v16350_v25  ;;  %v16390_v25 = vcombine.high %v997_v15, %v1001_v18  ;;  %v1158_v35 = vld [vmem:[%s18230_s11 + $0x1c20] sm:$0xff] }
 0x60d   : > { %13566 = vmatpush1.bf16.xpose.msra.mxu0 %v16221_v32  ;;  %v16261_v32 = vcombine.low %v869_v11, %v873_v12  ;;  %v1034_v11 = vld [vmem:[%s18230_s11 + $0x1840] sm:$0xff] }
 0x60e   : > { %13567 = vmatprep.subr.bf16.mxu0 %v16230_v37  ;;  %v16270_v37 = vcombine.high %v877_v26, %v881_v29  ;;  %v1038_v12 = vld [vmem:[%s18230_s11 + $0x1860] sm:$0xff] }
 0x60f   : > { %13730 = vmatpush1.bf16.xpose.msra.mxu1 %v16349_v33  ;;  %v16389_v33 = vcombine.low %v997_v15, %v1001_v18  ;;  %v1162_v15 = vld [vmem:[%s18230_s11 + $0x1c40] sm:$0xff] }
 0x610   : > { %13731 = vmatprep.subr.bf16.mxu1 %v16358_v38  ;;  %v16398_v38 = vcombine.high %v1005_v30, %v1009_v39  ;;  %v1166_v18 = vld [vmem:[%s18230_s11 + $0x1c60] sm:$0xff] }
 0x615   : > { %13568 = vmatpush1.bf16.xpose.msra.mxu0 %v16229_v36  ;;  %v16269_v36 = vcombine.low %v877_v26, %v881_v29  ;;  %v1042_v26 = vld [vmem:[%s18230_s11 + $0x1880] sm:$0xff] }
 0x616   : > { %13569 = vmatprep.subr.bf16.mxu0 %v16238_v48  ;;  %v16278_v48 = vcombine.high %v885_v40, %v889_v43  ;;  %v1046_v29 = vld [vmem:[%s18230_s11 + $0x18a0] sm:$0xff] }
 0x617   : > { %13732 = vmatpush1.bf16.xpose.msra.mxu1 %v16357_v46  ;;  %v16397_v46 = vcombine.low %v1005_v30, %v1009_v39  ;;  %v1170_v30 = vld [vmem:[%s18230_s11 + $0x1c80] sm:$0xff] }
 0x618   : > { %13733 = vmatprep.subr.bf16.mxu1 %v16366_v49  ;;  %v16406_v49 = vcombine.high %v1013_v44, %v1017_v45  ;;  %v1174_v39 = vld [vmem:[%s18230_s11 + $0x1ca0] sm:$0xff] }
 0x61d   : > { %13570 = vmatpush1.bf16.xpose.msra.mxu0 %v16237_v58  ;;  %v16277_v58 = vcombine.low %v885_v40, %v889_v43  ;;  %v1050_v40 = vld [vmem:[%s18230_s11 + $0x18c0] sm:$0xff] }
 0x61e   : > { %13571 = vmatprep.subr.bf16.mxu0 %v16246_v62  ;;  %v16286_v62 = vcombine.high %v893_v51, %v897_v53  ;;  %v1054_v43 = vld [vmem:[%s18230_s11 + $0x18e0] sm:$0xff] }
 0x61f   : > { %13734 = vmatpush1.bf16.xpose.msra.mxu1 %v16365_v60  ;;  %v16405_v60 = vcombine.low %v1013_v44, %v1017_v45  ;;  %v1178_v44 = vld [vmem:[%s18230_s11 + $0x1cc0] sm:$0xff] }
 0x620   : > { %13735 = vmatprep.subr.bf16.mxu1 %v16374_v3  ;;  %v16414_v3 = vcombine.high %v1021_v54, %v1025_v55  ;;  %v1182_v45 = vld [vmem:[%s18230_s11 + $0x1ce0] sm:$0xff] }
 0x625   : > { %13572 = vmatpush1.bf16.xpose.msra.mxu0 %v16245_v28  ;;  %v16285_v28 = vcombine.low %v893_v51, %v897_v53  ;;  %v1058_v51 = vld [vmem:[%s18230_s11 + $0x1900] sm:$0xff] }
 0x626   : > { %13573 = vmatprep.subr.bf16.mxu0 %v16254_v8  ;;  %v16416_v8 = vcombine.high %v1026_v63, %v1030_v0  ;;  %v1062_v53 = vld [vmem:[%s18230_s11 + $0x1920] sm:$0xff] }
 0x627   : > { %13736 = vmatpush1.bf16.xpose.msra.mxu1 %v16373_v5  ;;  %v16413_v5 = vcombine.low %v1021_v54, %v1025_v55  ;;  %v1186_v54 = vld [vmem:[%s18230_s11 + $0x1d00] sm:$0xff] }
 0x628   : > { %13737 = vmatprep.subr.bf16.mxu1 %v16382_v14  ;;  %v16544_v14 = vcombine.high %v1154_v1, %v1158_v35  ;;  %v1190_v55 = vld [vmem:[%s18230_s11 + $0x1d20] sm:$0xff] }
 0x62d   : > { %13574 = vmatpush1.bf16.xpose.msra.mxu0 %v16253_v19  ;;  %v16415_v19 = vcombine.low %v1026_v63, %v1030_v0  ;;  %v1066_v63 = vld [vmem:[%s18230_s11 + $0x1940] sm:$0xff] }
 0x62e   : > { %13575 = vmatprep.subr.bf16.mxu0 %v16262_v24  ;;  %v16424_v24 = vcombine.high %v1034_v11, %v1038_v12  ;;  %v1070_v0 = vld [vmem:[%s18230_s11 + $0x1960] sm:$0xff] }
 0x62f   : > { %13738 = vmatpush1.bf16.xpose.msra.mxu1 %v16381_v22  ;;  %v16543_v22 = vcombine.low %v1154_v1, %v1158_v35  ;;  %v1194_v1 = vld [vmem:[%s18230_s11 + $0x1d40] sm:$0xff] }
 0x630   : > { %13739 = vmatprep.subr.bf16.mxu1 %v16390_v25  ;;  %v16552_v25 = vcombine.high %v1162_v15, %v1166_v18  ;;  %v1198_v35 = vld [vmem:[%s18230_s11 + $0x1d60] sm:$0xff] }
 0x635   : > { %13576 = vmatpush1.bf16.xpose.msra.mxu0 %v16261_v32  ;;  %v16423_v32 = vcombine.low %v1034_v11, %v1038_v12  ;;  %v1074_v11 = vld [vmem:[%s18230_s11 + $0x1980] sm:$0xff] }
 0x636   : > { %13577 = vmatprep.subr.bf16.mxu0 %v16270_v37  ;;  %v16432_v37 = vcombine.high %v1042_v26, %v1046_v29  ;;  %v1078_v12 = vld [vmem:[%s18230_s11 + $0x19a0] sm:$0xff] }
 0x637   : > { %13740 = vmatpush1.bf16.xpose.msra.mxu1 %v16389_v33  ;;  %v16551_v33 = vcombine.low %v1162_v15, %v1166_v18  ;;  %v1202_v15 = vld [vmem:[%s18230_s11 + $0x1d80] sm:$0xff] }
 0x638   : > { %13741 = vmatprep.subr.bf16.mxu1 %v16398_v38  ;;  %v16560_v38 = vcombine.high %v1170_v30, %v1174_v39  ;;  %v1206_v18 = vld [vmem:[%s18230_s11 + $0x1da0] sm:$0xff] }
 0x63d   : > { %13578 = vmatpush1.bf16.xpose.msra.mxu0 %v16269_v36  ;;  %v16431_v36 = vcombine.low %v1042_v26, %v1046_v29  ;;  %v1082_v26 = vld [vmem:[%s18230_s11 + $0x19c0] sm:$0xff] }
 0x63e   : > { %13579 = vmatprep.subr.bf16.mxu0 %v16278_v48  ;;  %v16440_v48 = vcombine.high %v1050_v40, %v1054_v43  ;;  %v1086_v29 = vld [vmem:[%s18230_s11 + $0x19e0] sm:$0xff] }
 0x63f   : > { %13742 = vmatpush1.bf16.xpose.msra.mxu1 %v16397_v46  ;;  %v16559_v46 = vcombine.low %v1170_v30, %v1174_v39  ;;  %v1210_v30 = vld [vmem:[%s18230_s11 + $0x1dc0] sm:$0xff] }
 0x640   : > { %13743 = vmatprep.subr.bf16.mxu1 %v16406_v49  ;;  %v16568_v49 = vcombine.high %v1178_v44, %v1182_v45  ;;  %v1214_v39 = vld [vmem:[%s18230_s11 + $0x1de0] sm:$0xff] }
 0x645   : > { %13580 = vmatpush1.bf16.xpose.msra.mxu0 %v16277_v58  ;;  %v16439_v58 = vcombine.low %v1050_v40, %v1054_v43  ;;  %v1090_v40 = vld [vmem:[%s18230_s11 + $0x1a00] sm:$0xff] }
 0x646   : > { %13581 = vmatprep.subr.bf16.mxu0 %v16286_v62  ;;  %v16448_v62 = vcombine.high %v1058_v51, %v1062_v53  ;;  %v1094_v43 = vld [vmem:[%s18230_s11 + $0x1a20] sm:$0xff] }
 0x647   : > { %13744 = vmatpush1.bf16.xpose.msra.mxu1 %v16405_v60  ;;  %v16567_v60 = vcombine.low %v1178_v44, %v1182_v45  ;;  %v1218_v44 = vld [vmem:[%s18230_s11 + $0x1e00] sm:$0xff] }
 0x648   : > { %13745 = vmatprep.subr.bf16.mxu1 %v16414_v3  ;;  %v16576_v3 = vcombine.high %v1186_v54, %v1190_v55  ;;  %v1222_v45 = vld [vmem:[%s18230_s11 + $0x1e20] sm:$0xff] }
 0x64d   : > { %13582 = vmatpush1.bf16.xpose.msra.mxu0 %v16285_v28  ;;  %v16447_v28 = vcombine.low %v1058_v51, %v1062_v53  ;;  %v1098_v51 = vld [vmem:[%s18230_s11 + $0x1a40] sm:$0xff] }
 0x64e   : > { %13756 = vmatprep.subr.bf16.mxu0 %v16416_v8  ;;  %v16456_v8 = vcombine.high %v1066_v63, %v1070_v0  ;;  %v1102_v53 = vld [vmem:[%s18230_s11 + $0x1a60] sm:$0xff] }
 0x64f   : > { %13746 = vmatpush1.bf16.xpose.msra.mxu1 %v16413_v5  ;;  %v16575_v5 = vcombine.low %v1186_v54, %v1190_v55  ;;  %v1226_v54 = vld [vmem:[%s18230_s11 + $0x1e40] sm:$0xff] }
 0x650   : > { %13920 = vmatprep.subr.bf16.mxu1 %v16544_v14  ;;  %v16584_v14 = vcombine.high %v1194_v1, %v1198_v35  ;;  %v1230_v55 = vld [vmem:[%s18230_s11 + $0x1e60] sm:$0xff] }
 0x654   : > { %13584 = vmatmul.mubr.bf16.vlgmr.msra.gmra.mrb[8].mxu0 %v18569_v13 }
 0x655   : > { %13757 = vmatpush1.bf16.xpose.msra.mxu0 %v16415_v19  ;;  %13788 = vmatprep.mubr.bf16.mxu0 %v18279_v47  ;;  %v16455_v19 = vcombine.low %v1066_v63, %v1070_v0  ;;  %v1106_v63 = vld [vmem:[%s18230_s11 + $0x1a80] sm:$0xff] }
 0x656   : > { %13748 = vmatmul.mubr.bf16.vlgmr.msra.gmra.mrb[8].mxu1 %v18569_v13  ;;  %13758 = vmatprep.subr.bf16.mxu0 %v16424_v24  ;;  %v16464_v24 = vcombine.high %v1074_v11, %v1078_v12  ;;  %v1110_v0 = vld [vmem:[%s18230_s11 + $0x1aa0] sm:$0xff] }
 0x657   : > { %13921 = vmatpush1.bf16.xpose.msra.mxu1 %v16543_v22  ;;  %13952 = vmatprep.mubr.bf16.mxu1 %v18279_v47  ;;  %v16583_v22 = vcombine.low %v1194_v1, %v1198_v35  ;;  %v1234_v1 = vld [vmem:[%s18230_s11 + $0x1e80] sm:$0xff] }
 0x658   : > { %13922 = vmatprep.subr.bf16.mxu1 %v16552_v25  ;;  %v16592_v25 = vcombine.high %v1202_v15, %v1206_v18  ;;  %v1238_v35 = vld [vmem:[%s18230_s11 + $0x1ea0] sm:$0xff] }
 0x65d   : > { %13759 = vmatpush1.bf16.xpose.msra.mxu0 %v16423_v32  ;;  %v16463_v32 = vcombine.low %v1074_v11, %v1078_v12  ;;  %v1114_v11 = vld [vmem:[%s18230_s11 + $0x1ac0] sm:$0xff] }
 0x65e   : > { %13760 = vmatprep.subr.bf16.mxu0 %v16432_v37  ;;  %v16472_v37 = vcombine.high %v1082_v26, %v1086_v29  ;;  %v1118_v12 = vld [vmem:[%s18230_s11 + $0x1ae0] sm:$0xff] }
 0x65f   : > { %13923 = vmatpush1.bf16.xpose.msra.mxu1 %v16551_v33  ;;  %v16591_v33 = vcombine.low %v1202_v15, %v1206_v18  ;;  %v1242_v15 = vld [vmem:[%s18230_s11 + $0x1ec0] sm:$0xff] }
 0x660   : > { %13924 = vmatprep.subr.bf16.mxu1 %v16560_v38  ;;  %v16600_v38 = vcombine.high %v1210_v30, %v1214_v39  ;;  %v1246_v18 = vld [vmem:[%s18230_s11 + $0x1ee0] sm:$0xff] }
 0x665   : > { %13761 = vmatpush1.bf16.xpose.msra.mxu0 %v16431_v36  ;;  %v16471_v36 = vcombine.low %v1082_v26, %v1086_v29  ;;  %v1122_v26 = vld [vmem:[%s18230_s11 + $0x1b00] sm:$0xff] }
 0x666   : > { %13762 = vmatprep.subr.bf16.mxu0 %v16440_v48  ;;  %v16480_v48 = vcombine.high %v1090_v40, %v1094_v43  ;;  %v1126_v29 = vld [vmem:[%s18230_s11 + $0x1b20] sm:$0xff] }
 0x667   : > { %13925 = vmatpush1.bf16.xpose.msra.mxu1 %v16559_v46  ;;  %v16599_v46 = vcombine.low %v1210_v30, %v1214_v39  ;;  %v1250_v30 = vld [vmem:[%s18230_s11 + $0x1f00] sm:$0xff] }
 0x668   : > { %13926 = vmatprep.subr.bf16.mxu1 %v16568_v49  ;;  %v16608_v49 = vcombine.high %v1218_v44, %v1222_v45  ;;  %v1254_v39 = vld [vmem:[%s18230_s11 + $0x1f20] sm:$0xff] }
 0x66d   : > { %13763 = vmatpush1.bf16.xpose.msra.mxu0 %v16439_v58  ;;  %v16479_v58 = vcombine.low %v1090_v40, %v1094_v43  ;;  %v1130_v40 = vld [vmem:[%s18230_s11 + $0x1b40] sm:$0xff] }
 0x66e   : > { %13764 = vmatprep.subr.bf16.mxu0 %v16448_v62  ;;  %v16488_v62 = vcombine.high %v1098_v51, %v1102_v53  ;;  %v1134_v43 = vld [vmem:[%s18230_s11 + $0x1b60] sm:$0xff] }
 0x66f   : > { %13927 = vmatpush1.bf16.xpose.msra.mxu1 %v16567_v60  ;;  %v16607_v60 = vcombine.low %v1218_v44, %v1222_v45  ;;  %v1258_v44 = vld [vmem:[%s18230_s11 + $0x1f40] sm:$0xff] }
 0x670   : > { %13928 = vmatprep.subr.bf16.mxu1 %v16576_v3  ;;  %v16616_v3 = vcombine.high %v1226_v54, %v1230_v55  ;;  %v1262_v45 = vld [vmem:[%s18230_s11 + $0x1f60] sm:$0xff] }
 0x675   : > { %13765 = vmatpush1.bf16.xpose.msra.mxu0 %v16447_v28  ;;  %v16487_v28 = vcombine.low %v1098_v51, %v1102_v53  ;;  %v1138_v51 = vld [vmem:[%s18230_s11 + $0x1b80] sm:$0xff] }
 0x676   : > { %13766 = vmatprep.subr.bf16.mxu0 %v16456_v8  ;;  %v16496_v8 = vcombine.high %v1106_v63, %v1110_v0  ;;  %v1142_v53 = vld [vmem:[%s18230_s11 + $0x1ba0] sm:$0xff] }
 0x677   : > { %13929 = vmatpush1.bf16.xpose.msra.mxu1 %v16575_v5  ;;  %v16615_v5 = vcombine.low %v1226_v54, %v1230_v55  ;;  %v1266_v54 = vld [vmem:[%s18230_s11 + $0x1f80] sm:$0xff] }
 0x678   : > { %13930 = vmatprep.subr.bf16.mxu1 %v16584_v14  ;;  %v16624_v14 = vcombine.high %v1234_v1, %v1238_v35  ;;  %v1270_v55 = vld [vmem:[%s18230_s11 + $0x1fa0] sm:$0xff] }
 0x67d   : > { %13767 = vmatpush1.bf16.xpose.msra.mxu0 %v16455_v19  ;;  %v16495_v19 = vcombine.low %v1106_v63, %v1110_v0  ;;  %v1146_v63 = vld [vmem:[%s18230_s11 + $0x1bc0] sm:$0xff] }
 0x67e   : > { %13768 = vmatprep.subr.bf16.mxu0 %v16464_v24  ;;  %v16504_v24 = vcombine.high %v1114_v11, %v1118_v12  ;;  %v1150_v0 = vld [vmem:[%s18230_s11 + $0x1be0] sm:$0xff] }
 0x67f   : > { %13931 = vmatpush1.bf16.xpose.msra.mxu1 %v16583_v22  ;;  %v16623_v22 = vcombine.low %v1234_v1, %v1238_v35  ;;  %v1274_v1 = vld [vmem:[%s18230_s11 + $0x1fc0] sm:$0xff] }
 0x680   : > { %13932 = vmatprep.subr.bf16.mxu1 %v16592_v25  ;;  %v16632_v25 = vcombine.high %v1242_v15, %v1246_v18  ;;  %v1278_v35 = vld [vmem:[%s18230_s11 + $0x1fe0] sm:$0xff] }
 0x685   : > { %13769 = vmatpush1.bf16.xpose.msra.mxu0 %v16463_v32  ;;  %v16503_v32 = vcombine.low %v1114_v11, %v1118_v12  ;;  %v1027_v11 = vld [vmem:[%s18230_s11 + $0x1808] sm:$0xff] }
 0x686   : > { %13770 = vmatprep.subr.bf16.mxu0 %v16472_v37  ;;  %v16512_v37 = vcombine.high %v1122_v26, %v1126_v29  ;;  %v1031_v12 = vld [vmem:[%s18230_s11 + $0x1828] sm:$0xff] }
 0x687   : > { %13933 = vmatpush1.bf16.xpose.msra.mxu1 %v16591_v33  ;;  %v16631_v33 = vcombine.low %v1242_v15, %v1246_v18  ;;  %v1155_v15 = vld [vmem:[%s18230_s11 + $0x1c08] sm:$0xff] }
 0x688   : > { %13934 = vmatprep.subr.bf16.mxu1 %v16600_v38  ;;  %v16640_v38 = vcombine.high %v1250_v30, %v1254_v39  ;;  %v1159_v18 = vld [vmem:[%s18230_s11 + $0x1c28] sm:$0xff] }
 0x68d   : > { %13771 = vmatpush1.bf16.xpose.msra.mxu0 %v16471_v36  ;;  %v16511_v36 = vcombine.low %v1122_v26, %v1126_v29  ;;  %v1035_v26 = vld [vmem:[%s18230_s11 + $0x1848] sm:$0xff] }
 0x68e   : > { %13772 = vmatprep.subr.bf16.mxu0 %v16480_v48  ;;  %v16520_v48 = vcombine.high %v1130_v40, %v1134_v43  ;;  %v1039_v29 = vld [vmem:[%s18230_s11 + $0x1868] sm:$0xff] }
 0x68f   : > { %13935 = vmatpush1.bf16.xpose.msra.mxu1 %v16599_v46  ;;  %v16639_v46 = vcombine.low %v1250_v30, %v1254_v39  ;;  %v1163_v30 = vld [vmem:[%s18230_s11 + $0x1c48] sm:$0xff] }
 0x690   : > { %13936 = vmatprep.subr.bf16.mxu1 %v16608_v49  ;;  %v16648_v49 = vcombine.high %v1258_v44, %v1262_v45  ;;  %v1167_v39 = vld [vmem:[%s18230_s11 + $0x1c68] sm:$0xff] }
 0x695   : > { %13773 = vmatpush1.bf16.xpose.msra.mxu0 %v16479_v58  ;;  %v16519_v58 = vcombine.low %v1130_v40, %v1134_v43  ;;  %v1043_v40 = vld [vmem:[%s18230_s11 + $0x1888] sm:$0xff] }
 0x696   : > { %13774 = vmatprep.subr.bf16.mxu0 %v16488_v62  ;;  %v16528_v62 = vcombine.high %v1138_v51, %v1142_v53  ;;  %v1047_v43 = vld [vmem:[%s18230_s11 + $0x18a8] sm:$0xff] }
 0x697   : > { %13937 = vmatpush1.bf16.xpose.msra.mxu1 %v16607_v60  ;;  %v16647_v60 = vcombine.low %v1258_v44, %v1262_v45  ;;  %v1171_v44 = vld [vmem:[%s18230_s11 + $0x1c88] sm:$0xff] }
 0x698   : > { %13938 = vmatprep.subr.bf16.mxu1 %v16616_v3  ;;  %v16656_v3 = vcombine.high %v1266_v54, %v1270_v55  ;;  %v1175_v45 = vld [vmem:[%s18230_s11 + $0x1ca8] sm:$0xff] }
 0x69d   : > { %13775 = vmatpush1.bf16.xpose.msra.mxu0 %v16487_v28  ;;  %v16527_v28 = vcombine.low %v1138_v51, %v1142_v53  ;;  %v1051_v51 = vld [vmem:[%s18230_s11 + $0x18c8] sm:$0xff] }
 0x69e   : > { %13776 = vmatprep.subr.bf16.mxu0 %v16496_v8  ;;  %v16536_v8 = vcombine.high %v1146_v63, %v1150_v0  ;;  %v1055_v53 = vld [vmem:[%s18230_s11 + $0x18e8] sm:$0xff] }
 0x69f   : > { %13939 = vmatpush1.bf16.xpose.msra.mxu1 %v16615_v5  ;;  %v16655_v5 = vcombine.low %v1266_v54, %v1270_v55  ;;  %v1179_v54 = vld [vmem:[%s18230_s11 + $0x1cc8] sm:$0xff] }
 0x6a0   : > { %13940 = vmatprep.subr.bf16.mxu1 %v16624_v14  ;;  %v16664_v14 = vcombine.high %v1274_v1, %v1278_v35  ;;  %v1183_v55 = vld [vmem:[%s18230_s11 + $0x1ce8] sm:$0xff] }
 0x6a5   : > { %13777 = vmatpush1.bf16.xpose.msra.mxu0 %v16495_v19  ;;  %v16535_v19 = vcombine.low %v1146_v63, %v1150_v0  ;;  %v1059_v63 = vld [vmem:[%s18230_s11 + $0x1908] sm:$0xff] }
 0x6a6   : > { %13778 = vmatprep.subr.bf16.mxu0 %v16504_v24  ;;  %v16418_v24 = vcombine.high %v1027_v11, %v1031_v12  ;;  %v1063_v0 = vld [vmem:[%s18230_s11 + $0x1928] sm:$0xff] }
 0x6a7   : > { %13941 = vmatpush1.bf16.xpose.msra.mxu1 %v16623_v22  ;;  %v16663_v22 = vcombine.low %v1274_v1, %v1278_v35  ;;  %v1187_v1 = vld [vmem:[%s18230_s11 + $0x1d08] sm:$0xff] }
 0x6a8   : > { %13942 = vmatprep.subr.bf16.mxu1 %v16632_v25  ;;  %v16546_v25 = vcombine.high %v1155_v15, %v1159_v18  ;;  %v1191_v35 = vld [vmem:[%s18230_s11 + $0x1d28] sm:$0xff] }
 0x6ad   : > { %13779 = vmatpush1.bf16.xpose.msra.mxu0 %v16503_v32  ;;  %v16417_v32 = vcombine.low %v1027_v11, %v1031_v12  ;;  %v1067_v11 = vld [vmem:[%s18230_s11 + $0x1948] sm:$0xff] }
 0x6ae   : > { %13780 = vmatprep.subr.bf16.mxu0 %v16512_v37  ;;  %v16426_v37 = vcombine.high %v1035_v26, %v1039_v29  ;;  %v1071_v12 = vld [vmem:[%s18230_s11 + $0x1968] sm:$0xff] }
 0x6af   : > { %13943 = vmatpush1.bf16.xpose.msra.mxu1 %v16631_v33  ;;  %v16545_v33 = vcombine.low %v1155_v15, %v1159_v18  ;;  %v1195_v15 = vld [vmem:[%s18230_s11 + $0x1d48] sm:$0xff] }
 0x6b0   : > { %13944 = vmatprep.subr.bf16.mxu1 %v16640_v38  ;;  %v16554_v38 = vcombine.high %v1163_v30, %v1167_v39  ;;  %v1199_v18 = vld [vmem:[%s18230_s11 + $0x1d68] sm:$0xff] }
 0x6b5   : > { %13781 = vmatpush1.bf16.xpose.msra.mxu0 %v16511_v36  ;;  %v16425_v36 = vcombine.low %v1035_v26, %v1039_v29  ;;  %v1075_v26 = vld [vmem:[%s18230_s11 + $0x1988] sm:$0xff] }
 0x6b6   : > { %13782 = vmatprep.subr.bf16.mxu0 %v16520_v48  ;;  %v16434_v48 = vcombine.high %v1043_v40, %v1047_v43  ;;  %v1079_v29 = vld [vmem:[%s18230_s11 + $0x19a8] sm:$0xff] }
 0x6b7   : > { %13945 = vmatpush1.bf16.xpose.msra.mxu1 %v16639_v46  ;;  %v16553_v46 = vcombine.low %v1163_v30, %v1167_v39  ;;  %v1203_v30 = vld [vmem:[%s18230_s11 + $0x1d88] sm:$0xff] }
 0x6b8   : > { %13946 = vmatprep.subr.bf16.mxu1 %v16648_v49  ;;  %v16562_v49 = vcombine.high %v1171_v44, %v1175_v45  ;;  %v1207_v39 = vld [vmem:[%s18230_s11 + $0x1da8] sm:$0xff] }
 0x6bd   : > { %13783 = vmatpush1.bf16.xpose.msra.mxu0 %v16519_v58  ;;  %v16433_v58 = vcombine.low %v1043_v40, %v1047_v43  ;;  %v1083_v40 = vld [vmem:[%s18230_s11 + $0x19c8] sm:$0xff] }
 0x6be   : > { %13784 = vmatprep.subr.bf16.mxu0 %v16528_v62  ;;  %v16442_v62 = vcombine.high %v1051_v51, %v1055_v53  ;;  %v1087_v43 = vld [vmem:[%s18230_s11 + $0x19e8] sm:$0xff] }
 0x6bf   : > { %13947 = vmatpush1.bf16.xpose.msra.mxu1 %v16647_v60  ;;  %v16561_v60 = vcombine.low %v1171_v44, %v1175_v45  ;;  %v1211_v44 = vld [vmem:[%s18230_s11 + $0x1dc8] sm:$0xff] }
 0x6c0   : > { %13948 = vmatprep.subr.bf16.mxu1 %v16656_v3  ;;  %v16570_v3 = vcombine.high %v1179_v54, %v1183_v55  ;;  %v1215_v45 = vld [vmem:[%s18230_s11 + $0x1de8] sm:$0xff] }
 0x6c5   : > { %13785 = vmatpush1.bf16.xpose.msra.mxu0 %v16527_v28  ;;  %v16441_v28 = vcombine.low %v1051_v51, %v1055_v53  ;;  %v1091_v51 = vld [vmem:[%s18230_s11 + $0x1a08] sm:$0xff] }
 0x6c6   : > { %13786 = vmatprep.subr.bf16.mxu0 %v16536_v8  ;;  %v16450_v8 = vcombine.high %v1059_v63, %v1063_v0  ;;  %v1095_v53 = vld [vmem:[%s18230_s11 + $0x1a28] sm:$0xff] }
 0x6c7   : > { %13949 = vmatpush1.bf16.xpose.msra.mxu1 %v16655_v5  ;;  %v16569_v5 = vcombine.low %v1179_v54, %v1183_v55  ;;  %v1219_v54 = vld [vmem:[%s18230_s11 + $0x1e08] sm:$0xff] }
 0x6c8   : > { %13950 = vmatprep.subr.bf16.mxu1 %v16664_v14  ;;  %v16578_v14 = vcombine.high %v1187_v1, %v1191_v35  ;;  %v1223_v55 = vld [vmem:[%s18230_s11 + $0x1e28] sm:$0xff] }
 0x6cd   : > { %13787 = vmatpush1.bf16.xpose.msra.mxu0 %v16535_v19  ;;  %v16449_v19 = vcombine.low %v1059_v63, %v1063_v0  ;;  %v1099_v63 = vld [vmem:[%s18230_s11 + $0x1a48] sm:$0xff] }
 0x6ce   : > { %13797 = vmatprep.subr.bf16.mxu0 %v16418_v24  ;;  %v16458_v24 = vcombine.high %v1067_v11, %v1071_v12  ;;  %v1103_v0 = vld [vmem:[%s18230_s11 + $0x1a68] sm:$0xff] }
 0x6cf   : > { %13951 = vmatpush1.bf16.xpose.msra.mxu1 %v16663_v22  ;;  %v16577_v22 = vcombine.low %v1187_v1, %v1191_v35  ;;  %v1227_v1 = vld [vmem:[%s18230_s11 + $0x1e48] sm:$0xff] }
 0x6d0   : > { %13961 = vmatprep.subr.bf16.mxu1 %v16546_v25  ;;  %v16586_v25 = vcombine.high %v1195_v15, %v1199_v18  ;;  %v1231_v35 = vld [vmem:[%s18230_s11 + $0x1e68] sm:$0xff] }
 0x6d4   : > { %13789 = vmatmul.mubr.bf16.vlgmr.msra.gmra.mrb[12].mxu0 %v18335_v23 }
 0x6d5   : > { %13798 = vmatpush1.bf16.xpose.msra.mxu0 %v16417_v32  ;;  %13829 = vmatprep.mubr.bf16.mxu0 %v18341_v31  ;;  %v16457_v32 = vcombine.low %v1067_v11, %v1071_v12  ;;  %v1107_v11 = vld [vmem:[%s18230_s11 + $0x1a88] sm:$0xff] }
 0x6d6   : > { %13953 = vmatmul.mubr.bf16.vlgmr.msra.gmra.mrb[12].mxu1 %v18335_v23  ;;  %13799 = vmatprep.subr.bf16.mxu0 %v16426_v37  ;;  %v16466_v37 = vcombine.high %v1075_v26, %v1079_v29  ;;  %v1111_v12 = vld [vmem:[%s18230_s11 + $0x1aa8] sm:$0xff] }
 0x6d7   : > { %13962 = vmatpush1.bf16.xpose.msra.mxu1 %v16545_v33  ;;  %13993 = vmatprep.mubr.bf16.mxu1 %v18341_v31  ;;  %v16585_v33 = vcombine.low %v1195_v15, %v1199_v18  ;;  %v1235_v15 = vld [vmem:[%s18230_s11 + $0x1e88] sm:$0xff] }
 0x6d8   : > { %13963 = vmatprep.subr.bf16.mxu1 %v16554_v38  ;;  %v16594_v38 = vcombine.high %v1203_v30, %v1207_v39  ;;  %v1239_v18 = vld [vmem:[%s18230_s11 + $0x1ea8] sm:$0xff] }
 0x6dd   : > { %13800 = vmatpush1.bf16.xpose.msra.mxu0 %v16425_v36  ;;  %v16465_v36 = vcombine.low %v1075_v26, %v1079_v29  ;;  %v1115_v26 = vld [vmem:[%s18230_s11 + $0x1ac8] sm:$0xff] }
 0x6de   : > { %13801 = vmatprep.subr.bf16.mxu0 %v16434_v48  ;;  %v16474_v48 = vcombine.high %v1083_v40, %v1087_v43  ;;  %v1119_v29 = vld [vmem:[%s18230_s11 + $0x1ae8] sm:$0xff] }
 0x6df   : > { %13964 = vmatpush1.bf16.xpose.msra.mxu1 %v16553_v46  ;;  %v16593_v46 = vcombine.low %v1203_v30, %v1207_v39  ;;  %v1243_v30 = vld [vmem:[%s18230_s11 + $0x1ec8] sm:$0xff] }
 0x6e0   : > { %13965 = vmatprep.subr.bf16.mxu1 %v16562_v49  ;;  %v16602_v49 = vcombine.high %v1211_v44, %v1215_v45  ;;  %v1247_v39 = vld [vmem:[%s18230_s11 + $0x1ee8] sm:$0xff] }
 0x6e5   : > { %13802 = vmatpush1.bf16.xpose.msra.mxu0 %v16433_v58  ;;  %v16473_v58 = vcombine.low %v1083_v40, %v1087_v43  ;;  %v16634_v40 = vcombine.high %v1243_v30, %v1247_v39 }
 0x6e6   : > { %13803 = vmatprep.subr.bf16.mxu0 %v16442_v62  ;;  %v16482_v62 = vcombine.high %v1091_v51, %v1095_v53 }
 0x6e7   : > { %13966 = vmatpush1.bf16.xpose.msra.mxu1 %v16561_v60  ;;  %v16601_v60 = vcombine.low %v1211_v44, %v1215_v45 }
 0x6e8   : > { %13967 = vmatprep.subr.bf16.mxu1 %v16570_v3  ;;  %v16610_v3 = vcombine.high %v1219_v54, %v1223_v55 }
 0x6ed   : > { %13804 = vmatpush1.bf16.xpose.msra.mxu0 %v16441_v28  ;;  %v16481_v28 = vcombine.low %v1091_v51, %v1095_v53 }
 0x6ee   : > { %13805 = vmatprep.subr.bf16.mxu0 %v16450_v8  ;;  %v16490_v8 = vcombine.high %v1099_v63, %v1103_v0 }
 0x6ef   : > { %13968 = vmatpush1.bf16.xpose.msra.mxu1 %v16569_v5  ;;  %v16609_v5 = vcombine.low %v1219_v54, %v1223_v55  ;;  %v1251_v55 = vld [vmem:[%s18230_s11 + $0x1f08] sm:$0xff] }
 0x6f0   : > { %13969 = vmatprep.subr.bf16.mxu1 %v16578_v14  ;;  %v16618_v14 = vcombine.high %v1227_v1, %v1231_v35 }
 0x6f5   : > { %13806 = vmatpush1.bf16.xpose.msra.mxu0 %v16449_v19  ;;  %v16489_v19 = vcombine.low %v1099_v63, %v1103_v0  ;;  %v16505_v0 = vcombine.low %v1115_v26, %v1119_v29 }
 0x6f6   : > { %13807 = vmatprep.subr.bf16.mxu0 %v16458_v24  ;;  %v16498_v24 = vcombine.high %v1107_v11, %v1111_v12 }
 0x6f7   : > { %13970 = vmatpush1.bf16.xpose.msra.mxu1 %v16577_v22  ;;  %v16617_v22 = vcombine.low %v1227_v1, %v1231_v35 }
 0x6f8   : > { %13971 = vmatprep.subr.bf16.mxu1 %v16586_v25  ;;  %v16626_v25 = vcombine.high %v1235_v15, %v1239_v18 }
 0x6fd   : > { %13808 = vmatpush1.bf16.xpose.msra.mxu0 %v16457_v32  ;;  %v16497_v32 = vcombine.low %v1107_v11, %v1111_v12 }
 0x6fe   : > { %13809 = vmatprep.subr.bf16.mxu0 %v16466_v37  ;;  %v16625_v37 = vcombine.low %v1235_v15, %v1239_v18 }
 0x6ff   : > { %13972 = vmatpush1.bf16.xpose.msra.mxu1 %v16585_v33  ;;  %v2307_v33 = vld [vmem:[%s18236_s6 + $0x8] sm:$0xff] }
 0x700   : > { %13973 = vmatprep.subr.bf16.mxu1 %v16594_v38  ;;  %v16506_v38 = vcombine.high %v1115_v26, %v1119_v29  ;;  %v12647_v43 = vrot.slane %v2307_v33, %v18684_v2  ;;  %v12655_v44 = vrot.slane %v2307_v33, %v18690_v6  ;;  %v12651_v45 = vrot.slane %v2307_v33, %v18693_v7  ;;  %v1131_v29 = vld [vmem:[%s18230_s11 + $0x1b48] sm:$0xff] }
 0x705   : > { %13810 = vmatpush1.bf16.xpose.msra.mxu0 %v16465_v36  ;;  %v12659_v36 = vrot.slane %v2307_v33, %v18696_v9  ;;  %v1263_v33 = vld [vmem:[%s18230_s11 + $0x1f68] sm:$0xff] }
 0x706   : > { %13811 = vmatprep.subr.bf16.mxu0 %v16474_v48  ;;  %v1123_v48 = vld [vmem:[%s18230_s11 + $0x1b08] sm:$0xff] }
 0x707   : > { %13974 = vmatpush1.bf16.xpose.msra.mxu1 %v16593_v46 }
 0x708   : > { %13975 = vmatprep.subr.bf16.mxu1 %v16602_v49  ;;  %v1127_v49 = vld [vmem:[%s18230_s11 + $0x1b28] sm:$0xff] }
 0x70d   : > { %13812 = vmatpush1.bf16.xpose.msra.mxu0 %v16473_v58  ;;  %v1255_v58 = vld [vmem:[%s18230_s11 + $0x1f28] sm:$0xff] }
 0x70e   : > { %13813 = vmatprep.subr.bf16.mxu0 %v16482_v62  ;;  %v16642_v18 = vcombine.high %v1251_v55, %v1255_v58 }
 0x70f   : > { %13976 = vmatpush1.bf16.xpose.msra.mxu1 %v16601_v60 }
 0x710   : > { %13977 = vmatprep.subr.bf16.mxu1 %v16610_v3 }
 0x715   : > { %13814 = vmatpush1.bf16.xpose.msra.mxu0 %v16481_v28 }
 0x716   : > { %13815 = vmatprep.subr.bf16.mxu0 %v16490_v8  ;;  %v16633_v8 = vcombine.low %v1243_v30, %v1247_v39  ;;  %v1135_v30 = vld [vmem:[%s18230_s11 + $0x1b68] sm:$0xff] }
 0x717   : > { %13978 = vmatpush1.bf16.xpose.msra.mxu1 %v16609_v5 }
 0x718   : > { %13979 = vmatprep.subr.bf16.mxu1 %v16618_v14  ;;  %v16514_v14 = vcombine.high %v1123_v48, %v1127_v49 }
 0x71d   : > { %13816 = vmatpush1.bf16.xpose.msra.mxu0 %v16489_v19 }
 0x71e   : > { %13817 = vmatprep.subr.bf16.mxu0 %v16498_v24 }
 0x71f   : > { %13980 = vmatpush1.bf16.xpose.msra.mxu1 %v16617_v22 }
 0x720   : > { %13981 = vmatprep.subr.bf16.mxu1 %v16626_v25 }
 0x725   : > { %13818 = vmatpush1.bf16.xpose.msra.mxu0 %v16497_v32  ;;  %v1259_v32 = vld [vmem:[%s18230_s11 + $0x1f48] sm:$0xff] }
 0x726   : > { %13819 = vmatprep.subr.bf16.mxu0 %v16506_v38  ;;  %v16513_v38 = vcombine.low %v1123_v48, %v1127_v49 }
 0x727   : > { %13982 = vmatpush1.bf16.xpose.msra.mxu1 %v16625_v37  ;;  %v13585_v46 = vpop.f32.mrb[8].mxu0 }
 0x728   : > { %13983 = vmatprep.subr.bf16.mxu1 %v16634_v40  ;;  %v17708_v51 = vadd.f32 %v13585_v46, %v12647_v43  ;;  %v13587_v54 = vpop.f32.mrb[9].mxu0  ;;  %v16641_v43 = vcombine.low %v1251_v55, %v1255_v58  ;;  %v1143_v46 = vld [vmem:[%s18230_s11 + $0x1ba8] sm:$0xff] }
 0x729   : > { %v13749_v53 = vpop.f32.mrb[8].mxu1  ;;  %v17709_v62 = vadd.f32 %v13587_v54, %v12651_v45  ;;  %v13589_v63 = vpop.f32.mrb[10].mxu0  ;;  %v16650_v45 = vcombine.high %v1259_v32, %v1263_v33  ;;  %v16521_v54 = vcombine.low %v1131_v29, %v1135_v30  ;;  %v1147_v55 = vld [vmem:[%s18230_s11 + $0x1bc8] sm:$0xff] }
 0x72a   : > { %v17710_v60 = vadd.f32 %v13749_v53, %v12655_v44  ;;  %v13751_v3 = vpop.f32.mrb[9].mxu1  ;;  %v15467_v1 = vmul.f32 %v17708_v51, %v18705_v17  ;;  %v13590_v5 = vpop.f32.mrb[11].mxu0  ;;  %v16522_v44 = vcombine.high %v1131_v29, %v1135_v30  ;;  %v1267_v51 = vld [vmem:[%s18230_s11 + $0x1f88] sm:$0xff] }
 0x72b   : > { %v17711_v35 = vadd.f32 %v13751_v3, %v12659_v36  ;;  %v13753_v28 = vpop.f32.mrb[10].mxu1  ;;  %v15468_v12 = vmul.f32 %v17709_v62, %v18712_v21  ;;  %v1139_v36 = vld [vmem:[%s18230_s11 + $0x1b88] sm:$0xff]  ;;  %v1032_v5 = vld [vmem:[%s18230_s11 + $0x1830] sm:$0xff] }
 0x72c   : > { %v15469_v11 = vmul.f32 %v17710_v60, %v18709_v20  ;;  %v13754_v15 = vpop.f32.mrb[11].mxu1  ;;  %v15475_v19 = vsel %vm15447_vm0, %v15467_v1, 0.0  ;;  %v1271_v53 = vld [vmem:[%s18230_s11 + $0x1fa8] sm:$0xff]  ;;  %v16649_v60 = vcombine.low %v1259_v32, %v1263_v33  ;;  %v16530_v48 = vcombine.high %v1139_v36, %v1143_v46  ;;  %v1028_v28 = vld [vmem:[%s18230_s11 + $0x1810] sm:$0xff] }
 0x72d   : > { %v15476_v22 = vsel %vm15447_vm0, %v15468_v12, 0.0  ;;  %v15470_v24 = vmul.f32 %v17711_v35, %v18719_v34  ;;  %13820 = vmatpush1.bf16.xpose.msra.mxu0 %v16505_v0  ;;  %v16658_v49 = vcombine.high %v1267_v51, %v1271_v53  ;;  %v1151_v58 = vld [vmem:[%s18230_s11 + $0x1be8] sm:$0xff]  ;;  %v16529_v63 = vcombine.low %v1139_v36, %v1143_v46  ;;  %v1044_v32 = vld [vmem:[%s18230_s11 + $0x1890] sm:$0xff] }
 0x72e   : > { %v15477_v25 = vadd.f32 %v15476_v22, %v15475_v19  ;;  %13821 = vmatprep.subr.bf16.mxu0 %v16514_v14  ;;  %v15478_v26 = vsel %vm15447_vm0, %v15469_v11, 0.0  ;;  %v1275_v62 = vld [vmem:[%s18230_s11 + $0x1fc8] sm:$0xff]  ;;  %v16657_v0 = vcombine.low %v1267_v51, %v1271_v53  ;;  %v16538_v1 = vcombine.high %v1147_v55, %v1151_v58  ;;  %v1160_v14 = vld [vmem:[%s18230_s11 + $0x1c30] sm:$0xff] }
 0x72f   : > { %13984 = vmatpush1.bf16.xpose.msra.mxu1 %v16633_v8  ;;  %v15480_v37 = vsel %vm15447_vm0, %v15470_v24, 0.0  ;;  %v1279_v3 = vld [vmem:[%s18230_s11 + $0x1fe8] sm:$0xff]  ;;  %v1156_v8 = vld [vmem:[%s18230_s11 + $0x1c10] sm:$0xff]  ;;  %v16537_v11 = vcombine.low %v1147_v55, %v1151_v58  ;;  %v16420_v15 = vcombine.high %v1028_v28, %v1032_v5 }
 0x730   : > { %13985 = vmatprep.subr.bf16.mxu1 %v16642_v18  ;;  %v15479_v39 = vadd.f32 %v15478_v26, %v15477_v25  ;;  %v16666_v35 = vcombine.high %v1275_v62, %v1279_v3  ;;  %v16665_v12 = vcombine.low %v1275_v62, %v1279_v3  ;;  %v16548_v18 = vcombine.high %v1156_v8, %v1160_v14  ;;  %v1036_v19 = vld [vmem:[%s18230_s11 + $0x1850] sm:$0xff] }
 0x731   : > { %v1040_v22 = vld [vmem:[%s18230_s11 + $0x1870] sm:$0xff]  ;;  %v16419_v26 = vcombine.low %v1028_v28, %v1032_v5  ;;  %v16547_v29 = vcombine.low %v1156_v8, %v1160_v14 }
 0x732   : > { %v19343_v40 = vadd.f32 %v15480_v37, %v15479_v39  ;;  %v1164_v24 = vld [vmem:[%s18230_s11 + $0x1c50] sm:$0xff]  ;;  %v16428_v30 = vcombine.high %v1036_v19, %v1040_v22 }
 0x733   : > { %v1168_v25 = vld [vmem:[%s18230_s11 + $0x1c70] sm:$0xff] }
 0x734   : > { %v16556_v39 = vcombine.high %v1164_v24, %v1168_v25  ;;  %v1048_v33 = vld [vmem:[%s18230_s11 + $0x18b0] sm:$0xff] }
 0x735   : > { %13822 = vmatpush1.bf16.xpose.msra.mxu0 %v16513_v38  ;;  %v1172_v37 = vld [vmem:[%s18230_s11 + $0x1c90] sm:$0xff] }
 0x736   : > { %13823 = vmatprep.subr.bf16.mxu0 %v16522_v44  ;;  %v1176_v38 = vld [vmem:[%s18230_s11 + $0x1cb0] sm:$0xff]  ;;  %v16555_v44 = vcombine.low %v1164_v24, %v1168_v25 }
 0x737   : > { %13986 = vmatpush1.bf16.xpose.msra.mxu1 %v16641_v43  ;;  %v16427_v43 = vcombine.low %v1036_v19, %v1040_v22  ;;  %v16564_v36 = vcombine.high %v1172_v37, %v1176_v38  ;;  %v1052_v46 = vld [vmem:[%s18230_s11 + $0x18d0] sm:$0xff] }
 0x738   : > { %13987 = vmatprep.subr.bf16.mxu1 %v16650_v45  ;;  %v16436_v45 = vcombine.high %v1044_v32, %v1048_v33  ;;  %v1056_v51 = vld [vmem:[%s18230_s11 + $0x18f0] sm:$0xff] }
 0x739   : > { %v1180_v53 = vld [vmem:[%s18230_s11 + $0x1cd0] sm:$0xff] }
 0x73a   : > { %v1060_v58 = vld [vmem:[%s18230_s11 + $0x1910] sm:$0xff] }
 0x73b   : > { %v1064_v62 = vld [vmem:[%s18230_s11 + $0x1930] sm:$0xff] }
 0x73c   : > { %v1188_v3 = vld [vmem:[%s18230_s11 + $0x1d10] sm:$0xff] }
 0x73d   : > { %13824 = vmatpush1.bf16.xpose.msra.mxu0 %v16521_v54  ;;  %v1184_v54 = vld [vmem:[%s18230_s11 + $0x1cf0] sm:$0xff] }
 0x73e   : > { %13825 = vmatprep.subr.bf16.mxu0 %v16530_v48  ;;  %v16563_v48 = vcombine.low %v1172_v37, %v1176_v38  ;;  %v16572_v55 = vcombine.high %v1180_v53, %v1184_v54  ;;  %v1068_v5 = vld [vmem:[%s18230_s11 + $0x1950] sm:$0xff] }
 0x73f   : > { %13988 = vmatpush1.bf16.xpose.msra.mxu1 %v16649_v60  ;;  %v16435_v60 = vcombine.low %v1044_v32, %v1048_v33  ;;  %v1072_v8 = vld [vmem:[%s18230_s11 + $0x1970] sm:$0xff] }
 0x740   : > { %13989 = vmatprep.subr.bf16.mxu1 %v16658_v49  ;;  %v16444_v49 = vcombine.high %v1052_v46, %v1056_v51  ;;  %v1196_v14 = vld [vmem:[%s18230_s11 + $0x1d50] sm:$0xff] }
 0x741   : > { %v1076_v22 = vld [vmem:[%s18230_s11 + $0x1990] sm:$0xff] }
 0x742   : > { %v1080_v24 = vld [vmem:[%s18230_s11 + $0x19b0] sm:$0xff] }
 0x743   : > { %v1204_v25 = vld [vmem:[%s18230_s11 + $0x1d90] sm:$0xff] }
 0x744   : > { %v1084_v33 = vld [vmem:[%s18230_s11 + $0x19d0] sm:$0xff] }
 0x745   : > { %13826 = vmatpush1.bf16.xpose.msra.mxu0 %v16529_v63  ;;  %v1192_v63 = vld [vmem:[%s18230_s11 + $0x1d30] sm:$0xff] }
 0x746   : > { %13827 = vmatprep.subr.bf16.mxu0 %v16538_v1  ;;  %v16571_v1 = vcombine.low %v1180_v53, %v1184_v54  ;;  %v16580_v28 = vcombine.high %v1188_v3, %v1192_v63  ;;  %v1088_v37 = vld [vmem:[%s18230_s11 + $0x19f0] sm:$0xff] }
 0x747   : > { %13990 = vmatpush1.bf16.xpose.msra.mxu1 %v16657_v0  ;;  %v16443_v0 = vcombine.low %v1052_v46, %v1056_v51  ;;  %v1212_v38 = vld [vmem:[%s18230_s11 + $0x1dd0] sm:$0xff] }
 0x748   : > { %13991 = vmatprep.subr.bf16.mxu1 %v16666_v35  ;;  %v16452_v35 = vcombine.high %v1060_v58, %v1064_v62  ;;  %v1092_v51 = vld [vmem:[%s18230_s11 + $0x1a10] sm:$0xff] }
 0x749   : > { %v1096_v53 = vld [vmem:[%s18230_s11 + $0x1a30] sm:$0xff] }
 0x74a   : > { %v1220_v54 = vld [vmem:[%s18230_s11 + $0x1e10] sm:$0xff] }
 0x74d   : > { %13828 = vmatpush1.bf16.xpose.msra.mxu0 %v16537_v11  ;;  %v1200_v11 = vld [vmem:[%s18230_s11 + $0x1d70] sm:$0xff] }
 0x74e   : > { %13838 = vmatprep.subr.bf16.mxu0 %v16420_v15  ;;  %v16579_v15 = vcombine.low %v1188_v3, %v1192_v63  ;;  %v16588_v19 = vcombine.high %v1196_v14, %v1200_v11  ;;  %v1104_v3 = vld [vmem:[%s18230_s11 + $0x1a70] sm:$0xff] }
 0x74f   : > { %13992 = vmatpush1.bf16.xpose.msra.mxu1 %v16665_v12  ;;  %v16451_v12 = vcombine.low %v1060_v58, %v1064_v62  ;;  %v1100_v62 = vld [vmem:[%s18230_s11 + $0x1a50] sm:$0xff] }
 0x750   : > { %14002 = vmatprep.subr.bf16.mxu1 %v16548_v18  ;;  %v16460_v18 = vcombine.high %v1068_v5, %v1072_v8  ;;  %v1228_v63 = vld [vmem:[%s18230_s11 + $0x1e50] sm:$0xff] }
 0x754   : > { %13830 = vmatmul.mubr.bf16.vlgmr.msra.gmra.mrb[12].mxu0 %v18416_v42 }
 0x755   : > { %13839 = vmatpush1.bf16.xpose.msra.mxu0 %v16419_v26  ;;  %13870 = vmatprep.mubr.bf16.mxu0 %v18423_v50  ;;  %v1208_v26 = vld [vmem:[%s18230_s11 + $0x1db0] sm:$0xff] }
 0x756   : > { %13994 = vmatmul.mubr.bf16.vlgmr.msra.gmra.mrb[12].mxu1 %v18416_v42  ;;  %13840 = vmatprep.subr.bf16.mxu0 %v16428_v30  ;;  %v16587_v30 = vcombine.low %v1196_v14, %v1200_v11  ;;  %v16596_v32 = vcombine.high %v1204_v25, %v1208_v26  ;;  %v1112_v14 = vld [vmem:[%s18230_s11 + $0x1ab0] sm:$0xff] }
 0x757   : > { %14003 = vmatpush1.bf16.xpose.msra.mxu1 %v16547_v29  ;;  %14034 = vmatprep.mubr.bf16.mxu1 %v18423_v50  ;;  %v16459_v29 = vcombine.low %v1068_v5, %v1072_v8  ;;  %v1108_v8 = vld [vmem:[%s18230_s11 + $0x1a90] sm:$0xff] }
 0x758   : > { %14004 = vmatprep.subr.bf16.mxu1 %v16556_v39  ;;  %v16468_v39 = vcombine.high %v1076_v22, %v1080_v24  ;;  %v1236_v11 = vld [vmem:[%s18230_s11 + $0x1e90] sm:$0xff] }
 0x75d   : > { %13841 = vmatpush1.bf16.xpose.msra.mxu0 %v16427_v43  ;;  %v1216_v43 = vld [vmem:[%s18230_s11 + $0x1df0] sm:$0xff] }
 0x75e   : > { %13842 = vmatprep.subr.bf16.mxu0 %v16436_v45  ;;  %v16595_v45 = vcombine.low %v1204_v25, %v1208_v26  ;;  %v16604_v46 = vcombine.high %v1212_v38, %v1216_v43  ;;  %v1120_v25 = vld [vmem:[%s18230_s11 + $0x1af0] sm:$0xff] }
 0x75f   : > { %14005 = vmatpush1.bf16.xpose.msra.mxu1 %v16555_v44  ;;  %v16467_v44 = vcombine.low %v1076_v22, %v1080_v24  ;;  %v1116_v24 = vld [vmem:[%s18230_s11 + $0x1ad0] sm:$0xff] }
 0x760   : > { %14006 = vmatprep.subr.bf16.mxu1 %v16564_v36  ;;  %v16476_v36 = vcombine.high %v1084_v33, %v1088_v37  ;;  %v1244_v26 = vld [vmem:[%s18230_s11 + $0x1ed0] sm:$0xff] }
 0x765   : > { %13843 = vmatpush1.bf16.xpose.msra.mxu0 %v16435_v60  ;;  %v1224_v60 = vld [vmem:[%s18230_s11 + $0x1e30] sm:$0xff] }
 0x766   : > { %13844 = vmatprep.subr.bf16.mxu0 %v16444_v49  ;;  %v16603_v49 = vcombine.low %v1212_v38, %v1216_v43  ;;  %v16612_v58 = vcombine.high %v1220_v54, %v1224_v60  ;;  %v1128_v38 = vld [vmem:[%s18230_s11 + $0x1b30] sm:$0xff] }
 0x767   : > { %14007 = vmatpush1.bf16.xpose.msra.mxu1 %v16563_v48  ;;  %v16475_v48 = vcombine.low %v1084_v33, %v1088_v37  ;;  %v1124_v37 = vld [vmem:[%s18230_s11 + $0x1b10] sm:$0xff] }
 0x768   : > { %14008 = vmatprep.subr.bf16.mxu1 %v16572_v55  ;;  %v16484_v55 = vcombine.high %v1092_v51, %v1096_v53  ;;  %v1252_v43 = vld [vmem:[%s18230_s11 + $0x1f10] sm:$0xff] }
 0x76d   : > { %13845 = vmatpush1.bf16.xpose.msra.mxu0 %v16443_v0  ;;  %v1232_v0 = vld [vmem:[%s18230_s11 + $0x1e70] sm:$0xff] }
 0x76e   : > { %13846 = vmatprep.subr.bf16.mxu0 %v16452_v35  ;;  %v16611_v35 = vcombine.low %v1220_v54, %v1224_v60  ;;  %v16620_v5 = vcombine.high %v1228_v63, %v1232_v0  ;;  %v1136_v54 = vld [vmem:[%s18230_s11 + $0x1b70] sm:$0xff] }
 0x76f   : > { %14009 = vmatpush1.bf16.xpose.msra.mxu1 %v16571_v1  ;;  %v16483_v1 = vcombine.low %v1092_v51, %v1096_v53  ;;  %v1132_v53 = vld [vmem:[%s18230_s11 + $0x1b50] sm:$0xff] }
 0x770   : > { %14010 = vmatprep.subr.bf16.mxu1 %v16580_v28  ;;  %v16492_v28 = vcombine.high %v1100_v62, %v1104_v3  ;;  %v1260_v60 = vld [vmem:[%s18230_s11 + $0x1f50] sm:$0xff] }
 0x775   : > { %13847 = vmatpush1.bf16.xpose.msra.mxu0 %v16451_v12  ;;  %v1240_v12 = vld [vmem:[%s18230_s11 + $0x1eb0] sm:$0xff] }
 0x776   : > { %13848 = vmatprep.subr.bf16.mxu0 %v16460_v18  ;;  %v16619_v18 = vcombine.low %v1228_v63, %v1232_v0  ;;  %v16628_v22 = vcombine.high %v1236_v11, %v1240_v12  ;;  %v1144_v63 = vld [vmem:[%s18230_s11 + $0x1bb0] sm:$0xff] }
 0x777   : > { %14011 = vmatpush1.bf16.xpose.msra.mxu1 %v16579_v15  ;;  %v16491_v15 = vcombine.low %v1100_v62, %v1104_v3  ;;  %v1140_v3 = vld [vmem:[%s18230_s11 + $0x1b90] sm:$0xff] }
 0x778   : > { %14012 = vmatprep.subr.bf16.mxu1 %v16588_v19  ;;  %v16500_v19 = vcombine.high %v1108_v8, %v1112_v14  ;;  %v1268_v0 = vld [vmem:[%s18230_s11 + $0x1f90] sm:$0xff] }
 0x77d   : > { %13849 = vmatpush1.bf16.xpose.msra.mxu0 %v16459_v29  ;;  %v1248_v29 = vld [vmem:[%s18230_s11 + $0x1ef0] sm:$0xff] }
 0x77e   : > { %13850 = vmatprep.subr.bf16.mxu0 %v16468_v39  ;;  %v16627_v39 = vcombine.low %v1236_v11, %v1240_v12  ;;  %v16636_v33 = vcombine.high %v1244_v26, %v1248_v29  ;;  %v1152_v11 = vld [vmem:[%s18230_s11 + $0x1bf0] sm:$0xff] }
 0x77f   : > { %14013 = vmatpush1.bf16.xpose.msra.mxu1 %v16587_v30  ;;  %v16499_v30 = vcombine.low %v1108_v8, %v1112_v14  ;;  %v1148_v14 = vld [vmem:[%s18230_s11 + $0x1bd0] sm:$0xff] }
 0x780   : > { %14014 = vmatprep.subr.bf16.mxu1 %v16596_v32  ;;  %v16508_v32 = vcombine.high %v1116_v24, %v1120_v25  ;;  %v1276_v12 = vld [vmem:[%s18230_s11 + $0x1fd0] sm:$0xff] }
 0x785   : > { %13851 = vmatpush1.bf16.xpose.msra.mxu0 %v16467_v44  ;;  %v1256_v44 = vld [vmem:[%s18230_s11 + $0x1f30] sm:$0xff] }
 0x786   : > { %13852 = vmatprep.subr.bf16.mxu0 %v16476_v36  ;;  %v16635_v36 = vcombine.low %v1244_v26, %v1248_v29  ;;  %v16644_v51 = vcombine.high %v1252_v43, %v1256_v44  ;;  %v1033_v26 = vld [vmem:[%s18230_s11 + $0x1838] sm:$0xff] }
 0x787   : > { %14015 = vmatpush1.bf16.xpose.msra.mxu1 %v16595_v45  ;;  %v16507_v45 = vcombine.low %v1116_v24, %v1120_v25  ;;  %v1029_v25 = vld [vmem:[%s18230_s11 + $0x1818] sm:$0xff] }
 0x788   : > { %14016 = vmatprep.subr.bf16.mxu1 %v16604_v46  ;;  %v16516_v46 = vcombine.high %v1124_v37, %v1128_v38  ;;  %v1157_v29 = vld [vmem:[%s18230_s11 + $0x1c18] sm:$0xff] }
 0x78d   : > { %13853 = vmatpush1.bf16.xpose.msra.mxu0 %v16475_v48  ;;  %v1264_v48 = vld [vmem:[%s18230_s11 + $0x1f70] sm:$0xff] }
 0x78e   : > { %13854 = vmatprep.subr.bf16.mxu0 %v16484_v55  ;;  %v16643_v55 = vcombine.low %v1252_v43, %v1256_v44  ;;  %v16652_v62 = vcombine.high %v1260_v60, %v1264_v48  ;;  %v1041_v43 = vld [vmem:[%s18230_s11 + $0x1878] sm:$0xff] }
 0x78f   : > { %14017 = vmatpush1.bf16.xpose.msra.mxu1 %v16603_v49  ;;  %v16515_v49 = vcombine.low %v1124_v37, %v1128_v38  ;;  %v1037_v38 = vld [vmem:[%s18230_s11 + $0x1858] sm:$0xff] }
 0x790   : > { %14018 = vmatprep.subr.bf16.mxu1 %v16612_v58  ;;  %v16524_v58 = vcombine.high %v1132_v53, %v1136_v54  ;;  %v1165_v44 = vld [vmem:[%s18230_s11 + $0x1c58] sm:$0xff] }
 0x795   : > { %13855 = vmatpush1.bf16.xpose.msra.mxu0 %v16483_v1  ;;  %v1272_v1 = vld [vmem:[%s18230_s11 + $0x1fb0] sm:$0xff] }
 0x796   : > { %13856 = vmatprep.subr.bf16.mxu0 %v16492_v28  ;;  %v16651_v28 = vcombine.low %v1260_v60, %v1264_v48  ;;  %v16660_v8 = vcombine.high %v1268_v0, %v1272_v1  ;;  %v1049_v60 = vld [vmem:[%s18230_s11 + $0x18b8] sm:$0xff] }
 0x797   : > { %14019 = vmatpush1.bf16.xpose.msra.mxu1 %v16611_v35  ;;  %v16523_v35 = vcombine.low %v1132_v53, %v1136_v54  ;;  %v1045_v54 = vld [vmem:[%s18230_s11 + $0x1898] sm:$0xff] }
 0x798   : > { %14020 = vmatprep.subr.bf16.mxu1 %v16620_v5  ;;  %v16532_v5 = vcombine.high %v1140_v3, %v1144_v63  ;;  %v1173_v48 = vld [vmem:[%s18230_s11 + $0x1c98] sm:$0xff] }
 0x79d   : > { %13857 = vmatpush1.bf16.xpose.msra.mxu0 %v16491_v15  ;;  %v1280_v15 = vld [vmem:[%s18230_s11 + $0x1ff0] sm:$0xff] }
 0x79e   : > { %13858 = vmatprep.subr.bf16.mxu0 %v16500_v19  ;;  %v16659_v19 = vcombine.low %v1268_v0, %v1272_v1  ;;  %v16668_v24 = vcombine.high %v1276_v12, %v1280_v15  ;;  %v1057_v0 = vld [vmem:[%s18230_s11 + $0x18f8] sm:$0xff] }
 0x79f   : > { %14021 = vmatpush1.bf16.xpose.msra.mxu1 %v16619_v18  ;;  %v16531_v18 = vcombine.low %v1140_v3, %v1144_v63  ;;  %v1053_v63 = vld [vmem:[%s18230_s11 + $0x18d8] sm:$0xff] }
 0x7a0   : > { %14022 = vmatprep.subr.bf16.mxu1 %v16628_v22  ;;  %v16540_v22 = vcombine.high %v1148_v14, %v1152_v11  ;;  %v1181_v1 = vld [vmem:[%s18230_s11 + $0x1cd8] sm:$0xff] }
 0x7a5   : > { %13859 = vmatpush1.bf16.xpose.msra.mxu0 %v16499_v30  ;;  %v1161_v30 = vld [vmem:[%s18230_s11 + $0x1c38] sm:$0xff] }
 0x7a6   : > { %13860 = vmatprep.subr.bf16.mxu0 %v16508_v32  ;;  %v16667_v32 = vcombine.low %v1276_v12, %v1280_v15  ;;  %v16550_v37 = vcombine.high %v1157_v29, %v1161_v30  ;;  %v1065_v12 = vld [vmem:[%s18230_s11 + $0x1938] sm:$0xff] }
 0x7a7   : > { %14023 = vmatpush1.bf16.xpose.msra.mxu1 %v16627_v39  ;;  %v16539_v39 = vcombine.low %v1148_v14, %v1152_v11  ;;  %v1061_v11 = vld [vmem:[%s18230_s11 + $0x1918] sm:$0xff] }
 0x7a8   : > { %14024 = vmatprep.subr.bf16.mxu1 %v16636_v33  ;;  %v16422_v33 = vcombine.high %v1029_v25, %v1033_v26  ;;  %v1189_v15 = vld [vmem:[%s18230_s11 + $0x1d18] sm:$0xff] }
 0x7ad   : > { %13861 = vmatpush1.bf16.xpose.msra.mxu0 %v16507_v45  ;;  %v1169_v45 = vld [vmem:[%s18230_s11 + $0x1c78] sm:$0xff] }
 0x7ae   : > { %13862 = vmatprep.subr.bf16.mxu0 %v16516_v46  ;;  %v16549_v46 = vcombine.low %v1157_v29, %v1161_v30  ;;  %v16558_v53 = vcombine.high %v1165_v44, %v1169_v45  ;;  %v1073_v29 = vld [vmem:[%s18230_s11 + $0x1978] sm:$0xff] }
 0x7af   : > { %14025 = vmatpush1.bf16.xpose.msra.mxu1 %v16635_v36  ;;  %v16421_v36 = vcombine.low %v1029_v25, %v1033_v26  ;;  %v1069_v26 = vld [vmem:[%s18230_s11 + $0x1958] sm:$0xff] }
 0x7b0   : > { %14026 = vmatprep.subr.bf16.mxu1 %v16644_v51  ;;  %v16430_v51 = vcombine.high %v1037_v38, %v1041_v43  ;;  %v1197_v30 = vld [vmem:[%s18230_s11 + $0x1d58] sm:$0xff] }
 0x7b5   : > { %13863 = vmatpush1.bf16.xpose.msra.mxu0 %v16515_v49  ;;  %v1177_v49 = vld [vmem:[%s18230_s11 + $0x1cb8] sm:$0xff] }
 0x7b6   : > { %13864 = vmatprep.subr.bf16.mxu0 %v16524_v58  ;;  %v16557_v58 = vcombine.low %v1165_v44, %v1169_v45  ;;  %v16566_v3 = vcombine.high %v1173_v48, %v1177_v49  ;;  %v1081_v44 = vld [vmem:[%s18230_s11 + $0x19b8] sm:$0xff] }
 0x7b7   : > { %14027 = vmatpush1.bf16.xpose.msra.mxu1 %v16643_v55  ;;  %v16429_v55 = vcombine.low %v1037_v38, %v1041_v43  ;;  %v1077_v43 = vld [vmem:[%s18230_s11 + $0x1998] sm:$0xff] }
 0x7b8   : > { %14028 = vmatprep.subr.bf16.mxu1 %v16652_v62  ;;  %v16438_v62 = vcombine.high %v1045_v54, %v1049_v60  ;;  %v1205_v45 = vld [vmem:[%s18230_s11 + $0x1d98] sm:$0xff] }
 0x7bd   : > { %13865 = vmatpush1.bf16.xpose.msra.mxu0 %v16523_v35  ;;  %v1185_v35 = vld [vmem:[%s18230_s11 + $0x1cf8] sm:$0xff] }
 0x7be   : > { %13866 = vmatprep.subr.bf16.mxu0 %v16532_v5  ;;  %v16565_v5 = vcombine.low %v1173_v48, %v1177_v49  ;;  %v16574_v14 = vcombine.high %v1181_v1, %v1185_v35  ;;  %v1089_v48 = vld [vmem:[%s18230_s11 + $0x19f8] sm:$0xff] }
 0x7bf   : > { %14029 = vmatpush1.bf16.xpose.msra.mxu1 %v16651_v28  ;;  %v16437_v28 = vcombine.low %v1045_v54, %v1049_v60  ;;  %v1085_v60 = vld [vmem:[%s18230_s11 + $0x19d8] sm:$0xff] }
 0x7c0   : > { %14030 = vmatprep.subr.bf16.mxu1 %v16660_v8  ;;  %v16446_v8 = vcombine.high %v1053_v63, %v1057_v0  ;;  %v1213_v49 = vld [vmem:[%s18230_s11 + $0x1dd8] sm:$0xff] }
 0x7c5   : > { %13867 = vmatpush1.bf16.xpose.msra.mxu0 %v16531_v18  ;;  %v1193_v18 = vld [vmem:[%s18230_s11 + $0x1d38] sm:$0xff] }
 0x7c6   : > { %13868 = vmatprep.subr.bf16.mxu0 %v16540_v22  ;;  %v16573_v22 = vcombine.low %v1181_v1, %v1185_v35  ;;  %v16582_v25 = vcombine.high %v1189_v15, %v1193_v18  ;;  %v1097_v1 = vld [vmem:[%s18230_s11 + $0x1a38] sm:$0xff] }
 0x7c7   : > { %14031 = vmatpush1.bf16.xpose.msra.mxu1 %v16659_v19  ;;  %v16445_v19 = vcombine.low %v1053_v63, %v1057_v0  ;;  %v1093_v0 = vld [vmem:[%s18230_s11 + $0x1a18] sm:$0xff] }
 0x7c8   : > { %14032 = vmatprep.subr.bf16.mxu1 %v16668_v24  ;;  %v16454_v24 = vcombine.high %v1061_v11, %v1065_v12  ;;  %v1221_v35 = vld [vmem:[%s18230_s11 + $0x1e18] sm:$0xff] }
 0x7cd   : > { %13869 = vmatpush1.bf16.xpose.msra.mxu0 %v16539_v39  ;;  %v1201_v39 = vld [vmem:[%s18230_s11 + $0x1d78] sm:$0xff] }
 0x7ce   : > { %13879 = vmatprep.subr.bf16.mxu0 %v16422_v33  ;;  %v16581_v33 = vcombine.low %v1189_v15, %v1193_v18  ;;  %v16590_v38 = vcombine.high %v1197_v30, %v1201_v39  ;;  %v1105_v15 = vld [vmem:[%s18230_s11 + $0x1a78] sm:$0xff] }
 0x7cf   : > { %14033 = vmatpush1.bf16.xpose.msra.mxu1 %v16667_v32  ;;  %v16453_v32 = vcombine.low %v1061_v11, %v1065_v12  ;;  %v1101_v12 = vld [vmem:[%s18230_s11 + $0x1a58] sm:$0xff] }
 0x7d0   : > { %14043 = vmatprep.subr.bf16.mxu1 %v16550_v37  ;;  %v16462_v37 = vcombine.high %v1069_v26, %v1073_v29  ;;  %v1229_v18 = vld [vmem:[%s18230_s11 + $0x1e58] sm:$0xff] }
 0x7d4   : > { %13871 = vmatmul.mubr.bf16.vlgmr.msra.gmra.mrb[12].mxu0 %v18493_v61 }
 0x7d5   : > { %13880 = vmatpush1.bf16.xpose.msra.mxu0 %v16421_v36  ;;  %13911 = vmatprep.mubr.bf16.mxu0 %v18499_v4  ;;  %v1209_v36 = vld [vmem:[%s18230_s11 + $0x1db8] sm:$0xff] }
 0x7d6   : > { %14035 = vmatmul.mubr.bf16.vlgmr.msra.gmra.mrb[12].mxu1 %v18493_v61  ;;  %13881 = vmatprep.subr.bf16.mxu0 %v16430_v51  ;;  %v16589_v51 = vcombine.low %v1197_v30, %v1201_v39  ;;  %v16598_v54 = vcombine.high %v1205_v45, %v1209_v36  ;;  %v1113_v30 = vld [vmem:[%s18230_s11 + $0x1ab8] sm:$0xff] }
 0x7d7   : > { %14044 = vmatpush1.bf16.xpose.msra.mxu1 %v16549_v46  ;;  %14075 = vmatprep.mubr.bf16.mxu1 %v18499_v4  ;;  %v16461_v46 = vcombine.low %v1069_v26, %v1073_v29  ;;  %v1109_v29 = vld [vmem:[%s18230_s11 + $0x1a98] sm:$0xff] }
 0x7d8   : > { %14045 = vmatprep.subr.bf16.mxu1 %v16558_v53  ;;  %v16470_v53 = vcombine.high %v1077_v43, %v1081_v44  ;;  %v1237_v39 = vld [vmem:[%s18230_s11 + $0x1e98] sm:$0xff] }
 0x7dd   : > { %13882 = vmatpush1.bf16.xpose.msra.mxu0 %v16429_v55  ;;  %v1217_v55 = vld [vmem:[%s18230_s11 + $0x1df8] sm:$0xff] }
 0x7de   : > { %13883 = vmatprep.subr.bf16.mxu0 %v16438_v62  ;;  %v16597_v62 = vcombine.low %v1205_v45, %v1209_v36  ;;  %v16606_v63 = vcombine.high %v1213_v49, %v1217_v55  ;;  %v1121_v45 = vld [vmem:[%s18230_s11 + $0x1af8] sm:$0xff] }
 0x7df   : > { %14046 = vmatpush1.bf16.xpose.msra.mxu1 %v16557_v58  ;;  %v16469_v58 = vcombine.low %v1077_v43, %v1081_v44  ;;  %v1117_v44 = vld [vmem:[%s18230_s11 + $0x1ad8] sm:$0xff] }
 0x7e0   : > { %14047 = vmatprep.subr.bf16.mxu1 %v16566_v3  ;;  %v16478_v3 = vcombine.high %v1085_v60, %v1089_v48  ;;  %v1245_v36 = vld [vmem:[%s18230_s11 + $0x1ed8] sm:$0xff] }
 0x7e5   : > { %13884 = vmatpush1.bf16.xpose.msra.mxu0 %v16437_v28  ;;  %v1225_v28 = vld [vmem:[%s18230_s11 + $0x1e38] sm:$0xff] }
 0x7e6   : > { %13885 = vmatprep.subr.bf16.mxu0 %v16446_v8  ;;  %v16605_v8 = vcombine.low %v1213_v49, %v1217_v55  ;;  %v16614_v11 = vcombine.high %v1221_v35, %v1225_v28  ;;  %v1129_v49 = vld [vmem:[%s18230_s11 + $0x1b38] sm:$0xff] }
 0x7e7   : > { %14048 = vmatpush1.bf16.xpose.msra.mxu1 %v16565_v5  ;;  %v16477_v5 = vcombine.low %v1085_v60, %v1089_v48  ;;  %v1125_v48 = vld [vmem:[%s18230_s11 + $0x1b18] sm:$0xff] }
 0x7e8   : > { %14049 = vmatprep.subr.bf16.mxu1 %v16574_v14  ;;  %v16486_v14 = vcombine.high %v1093_v0, %v1097_v1  ;;  %v1253_v55 = vld [vmem:[%s18230_s11 + $0x1f18] sm:$0xff] }
 0x7ed   : > { %13886 = vmatpush1.bf16.xpose.msra.mxu0 %v16445_v19  ;;  %v1233_v19 = vld [vmem:[%s18230_s11 + $0x1e78] sm:$0xff] }
 0x7ee   : > { %13887 = vmatprep.subr.bf16.mxu0 %v16454_v24  ;;  %v16613_v24 = vcombine.low %v1221_v35, %v1225_v28  ;;  %v16622_v26 = vcombine.high %v1229_v18, %v1233_v19  ;;  %v1137_v35 = vld [vmem:[%s18230_s11 + $0x1b78] sm:$0xff] }
 0x7ef   : > { %14050 = vmatpush1.bf16.xpose.msra.mxu1 %v16573_v22  ;;  %v16485_v22 = vcombine.low %v1093_v0, %v1097_v1  ;;  %v1133_v1 = vld [vmem:[%s18230_s11 + $0x1b58] sm:$0xff] }
 0x7f0   : > { %14051 = vmatprep.subr.bf16.mxu1 %v16582_v25  ;;  %v16494_v25 = vcombine.high %v1101_v12, %v1105_v15  ;;  %v1261_v28 = vld [vmem:[%s18230_s11 + $0x1f58] sm:$0xff] }
 0x7f5   : > { %13888 = vmatpush1.bf16.xpose.msra.mxu0 %v16453_v32  ;;  %v1241_v32 = vld [vmem:[%s18230_s11 + $0x1eb8] sm:$0xff] }
 0x7f6   : > { %13889 = vmatprep.subr.bf16.mxu0 %v16462_v37  ;;  %v16621_v37 = vcombine.low %v1229_v18, %v1233_v19  ;;  %v16630_v43 = vcombine.high %v1237_v39, %v1241_v32  ;;  %v1145_v18 = vld [vmem:[%s18230_s11 + $0x1bb8] sm:$0xff] }
 0x7f7   : > { %14052 = vmatpush1.bf16.xpose.msra.mxu1 %v16581_v33  ;;  %v16493_v33 = vcombine.low %v1101_v12, %v1105_v15  ;;  %v1141_v15 = vld [vmem:[%s18230_s11 + $0x1b98] sm:$0xff] }
 0x7f8   : > { %14053 = vmatprep.subr.bf16.mxu1 %v16590_v38  ;;  %v16502_v38 = vcombine.high %v1109_v29, %v1113_v30  ;;  %v1269_v19 = vld [vmem:[%s18230_s11 + $0x1f98] sm:$0xff] }
 0x7fd   : > { %13890 = vmatpush1.bf16.xpose.msra.mxu0 %v16461_v46  ;;  %v1249_v46 = vld [vmem:[%s18230_s11 + $0x1ef8] sm:$0xff] }
 0x7fe   : > { %13891 = vmatprep.subr.bf16.mxu0 %v16470_v53  ;;  %v16629_v53 = vcombine.low %v1237_v39, %v1241_v32  ;;  %v16638_v60 = vcombine.high %v1245_v36, %v1249_v46  ;;  %v1153_v39 = vld [vmem:[%s18230_s11 + $0x1bf8] sm:$0xff] }
 0x7ff   : > { %14054 = vmatpush1.bf16.xpose.msra.mxu1 %v16589_v51  ;;  %v16501_v51 = vcombine.low %v1109_v29, %v1113_v30  ;;  %v1149_v30 = vld [vmem:[%s18230_s11 + $0x1bd8] sm:$0xff] }
 0x800   : > { %14055 = vmatprep.subr.bf16.mxu1 %v16598_v54  ;;  %v16510_v54 = vcombine.high %v1117_v44, %v1121_v45  ;;  %v1277_v32 = vld [vmem:[%s18230_s11 + $0x1fd8] sm:$0xff] }
 0x805   : > { %13892 = vmatpush1.bf16.xpose.msra.mxu0 %v16469_v58  ;;  %v1257_v58 = vld [vmem:[%s18230_s11 + $0x1f38] sm:$0xff] }
 0x806   : > { %13893 = vmatprep.subr.bf16.mxu0 %v16478_v3  ;;  %v16637_v3 = vcombine.low %v1245_v36, %v1249_v46  ;;  %v16646_v0 = vcombine.high %v1253_v55, %v1257_v58  ;;  %v1286_v36 = vld [vmem:[%s18230_s11 + $0x2020] sm:$0xff] }
 0x807   : > { %14056 = vmatpush1.bf16.xpose.msra.mxu1 %v16597_v62  ;;  %v16509_v62 = vcombine.low %v1117_v44, %v1121_v45  ;;  %v1282_v45 = vld [vmem:[%s18230_s11 + $0x2000] sm:$0xff] }
 0x808   : > { %14057 = vmatprep.subr.bf16.mxu1 %v16606_v63  ;;  %v16518_v63 = vcombine.high %v1125_v48, %v1129_v49  ;;  %v1410_v46 = vld [vmem:[%s18230_s11 + $0x2400] sm:$0xff] }
 0x80d   : > { %13894 = vmatpush1.bf16.xpose.msra.mxu0 %v16477_v5  ;;  %v1265_v5 = vld [vmem:[%s18230_s11 + $0x1f78] sm:$0xff] }
 0x80e   : > { %13895 = vmatprep.subr.bf16.mxu0 %v16486_v14  ;;  %v16645_v14 = vcombine.low %v1253_v55, %v1257_v58  ;;  %v16654_v12 = vcombine.high %v1261_v28, %v1265_v5  ;;  %v1294_v55 = vld [vmem:[%s18230_s11 + $0x2060] sm:$0xff] }
 0x80f   : > { %14058 = vmatpush1.bf16.xpose.msra.mxu1 %v16605_v8  ;;  %v16517_v8 = vcombine.low %v1125_v48, %v1129_v49  ;;  %v1290_v49 = vld [vmem:[%s18230_s11 + $0x2040] sm:$0xff] }
 0x810   : > { %14059 = vmatprep.subr.bf16.mxu1 %v16614_v11  ;;  %v16526_v11 = vcombine.high %v1133_v1, %v1137_v35  ;;  %v1418_v58 = vld [vmem:[%s18230_s11 + $0x2440] sm:$0xff] }
 0x815   : > { %13896 = vmatpush1.bf16.xpose.msra.mxu0 %v16485_v22  ;;  %v1273_v22 = vld [vmem:[%s18230_s11 + $0x1fb8] sm:$0xff] }
 0x816   : > { %13897 = vmatprep.subr.bf16.mxu0 %v16494_v25  ;;  %v16653_v25 = vcombine.low %v1261_v28, %v1265_v5  ;;  %v16662_v29 = vcombine.high %v1269_v19, %v1273_v22  ;;  %v1302_v28 = vld [vmem:[%s18230_s11 + $0x20a0] sm:$0xff] }
 0x817   : > { %14060 = vmatpush1.bf16.xpose.msra.mxu1 %v16613_v24  ;;  %v16525_v24 = vcombine.low %v1133_v1, %v1137_v35  ;;  %v1298_v35 = vld [vmem:[%s18230_s11 + $0x2080] sm:$0xff] }
 0x818   : > { %14061 = vmatprep.subr.bf16.mxu1 %v16622_v26  ;;  %v16534_v26 = vcombine.high %v1141_v15, %v1145_v18  ;;  %v1426_v5 = vld [vmem:[%s18230_s11 + $0x2480] sm:$0xff] }
 0x81d   : > { %13898 = vmatpush1.bf16.xpose.msra.mxu0 %v16493_v33  ;;  %v1281_v33 = vld [vmem:[%s18230_s11 + $0x1ff8] sm:$0xff] }
 0x81e   : > { %13899 = vmatprep.subr.bf16.mxu0 %v16502_v38  ;;  %v16661_v38 = vcombine.low %v1269_v19, %v1273_v22  ;;  %v16670_v44 = vcombine.high %v1277_v32, %v1281_v33  ;;  %v1310_v19 = vld [vmem:[%s18230_s11 + $0x20e0] sm:$0xff] }
 0x81f   : > { %14062 = vmatpush1.bf16.xpose.msra.mxu1 %v16621_v37  ;;  %v16533_v37 = vcombine.low %v1141_v15, %v1145_v18  ;;  %v1306_v18 = vld [vmem:[%s18230_s11 + $0x20c0] sm:$0xff] }
 0x820   : > { %14063 = vmatprep.subr.bf16.mxu1 %v16630_v43  ;;  %v16542_v43 = vcombine.high %v1149_v30, %v1153_v39  ;;  %v1434_v22 = vld [vmem:[%s18230_s11 + $0x24c0] sm:$0xff] }
 0x825   : > { %13900 = vmatpush1.bf16.xpose.msra.mxu0 %v16501_v51  ;;  %v1414_v51 = vld [vmem:[%s18230_s11 + $0x2420] sm:$0xff] }
 0x826   : > { %13901 = vmatprep.subr.bf16.mxu0 %v16510_v54  ;;  %v16669_v54 = vcombine.low %v1277_v32, %v1281_v33  ;;  %v16800_v48 = vcombine.high %v1410_v46, %v1414_v51  ;;  %v1318_v32 = vld [vmem:[%s18230_s11 + $0x2120] sm:$0xff] }
 0x827   : > { %14064 = vmatpush1.bf16.xpose.msra.mxu1 %v16629_v53  ;;  %v16541_v53 = vcombine.low %v1149_v30, %v1153_v39  ;;  %v1314_v39 = vld [vmem:[%s18230_s11 + $0x2100] sm:$0xff] }
 0x828   : > { %14065 = vmatprep.subr.bf16.mxu1 %v16638_v60  ;;  %v16672_v60 = vcombine.high %v1282_v45, %v1286_v36  ;;  %v1442_v33 = vld [vmem:[%s18230_s11 + $0x2500] sm:$0xff] }
 0x82d   : > { %13902 = vmatpush1.bf16.xpose.msra.mxu0 %v16509_v62  ;;  %v1422_v62 = vld [vmem:[%s18230_s11 + $0x2460] sm:$0xff] }
 0x82e   : > { %13903 = vmatprep.subr.bf16.mxu0 %v16518_v63  ;;  %v16799_v63 = vcombine.low %v1410_v46, %v1414_v51  ;;  %v16808_v1 = vcombine.high %v1418_v58, %v1422_v62  ;;  %v1326_v46 = vld [vmem:[%s18230_s11 + $0x2160] sm:$0xff] }
 0x82f   : > { %14066 = vmatpush1.bf16.xpose.msra.mxu1 %v16637_v3  ;;  %v16671_v3 = vcombine.low %v1282_v45, %v1286_v36  ;;  %v1322_v36 = vld [vmem:[%s18230_s11 + $0x2140] sm:$0xff] }
 0x830   : > { %14067 = vmatprep.subr.bf16.mxu1 %v16646_v0  ;;  %v16680_v0 = vcombine.high %v1290_v49, %v1294_v55  ;;  %v1450_v51 = vld [vmem:[%s18230_s11 + $0x2540] sm:$0xff] }
 0x835   : > { %13904 = vmatpush1.bf16.xpose.msra.mxu0 %v16517_v8  ;;  %v1430_v8 = vld [vmem:[%s18230_s11 + $0x24a0] sm:$0xff] }
 0x836   : > { %13905 = vmatprep.subr.bf16.mxu0 %v16526_v11  ;;  %v16807_v11 = vcombine.low %v1418_v58, %v1422_v62  ;;  %v16816_v15 = vcombine.high %v1426_v5, %v1430_v8  ;;  %v1334_v58 = vld [vmem:[%s18230_s11 + $0x21a0] sm:$0xff] }
 0x837   : > { %14068 = vmatpush1.bf16.xpose.msra.mxu1 %v16645_v14  ;;  %v16679_v14 = vcombine.low %v1290_v49, %v1294_v55  ;;  %v1330_v55 = vld [vmem:[%s18230_s11 + $0x2180] sm:$0xff] }
 0x838   : > { %14069 = vmatprep.subr.bf16.mxu1 %v16654_v12  ;;  %v16688_v12 = vcombine.high %v1298_v35, %v1302_v28  ;;  %v1458_v62 = vld [vmem:[%s18230_s11 + $0x2580] sm:$0xff] }
 0x83d   : > { %13906 = vmatpush1.bf16.xpose.msra.mxu0 %v16525_v24  ;;  %v1438_v24 = vld [vmem:[%s18230_s11 + $0x24e0] sm:$0xff] }
 0x83e   : > { %13907 = vmatprep.subr.bf16.mxu0 %v16534_v26  ;;  %v16815_v26 = vcombine.low %v1426_v5, %v1430_v8  ;;  %v16824_v30 = vcombine.high %v1434_v22, %v1438_v24  ;;  %v1342_v5 = vld [vmem:[%s18230_s11 + $0x21e0] sm:$0xff] }
 0x83f   : > { %14070 = vmatpush1.bf16.xpose.msra.mxu1 %v16653_v25  ;;  %v16687_v25 = vcombine.low %v1298_v35, %v1302_v28  ;;  %v1338_v28 = vld [vmem:[%s18230_s11 + $0x21c0] sm:$0xff] }
 0x840   : > { %14071 = vmatprep.subr.bf16.mxu1 %v16662_v29  ;;  %v16696_v29 = vcombine.high %v1306_v18, %v1310_v19  ;;  %v1466_v8 = vld [vmem:[%s18230_s11 + $0x25c0] sm:$0xff] }
 0x845   : > { %13908 = vmatpush1.bf16.xpose.msra.mxu0 %v16533_v37  ;;  %v1446_v37 = vld [vmem:[%s18230_s11 + $0x2520] sm:$0xff] }
 0x846   : > { %13909 = vmatprep.subr.bf16.mxu0 %v16542_v43  ;;  %v16823_v43 = vcombine.low %v1434_v22, %v1438_v24  ;;  %v16832_v45 = vcombine.high %v1442_v33, %v1446_v37  ;;  %v1350_v22 = vld [vmem:[%s18230_s11 + $0x2220] sm:$0xff] }
 0x847   : > { %14072 = vmatpush1.bf16.xpose.msra.mxu1 %v16661_v38  ;;  %v16695_v38 = vcombine.low %v1306_v18, %v1310_v19  ;;  %v1346_v19 = vld [vmem:[%s18230_s11 + $0x2200] sm:$0xff] }
 0x848   : > { %14073 = vmatprep.subr.bf16.mxu1 %v16670_v44  ;;  %v16704_v44 = vcombine.high %v1314_v39, %v1318_v32  ;;  %v1474_v24 = vld [vmem:[%s18230_s11 + $0x2600] sm:$0xff] }
 0x84d   : > { %13910 = vmatpush1.bf16.xpose.msra.mxu0 %v16541_v53  ;;  %v1454_v53 = vld [vmem:[%s18230_s11 + $0x2560] sm:$0xff] }
 0x84e   : > { %14084 = vmatprep.subr.bf16.mxu0 %v16672_v60  ;;  %v16831_v60 = vcombine.low %v1442_v33, %v1446_v37  ;;  %v16840_v49 = vcombine.high %v1450_v51, %v1454_v53  ;;  %v1358_v33 = vld [vmem:[%s18230_s11 + $0x2260] sm:$0xff] }
 0x84f   : > { %14074 = vmatpush1.bf16.xpose.msra.mxu1 %v16669_v54  ;;  %v16703_v54 = vcombine.low %v1314_v39, %v1318_v32  ;;  %v1354_v32 = vld [vmem:[%s18230_s11 + $0x2240] sm:$0xff] }
 0x850   : > { %14248 = vmatprep.subr.bf16.mxu1 %v16800_v48  ;;  %v16712_v48 = vcombine.high %v1322_v36, %v1326_v46  ;;  %v1482_v37 = vld [vmem:[%s18230_s11 + $0x2640] sm:$0xff] }
 0x854   : > { %13912 = vmatmul.mubr.bf16.vlgmr.msra.gmra.mrb[12].mxu0 %v18569_v13 }
 0x855   : > { %14085 = vmatpush1.bf16.xpose.msra.mxu0 %v16671_v3  ;;  %14116 = vmatprep.mubr.bf16.mxu0 %v18279_v47  ;;  %v1462_v3 = vld [vmem:[%s18230_s11 + $0x25a0] sm:$0xff] }
 0x856   : > { %14076 = vmatmul.mubr.bf16.vlgmr.msra.gmra.mrb[12].mxu1 %v18569_v13  ;;  %14086 = vmatprep.subr.bf16.mxu0 %v16680_v0  ;;  %v16839_v0 = vcombine.low %v1450_v51, %v1454_v53  ;;  %v16848_v35 = vcombine.high %v1458_v62, %v1462_v3  ;;  %v1366_v51 = vld [vmem:[%s18230_s11 + $0x22a0] sm:$0xff] }
 0x857   : > { %14249 = vmatpush1.bf16.xpose.msra.mxu1 %v16799_v63  ;;  %14280 = vmatprep.mubr.bf16.mxu1 %v18279_v47  ;;  %v16711_v63 = vcombine.low %v1322_v36, %v1326_v46  ;;  %v1362_v46 = vld [vmem:[%s18230_s11 + $0x2280] sm:$0xff] }
 0x858   : > { %14250 = vmatprep.subr.bf16.mxu1 %v16808_v1  ;;  %v16720_v1 = vcombine.high %v1330_v55, %v1334_v58  ;;  %v1490_v53 = vld [vmem:[%s18230_s11 + $0x2680] sm:$0xff] }
 0x85d   : > { %14087 = vmatpush1.bf16.xpose.msra.mxu0 %v16679_v14  ;;  %v1470_v14 = vld [vmem:[%s18230_s11 + $0x25e0] sm:$0xff] }
 0x85e   : > { %14088 = vmatprep.subr.bf16.mxu0 %v16688_v12  ;;  %v16847_v12 = vcombine.low %v1458_v62, %v1462_v3  ;;  %v16856_v18 = vcombine.high %v1466_v8, %v1470_v14  ;;  %v1374_v62 = vld [vmem:[%s18230_s11 + $0x22e0] sm:$0xff] }
 0x85f   : > { %14251 = vmatpush1.bf16.xpose.msra.mxu1 %v16807_v11  ;;  %v16719_v11 = vcombine.low %v1330_v55, %v1334_v58  ;;  %v1370_v58 = vld [vmem:[%s18230_s11 + $0x22c0] sm:$0xff] }
 0x860   : > { %14252 = vmatprep.subr.bf16.mxu1 %v16816_v15  ;;  %v16728_v15 = vcombine.high %v1338_v28, %v1342_v5  ;;  %v1498_v3 = vld [vmem:[%s18230_s11 + $0x26c0] sm:$0xff] }
 0x865   : > { %14089 = vmatpush1.bf16.xpose.msra.mxu0 %v16687_v25  ;;  %v1478_v25 = vld [vmem:[%s18230_s11 + $0x2620] sm:$0xff] }
 0x866   : > { %14090 = vmatprep.subr.bf16.mxu0 %v16696_v29  ;;  %v16855_v29 = vcombine.low %v1466_v8, %v1470_v14  ;;  %v16864_v39 = vcombine.high %v1474_v24, %v1478_v25  ;;  %v1382_v8 = vld [vmem:[%s18230_s11 + $0x2320] sm:$0xff] }
 0x867   : > { %14253 = vmatpush1.bf16.xpose.msra.mxu1 %v16815_v26  ;;  %v16727_v26 = vcombine.low %v1338_v28, %v1342_v5  ;;  %v1378_v5 = vld [vmem:[%s18230_s11 + $0x2300] sm:$0xff] }
 0x868   : > { %14254 = vmatprep.subr.bf16.mxu1 %v16824_v30  ;;  %v16736_v30 = vcombine.high %v1346_v19, %v1350_v22  ;;  %v1506_v14 = vld [vmem:[%s18230_s11 + $0x2700] sm:$0xff] }
 0x86d   : > { %14091 = vmatpush1.bf16.xpose.msra.mxu0 %v16695_v38  ;;  %v1486_v38 = vld [vmem:[%s18230_s11 + $0x2660] sm:$0xff] }
 0x86e   : > { %14092 = vmatprep.subr.bf16.mxu0 %v16704_v44  ;;  %v16863_v44 = vcombine.low %v1474_v24, %v1478_v25  ;;  %v16872_v36 = vcombine.high %v1482_v37, %v1486_v38  ;;  %v1390_v24 = vld [vmem:[%s18230_s11 + $0x2360] sm:$0xff] }
 0x86f   : > { %14255 = vmatpush1.bf16.xpose.msra.mxu1 %v16823_v43  ;;  %v16735_v43 = vcombine.low %v1346_v19, %v1350_v22  ;;  %v1386_v22 = vld [vmem:[%s18230_s11 + $0x2340] sm:$0xff] }
 0x870   : > { %14256 = vmatprep.subr.bf16.mxu1 %v16832_v45  ;;  %v16744_v45 = vcombine.high %v1354_v32, %v1358_v33  ;;  %v1514_v25 = vld [vmem:[%s18230_s11 + $0x2740] sm:$0xff] }
 0x875   : > { %14093 = vmatpush1.bf16.xpose.msra.mxu0 %v16703_v54  ;;  %v1494_v54 = vld [vmem:[%s18230_s11 + $0x26a0] sm:$0xff] }
 0x876   : > { %14094 = vmatprep.subr.bf16.mxu0 %v16712_v48  ;;  %v16871_v48 = vcombine.low %v1482_v37, %v1486_v38  ;;  %v16880_v55 = vcombine.high %v1490_v53, %v1494_v54  ;;  %v1398_v37 = vld [vmem:[%s18230_s11 + $0x23a0] sm:$0xff] }
 0x877   : > { %14257 = vmatpush1.bf16.xpose.msra.mxu1 %v16831_v60  ;;  %v16743_v60 = vcombine.low %v1354_v32, %v1358_v33  ;;  %v1394_v33 = vld [vmem:[%s18230_s11 + $0x2380] sm:$0xff] }
 0x878   : > { %14258 = vmatprep.subr.bf16.mxu1 %v16840_v49  ;;  %v16752_v49 = vcombine.high %v1362_v46, %v1366_v51  ;;  %v1522_v38 = vld [vmem:[%s18230_s11 + $0x2780] sm:$0xff] }
 0x87d   : > { %14095 = vmatpush1.bf16.xpose.msra.mxu0 %v16711_v63  ;;  %v1502_v63 = vld [vmem:[%s18230_s11 + $0x26e0] sm:$0xff] }
 0x87e   : > { %14096 = vmatprep.subr.bf16.mxu0 %v16720_v1  ;;  %v16879_v1 = vcombine.low %v1490_v53, %v1494_v54  ;;  %v16888_v28 = vcombine.high %v1498_v3, %v1502_v63  ;;  %v1406_v53 = vld [vmem:[%s18230_s11 + $0x23e0] sm:$0xff] }
 0x87f   : > { %14259 = vmatpush1.bf16.xpose.msra.mxu1 %v16839_v0  ;;  %v16751_v0 = vcombine.low %v1362_v46, %v1366_v51  ;;  %v1402_v51 = vld [vmem:[%s18230_s11 + $0x23c0] sm:$0xff] }
 0x880   : > { %14260 = vmatprep.subr.bf16.mxu1 %v16848_v35  ;;  %v16760_v35 = vcombine.high %v1370_v58, %v1374_v62  ;;  %v1530_v54 = vld [vmem:[%s18230_s11 + $0x27c0] sm:$0xff] }
 0x885   : > { %14097 = vmatpush1.bf16.xpose.msra.mxu0 %v16719_v11  ;;  %v1510_v11 = vld [vmem:[%s18230_s11 + $0x2720] sm:$0xff] }
 0x886   : > { %14098 = vmatprep.subr.bf16.mxu0 %v16728_v15  ;;  %v16887_v15 = vcombine.low %v1498_v3, %v1502_v63  ;;  %v16896_v19 = vcombine.high %v1506_v14, %v1510_v11  ;;  %v1287_v3 = vld [vmem:[%s18230_s11 + $0x2028] sm:$0xff] }
 0x887   : > { %14261 = vmatpush1.bf16.xpose.msra.mxu1 %v16847_v12  ;;  %v16759_v12 = vcombine.low %v1370_v58, %v1374_v62  ;;  %v1283_v62 = vld [vmem:[%s18230_s11 + $0x2008] sm:$0xff] }
 0x888   : > { %14262 = vmatprep.subr.bf16.mxu1 %v16856_v18  ;;  %v16768_v18 = vcombine.high %v1378_v5, %v1382_v8  ;;  %v1411_v63 = vld [vmem:[%s18230_s11 + $0x2408] sm:$0xff] }
 0x88d   : > { %14099 = vmatpush1.bf16.xpose.msra.mxu0 %v16727_v26  ;;  %v1518_v26 = vld [vmem:[%s18230_s11 + $0x2760] sm:$0xff] }
 0x88e   : > { %14100 = vmatprep.subr.bf16.mxu0 %v16736_v30  ;;  %v16895_v30 = vcombine.low %v1506_v14, %v1510_v11  ;;  %v16904_v32 = vcombine.high %v1514_v25, %v1518_v26  ;;  %v1295_v14 = vld [vmem:[%s18230_s11 + $0x2068] sm:$0xff] }
 0x88f   : > { %14263 = vmatpush1.bf16.xpose.msra.mxu1 %v16855_v29  ;;  %v16767_v29 = vcombine.low %v1378_v5, %v1382_v8  ;;  %v1291_v8 = vld [vmem:[%s18230_s11 + $0x2048] sm:$0xff] }
 0x890   : > { %14264 = vmatprep.subr.bf16.mxu1 %v16864_v39  ;;  %v16776_v39 = vcombine.high %v1386_v22, %v1390_v24  ;;  %v1419_v11 = vld [vmem:[%s18230_s11 + $0x2448] sm:$0xff] }
 0x895   : > { %14101 = vmatpush1.bf16.xpose.msra.mxu0 %v16735_v43  ;;  %v1526_v43 = vld [vmem:[%s18230_s11 + $0x27a0] sm:$0xff] }
 0x896   : > { %14102 = vmatprep.subr.bf16.mxu0 %v16744_v45  ;;  %v16903_v45 = vcombine.low %v1514_v25, %v1518_v26  ;;  %v16912_v46 = vcombine.high %v1522_v38, %v1526_v43  ;;  %v1303_v25 = vld [vmem:[%s18230_s11 + $0x20a8] sm:$0xff] }
 0x897   : > { %14265 = vmatpush1.bf16.xpose.msra.mxu1 %v16863_v44  ;;  %v16775_v44 = vcombine.low %v1386_v22, %v1390_v24  ;;  %v1299_v24 = vld [vmem:[%s18230_s11 + $0x2088] sm:$0xff] }
 0x898   : > { %14266 = vmatprep.subr.bf16.mxu1 %v16872_v36  ;;  %v16784_v36 = vcombine.high %v1394_v33, %v1398_v37  ;;  %v1427_v26 = vld [vmem:[%s18230_s11 + $0x2488] sm:$0xff] }
 0x89d   : > { %14103 = vmatpush1.bf16.xpose.msra.mxu0 %v16743_v60  ;;  %v1534_v60 = vld [vmem:[%s18230_s11 + $0x27e0] sm:$0xff] }
 0x89e   : > { %14104 = vmatprep.subr.bf16.mxu0 %v16752_v49  ;;  %v16911_v49 = vcombine.low %v1522_v38, %v1526_v43  ;;  %v16920_v58 = vcombine.high %v1530_v54, %v1534_v60  ;;  %v1311_v38 = vld [vmem:[%s18230_s11 + $0x20e8] sm:$0xff] }
 0x89f   : > { %14267 = vmatpush1.bf16.xpose.msra.mxu1 %v16871_v48  ;;  %v16783_v48 = vcombine.low %v1394_v33, %v1398_v37  ;;  %v1307_v37 = vld [vmem:[%s18230_s11 + $0x20c8] sm:$0xff] }
 0x8a0   : > { %14268 = vmatprep.subr.bf16.mxu1 %v16880_v55  ;;  %v16792_v55 = vcombine.high %v1402_v51, %v1406_v53  ;;  %v1435_v43 = vld [vmem:[%s18230_s11 + $0x24c8] sm:$0xff] }
 0x8a5   : > { %14105 = vmatpush1.bf16.xpose.msra.mxu0 %v16751_v0  ;;  %v1415_v0 = vld [vmem:[%s18230_s11 + $0x2428] sm:$0xff] }
 0x8a6   : > { %14106 = vmatprep.subr.bf16.mxu0 %v16760_v35  ;;  %v16919_v35 = vcombine.low %v1530_v54, %v1534_v60  ;;  %v16802_v5 = vcombine.high %v1411_v63, %v1415_v0  ;;  %v1319_v54 = vld [vmem:[%s18230_s11 + $0x2128] sm:$0xff] }
 0x8a7   : > { %14269 = vmatpush1.bf16.xpose.msra.mxu1 %v16879_v1  ;;  %v16791_v1 = vcombine.low %v1402_v51, %v1406_v53  ;;  %v1315_v53 = vld [vmem:[%s18230_s11 + $0x2108] sm:$0xff] }
 0x8a8   : > { %14270 = vmatprep.subr.bf16.mxu1 %v16888_v28  ;;  %v16674_v28 = vcombine.high %v1283_v62, %v1287_v3  ;;  %v1443_v60 = vld [vmem:[%s18230_s11 + $0x2508] sm:$0xff] }
 0x8ad   : > { %14107 = vmatpush1.bf16.xpose.msra.mxu0 %v16759_v12  ;;  %v1423_v12 = vld [vmem:[%s18230_s11 + $0x2468] sm:$0xff] }
 0x8ae   : > { %14108 = vmatprep.subr.bf16.mxu0 %v16768_v18  ;;  %v16801_v18 = vcombine.low %v1411_v63, %v1415_v0  ;;  %v16810_v22 = vcombine.high %v1419_v11, %v1423_v12  ;;  %v1327_v63 = vld [vmem:[%s18230_s11 + $0x2168] sm:$0xff] }
 0x8af   : > { %14271 = vmatpush1.bf16.xpose.msra.mxu1 %v16887_v15  ;;  %v16673_v15 = vcombine.low %v1283_v62, %v1287_v3  ;;  %v1323_v3 = vld [vmem:[%s18230_s11 + $0x2148] sm:$0xff] }
 0x8b0   : > { %14272 = vmatprep.subr.bf16.mxu1 %v16896_v19  ;;  %v16682_v19 = vcombine.high %v1291_v8, %v1295_v14  ;;  %v1451_v0 = vld [vmem:[%s18230_s11 + $0x2548] sm:$0xff] }
 0x8b5   : > { %14109 = vmatpush1.bf16.xpose.msra.mxu0 %v16767_v29  ;;  %v1431_v29 = vld [vmem:[%s18230_s11 + $0x24a8] sm:$0xff] }
 0x8b6   : > { %14110 = vmatprep.subr.bf16.mxu0 %v16776_v39  ;;  %v16809_v39 = vcombine.low %v1419_v11, %v1423_v12  ;;  %v16818_v33 = vcombine.high %v1427_v26, %v1431_v29  ;;  %v1335_v11 = vld [vmem:[%s18230_s11 + $0x21a8] sm:$0xff] }
 0x8b7   : > { %14273 = vmatpush1.bf16.xpose.msra.mxu1 %v16895_v30  ;;  %v16681_v30 = vcombine.low %v1291_v8, %v1295_v14  ;;  %v1331_v14 = vld [vmem:[%s18230_s11 + $0x2188] sm:$0xff] }
 0x8b8   : > { %14274 = vmatprep.subr.bf16.mxu1 %v16904_v32  ;;  %v16690_v32 = vcombine.high %v1299_v24, %v1303_v25  ;;  %v1459_v12 = vld [vmem:[%s18230_s11 + $0x2588] sm:$0xff] }
 0x8bd   : > { %14111 = vmatpush1.bf16.xpose.msra.mxu0 %v16775_v44  ;;  %v1439_v44 = vld [vmem:[%s18230_s11 + $0x24e8] sm:$0xff] }
 0x8be   : > { %14112 = vmatprep.subr.bf16.mxu0 %v16784_v36  ;;  %v16817_v36 = vcombine.low %v1427_v26, %v1431_v29  ;;  %v16826_v51 = vcombine.high %v1435_v43, %v1439_v44  ;;  %v1343_v26 = vld [vmem:[%s18230_s11 + $0x21e8] sm:$0xff] }
 0x8bf   : > { %14275 = vmatpush1.bf16.xpose.msra.mxu1 %v16903_v45  ;;  %v16689_v45 = vcombine.low %v1299_v24, %v1303_v25  ;;  %v1339_v25 = vld [vmem:[%s18230_s11 + $0x21c8] sm:$0xff] }
 0x8c0   : > { %14276 = vmatprep.subr.bf16.mxu1 %v16912_v46  ;;  %v16698_v46 = vcombine.high %v1307_v37, %v1311_v38  ;;  %v1467_v29 = vld [vmem:[%s18230_s11 + $0x25c8] sm:$0xff] }
 0x8c5   : > { %14113 = vmatpush1.bf16.xpose.msra.mxu0 %v16783_v48  ;;  %v1447_v48 = vld [vmem:[%s18230_s11 + $0x2528] sm:$0xff] }
 0x8c6   : > { %14114 = vmatprep.subr.bf16.mxu0 %v16792_v55  ;;  %v16825_v55 = vcombine.low %v1435_v43, %v1439_v44  ;;  %v16834_v62 = vcombine.high %v1443_v60, %v1447_v48  ;;  %v1351_v43 = vld [vmem:[%s18230_s11 + $0x2228] sm:$0xff] }
 0x8c7   : > { %14277 = vmatpush1.bf16.xpose.msra.mxu1 %v16911_v49  ;;  %v16697_v49 = vcombine.low %v1307_v37, %v1311_v38  ;;  %v1347_v38 = vld [vmem:[%s18230_s11 + $0x2208] sm:$0xff] }
 0x8c8   : > { %14278 = vmatprep.subr.bf16.mxu1 %v16920_v58  ;;  %v16706_v58 = vcombine.high %v1315_v53, %v1319_v54  ;;  %v1475_v44 = vld [vmem:[%s18230_s11 + $0x2608] sm:$0xff] }
 0x8cd   : > { %14115 = vmatpush1.bf16.xpose.msra.mxu0 %v16791_v1  ;;  %v1455_v1 = vld [vmem:[%s18230_s11 + $0x2568] sm:$0xff] }
 0x8ce   : > { %14125 = vmatprep.subr.bf16.mxu0 %v16674_v28  ;;  %v16833_v28 = vcombine.low %v1443_v60, %v1447_v48  ;;  %v16842_v8 = vcombine.high %v1451_v0, %v1455_v1  ;;  %v1359_v60 = vld [vmem:[%s18230_s11 + $0x2268] sm:$0xff] }
 0x8cf   : > { %14279 = vmatpush1.bf16.xpose.msra.mxu1 %v16919_v35  ;;  %v16705_v35 = vcombine.low %v1315_v53, %v1319_v54  ;;  %v1355_v54 = vld [vmem:[%s18230_s11 + $0x2248] sm:$0xff] }
 0x8d0   : > { %14289 = vmatprep.subr.bf16.mxu1 %v16802_v5  ;;  %v16714_v5 = vcombine.high %v1323_v3, %v1327_v63  ;;  %v1483_v48 = vld [vmem:[%s18230_s11 + $0x2648] sm:$0xff] }
 0x8d4   : > { %14117 = vmatmul.mubr.bf16.vlgmr.msra.gmra.mrb[16].mxu0 %v18335_v23 }
 0x8d5   : > { %14126 = vmatpush1.bf16.xpose.msra.mxu0 %v16673_v15  ;;  %14157 = vmatprep.mubr.bf16.mxu0 %v18341_v31  ;;  %v1463_v15 = vld [vmem:[%s18230_s11 + $0x25a8] sm:$0xff] }
 0x8d6   : > { %14281 = vmatmul.mubr.bf16.vlgmr.msra.gmra.mrb[16].mxu1 %v18335_v23  ;;  %14127 = vmatprep.subr.bf16.mxu0 %v16682_v19  ;;  %v16841_v19 = vcombine.low %v1451_v0, %v1455_v1  ;;  %v16850_v24 = vcombine.high %v1459_v12, %v1463_v15  ;;  %v1367_v0 = vld [vmem:[%s18230_s11 + $0x22a8] sm:$0xff] }
 0x8d7   : > { %14290 = vmatpush1.bf16.xpose.msra.mxu1 %v16801_v18  ;;  %14321 = vmatprep.mubr.bf16.mxu1 %v18341_v31  ;;  %v16713_v18 = vcombine.low %v1323_v3, %v1327_v63  ;;  %v1363_v63 = vld [vmem:[%s18230_s11 + $0x2288] sm:$0xff] }
 0x8d8   : > { %14291 = vmatprep.subr.bf16.mxu1 %v16810_v22  ;;  %v16722_v22 = vcombine.high %v1331_v14, %v1335_v11  ;;  %v1491_v1 = vld [vmem:[%s18230_s11 + $0x2688] sm:$0xff] }
 0x8dd   : > { %14128 = vmatpush1.bf16.xpose.msra.mxu0 %v16681_v30  ;;  %v1471_v30 = vld [vmem:[%s18230_s11 + $0x25e8] sm:$0xff] }
 0x8de   : > { %14129 = vmatprep.subr.bf16.mxu0 %v16690_v32  ;;  %v16849_v32 = vcombine.low %v1459_v12, %v1463_v15  ;;  %v16858_v37 = vcombine.high %v1467_v29, %v1471_v30  ;;  %v1375_v12 = vld [vmem:[%s18230_s11 + $0x22e8] sm:$0xff] }
 0x8df   : > { %14292 = vmatpush1.bf16.xpose.msra.mxu1 %v16809_v39  ;;  %v16721_v39 = vcombine.low %v1331_v14, %v1335_v11  ;;  %v1371_v11 = vld [vmem:[%s18230_s11 + $0x22c8] sm:$0xff] }
 0x8e0   : > { %14293 = vmatprep.subr.bf16.mxu1 %v16818_v33  ;;  %v16730_v33 = vcombine.high %v1339_v25, %v1343_v26  ;;  %v1499_v15 = vld [vmem:[%s18230_s11 + $0x26c8] sm:$0xff] }
 0x8e5   : > { %14130 = vmatpush1.bf16.xpose.msra.mxu0 %v16689_v45  ;;  %v1479_v45 = vld [vmem:[%s18230_s11 + $0x2628] sm:$0xff] }
 0x8e6   : > { %14131 = vmatprep.subr.bf16.mxu0 %v16698_v46  ;;  %v16857_v46 = vcombine.low %v1467_v29, %v1471_v30  ;;  %v16866_v53 = vcombine.high %v1475_v44, %v1479_v45 }
 0x8e7   : > { %14294 = vmatpush1.bf16.xpose.msra.mxu1 %v16817_v36  ;;  %v16729_v36 = vcombine.low %v1339_v25, %v1343_v26  ;;  %v17975_v26 = vld [vmem:[%s18236_s6 + $0x8] sm:$0xff] }
 0x8e8   : > { %14295 = vmatprep.subr.bf16.mxu1 %v16826_v51  ;;  %v16738_v51 = vcombine.high %v1347_v38, %v1351_v43  ;;  %v12663_v29 = vrot.slane %v17975_v26, %v18998_v52  ;;  %v12671_v30 = vrot.slane %v17975_v26, %v19003_v56 }
 0x8ed   : > { %14132 = vmatpush1.bf16.xpose.msra.mxu0 %v16697_v49  ;;  %v1487_v49 = vld [vmem:[%s18230_s11 + $0x2668] sm:$0xff] }
 0x8ee   : > { %14133 = vmatprep.subr.bf16.mxu0 %v16706_v58  ;;  %v16865_v58 = vcombine.low %v1475_v44, %v1479_v45  ;;  %v16874_v3 = vcombine.high %v1483_v48, %v1487_v49 }
 0x8ef   : > { %14296 = vmatpush1.bf16.xpose.msra.mxu1 %v16825_v55  ;;  %v16737_v55 = vcombine.low %v1347_v38, %v1351_v43  ;;  %v1383_v38 = vld [vmem:[%s18230_s11 + $0x2328] sm:$0xff] }
 0x8f0   : > { %14297 = vmatprep.subr.bf16.mxu1 %v16834_v62  ;;  %v16746_v62 = vcombine.high %v1355_v54, %v1359_v60 }
 0x8f5   : > { %14134 = vmatpush1.bf16.xpose.msra.mxu0 %v16705_v35  ;;  %v1495_v35 = vld [vmem:[%s18230_s11 + $0x26a8] sm:$0xff] }
 0x8f6   : > { %14135 = vmatprep.subr.bf16.mxu0 %v16714_v5  ;;  %v16873_v5 = vcombine.low %v1483_v48, %v1487_v49  ;;  %v16882_v14 = vcombine.high %v1491_v1, %v1495_v35  ;;  %v16761_v48 = vcombine.low %v1371_v11, %v1375_v12 }
 0x8f7   : > { %14298 = vmatpush1.bf16.xpose.msra.mxu1 %v16833_v28  ;;  %v16745_v28 = vcombine.low %v1355_v54, %v1359_v60 }
 0x8f8   : > { %14299 = vmatprep.subr.bf16.mxu1 %v16842_v8  ;;  %v16754_v8 = vcombine.high %v1363_v63, %v1367_v0 }
 0x8fd   : > { %14136 = vmatpush1.bf16.xpose.msra.mxu0 %v16713_v18  ;;  %v1503_v18 = vld [vmem:[%s18230_s11 + $0x26e8] sm:$0xff] }
 0x8fe   : > { %14137 = vmatprep.subr.bf16.mxu0 %v16722_v22  ;;  %v16881_v22 = vcombine.low %v1491_v1, %v1495_v35  ;;  %v16890_v25 = vcombine.high %v1499_v15, %v1503_v18 }
 0x8ff   : > { %14300 = vmatpush1.bf16.xpose.msra.mxu1 %v16841_v19  ;;  %v16753_v19 = vcombine.low %v1363_v63, %v1367_v0 }
 0x900   : > { %14301 = vmatprep.subr.bf16.mxu1 %v16850_v24  ;;  %v16762_v24 = vcombine.high %v1371_v11, %v1375_v12 }
 0x905   : > { %14138 = vmatpush1.bf16.xpose.msra.mxu0 %v16721_v39  ;;  %v12667_v39 = vrot.slane %v17975_v26, %v19006_v57 }
 0x906   : > { %14139 = vmatprep.subr.bf16.mxu0 %v16730_v33 }
 0x907   : > { %14302 = vmatpush1.bf16.xpose.msra.mxu1 %v16849_v32  ;;  %v12675_v32 = vrot.slane %v17975_v26, %v19009_v59 }
 0x908   : > { %14303 = vmatprep.subr.bf16.mxu1 %v16858_v37  ;;  %v1379_v37 = vld [vmem:[%s18230_s11 + $0x2308] sm:$0xff] }
 0x909   : > { %v16770_v63 = vcombine.high %v1379_v37, %v1383_v38 }
 0x90d   : > { %14140 = vmatpush1.bf16.xpose.msra.mxu0 %v16729_v36  ;;  %v1507_v36 = vld [vmem:[%s18230_s11 + $0x2708] sm:$0xff] }
 0x90e   : > { %14141 = vmatprep.subr.bf16.mxu0 %v16738_v51 }
 0x90f   : > { %14304 = vmatpush1.bf16.xpose.msra.mxu1 %v16857_v46  ;;  %v1511_v46 = vld [vmem:[%s18230_s11 + $0x2728] sm:$0xff] }
 0x910   : > { %14305 = vmatprep.subr.bf16.mxu1 %v16866_v53  ;;  %v16898_v35 = vcombine.high %v1507_v36, %v1511_v46  ;;  %v16897_v26 = vcombine.low %v1507_v36, %v1511_v46 }
 0x915   : > { %14142 = vmatpush1.bf16.xpose.msra.mxu0 %v16737_v55 }
 0x916   : > { %14143 = vmatprep.subr.bf16.mxu0 %v16746_v62 }
 0x917   : > { %14306 = vmatpush1.bf16.xpose.msra.mxu1 %v16865_v58 }
 0x918   : > { %14307 = vmatprep.subr.bf16.mxu1 %v16874_v3  ;;  %v16889_v3 = vcombine.low %v1499_v15, %v1503_v18  ;;  %v1387_v15 = vld [vmem:[%s18230_s11 + $0x2348] sm:$0xff] }
 0x919   : > { %v1391_v18 = vld [vmem:[%s18230_s11 + $0x2368] sm:$0xff] }
 0x91d   : > { %14144 = vmatpush1.bf16.xpose.msra.mxu0 %v16745_v28 }
 0x91e   : > { %14145 = vmatprep.subr.bf16.mxu0 %v16754_v8 }
 0x91f   : > { %14308 = vmatpush1.bf16.xpose.msra.mxu1 %v16873_v5 }
 0x920   : > { %14309 = vmatprep.subr.bf16.mxu1 %v16882_v14 }
 0x925   : > { %14146 = vmatpush1.bf16.xpose.msra.mxu0 %v16753_v19 }
 0x926   : > { %14147 = vmatprep.subr.bf16.mxu0 %v16762_v24  ;;  %v1519_v24 = vld [vmem:[%s18230_s11 + $0x2768] sm:$0xff] }
 0x927   : > { %14310 = vmatpush1.bf16.xpose.msra.mxu1 %v16881_v22  ;;  %v13913_v33 = vpop.f32.mrb[12].mxu0  ;;  %v1515_v22 = vld [vmem:[%s18230_s11 + $0x2748] sm:$0xff] }
 0x928   : > { %14311 = vmatprep.subr.bf16.mxu1 %v16890_v25  ;;  %v17712_v43 = vadd.f32 %v13913_v33, %v12663_v29  ;;  %v13915_v45 = vpop.f32.mrb[13].mxu0  ;;  %v1395_v33 = vld [vmem:[%s18230_s11 + $0x2388] sm:$0xff] }
 0x929   : > { %v14077_v44 = vpop.f32.mrb[12].mxu1  ;;  %v17713_v53 = vadd.f32 %v13915_v45, %v12667_v39  ;;  %v13917_v60 = vpop.f32.mrb[14].mxu0  ;;  %v16905_v45 = vcombine.low %v1515_v22, %v1519_v24 }
 0x92a   : > { %v17714_v51 = vadd.f32 %v14077_v44, %v12671_v30  ;;  %v14079_v54 = vpop.f32.mrb[13].mxu1  ;;  %v15471_v49 = vmul.f32 %v17712_v43, %v19019_v41  ;;  %v13918_v62 = vpop.f32.mrb[15].mxu0  ;;  %v16778_v30 = vcombine.high %v1387_v15, %v1391_v18  ;;  %v1399_v43 = vld [vmem:[%s18230_s11 + $0x23a8] sm:$0xff] }
 0x92b   : > { %v17715_v55 = vadd.f32 %v14079_v54, %v12675_v32  ;;  %v14081_v58 = vpop.f32.mrb[14].mxu1  ;;  %v15472_v0 = vmul.f32 %v17713_v53, %v19023_v10  ;;  %v16906_v32 = vcombine.high %v1515_v22, %v1519_v24  ;;  %v1523_v44 = vld [vmem:[%s18230_s11 + $0x2788] sm:$0xff]  ;;  %v16786_v36 = vcombine.high %v1395_v33, %v1399_v43  ;;  %v1284_v62 = vld [vmem:[%s18230_s11 + $0x2010] sm:$0xff] }
 0x92c   : > { %v14082_v1 = vpop.f32.mrb[15].mxu1  ;;  %v15482_v28 = vsel %vm15447_vm0, %v15471_v49, 0.0  ;;  %v15473_v5 = vmul.f32 %v17714_v51, %v19028_v16  ;;  %v1403_v51 = vld [vmem:[%s18230_s11 + $0x23c8] sm:$0xff]  ;;  %v1300_v24 = vld [vmem:[%s18230_s11 + $0x2090] sm:$0xff] }
 0x92d   : > { %v15483_v8 = vadd.f32 %v15482_v28, %v19343_v40  ;;  %v15484_v14 = vsel %vm15447_vm0, %v15472_v0, 0.0  ;;  %14148 = vmatpush1.bf16.xpose.msra.mxu0 %v16761_v48  ;;  %v15474_v11 = vmul.f32 %v17715_v55, %v19033_v27  ;;  %v16769_v40 = vcombine.low %v1379_v37, %v1383_v38  ;;  %v1527_v37 = vld [vmem:[%s18230_s11 + $0x27a8] sm:$0xff]  ;;  %v1416_v0 = vld [vmem:[%s18230_s11 + $0x2430] sm:$0xff] }
 0x92e   : > { %14149 = vmatprep.subr.bf16.mxu0 %v16770_v63  ;;  %v15486_v19 = vsel %vm15447_vm0, %v15473_v5, 0.0  ;;  %v16777_v38 = vcombine.low %v1387_v15, %v1391_v18  ;;  %v16914_v46 = vcombine.high %v1523_v44, %v1527_v37  ;;  %v1407_v53 = vld [vmem:[%s18230_s11 + $0x23e8] sm:$0xff]  ;;  %v16785_v48 = vcombine.low %v1395_v33, %v1399_v43  ;;  %v1412_v63 = vld [vmem:[%s18230_s11 + $0x2410] sm:$0xff] }
 0x92f   : > { %14312 = vmatpush1.bf16.xpose.msra.mxu1 %v16889_v3  ;;  %v15485_v12 = vadd.f32 %v15484_v14, %v15483_v8  ;;  %v15488_v29 = vsel %vm15447_vm0, %v15474_v11, 0.0  ;;  %v1531_v54 = vld [vmem:[%s18230_s11 + $0x27c8] sm:$0xff]  ;;  %v16913_v49 = vcombine.low %v1523_v44, %v1527_v37  ;;  %v16794_v55 = vcombine.high %v1403_v51, %v1407_v53  ;;  %v1288_v3 = vld [vmem:[%s18230_s11 + $0x2030] sm:$0xff] }
 0x930   : > { %14313 = vmatprep.subr.bf16.mxu1 %v16898_v35  ;;  %v1535_v60 = vld [vmem:[%s18230_s11 + $0x27e8] sm:$0xff]  ;;  %v16793_v1 = vcombine.low %v1403_v51, %v1407_v53  ;;  %v16676_v28 = vcombine.high %v1284_v62, %v1288_v3  ;;  %v16804_v5 = vcombine.high %v1412_v63, %v1416_v0  ;;  %v1292_v8 = vld [vmem:[%s18230_s11 + $0x2050] sm:$0xff]  ;;  %v16675_v15 = vcombine.low %v1284_v62, %v1288_v3 }
 0x931   : > { %v15487_v25 = vadd.f32 %v15486_v19, %v15485_v12  ;;  %v16922_v58 = vcombine.high %v1531_v54, %v1535_v60  ;;  %v16921_v35 = vcombine.low %v1531_v54, %v1535_v60  ;;  %v1296_v14 = vld [vmem:[%s18230_s11 + $0x2070] sm:$0xff]  ;;  %v16803_v18 = vcombine.low %v1412_v63, %v1416_v0 }
 0x932   : > { %v1420_v11 = vld [vmem:[%s18230_s11 + $0x2450] sm:$0xff]  ;;  %v16684_v19 = vcombine.high %v1292_v8, %v1296_v14 }
 0x933   : > { %v15489_v39 = vadd.f32 %v15488_v29, %v15487_v25  ;;  %v1424_v12 = vld [vmem:[%s18230_s11 + $0x2470] sm:$0xff]  ;;  %v16683_v29 = vcombine.low %v1292_v8, %v1296_v14 }
 0x934   : > { %v16812_v22 = vcombine.high %v1420_v11, %v1424_v12  ;;  %v1428_v25 = vld [vmem:[%s18230_s11 + $0x2490] sm:$0xff] }
 0x935   : > { %14150 = vmatpush1.bf16.xpose.msra.mxu0 %v16769_v40  ;;  %15490 = vadd.xlane.f32.xlu0 %v15489_v39  ;;  %v1304_v40 = vld [vmem:[%s18230_s11 + $0x20b0] sm:$0xff] }
 0x936   : > { %14151 = vmatprep.subr.bf16.mxu0 %v16778_v30  ;;  %v16811_v30 = vcombine.low %v1420_v11, %v1424_v12  ;;  %v16692_v39 = vcombine.high %v1300_v24, %v1304_v40  ;;  %v1308_v33 = vld [vmem:[%s18230_s11 + $0x20d0] sm:$0xff] }
 0x937   : > { %14314 = vmatpush1.bf16.xpose.msra.mxu1 %v16897_v26  ;;  %v1432_v26 = vld [vmem:[%s18230_s11 + $0x24b0] sm:$0xff] }
 0x938   : > { %14315 = vmatprep.subr.bf16.mxu1 %v16906_v32  ;;  %v16820_v32 = vcombine.high %v1428_v25, %v1432_v26  ;;  %v1312_v43 = vld [vmem:[%s18230_s11 + $0x20f0] sm:$0xff] }
 0x939   : > { %v1436_v44 = vld [vmem:[%s18230_s11 + $0x24d0] sm:$0xff] }
 0x93a   : > { %v1440_v37 = vld [vmem:[%s18230_s11 + $0x24f0] sm:$0xff] }
 0x93b   : > { %v1316_v51 = vld [vmem:[%s18230_s11 + $0x2110] sm:$0xff] }
 0x93c   : > { %v1320_v53 = vld [vmem:[%s18230_s11 + $0x2130] sm:$0xff] }
 0x93d   : > { %14152 = vmatpush1.bf16.xpose.msra.mxu0 %v16777_v38  ;;  %v16691_v38 = vcombine.low %v1300_v24, %v1304_v40  ;;  %v1444_v54 = vld [vmem:[%s18230_s11 + $0x2510] sm:$0xff] }
 0x93e   : > { %14153 = vmatprep.subr.bf16.mxu0 %v16786_v36  ;;  %v16700_v36 = vcombine.high %v1308_v33, %v1312_v43  ;;  %v1448_v60 = vld [vmem:[%s18230_s11 + $0x2530] sm:$0xff] }
 0x93f   : > { %14316 = vmatpush1.bf16.xpose.msra.mxu1 %v16905_v45  ;;  %v16819_v45 = vcombine.low %v1428_v25, %v1432_v26  ;;  %v1324_v62 = vld [vmem:[%s18230_s11 + $0x2150] sm:$0xff] }
 0x940   : > { %14317 = vmatprep.subr.bf16.mxu1 %v16914_v46  ;;  %v16828_v46 = vcombine.high %v1436_v44, %v1440_v37  ;;  %v1328_v3 = vld [vmem:[%s18230_s11 + $0x2170] sm:$0xff] }
 0x941   : > { %v1452_v63 = vld [vmem:[%s18230_s11 + $0x2550] sm:$0xff] }
 0x942   : > { %v1456_v0 = vld [vmem:[%s18230_s11 + $0x2570] sm:$0xff] }
 0x943   : > { %v1332_v8 = vld [vmem:[%s18230_s11 + $0x2190] sm:$0xff] }
 0x944   : > { %v1336_v14 = vld [vmem:[%s18230_s11 + $0x21b0] sm:$0xff] }
 0x945   : > { %14154 = vmatpush1.bf16.xpose.msra.mxu0 %v16785_v48  ;;  %v16699_v48 = vcombine.low %v1308_v33, %v1312_v43  ;;  %v1460_v11 = vld [vmem:[%s18230_s11 + $0x2590] sm:$0xff] }
 0x946   : > { %14155 = vmatprep.subr.bf16.mxu0 %v16794_v55  ;;  %v16708_v55 = vcombine.high %v1316_v51, %v1320_v53  ;;  %v1464_v12 = vld [vmem:[%s18230_s11 + $0x25b0] sm:$0xff] }
 0x947   : > { %14318 = vmatpush1.bf16.xpose.msra.mxu1 %v16913_v49  ;;  %v16827_v49 = vcombine.low %v1436_v44, %v1440_v37  ;;  %v1340_v24 = vld [vmem:[%s18230_s11 + $0x21d0] sm:$0xff] }
 0x948   : > { %14319 = vmatprep.subr.bf16.mxu1 %v16922_v58  ;;  %v16836_v58 = vcombine.high %v1444_v54, %v1448_v60  ;;  %v1344_v40 = vld [vmem:[%s18230_s11 + $0x21f0] sm:$0xff] }
 0x949   : > { %v1468_v25 = vld [vmem:[%s18230_s11 + $0x25d0] sm:$0xff] }
 0x94a   : > { %v1472_v26 = vld [vmem:[%s18230_s11 + $0x25f0] sm:$0xff] }
 0x94b   : > { %v1348_v33 = vld [vmem:[%s18230_s11 + $0x2210] sm:$0xff] }
 0x94c   : > { %v1352_v43 = vld [vmem:[%s18230_s11 + $0x2230] sm:$0xff] }
 0x94d   : > { %14156 = vmatpush1.bf16.xpose.msra.mxu0 %v16793_v1  ;;  %v16707_v1 = vcombine.low %v1316_v51, %v1320_v53  ;;  %v1476_v44 = vld [vmem:[%s18230_s11 + $0x2610] sm:$0xff] }
 0x94e   : > { %14166 = vmatprep.subr.bf16.mxu0 %v16676_v28  ;;  %v16716_v28 = vcombine.high %v1324_v62, %v1328_v3  ;;  %v1480_v37 = vld [vmem:[%s18230_s11 + $0x2630] sm:$0xff] }
 0x94f   : > { %14320 = vmatpush1.bf16.xpose.msra.mxu1 %v16921_v35  ;;  %v16835_v35 = vcombine.low %v1444_v54, %v1448_v60  ;;  %v1356_v51 = vld [vmem:[%s18230_s11 + $0x2250] sm:$0xff] }
 0x950   : > { %14330 = vmatprep.subr.bf16.mxu1 %v16804_v5  ;;  %v16844_v5 = vcombine.high %v1452_v63, %v1456_v0  ;;  %v1360_v53 = vld [vmem:[%s18230_s11 + $0x2270] sm:$0xff] }
 0x951   : > { %v1484_v54 = vld [vmem:[%s18230_s11 + $0x2650] sm:$0xff] }
 0x952   : > { %v1488_v60 = vld [vmem:[%s18230_s11 + $0x2670] sm:$0xff] }
 0x954   : > { %14158 = vmatmul.mubr.bf16.vlgmr.msra.gmra.mrb[16].mxu0 %v18416_v42 }
 0x955   : > { %14167 = vmatpush1.bf16.xpose.msra.mxu0 %v16675_v15  ;;  %14198 = vmatprep.mubr.bf16.mxu0 %v18423_v50  ;;  %v16715_v15 = vcombine.low %v1324_v62, %v1328_v3  ;;  %v1364_v62 = vld [vmem:[%s18230_s11 + $0x2290] sm:$0xff] }
 0x956   : > { %14322 = vmatmul.mubr.bf16.vlgmr.msra.gmra.mrb[16].mxu1 %v18416_v42  ;;  %14168 = vmatprep.subr.bf16.mxu0 %v16684_v19  ;;  %v16724_v19 = vcombine.high %v1332_v8, %v1336_v14  ;;  %v1368_v3 = vld [vmem:[%s18230_s11 + $0x22b0] sm:$0xff] }
 0x957   : > { %14331 = vmatpush1.bf16.xpose.msra.mxu1 %v16803_v18  ;;  %14362 = vmatprep.mubr.bf16.mxu1 %v18423_v50  ;;  %v16843_v18 = vcombine.low %v1452_v63, %v1456_v0  ;;  %v1492_v63 = vld [vmem:[%s18230_s11 + $0x2690] sm:$0xff] }
 0x958   : > { %14332 = vmatprep.subr.bf16.mxu1 %v16812_v22  ;;  %v16852_v22 = vcombine.high %v1460_v11, %v1464_v12  ;;  %v1496_v0 = vld [vmem:[%s18230_s11 + $0x26b0] sm:$0xff] }
 0x95d   : > { %14169 = vmatpush1.bf16.xpose.msra.mxu0 %v16683_v29  ;;  %v16723_v29 = vcombine.low %v1332_v8, %v1336_v14  ;;  %v1372_v8 = vld [vmem:[%s18230_s11 + $0x22d0] sm:$0xff] }
 0x95e   : > { %14170 = vmatprep.subr.bf16.mxu0 %v16692_v39  ;;  %v16732_v39 = vcombine.high %v1340_v24, %v1344_v40  ;;  %v1376_v14 = vld [vmem:[%s18230_s11 + $0x22f0] sm:$0xff] }
 0x95f   : > { %14333 = vmatpush1.bf16.xpose.msra.mxu1 %v16811_v30  ;;  %v16851_v30 = vcombine.low %v1460_v11, %v1464_v12  ;;  %v1500_v11 = vld [vmem:[%s18230_s11 + $0x26d0] sm:$0xff] }
 0x960   : > { %14334 = vmatprep.subr.bf16.mxu1 %v16820_v32  ;;  %v16860_v32 = vcombine.high %v1468_v25, %v1472_v26  ;;  %v1504_v12 = vld [vmem:[%s18230_s11 + $0x26f0] sm:$0xff] }
 0x965   : > { %14171 = vmatpush1.bf16.xpose.msra.mxu0 %v16691_v38  ;;  %v16731_v38 = vcombine.low %v1340_v24, %v1344_v40  ;;  %v1380_v24 = vld [vmem:[%s18230_s11 + $0x2310] sm:$0xff] }
 0x966   : > { %14172 = vmatprep.subr.bf16.mxu0 %v16700_v36  ;;  %v16740_v36 = vcombine.high %v1348_v33, %v1352_v43  ;;  %v1384_v40 = vld [vmem:[%s18230_s11 + $0x2330] sm:$0xff] }
 0x967   : > { %14335 = vmatpush1.bf16.xpose.msra.mxu1 %v16819_v45  ;;  %v16859_v45 = vcombine.low %v1468_v25, %v1472_v26  ;;  %v1508_v25 = vld [vmem:[%s18230_s11 + $0x2710] sm:$0xff] }
 0x968   : > { %14336 = vmatprep.subr.bf16.mxu1 %v16828_v46  ;;  %v16868_v46 = vcombine.high %v1476_v44, %v1480_v37  ;;  %v1512_v26 = vld [vmem:[%s18230_s11 + $0x2730] sm:$0xff] }
 0x96d   : > { %14173 = vmatpush1.bf16.xpose.msra.mxu0 %v16699_v48  ;;  %v16739_v48 = vcombine.low %v1348_v33, %v1352_v43  ;;  %v1388_v33 = vld [vmem:[%s18230_s11 + $0x2350] sm:$0xff] }
 0x96e   : > { %14174 = vmatprep.subr.bf16.mxu0 %v16708_v55  ;;  %v16748_v55 = vcombine.high %v1356_v51, %v1360_v53  ;;  %v1392_v43 = vld [vmem:[%s18230_s11 + $0x2370] sm:$0xff] }
 0x96f   : > { %14337 = vmatpush1.bf16.xpose.msra.mxu1 %v16827_v49  ;;  %v16867_v49 = vcombine.low %v1476_v44, %v1480_v37  ;;  %v1516_v44 = vld [vmem:[%s18230_s11 + $0x2750] sm:$0xff] }
 0x970   : > { %14338 = vmatprep.subr.bf16.mxu1 %v16836_v58  ;;  %v16876_v58 = vcombine.high %v1484_v54, %v1488_v60  ;;  %v1520_v37 = vld [vmem:[%s18230_s11 + $0x2770] sm:$0xff] }
 0x975   : > { %14175 = vmatpush1.bf16.xpose.msra.mxu0 %v16707_v1  ;;  %v16747_v1 = vcombine.low %v1356_v51, %v1360_v53  ;;  %v1396_v51 = vld [vmem:[%s18230_s11 + $0x2390] sm:$0xff] }
 0x976   : > { %14176 = vmatprep.subr.bf16.mxu0 %v16716_v28  ;;  %v16756_v28 = vcombine.high %v1364_v62, %v1368_v3  ;;  %v1400_v53 = vld [vmem:[%s18230_s11 + $0x23b0] sm:$0xff] }
 0x977   : > { %14339 = vmatpush1.bf16.xpose.msra.mxu1 %v16835_v35  ;;  %v16875_v35 = vcombine.low %v1484_v54, %v1488_v60  ;;  %v1524_v54 = vld [vmem:[%s18230_s11 + $0x2790] sm:$0xff] }
 0x978   : > { %14340 = vmatprep.subr.bf16.mxu1 %v16844_v5  ;;  %v16884_v5 = vcombine.high %v1492_v63, %v1496_v0  ;;  %v1528_v60 = vld [vmem:[%s18230_s11 + $0x27b0] sm:$0xff] }
 0x97d   : > { %14177 = vmatpush1.bf16.xpose.msra.mxu0 %v16715_v15  ;;  %v16755_v15 = vcombine.low %v1364_v62, %v1368_v3  ;;  %v1404_v62 = vld [vmem:[%s18230_s11 + $0x23d0] sm:$0xff] }
 0x97e   : > { %14178 = vmatprep.subr.bf16.mxu0 %v16724_v19  ;;  %v16764_v19 = vcombine.high %v1372_v8, %v1376_v14  ;;  %v1408_v3 = vld [vmem:[%s18230_s11 + $0x23f0] sm:$0xff] }
 0x97f   : > { %14341 = vmatpush1.bf16.xpose.msra.mxu1 %v16843_v18  ;;  %v16883_v18 = vcombine.low %v1492_v63, %v1496_v0  ;;  %v1532_v63 = vld [vmem:[%s18230_s11 + $0x27d0] sm:$0xff] }
 0x980   : > { %14342 = vmatprep.subr.bf16.mxu1 %v16852_v22  ;;  %v16892_v22 = vcombine.high %v1500_v11, %v1504_v12  ;;  %v1536_v0 = vld [vmem:[%s18230_s11 + $0x27f0] sm:$0xff] }
 0x985   : > { %14179 = vmatpush1.bf16.xpose.msra.mxu0 %v16723_v29  ;;  %v16763_v29 = vcombine.low %v1372_v8, %v1376_v14  ;;  %v16924_v8 = vcombine.high %v1532_v63, %v1536_v0  ;;  %v1285_v14 = vld [vmem:[%s18230_s11 + $0x2018] sm:$0xff] }
 0x986   : > { %14180 = vmatprep.subr.bf16.mxu0 %v16732_v39  ;;  %v16772_v39 = vcombine.high %v1380_v24, %v1384_v40 }
 0x987   : > { %14343 = vmatpush1.bf16.xpose.msra.mxu1 %v16851_v30  ;;  %v16891_v30 = vcombine.low %v1500_v11, %v1504_v12  ;;  %v1289_v11 = vld [vmem:[%s18230_s11 + $0x2038] sm:$0xff] }
 0x988   : > { %14344 = vmatprep.subr.bf16.mxu1 %v16860_v32  ;;  %v16900_v32 = vcombine.high %v1508_v25, %v1512_v26  ;;  %v1413_v12 = vld [vmem:[%s18230_s11 + $0x2418] sm:$0xff] }
 0x98d   : > { %14181 = vmatpush1.bf16.xpose.msra.mxu0 %v16731_v38  ;;  %v16771_v38 = vcombine.low %v1380_v24, %v1384_v40  ;;  %v1293_v40 = vld [vmem:[%s18230_s11 + $0x2058] sm:$0xff] }
 0x98e   : > { %14182 = vmatprep.subr.bf16.mxu0 %v16740_v36  ;;  %v16780_v36 = vcombine.high %v1388_v33, %v1392_v43 }
 0x98f   : > { %14345 = vmatpush1.bf16.xpose.msra.mxu1 %v16859_v45  ;;  %v16899_v45 = vcombine.low %v1508_v25, %v1512_v26  ;;  %v1297_v25 = vld [vmem:[%s18230_s11 + $0x2078] sm:$0xff] }
 0x990   : > { %14346 = vmatprep.subr.bf16.mxu1 %v16868_v46  ;;  %v16908_v46 = vcombine.high %v1516_v44, %v1520_v37  ;;  %v1421_v26 = vld [vmem:[%s18230_s11 + $0x2458] sm:$0xff] }
 0x995   : > { %14183 = vmatpush1.bf16.xpose.msra.mxu0 %v16739_v48  ;;  %v16779_v48 = vcombine.low %v1388_v33, %v1392_v43  ;;  %v1301_v43 = vld [vmem:[%s18230_s11 + $0x2098] sm:$0xff] }
 0x996   : > { %14184 = vmatprep.subr.bf16.mxu0 %v16748_v55  ;;  %v16788_v55 = vcombine.high %v1396_v51, %v1400_v53 }
 0x997   : > { %14347 = vmatpush1.bf16.xpose.msra.mxu1 %v16867_v49  ;;  %v16907_v49 = vcombine.low %v1516_v44, %v1520_v37  ;;  %v1305_v44 = vld [vmem:[%s18230_s11 + $0x20b8] sm:$0xff] }
 0x998   : > { %14348 = vmatprep.subr.bf16.mxu1 %v16876_v58  ;;  %v16916_v58 = vcombine.high %v1524_v54, %v1528_v60  ;;  %v1429_v37 = vld [vmem:[%s18230_s11 + $0x2498] sm:$0xff] }
 0x99d   : > { %14185 = vmatpush1.bf16.xpose.msra.mxu0 %v16747_v1  ;;  %v16787_v1 = vcombine.low %v1396_v51, %v1400_v53  ;;  %v1309_v53 = vld [vmem:[%s18230_s11 + $0x20d8] sm:$0xff] }
 0x99e   : > { %14186 = vmatprep.subr.bf16.mxu0 %v16756_v28  ;;  %v16915_v28 = vcombine.low %v1524_v54, %v1528_v60  ;;  %v1313_v54 = vld [vmem:[%s18230_s11 + $0x20f8] sm:$0xff] }
 0x99f   : > { %14349 = vmatpush1.bf16.xpose.msra.mxu1 %v16875_v35  ;;  %v1437_v60 = vld [vmem:[%s18230_s11 + $0x24d8] sm:$0xff] }
 0x9a0   : > { %14350 = vmatprep.subr.bf16.mxu1 %v16884_v5  ;;  %v16796_v5 = vcombine.high %v1404_v62, %v1408_v3 }
 0x9a5   : > { %14187 = vmatpush1.bf16.xpose.msra.mxu0 %v16755_v15  ;;  %v1417_v15 = vld [vmem:[%s18230_s11 + $0x2438] sm:$0xff] }
 0x9a6   : > { %14188 = vmatprep.subr.bf16.mxu0 %v16764_v19  ;;  %v16923_v19 = vcombine.low %v1532_v63, %v1536_v0  ;;  %v16806_v24 = vcombine.high %v1413_v12, %v1417_v15  ;;  %v1321_v63 = vld [vmem:[%s18230_s11 + $0x2138] sm:$0xff] }
 0x9a7   : > { %14351 = vmatpush1.bf16.xpose.msra.mxu1 %v16883_v18  ;;  %v16795_v18 = vcombine.low %v1404_v62, %v1408_v3  ;;  %v1317_v3 = vld [vmem:[%s18230_s11 + $0x2118] sm:$0xff] }
 0x9a8   : > { %14352 = vmatprep.subr.bf16.mxu1 %v16892_v22  ;;  %v16678_v22 = vcombine.high %v1285_v14, %v1289_v11  ;;  %v1445_v0 = vld [vmem:[%s18230_s11 + $0x2518] sm:$0xff] }
 0x9ad   : > { %14189 = vmatpush1.bf16.xpose.msra.mxu0 %v16763_v29  ;;  %v1425_v29 = vld [vmem:[%s18230_s11 + $0x2478] sm:$0xff] }
 0x9ae   : > { %14190 = vmatprep.subr.bf16.mxu0 %v16772_v39  ;;  %v16805_v39 = vcombine.low %v1413_v12, %v1417_v15  ;;  %v16814_v33 = vcombine.high %v1421_v26, %v1425_v29  ;;  %v1453_v12 = vld [vmem:[%s18230_s11 + $0x2558] sm:$0xff] }
 0x9af   : > { %14353 = vmatpush1.bf16.xpose.msra.mxu1 %v16891_v30  ;;  %v16677_v30 = vcombine.low %v1285_v14, %v1289_v11  ;;  %v1325_v14 = vld [vmem:[%s18230_s11 + $0x2158] sm:$0xff] }
 0x9b0   : > { %14354 = vmatprep.subr.bf16.mxu1 %v16900_v32  ;;  %v16686_v32 = vcombine.high %v1293_v40, %v1297_v25  ;;  %v1329_v11 = vld [vmem:[%s18230_s11 + $0x2178] sm:$0xff] }
 0x9b1   : > { %v1457_v15 = vld [vmem:[%s18230_s11 + $0x2578] sm:$0xff] }
 0x9b5   : > { %14191 = vmatpush1.bf16.xpose.msra.mxu0 %v16771_v38  ;;  %v1433_v38 = vld [vmem:[%s18230_s11 + $0x24b8] sm:$0xff] }
 0x9b6   : > { %14192 = vmatprep.subr.bf16.mxu0 %v16780_v36  ;;  %v16813_v36 = vcombine.low %v1421_v26, %v1425_v29  ;;  %v16822_v51 = vcombine.high %v1429_v37, %v1433_v38  ;;  %v1461_v26 = vld [vmem:[%s18230_s11 + $0x2598] sm:$0xff] }
 0x9b7   : > { %14355 = vmatpush1.bf16.xpose.msra.mxu1 %v16899_v45  ;;  %v16685_v45 = vcombine.low %v1293_v40, %v1297_v25  ;;  %v1333_v40 = vld [vmem:[%s18230_s11 + $0x2198] sm:$0xff] }
 0x9b8   : > { %14356 = vmatprep.subr.bf16.mxu1 %v16908_v46  ;;  %v16694_v46 = vcombine.high %v1301_v43, %v1305_v44  ;;  %v1337_v25 = vld [vmem:[%s18230_s11 + $0x21b8] sm:$0xff] }
 0x9b9   : > { %v1465_v29 = vld [vmem:[%s18230_s11 + $0x25b8] sm:$0xff] }
 0x9bd   : > { %14193 = vmatpush1.bf16.xpose.msra.mxu0 %v16779_v48  ;;  %v1441_v48 = vld [vmem:[%s18230_s11 + $0x24f8] sm:$0xff] }
 0x9be   : > { %14194 = vmatprep.subr.bf16.mxu0 %v16788_v55  ;;  %v16821_v55 = vcombine.low %v1429_v37, %v1433_v38  ;;  %v16830_v62 = vcombine.high %v1437_v60, %v1441_v48  ;;  %v1469_v37 = vld [vmem:[%s18230_s11 + $0x25d8] sm:$0xff] }
 0x9bf   : > { %14357 = vmatpush1.bf16.xpose.msra.mxu1 %v16907_v49  ;;  %v16693_v49 = vcombine.low %v1301_v43, %v1305_v44  ;;  %v1341_v43 = vld [vmem:[%s18230_s11 + $0x21d8] sm:$0xff] }
 0x9c0   : > { %14358 = vmatprep.subr.bf16.mxu1 %v16916_v58  ;;  %v16702_v58 = vcombine.high %v1309_v53, %v1313_v54  ;;  %v1345_v44 = vld [vmem:[%s18230_s11 + $0x21f8] sm:$0xff] }
 0x9c1   : > { %v1473_v38 = vld [vmem:[%s18230_s11 + $0x25f8] sm:$0xff] }
 0x9c2   : > { %v15491_v35 = vpop.xlane.xlu0 %15490 }
 0x9c3   : > { %15492 = vst.msk [vmem:[%s19061_s22 + $0x1] sm:$0x1] %vm15465_vm1, %v15491_v35  ;;  %v16701_v35 = vcombine.low %v1309_v53, %v1313_v54  ;;  %v1349_v53 = vld [vmem:[%s18230_s11 + $0x2218] sm:$0xff] }
 0x9c4   : > { %v1353_v54 = vld [vmem:[%s18230_s11 + $0x2238] sm:$0xff] }
 0x9c5   : > { %14195 = vmatpush1.bf16.xpose.msra.mxu0 %v16787_v1  ;;  %v1449_v1 = vld [vmem:[%s18230_s11 + $0x2538] sm:$0xff] }
 0x9c6   : > { %14196 = vmatprep.subr.bf16.mxu0 %v16796_v5  ;;  %v16710_v5 = vcombine.high %v1317_v3, %v1321_v63 }
 0x9c7   : > { %14359 = vmatpush1.bf16.xpose.msra.mxu1 %v16915_v28  ;;  %v16829_v28 = vcombine.low %v1437_v60, %v1441_v48  ;;  %v1477_v60 = vld [vmem:[%s18230_s11 + $0x2618] sm:$0xff] }
 0x9c8   : > { %14360 = vmatprep.subr.bf16.mxu1 %v16924_v8  ;;  %v16838_v8 = vcombine.high %v1445_v0, %v1449_v1  ;;  %v1481_v48 = vld [vmem:[%s18230_s11 + $0x2638] sm:$0xff] }
 0x9cd   : > { %14197 = vmatpush1.bf16.xpose.msra.mxu0 %v16795_v18  ;;  %v16709_v18 = vcombine.low %v1317_v3, %v1321_v63  ;;  %v1357_v3 = vld [vmem:[%s18230_s11 + $0x2258] sm:$0xff] }
 0x9ce   : > { %14207 = vmatprep.subr.bf16.mxu0 %v16678_v22  ;;  %v16718_v22 = vcombine.high %v1325_v14, %v1329_v11  ;;  %v1361_v63 = vld [vmem:[%s18230_s11 + $0x2278] sm:$0xff] }
 0x9cf   : > { %14361 = vmatpush1.bf16.xpose.msra.mxu1 %v16923_v19  ;;  %v16837_v19 = vcombine.low %v1445_v0, %v1449_v1  ;;  %v1485_v0 = vld [vmem:[%s18230_s11 + $0x2658] sm:$0xff] }
 0x9d0   : > { %14371 = vmatprep.subr.bf16.mxu1 %v16806_v24  ;;  %v16846_v24 = vcombine.high %v1453_v12, %v1457_v15  ;;  %v1489_v1 = vld [vmem:[%s18230_s11 + $0x2678] sm:$0xff] }
 0x9d4   : > { %14199 = vmatmul.mubr.bf16.vlgmr.msra.gmra.mrb[16].mxu0 %v18493_v61 }
 0x9d5   : > { %14208 = vmatpush1.bf16.xpose.msra.mxu0 %v16677_v30  ;;  %14239 = vmatprep.mubr.bf16.mxu0 %v18499_v4  ;;  %v16717_v30 = vcombine.low %v1325_v14, %v1329_v11  ;;  %v1365_v14 = vld [vmem:[%s18230_s11 + $0x2298] sm:$0xff] }
 0x9d6   : > { %14363 = vmatmul.mubr.bf16.vlgmr.msra.gmra.mrb[16].mxu1 %v18493_v61  ;;  %14209 = vmatprep.subr.bf16.mxu0 %v16686_v32  ;;  %v16726_v32 = vcombine.high %v1333_v40, %v1337_v25  ;;  %v1369_v11 = vld [vmem:[%s18230_s11 + $0x22b8] sm:$0xff] }
 0x9d7   : > { %14372 = vmatpush1.bf16.xpose.msra.mxu1 %v16805_v39  ;;  %14403 = vmatprep.mubr.bf16.mxu1 %v18499_v4  ;;  %v16845_v39 = vcombine.low %v1453_v12, %v1457_v15  ;;  %v1493_v12 = vld [vmem:[%s18230_s11 + $0x2698] sm:$0xff] }
 0x9d8   : > { %14373 = vmatprep.subr.bf16.mxu1 %v16814_v33  ;;  %v16854_v33 = vcombine.high %v1461_v26, %v1465_v29  ;;  %v1497_v15 = vld [vmem:[%s18230_s11 + $0x26b8] sm:$0xff] }
 0x9dd   : > { %14210 = vmatpush1.bf16.xpose.msra.mxu0 %v16685_v45  ;;  %v16725_v45 = vcombine.low %v1333_v40, %v1337_v25  ;;  %v1373_v40 = vld [vmem:[%s18230_s11 + $0x22d8] sm:$0xff] }
 0x9de   : > { %14211 = vmatprep.subr.bf16.mxu0 %v16694_v46  ;;  %v16734_v46 = vcombine.high %v1341_v43, %v1345_v44  ;;  %v1377_v25 = vld [vmem:[%s18230_s11 + $0x22f8] sm:$0xff] }
 0x9df   : > { %14374 = vmatpush1.bf16.xpose.msra.mxu1 %v16813_v36  ;;  %v16853_v36 = vcombine.low %v1461_v26, %v1465_v29  ;;  %v1501_v26 = vld [vmem:[%s18230_s11 + $0x26d8] sm:$0xff] }
 0x9e0   : > { %14375 = vmatprep.subr.bf16.mxu1 %v16822_v51  ;;  %v16862_v51 = vcombine.high %v1469_v37, %v1473_v38  ;;  %v1505_v29 = vld [vmem:[%s18230_s11 + $0x26f8] sm:$0xff] }
 0x9e5   : > { %14212 = vmatpush1.bf16.xpose.msra.mxu0 %v16693_v49  ;;  %v16733_v49 = vcombine.low %v1341_v43, %v1345_v44  ;;  %v1381_v43 = vld [vmem:[%s18230_s11 + $0x2318] sm:$0xff] }
 0x9e6   : > { %14213 = vmatprep.subr.bf16.mxu0 %v16702_v58  ;;  %v16742_v58 = vcombine.high %v1349_v53, %v1353_v54  ;;  %v1385_v44 = vld [vmem:[%s18230_s11 + $0x2338] sm:$0xff] }
 0x9e7   : > { %14376 = vmatpush1.bf16.xpose.msra.mxu1 %v16821_v55  ;;  %v16861_v55 = vcombine.low %v1469_v37, %v1473_v38  ;;  %v1509_v37 = vld [vmem:[%s18230_s11 + $0x2718] sm:$0xff] }
 0x9e8   : > { %14377 = vmatprep.subr.bf16.mxu1 %v16830_v62  ;;  %v16870_v62 = vcombine.high %v1477_v60, %v1481_v48  ;;  %v1513_v38 = vld [vmem:[%s18230_s11 + $0x2738] sm:$0xff] }
 0x9ed   : > { %14214 = vmatpush1.bf16.xpose.msra.mxu0 %v16701_v35  ;;  %v16741_v35 = vcombine.low %v1349_v53, %v1353_v54  ;;  %v1389_v53 = vld [vmem:[%s18230_s11 + $0x2358] sm:$0xff] }
 0x9ee   : > { %14215 = vmatprep.subr.bf16.mxu0 %v16710_v5  ;;  %v16750_v5 = vcombine.high %v1357_v3, %v1361_v63  ;;  %v1393_v54 = vld [vmem:[%s18230_s11 + $0x2378] sm:$0xff] }
 0x9ef   : > { %14378 = vmatpush1.bf16.xpose.msra.mxu1 %v16829_v28  ;;  %v16869_v28 = vcombine.low %v1477_v60, %v1481_v48  ;;  %v1517_v60 = vld [vmem:[%s18230_s11 + $0x2758] sm:$0xff] }
 0x9f0   : > { %14379 = vmatprep.subr.bf16.mxu1 %v16838_v8  ;;  %v16878_v8 = vcombine.high %v1485_v0, %v1489_v1  ;;  %v1521_v48 = vld [vmem:[%s18230_s11 + $0x2778] sm:$0xff] }
 0x9f5   : > { %14216 = vmatpush1.bf16.xpose.msra.mxu0 %v16709_v18  ;;  %v16749_v18 = vcombine.low %v1357_v3, %v1361_v63  ;;  %v1397_v3 = vld [vmem:[%s18230_s11 + $0x2398] sm:$0xff] }
 0x9f6   : > { %14217 = vmatprep.subr.bf16.mxu0 %v16718_v22  ;;  %v16758_v22 = vcombine.high %v1365_v14, %v1369_v11  ;;  %v1401_v63 = vld [vmem:[%s18230_s11 + $0x23b8] sm:$0xff] }
 0x9f7   : > { %14380 = vmatpush1.bf16.xpose.msra.mxu1 %v16837_v19  ;;  %v16877_v19 = vcombine.low %v1485_v0, %v1489_v1  ;;  %v1525_v0 = vld [vmem:[%s18230_s11 + $0x2798] sm:$0xff] }
 0x9f8   : > { %14381 = vmatprep.subr.bf16.mxu1 %v16846_v24  ;;  %v16886_v24 = vcombine.high %v1493_v12, %v1497_v15  ;;  %v1529_v1 = vld [vmem:[%s18230_s11 + $0x27b8] sm:$0xff] }
 0x9fd   : > { %14218 = vmatpush1.bf16.xpose.msra.mxu0 %v16717_v30  ;;  %v16757_v30 = vcombine.low %v1365_v14, %v1369_v11  ;;  %v1405_v14 = vld [vmem:[%s18230_s11 + $0x23d8] sm:$0xff] }
 0x9fe   : > { %14219 = vmatprep.subr.bf16.mxu0 %v16726_v32  ;;  %v16766_v32 = vcombine.high %v1373_v40, %v1377_v25  ;;  %v1409_v11 = vld [vmem:[%s18230_s11 + $0x23f8] sm:$0xff] }
 0x9ff   : > { %14382 = vmatpush1.bf16.xpose.msra.mxu1 %v16845_v39  ;;  %v16885_v39 = vcombine.low %v1493_v12, %v1497_v15  ;;  %v1533_v12 = vld [vmem:[%s18230_s11 + $0x27d8] sm:$0xff] }
 0xa00   : > { %14383 = vmatprep.subr.bf16.mxu1 %v16854_v33  ;;  %v16894_v33 = vcombine.high %v1501_v26, %v1505_v29  ;;  %v1537_v15 = vld [vmem:[%s18230_s11 + $0x27f8] sm:$0xff] }
 0xa05   : > { %14220 = vmatpush1.bf16.xpose.msra.mxu0 %v16725_v45  ;;  %v16765_v45 = vcombine.low %v1373_v40, %v1377_v25  ;;  %v1538_v40 = vld [vmem:[%s18230_s11 + $0x2800] sm:$0xff] }
 0xa06   : > { %14221 = vmatprep.subr.bf16.mxu0 %v16734_v46  ;;  %v16774_v46 = vcombine.high %v1381_v43, %v1385_v44  ;;  %v1542_v25 = vld [vmem:[%s18230_s11 + $0x2820] sm:$0xff] }
 0xa07   : > { %14384 = vmatpush1.bf16.xpose.msra.mxu1 %v16853_v36  ;;  %v16893_v36 = vcombine.low %v1501_v26, %v1505_v29  ;;  %v1666_v26 = vld [vmem:[%s18230_s11 + $0x2c00] sm:$0xff] }
 0xa08   : > { %14385 = vmatprep.subr.bf16.mxu1 %v16862_v51  ;;  %v16902_v51 = vcombine.high %v1509_v37, %v1513_v38  ;;  %v1670_v29 = vld [vmem:[%s18230_s11 + $0x2c20] sm:$0xff] }
 0xa0d   : > { %14222 = vmatpush1.bf16.xpose.msra.mxu0 %v16733_v49  ;;  %v16773_v49 = vcombine.low %v1381_v43, %v1385_v44  ;;  %v1546_v43 = vld [vmem:[%s18230_s11 + $0x2840] sm:$0xff] }
 0xa0e   : > { %14223 = vmatprep.subr.bf16.mxu0 %v16742_v58  ;;  %v16782_v58 = vcombine.high %v1389_v53, %v1393_v54  ;;  %v1550_v44 = vld [vmem:[%s18230_s11 + $0x2860] sm:$0xff] }
 0xa0f   : > { %14386 = vmatpush1.bf16.xpose.msra.mxu1 %v16861_v55  ;;  %v16901_v55 = vcombine.low %v1509_v37, %v1513_v38  ;;  %v1674_v37 = vld [vmem:[%s18230_s11 + $0x2c40] sm:$0xff] }
 0xa10   : > { %14387 = vmatprep.subr.bf16.mxu1 %v16870_v62  ;;  %v16910_v62 = vcombine.high %v1517_v60, %v1521_v48  ;;  %v1678_v38 = vld [vmem:[%s18230_s11 + $0x2c60] sm:$0xff] }
 0xa15   : > { %14224 = vmatpush1.bf16.xpose.msra.mxu0 %v16741_v35  ;;  %v16781_v35 = vcombine.low %v1389_v53, %v1393_v54  ;;  %v1554_v53 = vld [vmem:[%s18230_s11 + $0x2880] sm:$0xff] }
 0xa16   : > { %14225 = vmatprep.subr.bf16.mxu0 %v16750_v5  ;;  %v16790_v5 = vcombine.high %v1397_v3, %v1401_v63  ;;  %v1558_v54 = vld [vmem:[%s18230_s11 + $0x28a0] sm:$0xff] }
 0xa17   : > { %14388 = vmatpush1.bf16.xpose.msra.mxu1 %v16869_v28  ;;  %v16909_v28 = vcombine.low %v1517_v60, %v1521_v48  ;;  %v1682_v60 = vld [vmem:[%s18230_s11 + $0x2c80] sm:$0xff] }
 0xa18   : > { %14389 = vmatprep.subr.bf16.mxu1 %v16878_v8  ;;  %v16918_v8 = vcombine.high %v1525_v0, %v1529_v1  ;;  %v1686_v48 = vld [vmem:[%s18230_s11 + $0x2ca0] sm:$0xff] }
 0xa1d   : > { %14226 = vmatpush1.bf16.xpose.msra.mxu0 %v16749_v18  ;;  %v16789_v18 = vcombine.low %v1397_v3, %v1401_v63  ;;  %v1562_v3 = vld [vmem:[%s18230_s11 + $0x28c0] sm:$0xff] }
 0xa1e   : > { %14227 = vmatprep.subr.bf16.mxu0 %v16758_v22  ;;  %v16798_v22 = vcombine.high %v1405_v14, %v1409_v11  ;;  %v1566_v63 = vld [vmem:[%s18230_s11 + $0x28e0] sm:$0xff] }
 0xa1f   : > { %14390 = vmatpush1.bf16.xpose.msra.mxu1 %v16877_v19  ;;  %v16917_v19 = vcombine.low %v1525_v0, %v1529_v1  ;;  %v1690_v0 = vld [vmem:[%s18230_s11 + $0x2cc0] sm:$0xff] }
 0xa20   : > { %14391 = vmatprep.subr.bf16.mxu1 %v16886_v24  ;;  %v16926_v24 = vcombine.high %v1533_v12, %v1537_v15  ;;  %v1694_v1 = vld [vmem:[%s18230_s11 + $0x2ce0] sm:$0xff] }
 0xa25   : > { %14228 = vmatpush1.bf16.xpose.msra.mxu0 %v16757_v30  ;;  %v16797_v30 = vcombine.low %v1405_v14, %v1409_v11  ;;  %v1570_v14 = vld [vmem:[%s18230_s11 + $0x2900] sm:$0xff] }
 0xa26   : > { %14229 = vmatprep.subr.bf16.mxu0 %v16766_v32  ;;  %v16928_v32 = vcombine.high %v1538_v40, %v1542_v25  ;;  %v1574_v11 = vld [vmem:[%s18230_s11 + $0x2920] sm:$0xff] }
 0xa27   : > { %14392 = vmatpush1.bf16.xpose.msra.mxu1 %v16885_v39  ;;  %v16925_v39 = vcombine.low %v1533_v12, %v1537_v15  ;;  %v1698_v12 = vld [vmem:[%s18230_s11 + $0x2d00] sm:$0xff] }
 0xa28   : > { %14393 = vmatprep.subr.bf16.mxu1 %v16894_v33  ;;  %v17056_v33 = vcombine.high %v1666_v26, %v1670_v29  ;;  %v1702_v15 = vld [vmem:[%s18230_s11 + $0x2d20] sm:$0xff] }
 0xa2d   : > { %14230 = vmatpush1.bf16.xpose.msra.mxu0 %v16765_v45  ;;  %v16927_v45 = vcombine.low %v1538_v40, %v1542_v25  ;;  %v1578_v40 = vld [vmem:[%s18230_s11 + $0x2940] sm:$0xff] }
 0xa2e   : > { %14231 = vmatprep.subr.bf16.mxu0 %v16774_v46  ;;  %v16936_v46 = vcombine.high %v1546_v43, %v1550_v44  ;;  %v1582_v25 = vld [vmem:[%s18230_s11 + $0x2960] sm:$0xff] }
 0xa2f   : > { %14394 = vmatpush1.bf16.xpose.msra.mxu1 %v16893_v36  ;;  %v17055_v36 = vcombine.low %v1666_v26, %v1670_v29  ;;  %v1706_v26 = vld [vmem:[%s18230_s11 + $0x2d40] sm:$0xff] }
 0xa30   : > { %14395 = vmatprep.subr.bf16.mxu1 %v16902_v51  ;;  %v17064_v51 = vcombine.high %v1674_v37, %v1678_v38  ;;  %v1710_v29 = vld [vmem:[%s18230_s11 + $0x2d60] sm:$0xff] }
 0xa35   : > { %14232 = vmatpush1.bf16.xpose.msra.mxu0 %v16773_v49  ;;  %v16935_v49 = vcombine.low %v1546_v43, %v1550_v44  ;;  %v1586_v43 = vld [vmem:[%s18230_s11 + $0x2980] sm:$0xff] }
 0xa36   : > { %14233 = vmatprep.subr.bf16.mxu0 %v16782_v58  ;;  %v16944_v58 = vcombine.high %v1554_v53, %v1558_v54  ;;  %v1590_v44 = vld [vmem:[%s18230_s11 + $0x29a0] sm:$0xff] }
 0xa37   : > { %14396 = vmatpush1.bf16.xpose.msra.mxu1 %v16901_v55  ;;  %v17063_v55 = vcombine.low %v1674_v37, %v1678_v38  ;;  %v1714_v37 = vld [vmem:[%s18230_s11 + $0x2d80] sm:$0xff] }
 0xa38   : > { %14397 = vmatprep.subr.bf16.mxu1 %v16910_v62  ;;  %v17072_v62 = vcombine.high %v1682_v60, %v1686_v48  ;;  %v1718_v38 = vld [vmem:[%s18230_s11 + $0x2da0] sm:$0xff] }
 0xa3d   : > { %14234 = vmatpush1.bf16.xpose.msra.mxu0 %v16781_v35  ;;  %v16943_v35 = vcombine.low %v1554_v53, %v1558_v54  ;;  %v1594_v53 = vld [vmem:[%s18230_s11 + $0x29c0] sm:$0xff] }
 0xa3e   : > { %14235 = vmatprep.subr.bf16.mxu0 %v16790_v5  ;;  %v16952_v5 = vcombine.high %v1562_v3, %v1566_v63  ;;  %v1598_v54 = vld [vmem:[%s18230_s11 + $0x29e0] sm:$0xff] }
 0xa3f   : > { %14398 = vmatpush1.bf16.xpose.msra.mxu1 %v16909_v28  ;;  %v17071_v28 = vcombine.low %v1682_v60, %v1686_v48  ;;  %v1722_v60 = vld [vmem:[%s18230_s11 + $0x2dc0] sm:$0xff] }
 0xa40   : > { %14399 = vmatprep.subr.bf16.mxu1 %v16918_v8  ;;  %v17080_v8 = vcombine.high %v1690_v0, %v1694_v1  ;;  %v1726_v48 = vld [vmem:[%s18230_s11 + $0x2de0] sm:$0xff] }
 0xa45   : > { %14236 = vmatpush1.bf16.xpose.msra.mxu0 %v16789_v18  ;;  %v16951_v18 = vcombine.low %v1562_v3, %v1566_v63  ;;  %v1602_v3 = vld [vmem:[%s18230_s11 + $0x2a00] sm:$0xff] }
 0xa46   : > { %14237 = vmatprep.subr.bf16.mxu0 %v16798_v22  ;;  %v16960_v22 = vcombine.high %v1570_v14, %v1574_v11  ;;  %v1606_v63 = vld [vmem:[%s18230_s11 + $0x2a20] sm:$0xff] }
 0xa47   : > { %14400 = vmatpush1.bf16.xpose.msra.mxu1 %v16917_v19  ;;  %v17079_v19 = vcombine.low %v1690_v0, %v1694_v1  ;;  %v1730_v0 = vld [vmem:[%s18230_s11 + $0x2e00] sm:$0xff] }
 0xa48   : > { %14401 = vmatprep.subr.bf16.mxu1 %v16926_v24  ;;  %v17088_v24 = vcombine.high %v1698_v12, %v1702_v15  ;;  %v1734_v1 = vld [vmem:[%s18230_s11 + $0x2e20] sm:$0xff] }
 0xa4d   : > { %14238 = vmatpush1.bf16.xpose.msra.mxu0 %v16797_v30  ;;  %v16959_v30 = vcombine.low %v1570_v14, %v1574_v11  ;;  %v1610_v14 = vld [vmem:[%s18230_s11 + $0x2a40] sm:$0xff] }
 0xa4e   : > { %14412 = vmatprep.subr.bf16.mxu0 %v16928_v32  ;;  %v16968_v32 = vcombine.high %v1578_v40, %v1582_v25  ;;  %v1614_v11 = vld [vmem:[%s18230_s11 + $0x2a60] sm:$0xff] }
 0xa4f   : > { %14402 = vmatpush1.bf16.xpose.msra.mxu1 %v16925_v39  ;;  %v17087_v39 = vcombine.low %v1698_v12, %v1702_v15  ;;  %v1738_v12 = vld [vmem:[%s18230_s11 + $0x2e40] sm:$0xff] }
 0xa50   : > { %14576 = vmatprep.subr.bf16.mxu1 %v17056_v33  ;;  %v17096_v33 = vcombine.high %v1706_v26, %v1710_v29  ;;  %v1742_v15 = vld [vmem:[%s18230_s11 + $0x2e60] sm:$0xff] }
 0xa54   : > { %14240 = vmatmul.mubr.bf16.vlgmr.msra.gmra.mrb[16].mxu0 %v18569_v13 }
 0xa55   : > { %14413 = vmatpush1.bf16.xpose.msra.mxu0 %v16927_v45  ;;  %14444 = vmatprep.mubr.bf16.mxu0 %v18279_v47  ;;  %v16967_v45 = vcombine.low %v1578_v40, %v1582_v25  ;;  %v1618_v40 = vld [vmem:[%s18230_s11 + $0x2a80] sm:$0xff] }
 0xa56   : > { %14404 = vmatmul.mubr.bf16.vlgmr.msra.gmra.mrb[16].mxu1 %v18569_v13  ;;  %14414 = vmatprep.subr.bf16.mxu0 %v16936_v46  ;;  %v16976_v46 = vcombine.high %v1586_v43, %v1590_v44  ;;  %v1622_v25 = vld [vmem:[%s18230_s11 + $0x2aa0] sm:$0xff] }
 0xa57   : > { %14577 = vmatpush1.bf16.xpose.msra.mxu1 %v17055_v36  ;;  %14608 = vmatprep.mubr.bf16.mxu1 %v18279_v47  ;;  %v17095_v36 = vcombine.low %v1706_v26, %v1710_v29  ;;  %v1746_v26 = vld [vmem:[%s18230_s11 + $0x2e80] sm:$0xff] }
 0xa58   : > { %14578 = vmatprep.subr.bf16.mxu1 %v17064_v51  ;;  %v17104_v51 = vcombine.high %v1714_v37, %v1718_v38  ;;  %v1750_v29 = vld [vmem:[%s18230_s11 + $0x2ea0] sm:$0xff] }
 0xa5d   : > { %14415 = vmatpush1.bf16.xpose.msra.mxu0 %v16935_v49  ;;  %v16975_v49 = vcombine.low %v1586_v43, %v1590_v44  ;;  %v1626_v43 = vld [vmem:[%s18230_s11 + $0x2ac0] sm:$0xff] }
 0xa5e   : > { %14416 = vmatprep.subr.bf16.mxu0 %v16944_v58  ;;  %v16984_v58 = vcombine.high %v1594_v53, %v1598_v54  ;;  %v1630_v44 = vld [vmem:[%s18230_s11 + $0x2ae0] sm:$0xff] }
 0xa5f   : > { %14579 = vmatpush1.bf16.xpose.msra.mxu1 %v17063_v55  ;;  %v17103_v55 = vcombine.low %v1714_v37, %v1718_v38  ;;  %v1754_v37 = vld [vmem:[%s18230_s11 + $0x2ec0] sm:$0xff] }
 0xa60   : > { %14580 = vmatprep.subr.bf16.mxu1 %v17072_v62  ;;  %v17112_v62 = vcombine.high %v1722_v60, %v1726_v48  ;;  %v1758_v38 = vld [vmem:[%s18230_s11 + $0x2ee0] sm:$0xff] }
 0xa65   : > { %14417 = vmatpush1.bf16.xpose.msra.mxu0 %v16943_v35  ;;  %v16983_v35 = vcombine.low %v1594_v53, %v1598_v54  ;;  %v1634_v53 = vld [vmem:[%s18230_s11 + $0x2b00] sm:$0xff] }
 0xa66   : > { %14418 = vmatprep.subr.bf16.mxu0 %v16952_v5  ;;  %v16992_v5 = vcombine.high %v1602_v3, %v1606_v63  ;;  %v1638_v54 = vld [vmem:[%s18230_s11 + $0x2b20] sm:$0xff] }
 0xa67   : > { %14581 = vmatpush1.bf16.xpose.msra.mxu1 %v17071_v28  ;;  %v17111_v28 = vcombine.low %v1722_v60, %v1726_v48  ;;  %v1762_v60 = vld [vmem:[%s18230_s11 + $0x2f00] sm:$0xff] }
 0xa68   : > { %14582 = vmatprep.subr.bf16.mxu1 %v17080_v8  ;;  %v17120_v8 = vcombine.high %v1730_v0, %v1734_v1  ;;  %v1766_v48 = vld [vmem:[%s18230_s11 + $0x2f20] sm:$0xff] }
 0xa6d   : > { %14419 = vmatpush1.bf16.xpose.msra.mxu0 %v16951_v18  ;;  %v16991_v18 = vcombine.low %v1602_v3, %v1606_v63  ;;  %v1642_v3 = vld [vmem:[%s18230_s11 + $0x2b40] sm:$0xff] }
 0xa6e   : > { %14420 = vmatprep.subr.bf16.mxu0 %v16960_v22  ;;  %v17000_v22 = vcombine.high %v1610_v14, %v1614_v11  ;;  %v1646_v63 = vld [vmem:[%s18230_s11 + $0x2b60] sm:$0xff] }
 0xa6f   : > { %14583 = vmatpush1.bf16.xpose.msra.mxu1 %v17079_v19  ;;  %v17119_v19 = vcombine.low %v1730_v0, %v1734_v1  ;;  %v1770_v0 = vld [vmem:[%s18230_s11 + $0x2f40] sm:$0xff] }
 0xa70   : > { %14584 = vmatprep.subr.bf16.mxu1 %v17088_v24  ;;  %v17128_v24 = vcombine.high %v1738_v12, %v1742_v15  ;;  %v1774_v1 = vld [vmem:[%s18230_s11 + $0x2f60] sm:$0xff] }
 0xa75   : > { %14421 = vmatpush1.bf16.xpose.msra.mxu0 %v16959_v30  ;;  %v16999_v30 = vcombine.low %v1610_v14, %v1614_v11  ;;  %v1650_v14 = vld [vmem:[%s18230_s11 + $0x2b80] sm:$0xff] }
 0xa76   : > { %14422 = vmatprep.subr.bf16.mxu0 %v16968_v32  ;;  %v17008_v32 = vcombine.high %v1618_v40, %v1622_v25  ;;  %v1654_v11 = vld [vmem:[%s18230_s11 + $0x2ba0] sm:$0xff] }
 0xa77   : > { %14585 = vmatpush1.bf16.xpose.msra.mxu1 %v17087_v39  ;;  %v17127_v39 = vcombine.low %v1738_v12, %v1742_v15  ;;  %v1778_v12 = vld [vmem:[%s18230_s11 + $0x2f80] sm:$0xff] }
 0xa78   : > { %14586 = vmatprep.subr.bf16.mxu1 %v17096_v33  ;;  %v17136_v33 = vcombine.high %v1746_v26, %v1750_v29  ;;  %v1782_v15 = vld [vmem:[%s18230_s11 + $0x2fa0] sm:$0xff] }
 0xa7d   : > { %14423 = vmatpush1.bf16.xpose.msra.mxu0 %v16967_v45  ;;  %v17007_v45 = vcombine.low %v1618_v40, %v1622_v25  ;;  %v1658_v40 = vld [vmem:[%s18230_s11 + $0x2bc0] sm:$0xff] }
 0xa7e   : > { %14424 = vmatprep.subr.bf16.mxu0 %v16976_v46  ;;  %v17016_v46 = vcombine.high %v1626_v43, %v1630_v44  ;;  %v1662_v25 = vld [vmem:[%s18230_s11 + $0x2be0] sm:$0xff] }
 0xa7f   : > { %14587 = vmatpush1.bf16.xpose.msra.mxu1 %v17095_v36  ;;  %v17135_v36 = vcombine.low %v1746_v26, %v1750_v29  ;;  %v1786_v26 = vld [vmem:[%s18230_s11 + $0x2fc0] sm:$0xff] }
 0xa80   : > { %14588 = vmatprep.subr.bf16.mxu1 %v17104_v51  ;;  %v17144_v51 = vcombine.high %v1754_v37, %v1758_v38  ;;  %v1790_v29 = vld [vmem:[%s18230_s11 + $0x2fe0] sm:$0xff] }
 0xa85   : > { %14425 = vmatpush1.bf16.xpose.msra.mxu0 %v16975_v49  ;;  %v17015_v49 = vcombine.low %v1626_v43, %v1630_v44  ;;  %v1539_v43 = vld [vmem:[%s18230_s11 + $0x2808] sm:$0xff] }
 0xa86   : > { %14426 = vmatprep.subr.bf16.mxu0 %v16984_v58  ;;  %v17024_v58 = vcombine.high %v1634_v53, %v1638_v54  ;;  %v1543_v44 = vld [vmem:[%s18230_s11 + $0x2828] sm:$0xff] }
 0xa87   : > { %14589 = vmatpush1.bf16.xpose.msra.mxu1 %v17103_v55  ;;  %v17143_v55 = vcombine.low %v1754_v37, %v1758_v38  ;;  %v1667_v37 = vld [vmem:[%s18230_s11 + $0x2c08] sm:$0xff] }
 0xa88   : > { %14590 = vmatprep.subr.bf16.mxu1 %v17112_v62  ;;  %v17152_v62 = vcombine.high %v1762_v60, %v1766_v48  ;;  %v1671_v38 = vld [vmem:[%s18230_s11 + $0x2c28] sm:$0xff] }
 0xa8d   : > { %14427 = vmatpush1.bf16.xpose.msra.mxu0 %v16983_v35  ;;  %v17023_v35 = vcombine.low %v1634_v53, %v1638_v54  ;;  %v1547_v53 = vld [vmem:[%s18230_s11 + $0x2848] sm:$0xff] }
 0xa8e   : > { %14428 = vmatprep.subr.bf16.mxu0 %v16992_v5  ;;  %v17032_v5 = vcombine.high %v1642_v3, %v1646_v63  ;;  %v1551_v54 = vld [vmem:[%s18230_s11 + $0x2868] sm:$0xff] }
 0xa8f   : > { %14591 = vmatpush1.bf16.xpose.msra.mxu1 %v17111_v28  ;;  %v17151_v28 = vcombine.low %v1762_v60, %v1766_v48  ;;  %v1675_v60 = vld [vmem:[%s18230_s11 + $0x2c48] sm:$0xff] }
 0xa90   : > { %14592 = vmatprep.subr.bf16.mxu1 %v17120_v8  ;;  %v17160_v8 = vcombine.high %v1770_v0, %v1774_v1  ;;  %v1679_v48 = vld [vmem:[%s18230_s11 + $0x2c68] sm:$0xff] }
 0xa95   : > { %14429 = vmatpush1.bf16.xpose.msra.mxu0 %v16991_v18  ;;  %v17031_v18 = vcombine.low %v1642_v3, %v1646_v63  ;;  %v1555_v3 = vld [vmem:[%s18230_s11 + $0x2888] sm:$0xff] }
 0xa96   : > { %14430 = vmatprep.subr.bf16.mxu0 %v17000_v22  ;;  %v17040_v22 = vcombine.high %v1650_v14, %v1654_v11  ;;  %v1559_v63 = vld [vmem:[%s18230_s11 + $0x28a8] sm:$0xff] }
 0xa97   : > { %14593 = vmatpush1.bf16.xpose.msra.mxu1 %v17119_v19  ;;  %v17159_v19 = vcombine.low %v1770_v0, %v1774_v1  ;;  %v1683_v0 = vld [vmem:[%s18230_s11 + $0x2c88] sm:$0xff] }
 0xa98   : > { %14594 = vmatprep.subr.bf16.mxu1 %v17128_v24  ;;  %v17168_v24 = vcombine.high %v1778_v12, %v1782_v15  ;;  %v1687_v1 = vld [vmem:[%s18230_s11 + $0x2ca8] sm:$0xff] }
 0xa9d   : > { %14431 = vmatpush1.bf16.xpose.msra.mxu0 %v16999_v30  ;;  %v17039_v30 = vcombine.low %v1650_v14, %v1654_v11  ;;  %v1563_v14 = vld [vmem:[%s18230_s11 + $0x28c8] sm:$0xff] }
 0xa9e   : > { %14432 = vmatprep.subr.bf16.mxu0 %v17008_v32  ;;  %v17048_v32 = vcombine.high %v1658_v40, %v1662_v25  ;;  %v1567_v11 = vld [vmem:[%s18230_s11 + $0x28e8] sm:$0xff] }
 0xa9f   : > { %14595 = vmatpush1.bf16.xpose.msra.mxu1 %v17127_v39  ;;  %v17167_v39 = vcombine.low %v1778_v12, %v1782_v15  ;;  %v1691_v12 = vld [vmem:[%s18230_s11 + $0x2cc8] sm:$0xff] }
 0xaa0   : > { %14596 = vmatprep.subr.bf16.mxu1 %v17136_v33  ;;  %v17176_v33 = vcombine.high %v1786_v26, %v1790_v29  ;;  %v1695_v15 = vld [vmem:[%s18230_s11 + $0x2ce8] sm:$0xff] }
 0xaa5   : > { %14433 = vmatpush1.bf16.xpose.msra.mxu0 %v17007_v45  ;;  %v17047_v45 = vcombine.low %v1658_v40, %v1662_v25  ;;  %v1571_v40 = vld [vmem:[%s18230_s11 + $0x2908] sm:$0xff] }
 0xaa6   : > { %14434 = vmatprep.subr.bf16.mxu0 %v17016_v46  ;;  %v16930_v46 = vcombine.high %v1539_v43, %v1543_v44  ;;  %v1575_v25 = vld [vmem:[%s18230_s11 + $0x2928] sm:$0xff] }
 0xaa7   : > { %14597 = vmatpush1.bf16.xpose.msra.mxu1 %v17135_v36  ;;  %v17175_v36 = vcombine.low %v1786_v26, %v1790_v29  ;;  %v1699_v26 = vld [vmem:[%s18230_s11 + $0x2d08] sm:$0xff] }
 0xaa8   : > { %14598 = vmatprep.subr.bf16.mxu1 %v17144_v51  ;;  %v17058_v51 = vcombine.high %v1667_v37, %v1671_v38  ;;  %v1703_v29 = vld [vmem:[%s18230_s11 + $0x2d28] sm:$0xff] }
 0xaad   : > { %14435 = vmatpush1.bf16.xpose.msra.mxu0 %v17015_v49  ;;  %v16929_v49 = vcombine.low %v1539_v43, %v1543_v44  ;;  %v1579_v43 = vld [vmem:[%s18230_s11 + $0x2948] sm:$0xff] }
 0xaae   : > { %14436 = vmatprep.subr.bf16.mxu0 %v17024_v58  ;;  %v16938_v58 = vcombine.high %v1547_v53, %v1551_v54  ;;  %v1583_v44 = vld [vmem:[%s18230_s11 + $0x2968] sm:$0xff] }
 0xaaf   : > { %14599 = vmatpush1.bf16.xpose.msra.mxu1 %v17143_v55  ;;  %v17057_v55 = vcombine.low %v1667_v37, %v1671_v38  ;;  %v1707_v37 = vld [vmem:[%s18230_s11 + $0x2d48] sm:$0xff] }
 0xab0   : > { %14600 = vmatprep.subr.bf16.mxu1 %v17152_v62  ;;  %v17066_v62 = vcombine.high %v1675_v60, %v1679_v48  ;;  %v1711_v38 = vld [vmem:[%s18230_s11 + $0x2d68] sm:$0xff] }
 0xab5   : > { %14437 = vmatpush1.bf16.xpose.msra.mxu0 %v17023_v35  ;;  %v16937_v35 = vcombine.low %v1547_v53, %v1551_v54  ;;  %v1587_v53 = vld [vmem:[%s18230_s11 + $0x2988] sm:$0xff] }
 0xab6   : > { %14438 = vmatprep.subr.bf16.mxu0 %v17032_v5  ;;  %v16946_v5 = vcombine.high %v1555_v3, %v1559_v63  ;;  %v1591_v54 = vld [vmem:[%s18230_s11 + $0x29a8] sm:$0xff] }
 0xab7   : > { %14601 = vmatpush1.bf16.xpose.msra.mxu1 %v17151_v28  ;;  %v17065_v28 = vcombine.low %v1675_v60, %v1679_v48  ;;  %v1715_v60 = vld [vmem:[%s18230_s11 + $0x2d88] sm:$0xff] }
 0xab8   : > { %14602 = vmatprep.subr.bf16.mxu1 %v17160_v8  ;;  %v17074_v8 = vcombine.high %v1683_v0, %v1687_v1  ;;  %v1719_v48 = vld [vmem:[%s18230_s11 + $0x2da8] sm:$0xff] }
 0xabd   : > { %14439 = vmatpush1.bf16.xpose.msra.mxu0 %v17031_v18  ;;  %v16945_v18 = vcombine.low %v1555_v3, %v1559_v63  ;;  %v1595_v3 = vld [vmem:[%s18230_s11 + $0x29c8] sm:$0xff] }
 0xabe   : > { %14440 = vmatprep.subr.bf16.mxu0 %v17040_v22  ;;  %v16954_v22 = vcombine.high %v1563_v14, %v1567_v11  ;;  %v1599_v63 = vld [vmem:[%s18230_s11 + $0x29e8] sm:$0xff] }
 0xabf   : > { %14603 = vmatpush1.bf16.xpose.msra.mxu1 %v17159_v19  ;;  %v17073_v19 = vcombine.low %v1683_v0, %v1687_v1  ;;  %v1723_v0 = vld [vmem:[%s18230_s11 + $0x2dc8] sm:$0xff] }
 0xac0   : > { %14604 = vmatprep.subr.bf16.mxu1 %v17168_v24  ;;  %v17082_v24 = vcombine.high %v1691_v12, %v1695_v15  ;;  %v1727_v1 = vld [vmem:[%s18230_s11 + $0x2de8] sm:$0xff] }
 0xac5   : > { %14441 = vmatpush1.bf16.xpose.msra.mxu0 %v17039_v30  ;;  %v16953_v30 = vcombine.low %v1563_v14, %v1567_v11  ;;  %v1603_v14 = vld [vmem:[%s18230_s11 + $0x2a08] sm:$0xff] }
 0xac6   : > { %14442 = vmatprep.subr.bf16.mxu0 %v17048_v32  ;;  %v16962_v32 = vcombine.high %v1571_v40, %v1575_v25  ;;  %v1607_v11 = vld [vmem:[%s18230_s11 + $0x2a28] sm:$0xff] }
 0xac7   : > { %14605 = vmatpush1.bf16.xpose.msra.mxu1 %v17167_v39  ;;  %v17081_v39 = vcombine.low %v1691_v12, %v1695_v15  ;;  %v1731_v12 = vld [vmem:[%s18230_s11 + $0x2e08] sm:$0xff] }
 0xac8   : > { %14606 = vmatprep.subr.bf16.mxu1 %v17176_v33  ;;  %v17090_v33 = vcombine.high %v1699_v26, %v1703_v29  ;;  %v1735_v15 = vld [vmem:[%s18230_s11 + $0x2e28] sm:$0xff] }
 0xacd   : > { %14443 = vmatpush1.bf16.xpose.msra.mxu0 %v17047_v45  ;;  %v16961_v45 = vcombine.low %v1571_v40, %v1575_v25  ;;  %v1611_v40 = vld [vmem:[%s18230_s11 + $0x2a48] sm:$0xff] }
 0xace   : > { %14453 = vmatprep.subr.bf16.mxu0 %v16930_v46  ;;  %v16970_v46 = vcombine.high %v1579_v43, %v1583_v44  ;;  %v1615_v25 = vld [vmem:[%s18230_s11 + $0x2a68] sm:$0xff] }
 0xacf   : > { %14607 = vmatpush1.bf16.xpose.msra.mxu1 %v17175_v36  ;;  %v17089_v36 = vcombine.low %v1699_v26, %v1703_v29  ;;  %v1739_v26 = vld [vmem:[%s18230_s11 + $0x2e48] sm:$0xff] }
 0xad0   : > { %14617 = vmatprep.subr.bf16.mxu1 %v17058_v51  ;;  %v17098_v51 = vcombine.high %v1707_v37, %v1711_v38  ;;  %v1743_v29 = vld [vmem:[%s18230_s11 + $0x2e68] sm:$0xff] }
 0xad4   : > { %14445 = vmatmul.mubr.bf16.vlgmr.msra.gmra.mrb[20].mxu0 %v18335_v23 }
 0xad5   : > { %14454 = vmatpush1.bf16.xpose.msra.mxu0 %v16929_v49  ;;  %14485 = vmatprep.mubr.bf16.mxu0 %v18341_v31  ;;  %v16969_v49 = vcombine.low %v1579_v43, %v1583_v44  ;;  %v1619_v43 = vld [vmem:[%s18230_s11 + $0x2a88] sm:$0xff] }
 0xad6   : > { %14609 = vmatmul.mubr.bf16.vlgmr.msra.gmra.mrb[20].mxu1 %v18335_v23  ;;  %14455 = vmatprep.subr.bf16.mxu0 %v16938_v58  ;;  %v16978_v58 = vcombine.high %v1587_v53, %v1591_v54  ;;  %v1623_v44 = vld [vmem:[%s18230_s11 + $0x2aa8] sm:$0xff] }
 0xad7   : > { %14618 = vmatpush1.bf16.xpose.msra.mxu1 %v17057_v55  ;;  %14649 = vmatprep.mubr.bf16.mxu1 %v18341_v31  ;;  %v17097_v55 = vcombine.low %v1707_v37, %v1711_v38  ;;  %v1747_v37 = vld [vmem:[%s18230_s11 + $0x2e88] sm:$0xff] }
 0xad8   : > { %14619 = vmatprep.subr.bf16.mxu1 %v17066_v62  ;;  %v17106_v62 = vcombine.high %v1715_v60, %v1719_v48  ;;  %v1751_v38 = vld [vmem:[%s18230_s11 + $0x2ea8] sm:$0xff] }
 0xadd   : > { %14456 = vmatpush1.bf16.xpose.msra.mxu0 %v16937_v35  ;;  %v16977_v35 = vcombine.low %v1587_v53, %v1591_v54  ;;  %v1627_v53 = vld [vmem:[%s18230_s11 + $0x2ac8] sm:$0xff] }
 0xade   : > { %14457 = vmatprep.subr.bf16.mxu0 %v16946_v5  ;;  %v16986_v5 = vcombine.high %v1595_v3, %v1599_v63  ;;  %v1631_v54 = vld [vmem:[%s18230_s11 + $0x2ae8] sm:$0xff] }
 0xadf   : > { %14620 = vmatpush1.bf16.xpose.msra.mxu1 %v17065_v28  ;;  %v17105_v28 = vcombine.low %v1715_v60, %v1719_v48  ;;  %v1755_v60 = vld [vmem:[%s18230_s11 + $0x2ec8] sm:$0xff] }
 0xae0   : > { %14621 = vmatprep.subr.bf16.mxu1 %v17074_v8  ;;  %v17114_v8 = vcombine.high %v1723_v0, %v1727_v1  ;;  %v1759_v48 = vld [vmem:[%s18230_s11 + $0x2ee8] sm:$0xff] }
 0xae5   : > { %14458 = vmatpush1.bf16.xpose.msra.mxu0 %v16945_v18  ;;  %v16985_v18 = vcombine.low %v1595_v3, %v1599_v63  ;;  %v17146_v3 = vcombine.high %v1755_v60, %v1759_v48 }
 0xae6   : > { %14459 = vmatprep.subr.bf16.mxu0 %v16954_v22  ;;  %v16994_v22 = vcombine.high %v1603_v14, %v1607_v11 }
 0xae7   : > { %14622 = vmatpush1.bf16.xpose.msra.mxu1 %v17073_v19  ;;  %v17113_v19 = vcombine.low %v1723_v0, %v1727_v1 }
 0xae8   : > { %14623 = vmatprep.subr.bf16.mxu1 %v17082_v24  ;;  %v17122_v24 = vcombine.high %v1731_v12, %v1735_v15 }
 0xaed   : > { %14460 = vmatpush1.bf16.xpose.msra.mxu0 %v16953_v30  ;;  %v16993_v30 = vcombine.low %v1603_v14, %v1607_v11 }
 0xaee   : > { %14461 = vmatprep.subr.bf16.mxu0 %v16962_v32  ;;  %v17002_v32 = vcombine.high %v1611_v40, %v1615_v25 }
 0xaef   : > { %14624 = vmatpush1.bf16.xpose.msra.mxu1 %v17081_v39  ;;  %v17121_v39 = vcombine.low %v1731_v12, %v1735_v15  ;;  %v1763_v15 = vld [vmem:[%s18230_s11 + $0x2f08] sm:$0xff] }
 0xaf0   : > { %14625 = vmatprep.subr.bf16.mxu1 %v17090_v33  ;;  %v17130_v33 = vcombine.high %v1739_v26, %v1743_v29 }
 0xaf5   : > { %14462 = vmatpush1.bf16.xpose.msra.mxu0 %v16961_v45  ;;  %v17001_v45 = vcombine.low %v1611_v40, %v1615_v25  ;;  %v17017_v25 = vcombine.low %v1627_v53, %v1631_v54 }
 0xaf6   : > { %14463 = vmatprep.subr.bf16.mxu0 %v16970_v46  ;;  %v17010_v46 = vcombine.high %v1619_v43, %v1623_v44 }
 0xaf7   : > { %14626 = vmatpush1.bf16.xpose.msra.mxu1 %v17089_v36  ;;  %v17129_v36 = vcombine.low %v1739_v26, %v1743_v29 }
 0xaf8   : > { %14627 = vmatprep.subr.bf16.mxu1 %v17098_v51  ;;  %v17138_v51 = vcombine.high %v1747_v37, %v1751_v38 }
 0xafd   : > { %14464 = vmatpush1.bf16.xpose.msra.mxu0 %v16969_v49  ;;  %v17009_v49 = vcombine.low %v1619_v43, %v1623_v44 }
 0xafe   : > { %14465 = vmatprep.subr.bf16.mxu0 %v16978_v58  ;;  %v17137_v58 = vcombine.low %v1747_v37, %v1751_v38 }
 0xaff   : > { %14628 = vmatpush1.bf16.xpose.msra.mxu1 %v17097_v55  ;;  %v2308_v55 = vld [vmem:[%s18236_s6 + $0x10] sm:$0xff] }
 0xb00   : > { %14629 = vmatprep.subr.bf16.mxu1 %v17106_v62  ;;  %v17018_v62 = vcombine.high %v1627_v53, %v1631_v54  ;;  %v12679_v63 = vrot.slane %v2308_v55, %v18684_v2  ;;  %v12687_v0 = vrot.slane %v2308_v55, %v18690_v6  ;;  %v12683_v1 = vrot.slane %v2308_v55, %v18693_v7  ;;  %v1643_v54 = vld [vmem:[%s18230_s11 + $0x2b48] sm:$0xff] }
 0xb05   : > { %14466 = vmatpush1.bf16.xpose.msra.mxu0 %v16977_v35  ;;  %v12691_v35 = vrot.slane %v2308_v55, %v18696_v9  ;;  %v1775_v55 = vld [vmem:[%s18230_s11 + $0x2f68] sm:$0xff] }
 0xb06   : > { %14467 = vmatprep.subr.bf16.mxu0 %v16986_v5  ;;  %v1635_v5 = vld [vmem:[%s18230_s11 + $0x2b08] sm:$0xff] }
 0xb07   : > { %14630 = vmatpush1.bf16.xpose.msra.mxu1 %v17105_v28 }
 0xb08   : > { %14631 = vmatprep.subr.bf16.mxu1 %v17114_v8  ;;  %v1639_v8 = vld [vmem:[%s18230_s11 + $0x2b28] sm:$0xff] }
 0xb0d   : > { %14468 = vmatpush1.bf16.xpose.msra.mxu0 %v16985_v18  ;;  %v1767_v18 = vld [vmem:[%s18230_s11 + $0x2f28] sm:$0xff] }
 0xb0e   : > { %14469 = vmatprep.subr.bf16.mxu0 %v16994_v22  ;;  %v17154_v38 = vcombine.high %v1763_v15, %v1767_v18 }
 0xb0f   : > { %14632 = vmatpush1.bf16.xpose.msra.mxu1 %v17113_v19 }
 0xb10   : > { %14633 = vmatprep.subr.bf16.mxu1 %v17122_v24 }
 0xb15   : > { %14470 = vmatpush1.bf16.xpose.msra.mxu0 %v16993_v30 }
 0xb16   : > { %14471 = vmatprep.subr.bf16.mxu0 %v17002_v32  ;;  %v17145_v32 = vcombine.low %v1755_v60, %v1759_v48  ;;  %v1647_v60 = vld [vmem:[%s18230_s11 + $0x2b68] sm:$0xff] }
 0xb17   : > { %14634 = vmatpush1.bf16.xpose.msra.mxu1 %v17121_v39 }
 0xb18   : > { %14635 = vmatprep.subr.bf16.mxu1 %v17130_v33  ;;  %v17026_v33 = vcombine.high %v1635_v5, %v1639_v8 }
 0xb1d   : > { %14472 = vmatpush1.bf16.xpose.msra.mxu0 %v17001_v45 }
 0xb1e   : > { %14473 = vmatprep.subr.bf16.mxu0 %v17010_v46 }
 0xb1f   : > { %14636 = vmatpush1.bf16.xpose.msra.mxu1 %v17129_v36 }
 0xb20   : > { %14637 = vmatprep.subr.bf16.mxu1 %v17138_v51 }
 0xb25   : > { %14474 = vmatpush1.bf16.xpose.msra.mxu0 %v17009_v49  ;;  %v1771_v49 = vld [vmem:[%s18230_s11 + $0x2f48] sm:$0xff] }
 0xb26   : > { %14475 = vmatprep.subr.bf16.mxu0 %v17018_v62  ;;  %v17025_v62 = vcombine.low %v1635_v5, %v1639_v8 }
 0xb27   : > { %14638 = vmatpush1.bf16.xpose.msra.mxu1 %v17137_v58  ;;  %v14241_v28 = vpop.f32.mrb[16].mxu0 }
 0xb28   : > { %14639 = vmatprep.subr.bf16.mxu1 %v17146_v3  ;;  %v17716_v14 = vadd.f32 %v14241_v28, %v12679_v63  ;;  %v14243_v12 = vpop.f32.mrb[17].mxu0  ;;  %v17153_v63 = vcombine.low %v1763_v15, %v1767_v18  ;;  %v1655_v28 = vld [vmem:[%s18230_s11 + $0x2ba8] sm:$0xff] }
 0xb29   : > { %v14405_v11 = vpop.f32.mrb[16].mxu1  ;;  %v17717_v22 = vadd.f32 %v14243_v12, %v12683_v1  ;;  %v14245_v40 = vpop.f32.mrb[18].mxu0  ;;  %v17162_v1 = vcombine.high %v1771_v49, %v1775_v55  ;;  %v17033_v12 = vcombine.low %v1643_v54, %v1647_v60  ;;  %v1659_v15 = vld [vmem:[%s18230_s11 + $0x2bc8] sm:$0xff] }
 0xb2a   : > { %v17718_v19 = vadd.f32 %v14405_v11, %v12687_v0  ;;  %v14407_v24 = vpop.f32.mrb[17].mxu1  ;;  %v15493_v26 = vmul.f32 %v17716_v14, %v18705_v17  ;;  %v14246_v39 = vpop.f32.mrb[19].mxu0  ;;  %v17034_v0 = vcombine.high %v1643_v54, %v1647_v60  ;;  %v1779_v14 = vld [vmem:[%s18230_s11 + $0x2f88] sm:$0xff] }
 0xb2b   : > { %v17719_v29 = vadd.f32 %v14407_v24, %v12691_v35  ;;  %v14409_v30 = vpop.f32.mrb[18].mxu1  ;;  %v15494_v44 = vmul.f32 %v17717_v22, %v18712_v21  ;;  %v1651_v35 = vld [vmem:[%s18230_s11 + $0x2b88] sm:$0xff]  ;;  %v1544_v39 = vld [vmem:[%s18230_s11 + $0x2830] sm:$0xff] }
 0xb2c   : > { %v15495_v43 = vmul.f32 %v17718_v19, %v18709_v20  ;;  %v14410_v37 = vpop.f32.mrb[19].mxu1  ;;  %v15501_v45 = vsel %vm15447_vm0, %v15493_v26, 0.0  ;;  %v1783_v11 = vld [vmem:[%s18230_s11 + $0x2fa8] sm:$0xff]  ;;  %v17161_v19 = vcombine.low %v1771_v49, %v1775_v55  ;;  %v17042_v5 = vcombine.high %v1651_v35, %v1655_v28  ;;  %v1540_v30 = vld [vmem:[%s18230_s11 + $0x2810] sm:$0xff] }
 0xb2d   : > { %v15502_v36 = vsel %vm15447_vm0, %v15494_v44, 0.0  ;;  %v15496_v46 = vmul.f32 %v17719_v29, %v18719_v34  ;;  %14476 = vmatpush1.bf16.xpose.msra.mxu0 %v17017_v25  ;;  %v17170_v8 = vcombine.high %v1779_v14, %v1783_v11  ;;  %v1663_v18 = vld [vmem:[%s18230_s11 + $0x2be8] sm:$0xff]  ;;  %v17041_v40 = vcombine.low %v1651_v35, %v1655_v28  ;;  %v1556_v49 = vld [vmem:[%s18230_s11 + $0x2890] sm:$0xff] }
 0xb2e   : > { %v15503_v51 = vadd.f32 %v15502_v36, %v15501_v45  ;;  %14477 = vmatprep.subr.bf16.mxu0 %v17026_v33  ;;  %v15504_v53 = vsel %vm15447_vm0, %v15495_v43, 0.0  ;;  %v1787_v22 = vld [vmem:[%s18230_s11 + $0x2fc8] sm:$0xff]  ;;  %v17169_v25 = vcombine.low %v1779_v14, %v1783_v11  ;;  %v17050_v26 = vcombine.high %v1659_v15, %v1663_v18  ;;  %v1672_v33 = vld [vmem:[%s18230_s11 + $0x2c30] sm:$0xff] }
 0xb2f   : > { %14640 = vmatpush1.bf16.xpose.msra.mxu1 %v17145_v32  ;;  %v15506_v58 = vsel %vm15447_vm0, %v15496_v46, 0.0  ;;  %v1791_v24 = vld [vmem:[%s18230_s11 + $0x2fe8] sm:$0xff]  ;;  %v1668_v32 = vld [vmem:[%s18230_s11 + $0x2c10] sm:$0xff]  ;;  %v17049_v43 = vcombine.low %v1659_v15, %v1663_v18  ;;  %v16932_v37 = vcombine.high %v1540_v30, %v1544_v39 }
 0xb30   : > { %14641 = vmatprep.subr.bf16.mxu1 %v17154_v38  ;;  %v15505_v48 = vadd.f32 %v15504_v53, %v15503_v51  ;;  %v17178_v29 = vcombine.high %v1787_v22, %v1791_v24  ;;  %v17177_v44 = vcombine.low %v1787_v22, %v1791_v24  ;;  %v17060_v38 = vcombine.high %v1668_v32, %v1672_v33  ;;  %v1548_v45 = vld [vmem:[%s18230_s11 + $0x2850] sm:$0xff] }
 0xb31   : > { %v1552_v36 = vld [vmem:[%s18230_s11 + $0x2870] sm:$0xff]  ;;  %v16931_v53 = vcombine.low %v1540_v30, %v1544_v39  ;;  %v17059_v54 = vcombine.low %v1668_v32, %v1672_v33 }
 0xb32   : > { %v19918_v3 = vadd.f32 %v15506_v58, %v15505_v48  ;;  %v1676_v46 = vld [vmem:[%s18230_s11 + $0x2c50] sm:$0xff]  ;;  %v16940_v60 = vcombine.high %v1548_v45, %v1552_v36 }
 0xb33   : > { %v1680_v51 = vld [vmem:[%s18230_s11 + $0x2c70] sm:$0xff] }
 0xb34   : > { %v17068_v48 = vcombine.high %v1676_v46, %v1680_v51  ;;  %v1560_v55 = vld [vmem:[%s18230_s11 + $0x28b0] sm:$0xff] }
 0xb35   : > { %14478 = vmatpush1.bf16.xpose.msra.mxu0 %v17025_v62  ;;  %v1684_v58 = vld [vmem:[%s18230_s11 + $0x2c90] sm:$0xff] }
 0xb36   : > { %14479 = vmatprep.subr.bf16.mxu0 %v17034_v0  ;;  %v1688_v62 = vld [vmem:[%s18230_s11 + $0x2cb0] sm:$0xff]  ;;  %v17067_v0 = vcombine.low %v1676_v46, %v1680_v51 }
 0xb37   : > { %14642 = vmatpush1.bf16.xpose.msra.mxu1 %v17153_v63  ;;  %v16939_v63 = vcombine.low %v1548_v45, %v1552_v36  ;;  %v17076_v35 = vcombine.high %v1684_v58, %v1688_v62  ;;  %v1564_v28 = vld [vmem:[%s18230_s11 + $0x28d0] sm:$0xff] }
 0xb38   : > { %14643 = vmatprep.subr.bf16.mxu1 %v17162_v1  ;;  %v16948_v1 = vcombine.high %v1556_v49, %v1560_v55  ;;  %v1568_v14 = vld [vmem:[%s18230_s11 + $0x28f0] sm:$0xff] }
 0xb39   : > { %v1692_v11 = vld [vmem:[%s18230_s11 + $0x2cd0] sm:$0xff] }
 0xb3a   : > { %v1572_v18 = vld [vmem:[%s18230_s11 + $0x2910] sm:$0xff] }
 0xb3b   : > { %v1576_v22 = vld [vmem:[%s18230_s11 + $0x2930] sm:$0xff] }
 0xb3c   : > { %v1700_v24 = vld [vmem:[%s18230_s11 + $0x2d10] sm:$0xff] }
 0xb3d   : > { %14480 = vmatpush1.bf16.xpose.msra.mxu0 %v17033_v12  ;;  %v1696_v12 = vld [vmem:[%s18230_s11 + $0x2cf0] sm:$0xff] }
 0xb3e   : > { %14481 = vmatprep.subr.bf16.mxu0 %v17042_v5  ;;  %v17075_v5 = vcombine.low %v1684_v58, %v1688_v62  ;;  %v17084_v15 = vcombine.high %v1692_v11, %v1696_v12  ;;  %v1580_v39 = vld [vmem:[%s18230_s11 + $0x2950] sm:$0xff] }
 0xb3f   : > { %14644 = vmatpush1.bf16.xpose.msra.mxu1 %v17161_v19  ;;  %v16947_v19 = vcombine.low %v1556_v49, %v1560_v55  ;;  %v1584_v32 = vld [vmem:[%s18230_s11 + $0x2970] sm:$0xff] }
 0xb40   : > { %14645 = vmatprep.subr.bf16.mxu1 %v17170_v8  ;;  %v16956_v8 = vcombine.high %v1564_v28, %v1568_v14  ;;  %v1708_v33 = vld [vmem:[%s18230_s11 + $0x2d50] sm:$0xff] }
 0xb41   : > { %v1588_v36 = vld [vmem:[%s18230_s11 + $0x2990] sm:$0xff] }
 0xb42   : > { %v1592_v46 = vld [vmem:[%s18230_s11 + $0x29b0] sm:$0xff] }
 0xb43   : > { %v1716_v51 = vld [vmem:[%s18230_s11 + $0x2d90] sm:$0xff] }
 0xb44   : > { %v1596_v55 = vld [vmem:[%s18230_s11 + $0x29d0] sm:$0xff] }
 0xb45   : > { %14482 = vmatpush1.bf16.xpose.msra.mxu0 %v17041_v40  ;;  %v1704_v40 = vld [vmem:[%s18230_s11 + $0x2d30] sm:$0xff] }
 0xb46   : > { %14483 = vmatprep.subr.bf16.mxu0 %v17050_v26  ;;  %v17083_v26 = vcombine.low %v1692_v11, %v1696_v12  ;;  %v17092_v30 = vcombine.high %v1700_v24, %v1704_v40  ;;  %v1600_v58 = vld [vmem:[%s18230_s11 + $0x29f0] sm:$0xff] }
 0xb47   : > { %14646 = vmatpush1.bf16.xpose.msra.mxu1 %v17169_v25  ;;  %v16955_v25 = vcombine.low %v1564_v28, %v1568_v14  ;;  %v1724_v62 = vld [vmem:[%s18230_s11 + $0x2dd0] sm:$0xff] }
 0xb48   : > { %14647 = vmatprep.subr.bf16.mxu1 %v17178_v29  ;;  %v16964_v29 = vcombine.high %v1572_v18, %v1576_v22  ;;  %v1604_v14 = vld [vmem:[%s18230_s11 + $0x2a10] sm:$0xff] }
 0xb49   : > { %v1608_v11 = vld [vmem:[%s18230_s11 + $0x2a30] sm:$0xff] }
 0xb4a   : > { %v1732_v12 = vld [vmem:[%s18230_s11 + $0x2e10] sm:$0xff] }
 0xb4d   : > { %14484 = vmatpush1.bf16.xpose.msra.mxu0 %v17049_v43  ;;  %v1712_v43 = vld [vmem:[%s18230_s11 + $0x2d70] sm:$0xff] }
 0xb4e   : > { %14494 = vmatprep.subr.bf16.mxu0 %v16932_v37  ;;  %v17091_v37 = vcombine.low %v1700_v24, %v1704_v40  ;;  %v17100_v45 = vcombine.high %v1708_v33, %v1712_v43  ;;  %v1616_v24 = vld [vmem:[%s18230_s11 + $0x2a70] sm:$0xff] }
 0xb4f   : > { %14648 = vmatpush1.bf16.xpose.msra.mxu1 %v17177_v44  ;;  %v16963_v44 = vcombine.low %v1572_v18, %v1576_v22  ;;  %v1612_v22 = vld [vmem:[%s18230_s11 + $0x2a50] sm:$0xff] }
 0xb50   : > { %14658 = vmatprep.subr.bf16.mxu1 %v17060_v38  ;;  %v16972_v38 = vcombine.high %v1580_v39, %v1584_v32  ;;  %v1740_v40 = vld [vmem:[%s18230_s11 + $0x2e50] sm:$0xff] }
 0xb54   : > { %14486 = vmatmul.mubr.bf16.vlgmr.msra.gmra.mrb[20].mxu0 %v18416_v42 }
 0xb55   : > { %14495 = vmatpush1.bf16.xpose.msra.mxu0 %v16931_v53  ;;  %14526 = vmatprep.mubr.bf16.mxu0 %v18423_v50  ;;  %v1720_v53 = vld [vmem:[%s18230_s11 + $0x2db0] sm:$0xff] }
 0xb56   : > { %14650 = vmatmul.mubr.bf16.vlgmr.msra.gmra.mrb[20].mxu1 %v18416_v42  ;;  %14496 = vmatprep.subr.bf16.mxu0 %v16940_v60  ;;  %v17099_v60 = vcombine.low %v1708_v33, %v1712_v43  ;;  %v17108_v49 = vcombine.high %v1716_v51, %v1720_v53  ;;  %v1624_v33 = vld [vmem:[%s18230_s11 + $0x2ab0] sm:$0xff] }
 0xb57   : > { %14659 = vmatpush1.bf16.xpose.msra.mxu1 %v17059_v54  ;;  %14690 = vmatprep.mubr.bf16.mxu1 %v18423_v50  ;;  %v16971_v54 = vcombine.low %v1580_v39, %v1584_v32  ;;  %v1620_v32 = vld [vmem:[%s18230_s11 + $0x2a90] sm:$0xff] }
 0xb58   : > { %14660 = vmatprep.subr.bf16.mxu1 %v17068_v48  ;;  %v16980_v48 = vcombine.high %v1588_v36, %v1592_v46  ;;  %v1748_v43 = vld [vmem:[%s18230_s11 + $0x2e90] sm:$0xff] }
 0xb5d   : > { %14497 = vmatpush1.bf16.xpose.msra.mxu0 %v16939_v63  ;;  %v1728_v63 = vld [vmem:[%s18230_s11 + $0x2df0] sm:$0xff] }
 0xb5e   : > { %14498 = vmatprep.subr.bf16.mxu0 %v16948_v1  ;;  %v17107_v1 = vcombine.low %v1716_v51, %v1720_v53  ;;  %v17116_v28 = vcombine.high %v1724_v62, %v1728_v63  ;;  %v1632_v51 = vld [vmem:[%s18230_s11 + $0x2af0] sm:$0xff] }
 0xb5f   : > { %14661 = vmatpush1.bf16.xpose.msra.mxu1 %v17067_v0  ;;  %v16979_v0 = vcombine.low %v1588_v36, %v1592_v46  ;;  %v1628_v46 = vld [vmem:[%s18230_s11 + $0x2ad0] sm:$0xff] }
 0xb60   : > { %14662 = vmatprep.subr.bf16.mxu1 %v17076_v35  ;;  %v16988_v35 = vcombine.high %v1596_v55, %v1600_v58  ;;  %v1756_v53 = vld [vmem:[%s18230_s11 + $0x2ed0] sm:$0xff] }
 0xb65   : > { %14499 = vmatpush1.bf16.xpose.msra.mxu0 %v16947_v19  ;;  %v1736_v19 = vld [vmem:[%s18230_s11 + $0x2e30] sm:$0xff] }
 0xb66   : > { %14500 = vmatprep.subr.bf16.mxu0 %v16956_v8  ;;  %v17115_v8 = vcombine.low %v1724_v62, %v1728_v63  ;;  %v17124_v18 = vcombine.high %v1732_v12, %v1736_v19  ;;  %v1640_v62 = vld [vmem:[%s18230_s11 + $0x2b30] sm:$0xff] }
 0xb67   : > { %14663 = vmatpush1.bf16.xpose.msra.mxu1 %v17075_v5  ;;  %v16987_v5 = vcombine.low %v1596_v55, %v1600_v58  ;;  %v1636_v58 = vld [vmem:[%s18230_s11 + $0x2b10] sm:$0xff] }
 0xb68   : > { %14664 = vmatprep.subr.bf16.mxu1 %v17084_v15  ;;  %v16996_v15 = vcombine.high %v1604_v14, %v1608_v11  ;;  %v1764_v63 = vld [vmem:[%s18230_s11 + $0x2f10] sm:$0xff] }
 0xb6d   : > { %14501 = vmatpush1.bf16.xpose.msra.mxu0 %v16955_v25  ;;  %v1744_v25 = vld [vmem:[%s18230_s11 + $0x2e70] sm:$0xff] }
 0xb6e   : > { %14502 = vmatprep.subr.bf16.mxu0 %v16964_v29  ;;  %v17123_v29 = vcombine.low %v1732_v12, %v1736_v19  ;;  %v17132_v39 = vcombine.high %v1740_v40, %v1744_v25  ;;  %v1648_v12 = vld [vmem:[%s18230_s11 + $0x2b70] sm:$0xff] }
 0xb6f   : > { %14665 = vmatpush1.bf16.xpose.msra.mxu1 %v17083_v26  ;;  %v16995_v26 = vcombine.low %v1604_v14, %v1608_v11  ;;  %v1644_v11 = vld [vmem:[%s18230_s11 + $0x2b50] sm:$0xff] }
 0xb70   : > { %14666 = vmatprep.subr.bf16.mxu1 %v17092_v30  ;;  %v17004_v30 = vcombine.high %v1612_v22, %v1616_v24  ;;  %v1772_v19 = vld [vmem:[%s18230_s11 + $0x2f50] sm:$0xff] }
 0xb75   : > { %14503 = vmatpush1.bf16.xpose.msra.mxu0 %v16963_v44  ;;  %v1752_v44 = vld [vmem:[%s18230_s11 + $0x2eb0] sm:$0xff] }
 0xb76   : > { %14504 = vmatprep.subr.bf16.mxu0 %v16972_v38  ;;  %v17131_v38 = vcombine.low %v1740_v40, %v1744_v25  ;;  %v17140_v36 = vcombine.high %v1748_v43, %v1752_v44  ;;  %v1656_v40 = vld [vmem:[%s18230_s11 + $0x2bb0] sm:$0xff] }
 0xb77   : > { %14667 = vmatpush1.bf16.xpose.msra.mxu1 %v17091_v37  ;;  %v17003_v37 = vcombine.low %v1612_v22, %v1616_v24  ;;  %v1652_v24 = vld [vmem:[%s18230_s11 + $0x2b90] sm:$0xff] }
 0xb78   : > { %14668 = vmatprep.subr.bf16.mxu1 %v17100_v45  ;;  %v17012_v45 = vcombine.high %v1620_v32, %v1624_v33  ;;  %v1780_v25 = vld [vmem:[%s18230_s11 + $0x2f90] sm:$0xff] }
 0xb7d   : > { %14505 = vmatpush1.bf16.xpose.msra.mxu0 %v16971_v54  ;;  %v1760_v54 = vld [vmem:[%s18230_s11 + $0x2ef0] sm:$0xff] }
 0xb7e   : > { %14506 = vmatprep.subr.bf16.mxu0 %v16980_v48  ;;  %v17139_v48 = vcombine.low %v1748_v43, %v1752_v44  ;;  %v17148_v55 = vcombine.high %v1756_v53, %v1760_v54  ;;  %v1664_v43 = vld [vmem:[%s18230_s11 + $0x2bf0] sm:$0xff] }
 0xb7f   : > { %14669 = vmatpush1.bf16.xpose.msra.mxu1 %v17099_v60  ;;  %v17011_v60 = vcombine.low %v1620_v32, %v1624_v33  ;;  %v1660_v33 = vld [vmem:[%s18230_s11 + $0x2bd0] sm:$0xff] }
 0xb80   : > { %14670 = vmatprep.subr.bf16.mxu1 %v17108_v49  ;;  %v17020_v49 = vcombine.high %v1628_v46, %v1632_v51  ;;  %v1788_v44 = vld [vmem:[%s18230_s11 + $0x2fd0] sm:$0xff] }
 0xb85   : > { %14507 = vmatpush1.bf16.xpose.msra.mxu0 %v16979_v0  ;;  %v1768_v0 = vld [vmem:[%s18230_s11 + $0x2f30] sm:$0xff] }
 0xb86   : > { %14508 = vmatprep.subr.bf16.mxu0 %v16988_v35  ;;  %v17147_v35 = vcombine.low %v1756_v53, %v1760_v54  ;;  %v17156_v14 = vcombine.high %v1764_v63, %v1768_v0  ;;  %v1545_v53 = vld [vmem:[%s18230_s11 + $0x2838] sm:$0xff] }
 0xb87   : > { %14671 = vmatpush1.bf16.xpose.msra.mxu1 %v17107_v1  ;;  %v17019_v1 = vcombine.low %v1628_v46, %v1632_v51  ;;  %v1541_v51 = vld [vmem:[%s18230_s11 + $0x2818] sm:$0xff] }
 0xb88   : > { %14672 = vmatprep.subr.bf16.mxu1 %v17116_v28  ;;  %v17028_v28 = vcombine.high %v1636_v58, %v1640_v62  ;;  %v1669_v54 = vld [vmem:[%s18230_s11 + $0x2c18] sm:$0xff] }
 0xb8d   : > { %14509 = vmatpush1.bf16.xpose.msra.mxu0 %v16987_v5  ;;  %v1776_v5 = vld [vmem:[%s18230_s11 + $0x2f70] sm:$0xff] }
 0xb8e   : > { %14510 = vmatprep.subr.bf16.mxu0 %v16996_v15  ;;  %v17155_v15 = vcombine.low %v1764_v63, %v1768_v0  ;;  %v17164_v22 = vcombine.high %v1772_v19, %v1776_v5  ;;  %v1553_v63 = vld [vmem:[%s18230_s11 + $0x2878] sm:$0xff] }
 0xb8f   : > { %14673 = vmatpush1.bf16.xpose.msra.mxu1 %v17115_v8  ;;  %v17027_v8 = vcombine.low %v1636_v58, %v1640_v62  ;;  %v1549_v62 = vld [vmem:[%s18230_s11 + $0x2858] sm:$0xff] }
 0xb90   : > { %14674 = vmatprep.subr.bf16.mxu1 %v17124_v18  ;;  %v17036_v18 = vcombine.high %v1644_v11, %v1648_v12  ;;  %v1677_v0 = vld [vmem:[%s18230_s11 + $0x2c58] sm:$0xff] }
 0xb95   : > { %14511 = vmatpush1.bf16.xpose.msra.mxu0 %v16995_v26  ;;  %v1784_v26 = vld [vmem:[%s18230_s11 + $0x2fb0] sm:$0xff] }
 0xb96   : > { %14512 = vmatprep.subr.bf16.mxu0 %v17004_v30  ;;  %v17163_v30 = vcombine.low %v1772_v19, %v1776_v5  ;;  %v17172_v32 = vcombine.high %v1780_v25, %v1784_v26  ;;  %v1561_v19 = vld [vmem:[%s18230_s11 + $0x28b8] sm:$0xff] }
 0xb97   : > { %14675 = vmatpush1.bf16.xpose.msra.mxu1 %v17123_v29  ;;  %v17035_v29 = vcombine.low %v1644_v11, %v1648_v12  ;;  %v1557_v12 = vld [vmem:[%s18230_s11 + $0x2898] sm:$0xff] }
 0xb98   : > { %14676 = vmatprep.subr.bf16.mxu1 %v17132_v39  ;;  %v17044_v39 = vcombine.high %v1652_v24, %v1656_v40  ;;  %v1685_v5 = vld [vmem:[%s18230_s11 + $0x2c98] sm:$0xff] }
 0xb9d   : > { %14513 = vmatpush1.bf16.xpose.msra.mxu0 %v17003_v37  ;;  %v1792_v37 = vld [vmem:[%s18230_s11 + $0x2ff0] sm:$0xff] }
 0xb9e   : > { %14514 = vmatprep.subr.bf16.mxu0 %v17012_v45  ;;  %v17171_v45 = vcombine.low %v1780_v25, %v1784_v26  ;;  %v17180_v46 = vcombine.high %v1788_v44, %v1792_v37  ;;  %v1569_v25 = vld [vmem:[%s18230_s11 + $0x28f8] sm:$0xff] }
 0xb9f   : > { %14677 = vmatpush1.bf16.xpose.msra.mxu1 %v17131_v38  ;;  %v17043_v38 = vcombine.low %v1652_v24, %v1656_v40  ;;  %v1565_v40 = vld [vmem:[%s18230_s11 + $0x28d8] sm:$0xff] }
 0xba0   : > { %14678 = vmatprep.subr.bf16.mxu1 %v17140_v36  ;;  %v17052_v36 = vcombine.high %v1660_v33, %v1664_v43  ;;  %v1693_v26 = vld [vmem:[%s18230_s11 + $0x2cd8] sm:$0xff] }
 0xba5   : > { %14515 = vmatpush1.bf16.xpose.msra.mxu0 %v17011_v60  ;;  %v1673_v60 = vld [vmem:[%s18230_s11 + $0x2c38] sm:$0xff] }
 0xba6   : > { %14516 = vmatprep.subr.bf16.mxu0 %v17020_v49  ;;  %v17179_v49 = vcombine.low %v1788_v44, %v1792_v37  ;;  %v17062_v58 = vcombine.high %v1669_v54, %v1673_v60  ;;  %v1577_v44 = vld [vmem:[%s18230_s11 + $0x2938] sm:$0xff] }
 0xba7   : > { %14679 = vmatpush1.bf16.xpose.msra.mxu1 %v17139_v48  ;;  %v17051_v48 = vcombine.low %v1660_v33, %v1664_v43  ;;  %v1573_v43 = vld [vmem:[%s18230_s11 + $0x2918] sm:$0xff] }
 0xba8   : > { %14680 = vmatprep.subr.bf16.mxu1 %v17148_v55  ;;  %v16934_v55 = vcombine.high %v1541_v51, %v1545_v53  ;;  %v1701_v37 = vld [vmem:[%s18230_s11 + $0x2d18] sm:$0xff] }
 0xbad   : > { %14517 = vmatpush1.bf16.xpose.msra.mxu0 %v17019_v1  ;;  %v1681_v1 = vld [vmem:[%s18230_s11 + $0x2c78] sm:$0xff] }
 0xbae   : > { %14518 = vmatprep.subr.bf16.mxu0 %v17028_v28  ;;  %v17061_v28 = vcombine.low %v1669_v54, %v1673_v60  ;;  %v17070_v11 = vcombine.high %v1677_v0, %v1681_v1  ;;  %v1585_v54 = vld [vmem:[%s18230_s11 + $0x2978] sm:$0xff] }
 0xbaf   : > { %14681 = vmatpush1.bf16.xpose.msra.mxu1 %v17147_v35  ;;  %v16933_v35 = vcombine.low %v1541_v51, %v1545_v53  ;;  %v1581_v53 = vld [vmem:[%s18230_s11 + $0x2958] sm:$0xff] }
 0xbb0   : > { %14682 = vmatprep.subr.bf16.mxu1 %v17156_v14  ;;  %v16942_v14 = vcombine.high %v1549_v62, %v1553_v63  ;;  %v1709_v60 = vld [vmem:[%s18230_s11 + $0x2d58] sm:$0xff] }
 0xbb5   : > { %14519 = vmatpush1.bf16.xpose.msra.mxu0 %v17027_v8  ;;  %v1689_v8 = vld [vmem:[%s18230_s11 + $0x2cb8] sm:$0xff] }
 0xbb6   : > { %14520 = vmatprep.subr.bf16.mxu0 %v17036_v18  ;;  %v17069_v18 = vcombine.low %v1677_v0, %v1681_v1  ;;  %v17078_v24 = vcombine.high %v1685_v5, %v1689_v8  ;;  %v1593_v0 = vld [vmem:[%s18230_s11 + $0x29b8] sm:$0xff] }
 0xbb7   : > { %14683 = vmatpush1.bf16.xpose.msra.mxu1 %v17155_v15  ;;  %v16941_v15 = vcombine.low %v1549_v62, %v1553_v63  ;;  %v1589_v63 = vld [vmem:[%s18230_s11 + $0x2998] sm:$0xff] }
 0xbb8   : > { %14684 = vmatprep.subr.bf16.mxu1 %v17164_v22  ;;  %v16950_v22 = vcombine.high %v1557_v12, %v1561_v19  ;;  %v1717_v1 = vld [vmem:[%s18230_s11 + $0x2d98] sm:$0xff] }
 0xbbd   : > { %14521 = vmatpush1.bf16.xpose.msra.mxu0 %v17035_v29  ;;  %v1697_v29 = vld [vmem:[%s18230_s11 + $0x2cf8] sm:$0xff] }
 0xbbe   : > { %14522 = vmatprep.subr.bf16.mxu0 %v17044_v39  ;;  %v17077_v39 = vcombine.low %v1685_v5, %v1689_v8  ;;  %v17086_v33 = vcombine.high %v1693_v26, %v1697_v29  ;;  %v1601_v5 = vld [vmem:[%s18230_s11 + $0x29f8] sm:$0xff] }
 0xbbf   : > { %14685 = vmatpush1.bf16.xpose.msra.mxu1 %v17163_v30  ;;  %v16949_v30 = vcombine.low %v1557_v12, %v1561_v19  ;;  %v1597_v19 = vld [vmem:[%s18230_s11 + $0x29d8] sm:$0xff] }
 0xbc0   : > { %14686 = vmatprep.subr.bf16.mxu1 %v17172_v32  ;;  %v16958_v32 = vcombine.high %v1565_v40, %v1569_v25  ;;  %v1725_v8 = vld [vmem:[%s18230_s11 + $0x2dd8] sm:$0xff] }
 0xbc5   : > { %14523 = vmatpush1.bf16.xpose.msra.mxu0 %v17043_v38  ;;  %v1705_v38 = vld [vmem:[%s18230_s11 + $0x2d38] sm:$0xff] }
 0xbc6   : > { %14524 = vmatprep.subr.bf16.mxu0 %v17052_v36  ;;  %v17085_v36 = vcombine.low %v1693_v26, %v1697_v29  ;;  %v17094_v51 = vcombine.high %v1701_v37, %v1705_v38  ;;  %v1609_v26 = vld [vmem:[%s18230_s11 + $0x2a38] sm:$0xff] }
 0xbc7   : > { %14687 = vmatpush1.bf16.xpose.msra.mxu1 %v17171_v45  ;;  %v16957_v45 = vcombine.low %v1565_v40, %v1569_v25  ;;  %v1605_v25 = vld [vmem:[%s18230_s11 + $0x2a18] sm:$0xff] }
 0xbc8   : > { %14688 = vmatprep.subr.bf16.mxu1 %v17180_v46  ;;  %v16966_v46 = vcombine.high %v1573_v43, %v1577_v44  ;;  %v1733_v29 = vld [vmem:[%s18230_s11 + $0x2e18] sm:$0xff] }
 0xbcd   : > { %14525 = vmatpush1.bf16.xpose.msra.mxu0 %v17051_v48  ;;  %v1713_v48 = vld [vmem:[%s18230_s11 + $0x2d78] sm:$0xff] }
 0xbce   : > { %14535 = vmatprep.subr.bf16.mxu0 %v16934_v55  ;;  %v17093_v55 = vcombine.low %v1701_v37, %v1705_v38  ;;  %v17102_v62 = vcombine.high %v1709_v60, %v1713_v48  ;;  %v1617_v37 = vld [vmem:[%s18230_s11 + $0x2a78] sm:$0xff] }
 0xbcf   : > { %14689 = vmatpush1.bf16.xpose.msra.mxu1 %v17179_v49  ;;  %v16965_v49 = vcombine.low %v1573_v43, %v1577_v44  ;;  %v1613_v44 = vld [vmem:[%s18230_s11 + $0x2a58] sm:$0xff] }
 0xbd0   : > { %14699 = vmatprep.subr.bf16.mxu1 %v17062_v58  ;;  %v16974_v58 = vcombine.high %v1581_v53, %v1585_v54  ;;  %v1741_v38 = vld [vmem:[%s18230_s11 + $0x2e58] sm:$0xff] }
 0xbd4   : > { %14527 = vmatmul.mubr.bf16.vlgmr.msra.gmra.mrb[20].mxu0 %v18493_v61 }
 0xbd5   : > { %14536 = vmatpush1.bf16.xpose.msra.mxu0 %v16933_v35  ;;  %14567 = vmatprep.mubr.bf16.mxu0 %v18499_v4  ;;  %v1721_v35 = vld [vmem:[%s18230_s11 + $0x2db8] sm:$0xff] }
 0xbd6   : > { %14691 = vmatmul.mubr.bf16.vlgmr.msra.gmra.mrb[20].mxu1 %v18493_v61  ;;  %14537 = vmatprep.subr.bf16.mxu0 %v16942_v14  ;;  %v17101_v14 = vcombine.low %v1709_v60, %v1713_v48  ;;  %v17110_v12 = vcombine.high %v1717_v1, %v1721_v35  ;;  %v1625_v60 = vld [vmem:[%s18230_s11 + $0x2ab8] sm:$0xff] }
 0xbd7   : > { %14700 = vmatpush1.bf16.xpose.msra.mxu1 %v17061_v28  ;;  %14731 = vmatprep.mubr.bf16.mxu1 %v18499_v4  ;;  %v16973_v28 = vcombine.low %v1581_v53, %v1585_v54  ;;  %v1621_v54 = vld [vmem:[%s18230_s11 + $0x2a98] sm:$0xff] }
 0xbd8   : > { %14701 = vmatprep.subr.bf16.mxu1 %v17070_v11  ;;  %v16982_v11 = vcombine.high %v1589_v63, %v1593_v0  ;;  %v1749_v48 = vld [vmem:[%s18230_s11 + $0x2e98] sm:$0xff] }
 0xbdd   : > { %14538 = vmatpush1.bf16.xpose.msra.mxu0 %v16941_v15  ;;  %v1729_v15 = vld [vmem:[%s18230_s11 + $0x2df8] sm:$0xff] }
 0xbde   : > { %14539 = vmatprep.subr.bf16.mxu0 %v16950_v22  ;;  %v17109_v22 = vcombine.low %v1717_v1, %v1721_v35  ;;  %v17118_v40 = vcombine.high %v1725_v8, %v1729_v15  ;;  %v1633_v1 = vld [vmem:[%s18230_s11 + $0x2af8] sm:$0xff] }
 0xbdf   : > { %14702 = vmatpush1.bf16.xpose.msra.mxu1 %v17069_v18  ;;  %v16981_v18 = vcombine.low %v1589_v63, %v1593_v0  ;;  %v1629_v0 = vld [vmem:[%s18230_s11 + $0x2ad8] sm:$0xff] }
 0xbe0   : > { %14703 = vmatprep.subr.bf16.mxu1 %v17078_v24  ;;  %v16990_v24 = vcombine.high %v1597_v19, %v1601_v5  ;;  %v1757_v35 = vld [vmem:[%s18230_s11 + $0x2ed8] sm:$0xff] }
 0xbe5   : > { %14540 = vmatpush1.bf16.xpose.msra.mxu0 %v16949_v30  ;;  %v1737_v30 = vld [vmem:[%s18230_s11 + $0x2e38] sm:$0xff] }
 0xbe6   : > { %14541 = vmatprep.subr.bf16.mxu0 %v16958_v32  ;;  %v17117_v32 = vcombine.low %v1725_v8, %v1729_v15  ;;  %v17126_v43 = vcombine.high %v1733_v29, %v1737_v30  ;;  %v1641_v8 = vld [vmem:[%s18230_s11 + $0x2b38] sm:$0xff] }
 0xbe7   : > { %14704 = vmatpush1.bf16.xpose.msra.mxu1 %v17077_v39  ;;  %v16989_v39 = vcombine.low %v1597_v19, %v1601_v5  ;;  %v1637_v5 = vld [vmem:[%s18230_s11 + $0x2b18] sm:$0xff] }
 0xbe8   : > { %14705 = vmatprep.subr.bf16.mxu1 %v17086_v33  ;;  %v16998_v33 = vcombine.high %v1605_v25, %v1609_v26  ;;  %v1765_v15 = vld [vmem:[%s18230_s11 + $0x2f18] sm:$0xff] }
 0xbed   : > { %14542 = vmatpush1.bf16.xpose.msra.mxu0 %v16957_v45  ;;  %v1745_v45 = vld [vmem:[%s18230_s11 + $0x2e78] sm:$0xff] }
 0xbee   : > { %14543 = vmatprep.subr.bf16.mxu0 %v16966_v46  ;;  %v17125_v46 = vcombine.low %v1733_v29, %v1737_v30  ;;  %v17134_v53 = vcombine.high %v1741_v38, %v1745_v45  ;;  %v1649_v29 = vld [vmem:[%s18230_s11 + $0x2b78] sm:$0xff] }
 0xbef   : > { %14706 = vmatpush1.bf16.xpose.msra.mxu1 %v17085_v36  ;;  %v16997_v36 = vcombine.low %v1605_v25, %v1609_v26  ;;  %v1645_v26 = vld [vmem:[%s18230_s11 + $0x2b58] sm:$0xff] }
 0xbf0   : > { %14707 = vmatprep.subr.bf16.mxu1 %v17094_v51  ;;  %v17006_v51 = vcombine.high %v1613_v44, %v1617_v37  ;;  %v1773_v30 = vld [vmem:[%s18230_s11 + $0x2f58] sm:$0xff] }
 0xbf5   : > { %14544 = vmatpush1.bf16.xpose.msra.mxu0 %v16965_v49  ;;  %v1753_v49 = vld [vmem:[%s18230_s11 + $0x2eb8] sm:$0xff] }
 0xbf6   : > { %14545 = vmatprep.subr.bf16.mxu0 %v16974_v58  ;;  %v17133_v58 = vcombine.low %v1741_v38, %v1745_v45  ;;  %v17142_v63 = vcombine.high %v1749_v48, %v1753_v49  ;;  %v1657_v38 = vld [vmem:[%s18230_s11 + $0x2bb8] sm:$0xff] }
 0xbf7   : > { %14708 = vmatpush1.bf16.xpose.msra.mxu1 %v17093_v55  ;;  %v17005_v55 = vcombine.low %v1613_v44, %v1617_v37  ;;  %v1653_v37 = vld [vmem:[%s18230_s11 + $0x2b98] sm:$0xff] }
 0xbf8   : > { %14709 = vmatprep.subr.bf16.mxu1 %v17102_v62  ;;  %v17014_v62 = vcombine.high %v1621_v54, %v1625_v60  ;;  %v1781_v45 = vld [vmem:[%s18230_s11 + $0x2f98] sm:$0xff] }
 0xbfd   : > { %14546 = vmatpush1.bf16.xpose.msra.mxu0 %v16973_v28  ;;  %v1761_v28 = vld [vmem:[%s18230_s11 + $0x2ef8] sm:$0xff] }
 0xbfe   : > { %14547 = vmatprep.subr.bf16.mxu0 %v16982_v11  ;;  %v17141_v11 = vcombine.low %v1749_v48, %v1753_v49  ;;  %v17150_v19 = vcombine.high %v1757_v35, %v1761_v28  ;;  %v1665_v48 = vld [vmem:[%s18230_s11 + $0x2bf8] sm:$0xff] }
 0xbff   : > { %14710 = vmatpush1.bf16.xpose.msra.mxu1 %v17101_v14  ;;  %v17013_v14 = vcombine.low %v1621_v54, %v1625_v60  ;;  %v1661_v60 = vld [vmem:[%s18230_s11 + $0x2bd8] sm:$0xff] }
 0xc00   : > { %14711 = vmatprep.subr.bf16.mxu1 %v17110_v12  ;;  %v17022_v12 = vcombine.high %v1629_v0, %v1633_v1  ;;  %v1789_v49 = vld [vmem:[%s18230_s11 + $0x2fd8] sm:$0xff] }
 0xc05   : > { %14548 = vmatpush1.bf16.xpose.msra.mxu0 %v16981_v18  ;;  %v1769_v18 = vld [vmem:[%s18230_s11 + $0x2f38] sm:$0xff] }
 0xc06   : > { %14549 = vmatprep.subr.bf16.mxu0 %v16990_v24  ;;  %v17149_v24 = vcombine.low %v1757_v35, %v1761_v28  ;;  %v17158_v25 = vcombine.high %v1765_v15, %v1769_v18  ;;  %v1798_v35 = vld [vmem:[%s18230_s11 + $0x3020] sm:$0xff] }
 0xc07   : > { %14712 = vmatpush1.bf16.xpose.msra.mxu1 %v17109_v22  ;;  %v17021_v22 = vcombine.low %v1629_v0, %v1633_v1  ;;  %v1794_v1 = vld [vmem:[%s18230_s11 + $0x3000] sm:$0xff] }
 0xc08   : > { %14713 = vmatprep.subr.bf16.mxu1 %v17118_v40  ;;  %v17030_v40 = vcombine.high %v1637_v5, %v1641_v8  ;;  %v1922_v28 = vld [vmem:[%s18230_s11 + $0x3400] sm:$0xff] }
 0xc0d   : > { %14550 = vmatpush1.bf16.xpose.msra.mxu0 %v16989_v39  ;;  %v1777_v39 = vld [vmem:[%s18230_s11 + $0x2f78] sm:$0xff] }
 0xc0e   : > { %14551 = vmatprep.subr.bf16.mxu0 %v16998_v33  ;;  %v17157_v33 = vcombine.low %v1765_v15, %v1769_v18  ;;  %v17166_v44 = vcombine.high %v1773_v30, %v1777_v39  ;;  %v1806_v15 = vld [vmem:[%s18230_s11 + $0x3060] sm:$0xff] }
 0xc0f   : > { %14714 = vmatpush1.bf16.xpose.msra.mxu1 %v17117_v32  ;;  %v17029_v32 = vcombine.low %v1637_v5, %v1641_v8  ;;  %v1802_v8 = vld [vmem:[%s18230_s11 + $0x3040] sm:$0xff] }
 0xc10   : > { %14715 = vmatprep.subr.bf16.mxu1 %v17126_v43  ;;  %v17038_v43 = vcombine.high %v1645_v26, %v1649_v29  ;;  %v1930_v18 = vld [vmem:[%s18230_s11 + $0x3440] sm:$0xff] }
 0xc15   : > { %14552 = vmatpush1.bf16.xpose.msra.mxu0 %v16997_v36  ;;  %v1785_v36 = vld [vmem:[%s18230_s11 + $0x2fb8] sm:$0xff] }
 0xc16   : > { %14553 = vmatprep.subr.bf16.mxu0 %v17006_v51  ;;  %v17165_v51 = vcombine.low %v1773_v30, %v1777_v39  ;;  %v17174_v54 = vcombine.high %v1781_v45, %v1785_v36  ;;  %v1814_v30 = vld [vmem:[%s18230_s11 + $0x30a0] sm:$0xff] }
 0xc17   : > { %14716 = vmatpush1.bf16.xpose.msra.mxu1 %v17125_v46  ;;  %v17037_v46 = vcombine.low %v1645_v26, %v1649_v29  ;;  %v1810_v29 = vld [vmem:[%s18230_s11 + $0x3080] sm:$0xff] }
 0xc18   : > { %14717 = vmatprep.subr.bf16.mxu1 %v17134_v53  ;;  %v17046_v53 = vcombine.high %v1653_v37, %v1657_v38  ;;  %v1938_v39 = vld [vmem:[%s18230_s11 + $0x3480] sm:$0xff] }
 0xc1d   : > { %14554 = vmatpush1.bf16.xpose.msra.mxu0 %v17005_v55  ;;  %v1793_v55 = vld [vmem:[%s18230_s11 + $0x2ff8] sm:$0xff] }
 0xc1e   : > { %14555 = vmatprep.subr.bf16.mxu0 %v17014_v62  ;;  %v17173_v62 = vcombine.low %v1781_v45, %v1785_v36  ;;  %v17182_v0 = vcombine.high %v1789_v49, %v1793_v55  ;;  %v1822_v45 = vld [vmem:[%s18230_s11 + $0x30e0] sm:$0xff] }
 0xc1f   : > { %14718 = vmatpush1.bf16.xpose.msra.mxu1 %v17133_v58  ;;  %v17045_v58 = vcombine.low %v1653_v37, %v1657_v38  ;;  %v1818_v38 = vld [vmem:[%s18230_s11 + $0x30c0] sm:$0xff] }
 0xc20   : > { %14719 = vmatprep.subr.bf16.mxu1 %v17142_v63  ;;  %v17054_v63 = vcombine.high %v1661_v60, %v1665_v48  ;;  %v1946_v36 = vld [vmem:[%s18230_s11 + $0x34c0] sm:$0xff] }
 0xc25   : > { %14556 = vmatpush1.bf16.xpose.msra.mxu0 %v17013_v14  ;;  %v1926_v14 = vld [vmem:[%s18230_s11 + $0x3420] sm:$0xff] }
 0xc26   : > { %14557 = vmatprep.subr.bf16.mxu0 %v17022_v12  ;;  %v17181_v12 = vcombine.low %v1789_v49, %v1793_v55  ;;  %v17312_v5 = vcombine.high %v1922_v28, %v1926_v14  ;;  %v1830_v49 = vld [vmem:[%s18230_s11 + $0x3120] sm:$0xff] }
 0xc27   : > { %14720 = vmatpush1.bf16.xpose.msra.mxu1 %v17141_v11  ;;  %v17053_v11 = vcombine.low %v1661_v60, %v1665_v48  ;;  %v1826_v48 = vld [vmem:[%s18230_s11 + $0x3100] sm:$0xff] }
 0xc28   : > { %14721 = vmatprep.subr.bf16.mxu1 %v17150_v19  ;;  %v17184_v19 = vcombine.high %v1794_v1, %v1798_v35  ;;  %v1954_v55 = vld [vmem:[%s18230_s11 + $0x3500] sm:$0xff] }
 0xc2d   : > { %14558 = vmatpush1.bf16.xpose.msra.mxu0 %v17021_v22  ;;  %v1934_v22 = vld [vmem:[%s18230_s11 + $0x3460] sm:$0xff] }
 0xc2e   : > { %14559 = vmatprep.subr.bf16.mxu0 %v17030_v40  ;;  %v17311_v40 = vcombine.low %v1922_v28, %v1926_v14  ;;  %v17320_v26 = vcombine.high %v1930_v18, %v1934_v22  ;;  %v1838_v28 = vld [vmem:[%s18230_s11 + $0x3160] sm:$0xff] }
 0xc2f   : > { %14722 = vmatpush1.bf16.xpose.msra.mxu1 %v17149_v24  ;;  %v17183_v24 = vcombine.low %v1794_v1, %v1798_v35  ;;  %v1834_v35 = vld [vmem:[%s18230_s11 + $0x3140] sm:$0xff] }
 0xc30   : > { %14723 = vmatprep.subr.bf16.mxu1 %v17158_v25  ;;  %v17192_v25 = vcombine.high %v1802_v8, %v1806_v15  ;;  %v1962_v14 = vld [vmem:[%s18230_s11 + $0x3540] sm:$0xff] }
 0xc35   : > { %14560 = vmatpush1.bf16.xpose.msra.mxu0 %v17029_v32  ;;  %v1942_v32 = vld [vmem:[%s18230_s11 + $0x34a0] sm:$0xff] }
 0xc36   : > { %14561 = vmatprep.subr.bf16.mxu0 %v17038_v43  ;;  %v17319_v43 = vcombine.low %v1930_v18, %v1934_v22  ;;  %v17328_v37 = vcombine.high %v1938_v39, %v1942_v32  ;;  %v1846_v18 = vld [vmem:[%s18230_s11 + $0x31a0] sm:$0xff] }
 0xc37   : > { %14724 = vmatpush1.bf16.xpose.msra.mxu1 %v17157_v33  ;;  %v17191_v33 = vcombine.low %v1802_v8, %v1806_v15  ;;  %v1842_v15 = vld [vmem:[%s18230_s11 + $0x3180] sm:$0xff] }
 0xc38   : > { %14725 = vmatprep.subr.bf16.mxu1 %v17166_v44  ;;  %v17200_v44 = vcombine.high %v1810_v29, %v1814_v30  ;;  %v1970_v22 = vld [vmem:[%s18230_s11 + $0x3580] sm:$0xff] }
 0xc3d   : > { %14562 = vmatpush1.bf16.xpose.msra.mxu0 %v17037_v46  ;;  %v1950_v46 = vld [vmem:[%s18230_s11 + $0x34e0] sm:$0xff] }
 0xc3e   : > { %14563 = vmatprep.subr.bf16.mxu0 %v17046_v53  ;;  %v17327_v53 = vcombine.low %v1938_v39, %v1942_v32  ;;  %v17336_v60 = vcombine.high %v1946_v36, %v1950_v46  ;;  %v1854_v39 = vld [vmem:[%s18230_s11 + $0x31e0] sm:$0xff] }
 0xc3f   : > { %14726 = vmatpush1.bf16.xpose.msra.mxu1 %v17165_v51  ;;  %v17199_v51 = vcombine.low %v1810_v29, %v1814_v30  ;;  %v1850_v30 = vld [vmem:[%s18230_s11 + $0x31c0] sm:$0xff] }
 0xc40   : > { %14727 = vmatprep.subr.bf16.mxu1 %v17174_v54  ;;  %v17208_v54 = vcombine.high %v1818_v38, %v1822_v45  ;;  %v1978_v32 = vld [vmem:[%s18230_s11 + $0x35c0] sm:$0xff] }
 0xc45   : > { %14564 = vmatpush1.bf16.xpose.msra.mxu0 %v17045_v58  ;;  %v1958_v58 = vld [vmem:[%s18230_s11 + $0x3520] sm:$0xff] }
 0xc46   : > { %14565 = vmatprep.subr.bf16.mxu0 %v17054_v63  ;;  %v17335_v63 = vcombine.low %v1946_v36, %v1950_v46  ;;  %v17344_v1 = vcombine.high %v1954_v55, %v1958_v58  ;;  %v1862_v36 = vld [vmem:[%s18230_s11 + $0x3220] sm:$0xff] }
 0xc47   : > { %14728 = vmatpush1.bf16.xpose.msra.mxu1 %v17173_v62  ;;  %v17207_v62 = vcombine.low %v1818_v38, %v1822_v45  ;;  %v1858_v45 = vld [vmem:[%s18230_s11 + $0x3200] sm:$0xff] }
 0xc48   : > { %14729 = vmatprep.subr.bf16.mxu1 %v17182_v0  ;;  %v17216_v0 = vcombine.high %v1826_v48, %v1830_v49  ;;  %v1986_v46 = vld [vmem:[%s18230_s11 + $0x3600] sm:$0xff] }
 0xc4d   : > { %14566 = vmatpush1.bf16.xpose.msra.mxu0 %v17053_v11  ;;  %v1966_v11 = vld [vmem:[%s18230_s11 + $0x3560] sm:$0xff] }
 0xc4e   : > { %14740 = vmatprep.subr.bf16.mxu0 %v17184_v19  ;;  %v17343_v19 = vcombine.low %v1954_v55, %v1958_v58  ;;  %v17352_v8 = vcombine.high %v1962_v14, %v1966_v11  ;;  %v1870_v55 = vld [vmem:[%s18230_s11 + $0x3260] sm:$0xff] }
 0xc4f   : > { %14730 = vmatpush1.bf16.xpose.msra.mxu1 %v17181_v12  ;;  %v17215_v12 = vcombine.low %v1826_v48, %v1830_v49  ;;  %v1866_v49 = vld [vmem:[%s18230_s11 + $0x3240] sm:$0xff] }
 0xc50   : > { %14904 = vmatprep.subr.bf16.mxu1 %v17312_v5  ;;  %v17224_v5 = vcombine.high %v1834_v35, %v1838_v28  ;;  %v1994_v58 = vld [vmem:[%s18230_s11 + $0x3640] sm:$0xff] }
 0xc54   : > { %14568 = vmatmul.mubr.bf16.vlgmr.msra.gmra.mrb[20].mxu0 %v18569_v13 }
 0xc55   : > { %14741 = vmatpush1.bf16.xpose.msra.mxu0 %v17183_v24  ;;  %14772 = vmatprep.mubr.bf16.mxu0 %v18279_v47  ;;  %v1974_v24 = vld [vmem:[%s18230_s11 + $0x35a0] sm:$0xff] }
 0xc56   : > { %14732 = vmatmul.mubr.bf16.vlgmr.msra.gmra.mrb[20].mxu1 %v18569_v13  ;;  %14742 = vmatprep.subr.bf16.mxu0 %v17192_v25  ;;  %v17351_v25 = vcombine.low %v1962_v14, %v1966_v11  ;;  %v17360_v29 = vcombine.high %v1970_v22, %v1974_v24  ;;  %v1878_v14 = vld [vmem:[%s18230_s11 + $0x32a0] sm:$0xff] }
 0xc57   : > { %14905 = vmatpush1.bf16.xpose.msra.mxu1 %v17311_v40  ;;  %14936 = vmatprep.mubr.bf16.mxu1 %v18279_v47  ;;  %v17223_v40 = vcombine.low %v1834_v35, %v1838_v28  ;;  %v1874_v28 = vld [vmem:[%s18230_s11 + $0x3280] sm:$0xff] }
 0xc58   : > { %14906 = vmatprep.subr.bf16.mxu1 %v17320_v26  ;;  %v17232_v26 = vcombine.high %v1842_v15, %v1846_v18  ;;  %v2002_v11 = vld [vmem:[%s18230_s11 + $0x3680] sm:$0xff] }
 0xc5d   : > { %14743 = vmatpush1.bf16.xpose.msra.mxu0 %v17191_v33  ;;  %v1982_v33 = vld [vmem:[%s18230_s11 + $0x35e0] sm:$0xff] }
 0xc5e   : > { %14744 = vmatprep.subr.bf16.mxu0 %v17200_v44  ;;  %v17359_v44 = vcombine.low %v1970_v22, %v1974_v24  ;;  %v17368_v38 = vcombine.high %v1978_v32, %v1982_v33  ;;  %v1886_v22 = vld [vmem:[%s18230_s11 + $0x32e0] sm:$0xff] }
 0xc5f   : > { %14907 = vmatpush1.bf16.xpose.msra.mxu1 %v17319_v43  ;;  %v17231_v43 = vcombine.low %v1842_v15, %v1846_v18  ;;  %v1882_v18 = vld [vmem:[%s18230_s11 + $0x32c0] sm:$0xff] }
 0xc60   : > { %14908 = vmatprep.subr.bf16.mxu1 %v17328_v37  ;;  %v17240_v37 = vcombine.high %v1850_v30, %v1854_v39  ;;  %v2010_v24 = vld [vmem:[%s18230_s11 + $0x36c0] sm:$0xff] }
 0xc65   : > { %14745 = vmatpush1.bf16.xpose.msra.mxu0 %v17199_v51  ;;  %v1990_v51 = vld [vmem:[%s18230_s11 + $0x3620] sm:$0xff] }
 0xc66   : > { %14746 = vmatprep.subr.bf16.mxu0 %v17208_v54  ;;  %v17367_v54 = vcombine.low %v1978_v32, %v1982_v33  ;;  %v17376_v48 = vcombine.high %v1986_v46, %v1990_v51  ;;  %v1894_v32 = vld [vmem:[%s18230_s11 + $0x3320] sm:$0xff] }
 0xc67   : > { %14909 = vmatpush1.bf16.xpose.msra.mxu1 %v17327_v53  ;;  %v17239_v53 = vcombine.low %v1850_v30, %v1854_v39  ;;  %v1890_v39 = vld [vmem:[%s18230_s11 + $0x3300] sm:$0xff] }
 0xc68   : > { %14910 = vmatprep.subr.bf16.mxu1 %v17336_v60  ;;  %v17248_v60 = vcombine.high %v1858_v45, %v1862_v36  ;;  %v2018_v33 = vld [vmem:[%s18230_s11 + $0x3700] sm:$0xff] }
 0xc6d   : > { %14747 = vmatpush1.bf16.xpose.msra.mxu0 %v17207_v62  ;;  %v1998_v62 = vld [vmem:[%s18230_s11 + $0x3660] sm:$0xff] }
 0xc6e   : > { %14748 = vmatprep.subr.bf16.mxu0 %v17216_v0  ;;  %v17375_v0 = vcombine.low %v1986_v46, %v1990_v51  ;;  %v17384_v35 = vcombine.high %v1994_v58, %v1998_v62  ;;  %v1902_v46 = vld [vmem:[%s18230_s11 + $0x3360] sm:$0xff] }
 0xc6f   : > { %14911 = vmatpush1.bf16.xpose.msra.mxu1 %v17335_v63  ;;  %v17247_v63 = vcombine.low %v1858_v45, %v1862_v36  ;;  %v1898_v36 = vld [vmem:[%s18230_s11 + $0x3340] sm:$0xff] }
 0xc70   : > { %14912 = vmatprep.subr.bf16.mxu1 %v17344_v1  ;;  %v17256_v1 = vcombine.high %v1866_v49, %v1870_v55  ;;  %v2026_v51 = vld [vmem:[%s18230_s11 + $0x3740] sm:$0xff] }
 0xc75   : > { %14749 = vmatpush1.bf16.xpose.msra.mxu0 %v17215_v12  ;;  %v2006_v12 = vld [vmem:[%s18230_s11 + $0x36a0] sm:$0xff] }
 0xc76   : > { %14750 = vmatprep.subr.bf16.mxu0 %v17224_v5  ;;  %v17383_v5 = vcombine.low %v1994_v58, %v1998_v62  ;;  %v17392_v15 = vcombine.high %v2002_v11, %v2006_v12  ;;  %v1910_v58 = vld [vmem:[%s18230_s11 + $0x33a0] sm:$0xff] }
 0xc77   : > { %14913 = vmatpush1.bf16.xpose.msra.mxu1 %v17343_v19  ;;  %v17255_v19 = vcombine.low %v1866_v49, %v1870_v55  ;;  %v1906_v55 = vld [vmem:[%s18230_s11 + $0x3380] sm:$0xff] }
 0xc78   : > { %14914 = vmatprep.subr.bf16.mxu1 %v17352_v8  ;;  %v17264_v8 = vcombine.high %v1874_v28, %v1878_v14  ;;  %v2034_v62 = vld [vmem:[%s18230_s11 + $0x3780] sm:$0xff] }
 0xc7d   : > { %14751 = vmatpush1.bf16.xpose.msra.mxu0 %v17223_v40  ;;  %v2014_v40 = vld [vmem:[%s18230_s11 + $0x36e0] sm:$0xff] }
 0xc7e   : > { %14752 = vmatprep.subr.bf16.mxu0 %v17232_v26  ;;  %v17391_v26 = vcombine.low %v2002_v11, %v2006_v12  ;;  %v17400_v30 = vcombine.high %v2010_v24, %v2014_v40  ;;  %v1918_v11 = vld [vmem:[%s18230_s11 + $0x33e0] sm:$0xff] }
 0xc7f   : > { %14915 = vmatpush1.bf16.xpose.msra.mxu1 %v17351_v25  ;;  %v17263_v25 = vcombine.low %v1874_v28, %v1878_v14  ;;  %v1914_v14 = vld [vmem:[%s18230_s11 + $0x33c0] sm:$0xff] }
 0xc80   : > { %14916 = vmatprep.subr.bf16.mxu1 %v17360_v29  ;;  %v17272_v29 = vcombine.high %v1882_v18, %v1886_v22  ;;  %v2042_v12 = vld [vmem:[%s18230_s11 + $0x37c0] sm:$0xff] }
 0xc85   : > { %14753 = vmatpush1.bf16.xpose.msra.mxu0 %v17231_v43  ;;  %v2022_v43 = vld [vmem:[%s18230_s11 + $0x3720] sm:$0xff] }
 0xc86   : > { %14754 = vmatprep.subr.bf16.mxu0 %v17240_v37  ;;  %v17399_v37 = vcombine.low %v2010_v24, %v2014_v40  ;;  %v17408_v45 = vcombine.high %v2018_v33, %v2022_v43  ;;  %v1799_v24 = vld [vmem:[%s18230_s11 + $0x3028] sm:$0xff] }
 0xc87   : > { %14917 = vmatpush1.bf16.xpose.msra.mxu1 %v17359_v44  ;;  %v17271_v44 = vcombine.low %v1882_v18, %v1886_v22  ;;  %v1795_v22 = vld [vmem:[%s18230_s11 + $0x3008] sm:$0xff] }
 0xc88   : > { %14918 = vmatprep.subr.bf16.mxu1 %v17368_v38  ;;  %v17280_v38 = vcombine.high %v1890_v39, %v1894_v32  ;;  %v1923_v40 = vld [vmem:[%s18230_s11 + $0x3408] sm:$0xff] }
 0xc8d   : > { %14755 = vmatpush1.bf16.xpose.msra.mxu0 %v17239_v53  ;;  %v2030_v53 = vld [vmem:[%s18230_s11 + $0x3760] sm:$0xff] }
 0xc8e   : > { %14756 = vmatprep.subr.bf16.mxu0 %v17248_v60  ;;  %v17407_v60 = vcombine.low %v2018_v33, %v2022_v43  ;;  %v17416_v49 = vcombine.high %v2026_v51, %v2030_v53  ;;  %v1807_v33 = vld [vmem:[%s18230_s11 + $0x3068] sm:$0xff] }
 0xc8f   : > { %14919 = vmatpush1.bf16.xpose.msra.mxu1 %v17367_v54  ;;  %v17279_v54 = vcombine.low %v1890_v39, %v1894_v32  ;;  %v1803_v32 = vld [vmem:[%s18230_s11 + $0x3048] sm:$0xff] }
 0xc90   : > { %14920 = vmatprep.subr.bf16.mxu1 %v17376_v48  ;;  %v17288_v48 = vcombine.high %v1898_v36, %v1902_v46  ;;  %v1931_v43 = vld [vmem:[%s18230_s11 + $0x3448] sm:$0xff] }
 0xc95   : > { %14757 = vmatpush1.bf16.xpose.msra.mxu0 %v17247_v63  ;;  %v2038_v63 = vld [vmem:[%s18230_s11 + $0x37a0] sm:$0xff] }
 0xc96   : > { %14758 = vmatprep.subr.bf16.mxu0 %v17256_v1  ;;  %v17415_v1 = vcombine.low %v2026_v51, %v2030_v53  ;;  %v17424_v28 = vcombine.high %v2034_v62, %v2038_v63  ;;  %v1815_v51 = vld [vmem:[%s18230_s11 + $0x30a8] sm:$0xff] }
 0xc97   : > { %14921 = vmatpush1.bf16.xpose.msra.mxu1 %v17375_v0  ;;  %v17287_v0 = vcombine.low %v1898_v36, %v1902_v46  ;;  %v1811_v46 = vld [vmem:[%s18230_s11 + $0x3088] sm:$0xff] }
 0xc98   : > { %14922 = vmatprep.subr.bf16.mxu1 %v17384_v35  ;;  %v17296_v35 = vcombine.high %v1906_v55, %v1910_v58  ;;  %v1939_v53 = vld [vmem:[%s18230_s11 + $0x3488] sm:$0xff] }
 0xc9d   : > { %14759 = vmatpush1.bf16.xpose.msra.mxu0 %v17255_v19  ;;  %v2046_v19 = vld [vmem:[%s18230_s11 + $0x37e0] sm:$0xff] }
 0xc9e   : > { %14760 = vmatprep.subr.bf16.mxu0 %v17264_v8  ;;  %v17423_v8 = vcombine.low %v2034_v62, %v2038_v63  ;;  %v17432_v18 = vcombine.high %v2042_v12, %v2046_v19  ;;  %v1823_v62 = vld [vmem:[%s18230_s11 + $0x30e8] sm:$0xff] }
 0xc9f   : > { %14923 = vmatpush1.bf16.xpose.msra.mxu1 %v17383_v5  ;;  %v17295_v5 = vcombine.low %v1906_v55, %v1910_v58  ;;  %v1819_v58 = vld [vmem:[%s18230_s11 + $0x30c8] sm:$0xff] }
 0xca0   : > { %14924 = vmatprep.subr.bf16.mxu1 %v17392_v15  ;;  %v17304_v15 = vcombine.high %v1914_v14, %v1918_v11  ;;  %v1947_v63 = vld [vmem:[%s18230_s11 + $0x34c8] sm:$0xff] }
 0xca5   : > { %14761 = vmatpush1.bf16.xpose.msra.mxu0 %v17263_v25  ;;  %v1927_v25 = vld [vmem:[%s18230_s11 + $0x3428] sm:$0xff] }
 0xca6   : > { %14762 = vmatprep.subr.bf16.mxu0 %v17272_v29  ;;  %v17431_v29 = vcombine.low %v2042_v12, %v2046_v19  ;;  %v17314_v39 = vcombine.high %v1923_v40, %v1927_v25  ;;  %v1831_v12 = vld [vmem:[%s18230_s11 + $0x3128] sm:$0xff] }
 0xca7   : > { %14925 = vmatpush1.bf16.xpose.msra.mxu1 %v17391_v26  ;;  %v17303_v26 = vcombine.low %v1914_v14, %v1918_v11  ;;  %v1827_v11 = vld [vmem:[%s18230_s11 + $0x3108] sm:$0xff] }
 0xca8   : > { %14926 = vmatprep.subr.bf16.mxu1 %v17400_v30  ;;  %v17186_v30 = vcombine.high %v1795_v22, %v1799_v24  ;;  %v1955_v19 = vld [vmem:[%s18230_s11 + $0x3508] sm:$0xff] }
 0xcad   : > { %14763 = vmatpush1.bf16.xpose.msra.mxu0 %v17271_v44  ;;  %v1935_v44 = vld [vmem:[%s18230_s11 + $0x3468] sm:$0xff] }
 0xcae   : > { %14764 = vmatprep.subr.bf16.mxu0 %v17280_v38  ;;  %v17313_v38 = vcombine.low %v1923_v40, %v1927_v25  ;;  %v17322_v36 = vcombine.high %v1931_v43, %v1935_v44  ;;  %v1839_v40 = vld [vmem:[%s18230_s11 + $0x3168] sm:$0xff] }
 0xcaf   : > { %14927 = vmatpush1.bf16.xpose.msra.mxu1 %v17399_v37  ;;  %v17185_v37 = vcombine.low %v1795_v22, %v1799_v24  ;;  %v1835_v24 = vld [vmem:[%s18230_s11 + $0x3148] sm:$0xff] }
 0xcb0   : > { %14928 = vmatprep.subr.bf16.mxu1 %v17408_v45  ;;  %v17194_v45 = vcombine.high %v1803_v32, %v1807_v33  ;;  %v1963_v25 = vld [vmem:[%s18230_s11 + $0x3548] sm:$0xff] }
 0xcb5   : > { %14765 = vmatpush1.bf16.xpose.msra.mxu0 %v17279_v54  ;;  %v1943_v54 = vld [vmem:[%s18230_s11 + $0x34a8] sm:$0xff] }
 0xcb6   : > { %14766 = vmatprep.subr.bf16.mxu0 %v17288_v48  ;;  %v17321_v48 = vcombine.low %v1931_v43, %v1935_v44  ;;  %v17330_v55 = vcombine.high %v1939_v53, %v1943_v54  ;;  %v1847_v43 = vld [vmem:[%s18230_s11 + $0x31a8] sm:$0xff] }
 0xcb7   : > { %14929 = vmatpush1.bf16.xpose.msra.mxu1 %v17407_v60  ;;  %v17193_v60 = vcombine.low %v1803_v32, %v1807_v33  ;;  %v1843_v33 = vld [vmem:[%s18230_s11 + $0x3188] sm:$0xff] }
 0xcb8   : > { %14930 = vmatprep.subr.bf16.mxu1 %v17416_v49  ;;  %v17202_v49 = vcombine.high %v1811_v46, %v1815_v51  ;;  %v1971_v44 = vld [vmem:[%s18230_s11 + $0x3588] sm:$0xff] }
 0xcbd   : > { %14767 = vmatpush1.bf16.xpose.msra.mxu0 %v17287_v0  ;;  %v1951_v0 = vld [vmem:[%s18230_s11 + $0x34e8] sm:$0xff] }
 0xcbe   : > { %14768 = vmatprep.subr.bf16.mxu0 %v17296_v35  ;;  %v17329_v35 = vcombine.low %v1939_v53, %v1943_v54  ;;  %v17338_v14 = vcombine.high %v1947_v63, %v1951_v0  ;;  %v1855_v53 = vld [vmem:[%s18230_s11 + $0x31e8] sm:$0xff] }
 0xcbf   : > { %14931 = vmatpush1.bf16.xpose.msra.mxu1 %v17415_v1  ;;  %v17201_v1 = vcombine.low %v1811_v46, %v1815_v51  ;;  %v1851_v51 = vld [vmem:[%s18230_s11 + $0x31c8] sm:$0xff] }
 0xcc0   : > { %14932 = vmatprep.subr.bf16.mxu1 %v17424_v28  ;;  %v17210_v28 = vcombine.high %v1819_v58, %v1823_v62  ;;  %v1979_v54 = vld [vmem:[%s18230_s11 + $0x35c8] sm:$0xff] }
 0xcc5   : > { %14769 = vmatpush1.bf16.xpose.msra.mxu0 %v17295_v5  ;;  %v1959_v5 = vld [vmem:[%s18230_s11 + $0x3528] sm:$0xff] }
 0xcc6   : > { %14770 = vmatprep.subr.bf16.mxu0 %v17304_v15  ;;  %v17337_v15 = vcombine.low %v1947_v63, %v1951_v0  ;;  %v17346_v22 = vcombine.high %v1955_v19, %v1959_v5  ;;  %v1863_v63 = vld [vmem:[%s18230_s11 + $0x3228] sm:$0xff] }
 0xcc7   : > { %14933 = vmatpush1.bf16.xpose.msra.mxu1 %v17423_v8  ;;  %v17209_v8 = vcombine.low %v1819_v58, %v1823_v62  ;;  %v1859_v62 = vld [vmem:[%s18230_s11 + $0x3208] sm:$0xff] }
 0xcc8   : > { %14934 = vmatprep.subr.bf16.mxu1 %v17432_v18  ;;  %v17218_v18 = vcombine.high %v1827_v11, %v1831_v12  ;;  %v1987_v0 = vld [vmem:[%s18230_s11 + $0x3608] sm:$0xff] }
 0xccd   : > { %14771 = vmatpush1.bf16.xpose.msra.mxu0 %v17303_v26  ;;  %v1967_v26 = vld [vmem:[%s18230_s11 + $0x3568] sm:$0xff] }
 0xcce   : > { %14781 = vmatprep.subr.bf16.mxu0 %v17186_v30  ;;  %v17345_v30 = vcombine.low %v1955_v19, %v1959_v5  ;;  %v17354_v32 = vcombine.high %v1963_v25, %v1967_v26  ;;  %v1871_v19 = vld [vmem:[%s18230_s11 + $0x3268] sm:$0xff] }
 0xccf   : > { %14935 = vmatpush1.bf16.xpose.msra.mxu1 %v17431_v29  ;;  %v17217_v29 = vcombine.low %v1827_v11, %v1831_v12  ;;  %v1867_v12 = vld [vmem:[%s18230_s11 + $0x3248] sm:$0xff] }
 0xcd0   : > { %14945 = vmatprep.subr.bf16.mxu1 %v17314_v39  ;;  %v17226_v39 = vcombine.high %v1835_v24, %v1839_v40  ;;  %v1995_v5 = vld [vmem:[%s18230_s11 + $0x3648] sm:$0xff] }
 0xcd4   : > { %14773 = vmatmul.mubr.bf16.vlgmr.msra.gmra.mrb[24].mxu0 %v18335_v23 }
 0xcd5   : > { %14782 = vmatpush1.bf16.xpose.msra.mxu0 %v17185_v37  ;;  %14813 = vmatprep.mubr.bf16.mxu0 %v18341_v31  ;;  %v1975_v37 = vld [vmem:[%s18230_s11 + $0x35a8] sm:$0xff] }
 0xcd6   : > { %14937 = vmatmul.mubr.bf16.vlgmr.msra.gmra.mrb[24].mxu1 %v18335_v23  ;;  %14783 = vmatprep.subr.bf16.mxu0 %v17194_v45  ;;  %v17353_v45 = vcombine.low %v1963_v25, %v1967_v26  ;;  %v17362_v46 = vcombine.high %v1971_v44, %v1975_v37  ;;  %v1879_v25 = vld [vmem:[%s18230_s11 + $0x32a8] sm:$0xff] }
 0xcd7   : > { %14946 = vmatpush1.bf16.xpose.msra.mxu1 %v17313_v38  ;;  %14977 = vmatprep.mubr.bf16.mxu1 %v18341_v31  ;;  %v17225_v38 = vcombine.low %v1835_v24, %v1839_v40  ;;  %v1875_v40 = vld [vmem:[%s18230_s11 + $0x3288] sm:$0xff] }
 0xcd8   : > { %14947 = vmatprep.subr.bf16.mxu1 %v17322_v36  ;;  %v17234_v36 = vcombine.high %v1843_v33, %v1847_v43  ;;  %v2003_v26 = vld [vmem:[%s18230_s11 + $0x3688] sm:$0xff] }
 0xcdd   : > { %14784 = vmatpush1.bf16.xpose.msra.mxu0 %v17193_v60  ;;  %v1983_v60 = vld [vmem:[%s18230_s11 + $0x35e8] sm:$0xff] }
 0xcde   : > { %14785 = vmatprep.subr.bf16.mxu0 %v17202_v49  ;;  %v17361_v49 = vcombine.low %v1971_v44, %v1975_v37  ;;  %v17370_v58 = vcombine.high %v1979_v54, %v1983_v60  ;;  %v1887_v44 = vld [vmem:[%s18230_s11 + $0x32e8] sm:$0xff] }
 0xcdf   : > { %14948 = vmatpush1.bf16.xpose.msra.mxu1 %v17321_v48  ;;  %v17233_v48 = vcombine.low %v1843_v33, %v1847_v43  ;;  %v1883_v43 = vld [vmem:[%s18230_s11 + $0x32c8] sm:$0xff] }
 0xce0   : > { %14949 = vmatprep.subr.bf16.mxu1 %v17330_v55  ;;  %v17242_v55 = vcombine.high %v1851_v51, %v1855_v53  ;;  %v2011_v37 = vld [vmem:[%s18230_s11 + $0x36c8] sm:$0xff] }
 0xce5   : > { %14786 = vmatpush1.bf16.xpose.msra.mxu0 %v17201_v1  ;;  %v1991_v1 = vld [vmem:[%s18230_s11 + $0x3628] sm:$0xff] }
 0xce6   : > { %14787 = vmatprep.subr.bf16.mxu0 %v17210_v28  ;;  %v17369_v28 = vcombine.low %v1979_v54, %v1983_v60  ;;  %v17378_v11 = vcombine.high %v1987_v0, %v1991_v1 }
 0xce7   : > { %14950 = vmatpush1.bf16.xpose.msra.mxu1 %v17329_v35  ;;  %v17241_v35 = vcombine.low %v1851_v51, %v1855_v53  ;;  %v17976_v53 = vld [vmem:[%s18236_s6 + $0x10] sm:$0xff] }
 0xce8   : > { %14951 = vmatprep.subr.bf16.mxu1 %v17338_v14  ;;  %v17250_v14 = vcombine.high %v1859_v62, %v1863_v63  ;;  %v12695_v54 = vrot.slane %v17976_v53, %v18998_v52  ;;  %v12703_v60 = vrot.slane %v17976_v53, %v19003_v56 }
 0xced   : > { %14788 = vmatpush1.bf16.xpose.msra.mxu0 %v17209_v8  ;;  %v1999_v8 = vld [vmem:[%s18230_s11 + $0x3668] sm:$0xff] }
 0xcee   : > { %14789 = vmatprep.subr.bf16.mxu0 %v17218_v18  ;;  %v17377_v18 = vcombine.low %v1987_v0, %v1991_v1  ;;  %v17386_v24 = vcombine.high %v1995_v5, %v1999_v8 }
 0xcef   : > { %14952 = vmatpush1.bf16.xpose.msra.mxu1 %v17337_v15  ;;  %v17249_v15 = vcombine.low %v1859_v62, %v1863_v63  ;;  %v1895_v62 = vld [vmem:[%s18230_s11 + $0x3328] sm:$0xff] }
 0xcf0   : > { %14953 = vmatprep.subr.bf16.mxu1 %v17346_v22  ;;  %v17258_v22 = vcombine.high %v1867_v12, %v1871_v19 }
 0xcf5   : > { %14790 = vmatpush1.bf16.xpose.msra.mxu0 %v17217_v29  ;;  %v2007_v29 = vld [vmem:[%s18230_s11 + $0x36a8] sm:$0xff] }
 0xcf6   : > { %14791 = vmatprep.subr.bf16.mxu0 %v17226_v39  ;;  %v17385_v39 = vcombine.low %v1995_v5, %v1999_v8  ;;  %v17394_v33 = vcombine.high %v2003_v26, %v2007_v29  ;;  %v17273_v5 = vcombine.low %v1883_v43, %v1887_v44 }
 0xcf7   : > { %14954 = vmatpush1.bf16.xpose.msra.mxu1 %v17345_v30  ;;  %v17257_v30 = vcombine.low %v1867_v12, %v1871_v19 }
 0xcf8   : > { %14955 = vmatprep.subr.bf16.mxu1 %v17354_v32  ;;  %v17266_v32 = vcombine.high %v1875_v40, %v1879_v25 }
 0xcfd   : > { %14792 = vmatpush1.bf16.xpose.msra.mxu0 %v17225_v38  ;;  %v2015_v38 = vld [vmem:[%s18230_s11 + $0x36e8] sm:$0xff] }
 0xcfe   : > { %14793 = vmatprep.subr.bf16.mxu0 %v17234_v36  ;;  %v17393_v36 = vcombine.low %v2003_v26, %v2007_v29  ;;  %v17402_v51 = vcombine.high %v2011_v37, %v2015_v38 }
 0xcff   : > { %14956 = vmatpush1.bf16.xpose.msra.mxu1 %v17353_v45  ;;  %v17265_v45 = vcombine.low %v1875_v40, %v1879_v25 }
 0xd00   : > { %14957 = vmatprep.subr.bf16.mxu1 %v17362_v46  ;;  %v17274_v46 = vcombine.high %v1883_v43, %v1887_v44 }
 0xd05   : > { %14794 = vmatpush1.bf16.xpose.msra.mxu0 %v17233_v48  ;;  %v12699_v48 = vrot.slane %v17976_v53, %v19006_v57 }
 0xd06   : > { %14795 = vmatprep.subr.bf16.mxu0 %v17242_v55 }
 0xd07   : > { %14958 = vmatpush1.bf16.xpose.msra.mxu1 %v17361_v49  ;;  %v12707_v49 = vrot.slane %v17976_v53, %v19009_v59 }
 0xd08   : > { %14959 = vmatprep.subr.bf16.mxu1 %v17370_v58  ;;  %v1891_v58 = vld [vmem:[%s18230_s11 + $0x3308] sm:$0xff] }
 0xd09   : > { %v17282_v40 = vcombine.high %v1891_v58, %v1895_v62 }
 0xd0d   : > { %14796 = vmatpush1.bf16.xpose.msra.mxu0 %v17241_v35  ;;  %v2019_v35 = vld [vmem:[%s18230_s11 + $0x3708] sm:$0xff] }
 0xd0e   : > { %14797 = vmatprep.subr.bf16.mxu0 %v17250_v14 }
 0xd0f   : > { %14960 = vmatpush1.bf16.xpose.msra.mxu1 %v17369_v28  ;;  %v2023_v28 = vld [vmem:[%s18230_s11 + $0x3728] sm:$0xff] }
 0xd10   : > { %14961 = vmatprep.subr.bf16.mxu1 %v17378_v11  ;;  %v17410_v29 = vcombine.high %v2019_v35, %v2023_v28  ;;  %v17409_v53 = vcombine.low %v2019_v35, %v2023_v28 }
 0xd15   : > { %14798 = vmatpush1.bf16.xpose.msra.mxu0 %v17249_v15 }
 0xd16   : > { %14799 = vmatprep.subr.bf16.mxu0 %v17258_v22 }
 0xd17   : > { %14962 = vmatpush1.bf16.xpose.msra.mxu1 %v17377_v18 }
 0xd18   : > { %14963 = vmatprep.subr.bf16.mxu1 %v17386_v24  ;;  %v17401_v24 = vcombine.low %v2011_v37, %v2015_v38  ;;  %v1899_v37 = vld [vmem:[%s18230_s11 + $0x3348] sm:$0xff] }
 0xd19   : > { %v1903_v38 = vld [vmem:[%s18230_s11 + $0x3368] sm:$0xff] }
 0xd1d   : > { %14800 = vmatpush1.bf16.xpose.msra.mxu0 %v17257_v30 }
 0xd1e   : > { %14801 = vmatprep.subr.bf16.mxu0 %v17266_v32 }
 0xd1f   : > { %14964 = vmatpush1.bf16.xpose.msra.mxu1 %v17385_v39 }
 0xd20   : > { %14965 = vmatprep.subr.bf16.mxu1 %v17394_v33 }
 0xd25   : > { %14802 = vmatpush1.bf16.xpose.msra.mxu0 %v17265_v45 }
 0xd26   : > { %14803 = vmatprep.subr.bf16.mxu0 %v17274_v46  ;;  %v2031_v46 = vld [vmem:[%s18230_s11 + $0x3768] sm:$0xff] }
 0xd27   : > { %14966 = vmatpush1.bf16.xpose.msra.mxu1 %v17393_v36  ;;  %v14569_v55 = vpop.f32.mrb[20].mxu0  ;;  %v2027_v36 = vld [vmem:[%s18230_s11 + $0x3748] sm:$0xff] }
 0xd28   : > { %14967 = vmatprep.subr.bf16.mxu1 %v17402_v51  ;;  %v17720_v63 = vadd.f32 %v14569_v55, %v12695_v54  ;;  %v14571_v1 = vpop.f32.mrb[21].mxu0  ;;  %v1907_v55 = vld [vmem:[%s18230_s11 + $0x3388] sm:$0xff] }
 0xd29   : > { %v14733_v0 = vpop.f32.mrb[20].mxu1  ;;  %v17721_v11 = vadd.f32 %v14571_v1, %v12699_v48  ;;  %v14573_v19 = vpop.f32.mrb[22].mxu0  ;;  %v17417_v1 = vcombine.low %v2027_v36, %v2031_v46 }
 0xd2a   : > { %v17722_v14 = vadd.f32 %v14733_v0, %v12703_v60  ;;  %v14735_v12 = vpop.f32.mrb[21].mxu1  ;;  %v15497_v8 = vmul.f32 %v17720_v63, %v19019_v41  ;;  %v14574_v22 = vpop.f32.mrb[23].mxu0  ;;  %v17290_v60 = vcombine.high %v1899_v37, %v1903_v38  ;;  %v1911_v63 = vld [vmem:[%s18230_s11 + $0x33a8] sm:$0xff] }
 0xd2b   : > { %v17723_v15 = vadd.f32 %v14735_v12, %v12707_v49  ;;  %v14737_v18 = vpop.f32.mrb[22].mxu1  ;;  %v15498_v25 = vmul.f32 %v17721_v11, %v19023_v10  ;;  %v17418_v49 = vcombine.high %v2027_v36, %v2031_v46  ;;  %v2035_v0 = vld [vmem:[%s18230_s11 + $0x3788] sm:$0xff]  ;;  %v17298_v35 = vcombine.high %v1907_v55, %v1911_v63  ;;  %v1796_v22 = vld [vmem:[%s18230_s11 + $0x3010] sm:$0xff] }
 0xd2c   : > { %v14738_v26 = vpop.f32.mrb[23].mxu1  ;;  %v15508_v30 = vsel %vm15447_vm0, %v15497_v8, 0.0  ;;  %v15499_v39 = vmul.f32 %v17722_v14, %v19028_v16  ;;  %v1915_v14 = vld [vmem:[%s18230_s11 + $0x33c8] sm:$0xff]  ;;  %v1812_v46 = vld [vmem:[%s18230_s11 + $0x3090] sm:$0xff] }
 0xd2d   : > { %v15509_v32 = vadd.f32 %v15508_v30, %v19918_v3  ;;  %v15510_v33 = vsel %vm15447_vm0, %v15498_v25, 0.0  ;;  %14804 = vmatpush1.bf16.xpose.msra.mxu0 %v17273_v5  ;;  %v15500_v43 = vmul.f32 %v17723_v15, %v19033_v27  ;;  %v17281_v3 = vcombine.low %v1891_v58, %v1895_v62  ;;  %v2039_v58 = vld [vmem:[%s18230_s11 + $0x37a8] sm:$0xff]  ;;  %v1928_v25 = vld [vmem:[%s18230_s11 + $0x3430] sm:$0xff] }
 0xd2e   : > { %14805 = vmatprep.subr.bf16.mxu0 %v17282_v40  ;;  %v15512_v45 = vsel %vm15447_vm0, %v15499_v39, 0.0  ;;  %v17289_v62 = vcombine.low %v1899_v37, %v1903_v38  ;;  %v17426_v28 = vcombine.high %v2035_v0, %v2039_v58  ;;  %v1919_v11 = vld [vmem:[%s18230_s11 + $0x33e8] sm:$0xff]  ;;  %v17297_v5 = vcombine.low %v1907_v55, %v1911_v63  ;;  %v1924_v40 = vld [vmem:[%s18230_s11 + $0x3410] sm:$0xff] }
 0xd2f   : > { %14968 = vmatpush1.bf16.xpose.msra.mxu1 %v17401_v24  ;;  %v15511_v44 = vadd.f32 %v15510_v33, %v15509_v32  ;;  %v15514_v54 = vsel %vm15447_vm0, %v15500_v43, 0.0  ;;  %v2043_v12 = vld [vmem:[%s18230_s11 + $0x37c8] sm:$0xff]  ;;  %v17425_v8 = vcombine.low %v2035_v0, %v2039_v58  ;;  %v17306_v15 = vcombine.high %v1915_v14, %v1919_v11  ;;  %v1800_v24 = vld [vmem:[%s18230_s11 + $0x3030] sm:$0xff] }
 0xd30   : > { %14969 = vmatprep.subr.bf16.mxu1 %v17410_v29  ;;  %v2047_v19 = vld [vmem:[%s18230_s11 + $0x37e8] sm:$0xff]  ;;  %v17305_v26 = vcombine.low %v1915_v14, %v1919_v11  ;;  %v17188_v30 = vcombine.high %v1796_v22, %v1800_v24  ;;  %v17316_v39 = vcombine.high %v1924_v40, %v1928_v25  ;;  %v1804_v32 = vld [vmem:[%s18230_s11 + $0x3050] sm:$0xff]  ;;  %v17187_v37 = vcombine.low %v1796_v22, %v1800_v24 }
 0xd31   : > { %v15513_v51 = vadd.f32 %v15512_v45, %v15511_v44  ;;  %v17434_v18 = vcombine.high %v2043_v12, %v2047_v19  ;;  %v17433_v29 = vcombine.low %v2043_v12, %v2047_v19  ;;  %v1808_v33 = vld [vmem:[%s18230_s11 + $0x3070] sm:$0xff]  ;;  %v17315_v38 = vcombine.low %v1924_v40, %v1928_v25 }
 0xd32   : > { %v1932_v43 = vld [vmem:[%s18230_s11 + $0x3450] sm:$0xff]  ;;  %v17196_v45 = vcombine.high %v1804_v32, %v1808_v33 }
 0xd33   : > { %v15515_v48 = vadd.f32 %v15514_v54, %v15513_v51  ;;  %v1936_v44 = vld [vmem:[%s18230_s11 + $0x3470] sm:$0xff]  ;;  %v17195_v54 = vcombine.low %v1804_v32, %v1808_v33 }
 0xd34   : > { %v17324_v36 = vcombine.high %v1932_v43, %v1936_v44  ;;  %v1940_v51 = vld [vmem:[%s18230_s11 + $0x3490] sm:$0xff] }
 0xd35   : > { %14806 = vmatpush1.bf16.xpose.msra.mxu0 %v17281_v3  ;;  %15516 = vadd.xlane.f32.xlu1 %v15515_v48  ;;  %v1816_v3 = vld [vmem:[%s18230_s11 + $0x30b0] sm:$0xff] }
 0xd36   : > { %14807 = vmatprep.subr.bf16.mxu0 %v17290_v60  ;;  %v17323_v60 = vcombine.low %v1932_v43, %v1936_v44  ;;  %v17204_v48 = vcombine.high %v1812_v46, %v1816_v3  ;;  %v1820_v55 = vld [vmem:[%s18230_s11 + $0x30d0] sm:$0xff] }
 0xd37   : > { %14970 = vmatpush1.bf16.xpose.msra.mxu1 %v17409_v53  ;;  %v1944_v53 = vld [vmem:[%s18230_s11 + $0x34b0] sm:$0xff] }
 0xd38   : > { %14971 = vmatprep.subr.bf16.mxu1 %v17418_v49  ;;  %v17332_v49 = vcombine.high %v1940_v51, %v1944_v53  ;;  %v1824_v63 = vld [vmem:[%s18230_s11 + $0x30f0] sm:$0xff] }
 0xd39   : > { %v1948_v0 = vld [vmem:[%s18230_s11 + $0x34d0] sm:$0xff] }
 0xd3a   : > { %v1952_v58 = vld [vmem:[%s18230_s11 + $0x34f0] sm:$0xff] }
 0xd3b   : > { %v1828_v14 = vld [vmem:[%s18230_s11 + $0x3110] sm:$0xff] }
 0xd3c   : > { %v1832_v11 = vld [vmem:[%s18230_s11 + $0x3130] sm:$0xff] }
 0xd3d   : > { %14808 = vmatpush1.bf16.xpose.msra.mxu0 %v17289_v62  ;;  %v17203_v62 = vcombine.low %v1812_v46, %v1816_v3  ;;  %v1956_v12 = vld [vmem:[%s18230_s11 + $0x3510] sm:$0xff] }
 0xd3e   : > { %14809 = vmatprep.subr.bf16.mxu0 %v17298_v35  ;;  %v17212_v35 = vcombine.high %v1820_v55, %v1824_v63  ;;  %v1960_v19 = vld [vmem:[%s18230_s11 + $0x3530] sm:$0xff] }
 0xd3f   : > { %14972 = vmatpush1.bf16.xpose.msra.mxu1 %v17417_v1  ;;  %v17331_v1 = vcombine.low %v1940_v51, %v1944_v53  ;;  %v1836_v22 = vld [vmem:[%s18230_s11 + $0x3150] sm:$0xff] }
 0xd40   : > { %14973 = vmatprep.subr.bf16.mxu1 %v17426_v28  ;;  %v17340_v28 = vcombine.high %v1948_v0, %v1952_v58  ;;  %v1840_v24 = vld [vmem:[%s18230_s11 + $0x3170] sm:$0xff] }
 0xd41   : > { %v1964_v40 = vld [vmem:[%s18230_s11 + $0x3550] sm:$0xff] }
 0xd42   : > { %v1968_v25 = vld [vmem:[%s18230_s11 + $0x3570] sm:$0xff] }
 0xd43   : > { %v1844_v32 = vld [vmem:[%s18230_s11 + $0x3190] sm:$0xff] }
 0xd44   : > { %v1848_v33 = vld [vmem:[%s18230_s11 + $0x31b0] sm:$0xff] }
 0xd45   : > { %14810 = vmatpush1.bf16.xpose.msra.mxu0 %v17297_v5  ;;  %v17211_v5 = vcombine.low %v1820_v55, %v1824_v63  ;;  %v1972_v43 = vld [vmem:[%s18230_s11 + $0x3590] sm:$0xff] }
 0xd46   : > { %14811 = vmatprep.subr.bf16.mxu0 %v17306_v15  ;;  %v17220_v15 = vcombine.high %v1828_v14, %v1832_v11  ;;  %v1976_v44 = vld [vmem:[%s18230_s11 + $0x35b0] sm:$0xff] }
 0xd47   : > { %14974 = vmatpush1.bf16.xpose.msra.mxu1 %v17425_v8  ;;  %v17339_v8 = vcombine.low %v1948_v0, %v1952_v58  ;;  %v1852_v46 = vld [vmem:[%s18230_s11 + $0x31d0] sm:$0xff] }
 0xd48   : > { %14975 = vmatprep.subr.bf16.mxu1 %v17434_v18  ;;  %v17348_v18 = vcombine.high %v1956_v12, %v1960_v19  ;;  %v1856_v3 = vld [vmem:[%s18230_s11 + $0x31f0] sm:$0xff] }
 0xd49   : > { %v1980_v51 = vld [vmem:[%s18230_s11 + $0x35d0] sm:$0xff] }
 0xd4a   : > { %v1984_v53 = vld [vmem:[%s18230_s11 + $0x35f0] sm:$0xff] }
 0xd4b   : > { %v1860_v55 = vld [vmem:[%s18230_s11 + $0x3210] sm:$0xff] }
 0xd4c   : > { %v1864_v63 = vld [vmem:[%s18230_s11 + $0x3230] sm:$0xff] }
 0xd4d   : > { %14812 = vmatpush1.bf16.xpose.msra.mxu0 %v17305_v26  ;;  %v17219_v26 = vcombine.low %v1828_v14, %v1832_v11  ;;  %v1988_v0 = vld [vmem:[%s18230_s11 + $0x3610] sm:$0xff] }
 0xd4e   : > { %14822 = vmatprep.subr.bf16.mxu0 %v17188_v30  ;;  %v17228_v30 = vcombine.high %v1836_v22, %v1840_v24  ;;  %v1992_v58 = vld [vmem:[%s18230_s11 + $0x3630] sm:$0xff] }
 0xd4f   : > { %14976 = vmatpush1.bf16.xpose.msra.mxu1 %v17433_v29  ;;  %v17347_v29 = vcombine.low %v1956_v12, %v1960_v19  ;;  %v1868_v14 = vld [vmem:[%s18230_s11 + $0x3250] sm:$0xff] }
 0xd50   : > { %14986 = vmatprep.subr.bf16.mxu1 %v17316_v39  ;;  %v17356_v39 = vcombine.high %v1964_v40, %v1968_v25  ;;  %v1872_v11 = vld [vmem:[%s18230_s11 + $0x3270] sm:$0xff] }
 0xd51   : > { %v1996_v12 = vld [vmem:[%s18230_s11 + $0x3650] sm:$0xff] }
 0xd52   : > { %v2000_v19 = vld [vmem:[%s18230_s11 + $0x3670] sm:$0xff] }
 0xd54   : > { %14814 = vmatmul.mubr.bf16.vlgmr.msra.gmra.mrb[24].mxu0 %v18416_v42 }
 0xd55   : > { %14823 = vmatpush1.bf16.xpose.msra.mxu0 %v17187_v37  ;;  %14854 = vmatprep.mubr.bf16.mxu0 %v18423_v50  ;;  %v17227_v37 = vcombine.low %v1836_v22, %v1840_v24  ;;  %v1876_v22 = vld [vmem:[%s18230_s11 + $0x3290] sm:$0xff] }
 0xd56   : > { %14978 = vmatmul.mubr.bf16.vlgmr.msra.gmra.mrb[24].mxu1 %v18416_v42  ;;  %14824 = vmatprep.subr.bf16.mxu0 %v17196_v45  ;;  %v17236_v45 = vcombine.high %v1844_v32, %v1848_v33  ;;  %v1880_v24 = vld [vmem:[%s18230_s11 + $0x32b0] sm:$0xff] }
 0xd57   : > { %14987 = vmatpush1.bf16.xpose.msra.mxu1 %v17315_v38  ;;  %15018 = vmatprep.mubr.bf16.mxu1 %v18423_v50  ;;  %v17355_v38 = vcombine.low %v1964_v40, %v1968_v25  ;;  %v2004_v40 = vld [vmem:[%s18230_s11 + $0x3690] sm:$0xff] }
 0xd58   : > { %14988 = vmatprep.subr.bf16.mxu1 %v17324_v36  ;;  %v17364_v36 = vcombine.high %v1972_v43, %v1976_v44  ;;  %v2008_v25 = vld [vmem:[%s18230_s11 + $0x36b0] sm:$0xff] }
 0xd5d   : > { %14825 = vmatpush1.bf16.xpose.msra.mxu0 %v17195_v54  ;;  %v17235_v54 = vcombine.low %v1844_v32, %v1848_v33  ;;  %v1884_v32 = vld [vmem:[%s18230_s11 + $0x32d0] sm:$0xff] }
 0xd5e   : > { %14826 = vmatprep.subr.bf16.mxu0 %v17204_v48  ;;  %v17244_v48 = vcombine.high %v1852_v46, %v1856_v3  ;;  %v1888_v33 = vld [vmem:[%s18230_s11 + $0x32f0] sm:$0xff] }
 0xd5f   : > { %14989 = vmatpush1.bf16.xpose.msra.mxu1 %v17323_v60  ;;  %v17363_v60 = vcombine.low %v1972_v43, %v1976_v44  ;;  %v2012_v43 = vld [vmem:[%s18230_s11 + $0x36d0] sm:$0xff] }
 0xd60   : > { %14990 = vmatprep.subr.bf16.mxu1 %v17332_v49  ;;  %v17372_v49 = vcombine.high %v1980_v51, %v1984_v53  ;;  %v2016_v44 = vld [vmem:[%s18230_s11 + $0x36f0] sm:$0xff] }
 0xd65   : > { %14827 = vmatpush1.bf16.xpose.msra.mxu0 %v17203_v62  ;;  %v17243_v62 = vcombine.low %v1852_v46, %v1856_v3  ;;  %v1892_v46 = vld [vmem:[%s18230_s11 + $0x3310] sm:$0xff] }
 0xd66   : > { %14828 = vmatprep.subr.bf16.mxu0 %v17212_v35  ;;  %v17252_v35 = vcombine.high %v1860_v55, %v1864_v63  ;;  %v1896_v3 = vld [vmem:[%s18230_s11 + $0x3330] sm:$0xff] }
 0xd67   : > { %14991 = vmatpush1.bf16.xpose.msra.mxu1 %v17331_v1  ;;  %v17371_v1 = vcombine.low %v1980_v51, %v1984_v53  ;;  %v2020_v51 = vld [vmem:[%s18230_s11 + $0x3710] sm:$0xff] }
 0xd68   : > { %14992 = vmatprep.subr.bf16.mxu1 %v17340_v28  ;;  %v17380_v28 = vcombine.high %v1988_v0, %v1992_v58  ;;  %v2024_v53 = vld [vmem:[%s18230_s11 + $0x3730] sm:$0xff] }
 0xd6d   : > { %14829 = vmatpush1.bf16.xpose.msra.mxu0 %v17211_v5  ;;  %v17251_v5 = vcombine.low %v1860_v55, %v1864_v63  ;;  %v1900_v55 = vld [vmem:[%s18230_s11 + $0x3350] sm:$0xff] }
 0xd6e   : > { %14830 = vmatprep.subr.bf16.mxu0 %v17220_v15  ;;  %v17260_v15 = vcombine.high %v1868_v14, %v1872_v11  ;;  %v1904_v63 = vld [vmem:[%s18230_s11 + $0x3370] sm:$0xff] }
 0xd6f   : > { %14993 = vmatpush1.bf16.xpose.msra.mxu1 %v17339_v8  ;;  %v17379_v8 = vcombine.low %v1988_v0, %v1992_v58  ;;  %v2028_v0 = vld [vmem:[%s18230_s11 + $0x3750] sm:$0xff] }
 0xd70   : > { %14994 = vmatprep.subr.bf16.mxu1 %v17348_v18  ;;  %v17388_v18 = vcombine.high %v1996_v12, %v2000_v19  ;;  %v2032_v58 = vld [vmem:[%s18230_s11 + $0x3770] sm:$0xff] }
 0xd75   : > { %14831 = vmatpush1.bf16.xpose.msra.mxu0 %v17219_v26  ;;  %v17259_v26 = vcombine.low %v1868_v14, %v1872_v11  ;;  %v1908_v14 = vld [vmem:[%s18230_s11 + $0x3390] sm:$0xff] }
 0xd76   : > { %14832 = vmatprep.subr.bf16.mxu0 %v17228_v30  ;;  %v17268_v30 = vcombine.high %v1876_v22, %v1880_v24  ;;  %v1912_v11 = vld [vmem:[%s18230_s11 + $0x33b0] sm:$0xff] }
 0xd77   : > { %14995 = vmatpush1.bf16.xpose.msra.mxu1 %v17347_v29  ;;  %v17387_v29 = vcombine.low %v1996_v12, %v2000_v19  ;;  %v2036_v12 = vld [vmem:[%s18230_s11 + $0x3790] sm:$0xff] }
 0xd78   : > { %14996 = vmatprep.subr.bf16.mxu1 %v17356_v39  ;;  %v17396_v39 = vcombine.high %v2004_v40, %v2008_v25  ;;  %v2040_v19 = vld [vmem:[%s18230_s11 + $0x37b0] sm:$0xff] }
 0xd7d   : > { %14833 = vmatpush1.bf16.xpose.msra.mxu0 %v17227_v37  ;;  %v17267_v37 = vcombine.low %v1876_v22, %v1880_v24  ;;  %v1916_v22 = vld [vmem:[%s18230_s11 + $0x33d0] sm:$0xff] }
 0xd7e   : > { %14834 = vmatprep.subr.bf16.mxu0 %v17236_v45  ;;  %v17276_v45 = vcombine.high %v1884_v32, %v1888_v33  ;;  %v1920_v24 = vld [vmem:[%s18230_s11 + $0x33f0] sm:$0xff] }
 0xd7f   : > { %14997 = vmatpush1.bf16.xpose.msra.mxu1 %v17355_v38  ;;  %v17395_v38 = vcombine.low %v2004_v40, %v2008_v25  ;;  %v2044_v40 = vld [vmem:[%s18230_s11 + $0x37d0] sm:$0xff] }
 0xd80   : > { %14998 = vmatprep.subr.bf16.mxu1 %v17364_v36  ;;  %v17404_v36 = vcombine.high %v2012_v43, %v2016_v44  ;;  %v2048_v25 = vld [vmem:[%s18230_s11 + $0x37f0] sm:$0xff] }
 0xd85   : > { %14835 = vmatpush1.bf16.xpose.msra.mxu0 %v17235_v54  ;;  %v17275_v54 = vcombine.low %v1884_v32, %v1888_v33  ;;  %v17436_v32 = vcombine.high %v2044_v40, %v2048_v25  ;;  %v1797_v33 = vld [vmem:[%s18230_s11 + $0x3018] sm:$0xff] }
 0xd86   : > { %14836 = vmatprep.subr.bf16.mxu0 %v17244_v48  ;;  %v17284_v48 = vcombine.high %v1892_v46, %v1896_v3 }
 0xd87   : > { %14999 = vmatpush1.bf16.xpose.msra.mxu1 %v17363_v60  ;;  %v17403_v60 = vcombine.low %v2012_v43, %v2016_v44  ;;  %v1801_v43 = vld [vmem:[%s18230_s11 + $0x3038] sm:$0xff] }
 0xd88   : > { %15000 = vmatprep.subr.bf16.mxu1 %v17372_v49  ;;  %v17412_v49 = vcombine.high %v2020_v51, %v2024_v53  ;;  %v1925_v44 = vld [vmem:[%s18230_s11 + $0x3418] sm:$0xff] }
 0xd8d   : > { %14837 = vmatpush1.bf16.xpose.msra.mxu0 %v17243_v62  ;;  %v17283_v62 = vcombine.low %v1892_v46, %v1896_v3  ;;  %v1805_v3 = vld [vmem:[%s18230_s11 + $0x3058] sm:$0xff] }
 0xd8e   : > { %14838 = vmatprep.subr.bf16.mxu0 %v17252_v35  ;;  %v17292_v35 = vcombine.high %v1900_v55, %v1904_v63 }
 0xd8f   : > { %15001 = vmatpush1.bf16.xpose.msra.mxu1 %v17371_v1  ;;  %v17411_v1 = vcombine.low %v2020_v51, %v2024_v53  ;;  %v1809_v51 = vld [vmem:[%s18230_s11 + $0x3078] sm:$0xff] }
 0xd90   : > { %15002 = vmatprep.subr.bf16.mxu1 %v17380_v28  ;;  %v17420_v28 = vcombine.high %v2028_v0, %v2032_v58  ;;  %v1933_v53 = vld [vmem:[%s18230_s11 + $0x3458] sm:$0xff] }
 0xd95   : > { %14839 = vmatpush1.bf16.xpose.msra.mxu0 %v17251_v5  ;;  %v17291_v5 = vcombine.low %v1900_v55, %v1904_v63  ;;  %v1813_v63 = vld [vmem:[%s18230_s11 + $0x3098] sm:$0xff] }
 0xd96   : > { %14840 = vmatprep.subr.bf16.mxu0 %v17260_v15  ;;  %v17300_v15 = vcombine.high %v1908_v14, %v1912_v11 }
 0xd97   : > { %15003 = vmatpush1.bf16.xpose.msra.mxu1 %v17379_v8  ;;  %v17419_v8 = vcombine.low %v2028_v0, %v2032_v58  ;;  %v1817_v0 = vld [vmem:[%s18230_s11 + $0x30b8] sm:$0xff] }
 0xd98   : > { %15004 = vmatprep.subr.bf16.mxu1 %v17388_v18  ;;  %v17428_v18 = vcombine.high %v2036_v12, %v2040_v19  ;;  %v1941_v58 = vld [vmem:[%s18230_s11 + $0x3498] sm:$0xff] }
 0xd9d   : > { %14841 = vmatpush1.bf16.xpose.msra.mxu0 %v17259_v26  ;;  %v17299_v26 = vcombine.low %v1908_v14, %v1912_v11  ;;  %v1821_v11 = vld [vmem:[%s18230_s11 + $0x30d8] sm:$0xff] }
 0xd9e   : > { %14842 = vmatprep.subr.bf16.mxu0 %v17268_v30  ;;  %v17427_v30 = vcombine.low %v2036_v12, %v2040_v19  ;;  %v1825_v12 = vld [vmem:[%s18230_s11 + $0x30f8] sm:$0xff] }
 0xd9f   : > { %15005 = vmatpush1.bf16.xpose.msra.mxu1 %v17387_v29  ;;  %v1949_v19 = vld [vmem:[%s18230_s11 + $0x34d8] sm:$0xff] }
 0xda0   : > { %15006 = vmatprep.subr.bf16.mxu1 %v17396_v39  ;;  %v17308_v39 = vcombine.high %v1916_v22, %v1920_v24 }
 0xda5   : > { %14843 = vmatpush1.bf16.xpose.msra.mxu0 %v17267_v37  ;;  %v1929_v37 = vld [vmem:[%s18230_s11 + $0x3438] sm:$0xff] }
 0xda6   : > { %14844 = vmatprep.subr.bf16.mxu0 %v17276_v45  ;;  %v17435_v45 = vcombine.low %v2044_v40, %v2048_v25  ;;  %v17318_v46 = vcombine.high %v1925_v44, %v1929_v37  ;;  %v1833_v40 = vld [vmem:[%s18230_s11 + $0x3138] sm:$0xff] }
 0xda7   : > { %15007 = vmatpush1.bf16.xpose.msra.mxu1 %v17395_v38  ;;  %v17307_v38 = vcombine.low %v1916_v22, %v1920_v24  ;;  %v1829_v24 = vld [vmem:[%s18230_s11 + $0x3118] sm:$0xff] }
 0xda8   : > { %15008 = vmatprep.subr.bf16.mxu1 %v17404_v36  ;;  %v17190_v36 = vcombine.high %v1797_v33, %v1801_v43  ;;  %v1957_v25 = vld [vmem:[%s18230_s11 + $0x3518] sm:$0xff] }
 0xdad   : > { %14845 = vmatpush1.bf16.xpose.msra.mxu0 %v17275_v54  ;;  %v1937_v54 = vld [vmem:[%s18230_s11 + $0x3478] sm:$0xff] }
 0xdae   : > { %14846 = vmatprep.subr.bf16.mxu0 %v17284_v48  ;;  %v17317_v48 = vcombine.low %v1925_v44, %v1929_v37  ;;  %v17326_v55 = vcombine.high %v1933_v53, %v1937_v54  ;;  %v1965_v44 = vld [vmem:[%s18230_s11 + $0x3558] sm:$0xff] }
 0xdaf   : > { %15009 = vmatpush1.bf16.xpose.msra.mxu1 %v17403_v60  ;;  %v17189_v60 = vcombine.low %v1797_v33, %v1801_v43  ;;  %v1837_v33 = vld [vmem:[%s18230_s11 + $0x3158] sm:$0xff] }
 0xdb0   : > { %15010 = vmatprep.subr.bf16.mxu1 %v17412_v49  ;;  %v17198_v49 = vcombine.high %v1805_v3, %v1809_v51  ;;  %v1841_v43 = vld [vmem:[%s18230_s11 + $0x3178] sm:$0xff] }
 0xdb1   : > { %v1969_v37 = vld [vmem:[%s18230_s11 + $0x3578] sm:$0xff] }
 0xdb5   : > { %14847 = vmatpush1.bf16.xpose.msra.mxu0 %v17283_v62  ;;  %v1945_v62 = vld [vmem:[%s18230_s11 + $0x34b8] sm:$0xff] }
 0xdb6   : > { %14848 = vmatprep.subr.bf16.mxu0 %v17292_v35  ;;  %v17325_v35 = vcombine.low %v1933_v53, %v1937_v54  ;;  %v17334_v14 = vcombine.high %v1941_v58, %v1945_v62  ;;  %v1973_v53 = vld [vmem:[%s18230_s11 + $0x3598] sm:$0xff] }
 0xdb7   : > { %15011 = vmatpush1.bf16.xpose.msra.mxu1 %v17411_v1  ;;  %v17197_v1 = vcombine.low %v1805_v3, %v1809_v51  ;;  %v1845_v3 = vld [vmem:[%s18230_s11 + $0x3198] sm:$0xff] }
 0xdb8   : > { %15012 = vmatprep.subr.bf16.mxu1 %v17420_v28  ;;  %v17206_v28 = vcombine.high %v1813_v63, %v1817_v0  ;;  %v1849_v51 = vld [vmem:[%s18230_s11 + $0x31b8] sm:$0xff] }
 0xdb9   : > { %v1977_v54 = vld [vmem:[%s18230_s11 + $0x35b8] sm:$0xff] }
 0xdbd   : > { %14849 = vmatpush1.bf16.xpose.msra.mxu0 %v17291_v5  ;;  %v1953_v5 = vld [vmem:[%s18230_s11 + $0x34f8] sm:$0xff] }
 0xdbe   : > { %14850 = vmatprep.subr.bf16.mxu0 %v17300_v15  ;;  %v17333_v15 = vcombine.low %v1941_v58, %v1945_v62  ;;  %v17342_v22 = vcombine.high %v1949_v19, %v1953_v5  ;;  %v1981_v58 = vld [vmem:[%s18230_s11 + $0x35d8] sm:$0xff] }
 0xdbf   : > { %15013 = vmatpush1.bf16.xpose.msra.mxu1 %v17419_v8  ;;  %v17205_v8 = vcombine.low %v1813_v63, %v1817_v0  ;;  %v1853_v63 = vld [vmem:[%s18230_s11 + $0x31d8] sm:$0xff] }
 0xdc0   : > { %15014 = vmatprep.subr.bf16.mxu1 %v17428_v18  ;;  %v17214_v18 = vcombine.high %v1821_v11, %v1825_v12  ;;  %v1857_v0 = vld [vmem:[%s18230_s11 + $0x31f8] sm:$0xff] }
 0xdc1   : > { %v1985_v62 = vld [vmem:[%s18230_s11 + $0x35f8] sm:$0xff] }
 0xdc2   : > { %v15517_v29 = vpop.xlane.xlu1 %15516 }
 0xdc3   : > { %15518 = vst.msk [vmem:[%s19061_s22 + $0x2] sm:$0x1] %vm15465_vm1, %v15517_v29  ;;  %v17213_v29 = vcombine.low %v1821_v11, %v1825_v12  ;;  %v1861_v11 = vld [vmem:[%s18230_s11 + $0x3218] sm:$0xff] }
 0xdc4   : > { %v1865_v12 = vld [vmem:[%s18230_s11 + $0x3238] sm:$0xff] }
 0xdc5   : > { %14851 = vmatpush1.bf16.xpose.msra.mxu0 %v17299_v26  ;;  %v1961_v26 = vld [vmem:[%s18230_s11 + $0x3538] sm:$0xff] }
 0xdc6   : > { %14852 = vmatprep.subr.bf16.mxu0 %v17308_v39  ;;  %v17222_v39 = vcombine.high %v1829_v24, %v1833_v40 }
 0xdc7   : > { %15015 = vmatpush1.bf16.xpose.msra.mxu1 %v17427_v30  ;;  %v17341_v30 = vcombine.low %v1949_v19, %v1953_v5  ;;  %v1989_v19 = vld [vmem:[%s18230_s11 + $0x3618] sm:$0xff] }
 0xdc8   : > { %15016 = vmatprep.subr.bf16.mxu1 %v17436_v32  ;;  %v17350_v32 = vcombine.high %v1957_v25, %v1961_v26  ;;  %v1993_v5 = vld [vmem:[%s18230_s11 + $0x3638] sm:$0xff] }
 0xdcd   : > { %14853 = vmatpush1.bf16.xpose.msra.mxu0 %v17307_v38  ;;  %v17221_v38 = vcombine.low %v1829_v24, %v1833_v40  ;;  %v1869_v24 = vld [vmem:[%s18230_s11 + $0x3258] sm:$0xff] }
 0xdce   : > { %14863 = vmatprep.subr.bf16.mxu0 %v17190_v36  ;;  %v17230_v36 = vcombine.high %v1837_v33, %v1841_v43  ;;  %v1873_v40 = vld [vmem:[%s18230_s11 + $0x3278] sm:$0xff] }
 0xdcf   : > { %15017 = vmatpush1.bf16.xpose.msra.mxu1 %v17435_v45  ;;  %v17349_v45 = vcombine.low %v1957_v25, %v1961_v26  ;;  %v1997_v25 = vld [vmem:[%s18230_s11 + $0x3658] sm:$0xff] }
 0xdd0   : > { %15027 = vmatprep.subr.bf16.mxu1 %v17318_v46  ;;  %v17358_v46 = vcombine.high %v1965_v44, %v1969_v37  ;;  %v2001_v26 = vld [vmem:[%s18230_s11 + $0x3678] sm:$0xff] }
 0xdd4   : > { %14855 = vmatmul.mubr.bf16.vlgmr.msra.gmra.mrb[24].mxu0 %v18493_v61 }
 0xdd5   : > { %14864 = vmatpush1.bf16.xpose.msra.mxu0 %v17189_v60  ;;  %14895 = vmatprep.mubr.bf16.mxu0 %v18499_v4  ;;  %v17229_v60 = vcombine.low %v1837_v33, %v1841_v43  ;;  %v1877_v33 = vld [vmem:[%s18230_s11 + $0x3298] sm:$0xff] }
 0xdd6   : > { %15019 = vmatmul.mubr.bf16.vlgmr.msra.gmra.mrb[24].mxu1 %v18493_v61  ;;  %14865 = vmatprep.subr.bf16.mxu0 %v17198_v49  ;;  %v17238_v49 = vcombine.high %v1845_v3, %v1849_v51  ;;  %v1881_v43 = vld [vmem:[%s18230_s11 + $0x32b8] sm:$0xff] }
 0xdd7   : > { %15028 = vmatpush1.bf16.xpose.msra.mxu1 %v17317_v48  ;;  %15059 = vmatprep.mubr.bf16.mxu1 %v18499_v4  ;;  %v17357_v48 = vcombine.low %v1965_v44, %v1969_v37  ;;  %v2005_v44 = vld [vmem:[%s18230_s11 + $0x3698] sm:$0xff] }
 0xdd8   : > { %15029 = vmatprep.subr.bf16.mxu1 %v17326_v55  ;;  %v17366_v55 = vcombine.high %v1973_v53, %v1977_v54  ;;  %v2009_v37 = vld [vmem:[%s18230_s11 + $0x36b8] sm:$0xff] }
 0xddd   : > { %14866 = vmatpush1.bf16.xpose.msra.mxu0 %v17197_v1  ;;  %v17237_v1 = vcombine.low %v1845_v3, %v1849_v51  ;;  %v1885_v3 = vld [vmem:[%s18230_s11 + $0x32d8] sm:$0xff] }
 0xdde   : > { %14867 = vmatprep.subr.bf16.mxu0 %v17206_v28  ;;  %v17246_v28 = vcombine.high %v1853_v63, %v1857_v0  ;;  %v1889_v51 = vld [vmem:[%s18230_s11 + $0x32f8] sm:$0xff] }
 0xddf   : > { %15030 = vmatpush1.bf16.xpose.msra.mxu1 %v17325_v35  ;;  %v17365_v35 = vcombine.low %v1973_v53, %v1977_v54  ;;  %v2013_v53 = vld [vmem:[%s18230_s11 + $0x36d8] sm:$0xff] }
 0xde0   : > { %15031 = vmatprep.subr.bf16.mxu1 %v17334_v14  ;;  %v17374_v14 = vcombine.high %v1981_v58, %v1985_v62  ;;  %v2017_v54 = vld [vmem:[%s18230_s11 + $0x36f8] sm:$0xff] }
 0xde5   : > { %14868 = vmatpush1.bf16.xpose.msra.mxu0 %v17205_v8  ;;  %v17245_v8 = vcombine.low %v1853_v63, %v1857_v0  ;;  %v1893_v63 = vld [vmem:[%s18230_s11 + $0x3318] sm:$0xff] }
 0xde6   : > { %14869 = vmatprep.subr.bf16.mxu0 %v17214_v18  ;;  %v17254_v18 = vcombine.high %v1861_v11, %v1865_v12  ;;  %v1897_v0 = vld [vmem:[%s18230_s11 + $0x3338] sm:$0xff] }
 0xde7   : > { %15032 = vmatpush1.bf16.xpose.msra.mxu1 %v17333_v15  ;;  %v17373_v15 = vcombine.low %v1981_v58, %v1985_v62  ;;  %v2021_v58 = vld [vmem:[%s18230_s11 + $0x3718] sm:$0xff] }
 0xde8   : > { %15033 = vmatprep.subr.bf16.mxu1 %v17342_v22  ;;  %v17382_v22 = vcombine.high %v1989_v19, %v1993_v5  ;;  %v2025_v62 = vld [vmem:[%s18230_s11 + $0x3738] sm:$0xff] }
 0xded   : > { %14870 = vmatpush1.bf16.xpose.msra.mxu0 %v17213_v29  ;;  %v17253_v29 = vcombine.low %v1861_v11, %v1865_v12  ;;  %v1901_v11 = vld [vmem:[%s18230_s11 + $0x3358] sm:$0xff] }
 0xdee   : > { %14871 = vmatprep.subr.bf16.mxu0 %v17222_v39  ;;  %v17262_v39 = vcombine.high %v1869_v24, %v1873_v40  ;;  %v1905_v12 = vld [vmem:[%s18230_s11 + $0x3378] sm:$0xff] }
 0xdef   : > { %15034 = vmatpush1.bf16.xpose.msra.mxu1 %v17341_v30  ;;  %v17381_v30 = vcombine.low %v1989_v19, %v1993_v5  ;;  %v2029_v19 = vld [vmem:[%s18230_s11 + $0x3758] sm:$0xff] }
 0xdf0   : > { %15035 = vmatprep.subr.bf16.mxu1 %v17350_v32  ;;  %v17390_v32 = vcombine.high %v1997_v25, %v2001_v26  ;;  %v2033_v5 = vld [vmem:[%s18230_s11 + $0x3778] sm:$0xff] }
 0xdf5   : > { %14872 = vmatpush1.bf16.xpose.msra.mxu0 %v17221_v38  ;;  %v17261_v38 = vcombine.low %v1869_v24, %v1873_v40  ;;  %v1909_v24 = vld [vmem:[%s18230_s11 + $0x3398] sm:$0xff] }
 0xdf6   : > { %14873 = vmatprep.subr.bf16.mxu0 %v17230_v36  ;;  %v17270_v36 = vcombine.high %v1877_v33, %v1881_v43  ;;  %v1913_v40 = vld [vmem:[%s18230_s11 + $0x33b8] sm:$0xff] }
 0xdf7   : > { %15036 = vmatpush1.bf16.xpose.msra.mxu1 %v17349_v45  ;;  %v17389_v45 = vcombine.low %v1997_v25, %v2001_v26  ;;  %v2037_v25 = vld [vmem:[%s18230_s11 + $0x3798] sm:$0xff] }
 0xdf8   : > { %15037 = vmatprep.subr.bf16.mxu1 %v17358_v46  ;;  %v17398_v46 = vcombine.high %v2005_v44, %v2009_v37  ;;  %v2041_v26 = vld [vmem:[%s18230_s11 + $0x37b8] sm:$0xff] }
 0xdfd   : > { %14874 = vmatpush1.bf16.xpose.msra.mxu0 %v17229_v60  ;;  %v17269_v60 = vcombine.low %v1877_v33, %v1881_v43  ;;  %v1917_v33 = vld [vmem:[%s18230_s11 + $0x33d8] sm:$0xff] }
 0xdfe   : > { %14875 = vmatprep.subr.bf16.mxu0 %v17238_v49  ;;  %v17278_v49 = vcombine.high %v1885_v3, %v1889_v51  ;;  %v1921_v43 = vld [vmem:[%s18230_s11 + $0x33f8] sm:$0xff] }
 0xdff   : > { %15038 = vmatpush1.bf16.xpose.msra.mxu1 %v17357_v48  ;;  %v17397_v48 = vcombine.low %v2005_v44, %v2009_v37  ;;  %v2045_v44 = vld [vmem:[%s18230_s11 + $0x37d8] sm:$0xff] }
 0xe00   : > { %15039 = vmatprep.subr.bf16.mxu1 %v17366_v55  ;;  %v17406_v55 = vcombine.high %v2013_v53, %v2017_v54  ;;  %v2049_v37 = vld [vmem:[%s18230_s11 + $0x37f8] sm:$0xff] }
 0xe05   : > { %14876 = vmatpush1.bf16.xpose.msra.mxu0 %v17237_v1  ;;  %v17277_v1 = vcombine.low %v1885_v3, %v1889_v51  ;;  %v2050_v3 = vld [vmem:[%s18230_s11 + $0x3800] sm:$0xff] }
 0xe06   : > { %14877 = vmatprep.subr.bf16.mxu0 %v17246_v28  ;;  %v17286_v28 = vcombine.high %v1893_v63, %v1897_v0  ;;  %v2054_v51 = vld [vmem:[%s18230_s11 + $0x3820] sm:$0xff] }
 0xe07   : > { %15040 = vmatpush1.bf16.xpose.msra.mxu1 %v17365_v35  ;;  %v17405_v35 = vcombine.low %v2013_v53, %v2017_v54  ;;  %v2178_v53 = vld [vmem:[%s18230_s11 + $0x3c00] sm:$0xff] }
 0xe08   : > { %15041 = vmatprep.subr.bf16.mxu1 %v17374_v14  ;;  %v17414_v14 = vcombine.high %v2021_v58, %v2025_v62  ;;  %v2182_v54 = vld [vmem:[%s18230_s11 + $0x3c20] sm:$0xff] }
 0xe0d   : > { %14878 = vmatpush1.bf16.xpose.msra.mxu0 %v17245_v8  ;;  %v17285_v8 = vcombine.low %v1893_v63, %v1897_v0  ;;  %v2058_v63 = vld [vmem:[%s18230_s11 + $0x3840] sm:$0xff] }
 0xe0e   : > { %14879 = vmatprep.subr.bf16.mxu0 %v17254_v18  ;;  %v17294_v18 = vcombine.high %v1901_v11, %v1905_v12  ;;  %v2062_v0 = vld [vmem:[%s18230_s11 + $0x3860] sm:$0xff] }
 0xe0f   : > { %15042 = vmatpush1.bf16.xpose.msra.mxu1 %v17373_v15  ;;  %v17413_v15 = vcombine.low %v2021_v58, %v2025_v62  ;;  %v2186_v58 = vld [vmem:[%s18230_s11 + $0x3c40] sm:$0xff] }
 0xe10   : > { %15043 = vmatprep.subr.bf16.mxu1 %v17382_v22  ;;  %v17422_v22 = vcombine.high %v2029_v19, %v2033_v5  ;;  %v2190_v62 = vld [vmem:[%s18230_s11 + $0x3c60] sm:$0xff] }
 0xe15   : > { %14880 = vmatpush1.bf16.xpose.msra.mxu0 %v17253_v29  ;;  %v17293_v29 = vcombine.low %v1901_v11, %v1905_v12  ;;  %v2066_v11 = vld [vmem:[%s18230_s11 + $0x3880] sm:$0xff] }
 0xe16   : > { %14881 = vmatprep.subr.bf16.mxu0 %v17262_v39  ;;  %v17302_v39 = vcombine.high %v1909_v24, %v1913_v40  ;;  %v2070_v12 = vld [vmem:[%s18230_s11 + $0x38a0] sm:$0xff] }
 0xe17   : > { %15044 = vmatpush1.bf16.xpose.msra.mxu1 %v17381_v30  ;;  %v17421_v30 = vcombine.low %v2029_v19, %v2033_v5  ;;  %v2194_v19 = vld [vmem:[%s18230_s11 + $0x3c80] sm:$0xff] }
 0xe18   : > { %15045 = vmatprep.subr.bf16.mxu1 %v17390_v32  ;;  %v17430_v32 = vcombine.high %v2037_v25, %v2041_v26  ;;  %v2198_v5 = vld [vmem:[%s18230_s11 + $0x3ca0] sm:$0xff] }
 0xe1d   : > { %14882 = vmatpush1.bf16.xpose.msra.mxu0 %v17261_v38  ;;  %v17301_v38 = vcombine.low %v1909_v24, %v1913_v40  ;;  %v2074_v24 = vld [vmem:[%s18230_s11 + $0x38c0] sm:$0xff] }
 0xe1e   : > { %14883 = vmatprep.subr.bf16.mxu0 %v17270_v36  ;;  %v17310_v36 = vcombine.high %v1917_v33, %v1921_v43  ;;  %v2078_v40 = vld [vmem:[%s18230_s11 + $0x38e0] sm:$0xff] }
 0xe1f   : > { %15046 = vmatpush1.bf16.xpose.msra.mxu1 %v17389_v45  ;;  %v17429_v45 = vcombine.low %v2037_v25, %v2041_v26  ;;  %v2202_v25 = vld [vmem:[%s18230_s11 + $0x3cc0] sm:$0xff] }
 0xe20   : > { %15047 = vmatprep.subr.bf16.mxu1 %v17398_v46  ;;  %v17438_v46 = vcombine.high %v2045_v44, %v2049_v37  ;;  %v2206_v26 = vld [vmem:[%s18230_s11 + $0x3ce0] sm:$0xff] }
 0xe25   : > { %14884 = vmatpush1.bf16.xpose.msra.mxu0 %v17269_v60  ;;  %v17309_v60 = vcombine.low %v1917_v33, %v1921_v43  ;;  %v2086_v33 = vld [vmem:[%s18230_s11 + $0x3920] sm:$0xff] }
 0xe26   : > { %14885 = vmatprep.subr.bf16.mxu0 %v17278_v49  ;;  %v17440_v49 = vcombine.high %v2050_v3, %v2054_v51  ;;  %v2210_v43 = vld [vmem:[%s18230_s11 + $0x3d00] sm:$0xff] }
 0xe27   : > { %15048 = vmatpush1.bf16.xpose.msra.mxu1 %v17397_v48  ;;  %v17437_v48 = vcombine.low %v2045_v44, %v2049_v37  ;;  %v2214_v44 = vld [vmem:[%s18230_s11 + $0x3d20] sm:$0xff]  ;;  %v17463_v37 = vcombine.low %v2074_v24, %v2078_v40 }
 0xe28   : > { %15049 = vmatprep.subr.bf16.mxu1 %v17406_v55  ;;  %v17568_v55 = vcombine.high %v2178_v53, %v2182_v54 }
 0xe2d   : > { %14886 = vmatpush1.bf16.xpose.msra.mxu0 %v17277_v1  ;;  %v17439_v1 = vcombine.low %v2050_v3, %v2054_v51  ;;  %v2094_v3 = vld [vmem:[%s18230_s11 + $0x3960] sm:$0xff] }
 0xe2e   : > { %14887 = vmatprep.subr.bf16.mxu0 %v17286_v28  ;;  %v17448_v28 = vcombine.high %v2058_v63, %v2062_v0  ;;  %v2218_v51 = vld [vmem:[%s18230_s11 + $0x3d40] sm:$0xff] }
 0xe2f   : > { %15050 = vmatpush1.bf16.xpose.msra.mxu1 %v17405_v35  ;;  %v17567_v35 = vcombine.low %v2178_v53, %v2182_v54  ;;  %v2222_v53 = vld [vmem:[%s18230_s11 + $0x3d60] sm:$0xff] }
 0xe30   : > { %15051 = vmatprep.subr.bf16.mxu1 %v17414_v14  ;;  %v17576_v14 = vcombine.high %v2186_v58, %v2190_v62 }
 0xe35   : > { %14888 = vmatpush1.bf16.xpose.msra.mxu0 %v17285_v8  ;;  %v17447_v8 = vcombine.low %v2058_v63, %v2062_v0  ;;  %v2102_v63 = vld [vmem:[%s18230_s11 + $0x39a0] sm:$0xff] }
 0xe36   : > { %14889 = vmatprep.subr.bf16.mxu0 %v17294_v18  ;;  %v17456_v18 = vcombine.high %v2066_v11, %v2070_v12  ;;  %v2226_v0 = vld [vmem:[%s18230_s11 + $0x3d80] sm:$0xff] }
 0xe37   : > { %15052 = vmatpush1.bf16.xpose.msra.mxu1 %v17413_v15  ;;  %v17575_v15 = vcombine.low %v2186_v58, %v2190_v62  ;;  %v2230_v58 = vld [vmem:[%s18230_s11 + $0x3da0] sm:$0xff] }
 0xe38   : > { %15053 = vmatprep.subr.bf16.mxu1 %v17422_v22  ;;  %v17584_v22 = vcombine.high %v2194_v19, %v2198_v5 }
 0xe3d   : > { %14890 = vmatpush1.bf16.xpose.msra.mxu0 %v17293_v29  ;;  %v17455_v29 = vcombine.low %v2066_v11, %v2070_v12  ;;  %v2110_v11 = vld [vmem:[%s18230_s11 + $0x39e0] sm:$0xff] }
 0xe3e   : > { %14891 = vmatprep.subr.bf16.mxu0 %v17302_v39  ;;  %v17464_v39 = vcombine.high %v2074_v24, %v2078_v40  ;;  %v2234_v12 = vld [vmem:[%s18230_s11 + $0x3dc0] sm:$0xff] }
 0xe3f   : > { %15054 = vmatpush1.bf16.xpose.msra.mxu1 %v17421_v30  ;;  %v17583_v30 = vcombine.low %v2194_v19, %v2198_v5  ;;  %v2238_v19 = vld [vmem:[%s18230_s11 + $0x3de0] sm:$0xff] }
 0xe40   : > { %15055 = vmatprep.subr.bf16.mxu1 %v17430_v32  ;;  %v2082_v32 = vld [vmem:[%s18230_s11 + $0x3900] sm:$0xff] }
 0xe41   : > { %v17471_v54 = vcombine.low %v2082_v32, %v2086_v33  ;;  %v2118_v24 = vld [vmem:[%s18230_s11 + $0x3a20] sm:$0xff] }
 0xe42   : > { %v2242_v40 = vld [vmem:[%s18230_s11 + $0x3e00] sm:$0xff] }
 0xe45   : > { %14892 = vmatpush1.bf16.xpose.msra.mxu0 %v17301_v38  ;;  %v17591_v38 = vcombine.low %v2202_v25, %v2206_v26 }
 0xe46   : > { %14893 = vmatprep.subr.bf16.mxu0 %v17310_v36  ;;  %v17600_v36 = vcombine.high %v2210_v43, %v2214_v44 }
 0xe47   : > { %15056 = vmatpush1.bf16.xpose.msra.mxu1 %v17429_v45  ;;  %v17472_v45 = vcombine.high %v2082_v32, %v2086_v33  ;;  %v2126_v32 = vld [vmem:[%s18230_s11 + $0x3a60] sm:$0xff] }
 0xe48   : > { %15057 = vmatprep.subr.bf16.mxu1 %v17438_v46  ;;  %v2090_v46 = vld [vmem:[%s18230_s11 + $0x3940] sm:$0xff] }
 0xe49   : > { %v17479_v62 = vcombine.low %v2090_v46, %v2094_v3  ;;  %v2250_v33 = vld [vmem:[%s18230_s11 + $0x3e40] sm:$0xff] }
 0xe4d   : > { %14894 = vmatpush1.bf16.xpose.msra.mxu0 %v17309_v60  ;;  %v17599_v60 = vcombine.low %v2210_v43, %v2214_v44  ;;  %v2254_v43 = vld [vmem:[%s18230_s11 + $0x3e60] sm:$0xff] }
 0xe4e   : > { %15068 = vmatprep.subr.bf16.mxu0 %v17440_v49  ;;  %v17608_v49 = vcombine.high %v2218_v51, %v2222_v53 }
 0xe4f   : > { %15058 = vmatpush1.bf16.xpose.msra.mxu1 %v17437_v48  ;;  %v17480_v48 = vcombine.high %v2090_v46, %v2094_v3  ;;  %v2134_v46 = vld [vmem:[%s18230_s11 + $0x3aa0] sm:$0xff] }
 0xe50   : > { %15232 = vmatprep.subr.bf16.mxu1 %v17568_v55  ;;  %v2098_v55 = vld [vmem:[%s18230_s11 + $0x3980] sm:$0xff] }
 0xe51   : > { %v17487_v5 = vcombine.low %v2098_v55, %v2102_v63  ;;  %v2258_v3 = vld [vmem:[%s18230_s11 + $0x3e80] sm:$0xff] }
 0xe54   : > { %14896 = vmatmul.mubr.bf16.vlgmr.msra.gmra.mrb[24].mxu0 %v18569_v13 }
 0xe55   : > { %15069 = vmatpush1.bf16.xpose.msra.mxu0 %v17439_v1  ;;  %15100 = vmatprep.mubr.bf16.mxu0 %v18279_v47  ;;  %v17607_v1 = vcombine.low %v2218_v51, %v2222_v53  ;;  %v2262_v51 = vld [vmem:[%s18230_s11 + $0x3ea0] sm:$0xff] }
 0xe56   : > { %15060 = vmatmul.mubr.bf16.vlgmr.msra.gmra.mrb[24].mxu1 %v18569_v13  ;;  %15070 = vmatprep.subr.bf16.mxu0 %v17448_v28  ;;  %v17616_v28 = vcombine.high %v2226_v0, %v2230_v58 }
 0xe57   : > { %15233 = vmatpush1.bf16.xpose.msra.mxu1 %v17567_v35  ;;  %15264 = vmatprep.mubr.bf16.mxu1 %v18279_v47  ;;  %v17592_v47 = vcombine.high %v2202_v25, %v2206_v26  ;;  %v17488_v35 = vcombine.high %v2098_v55, %v2102_v63  ;;  %v2246_v25 = vld [vmem:[%s18230_s11 + $0x3e20] sm:$0xff] }
 0xe58   : > { %15234 = vmatprep.subr.bf16.mxu1 %v17576_v14  ;;  %v2106_v14 = vld [vmem:[%s18230_s11 + $0x39c0] sm:$0xff] }
 0xe59   : > { %v17495_v26 = vcombine.low %v2106_v14, %v2110_v11  ;;  %v2142_v55 = vld [vmem:[%s18230_s11 + $0x3ae0] sm:$0xff] }
 0xe5a   : > { %v2266_v63 = vld [vmem:[%s18230_s11 + $0x3ec0] sm:$0xff] }
 0xe5d   : > { %15071 = vmatpush1.bf16.xpose.msra.mxu0 %v17447_v8  ;;  %v17615_v8 = vcombine.low %v2226_v0, %v2230_v58  ;;  %v2270_v0 = vld [vmem:[%s18230_s11 + $0x3ee0] sm:$0xff] }
 0xe5e   : > { %15072 = vmatprep.subr.bf16.mxu0 %v17456_v18  ;;  %v17624_v18 = vcombine.high %v2234_v12, %v2238_v19 }
 0xe5f   : > { %15235 = vmatpush1.bf16.xpose.msra.mxu1 %v17575_v15  ;;  %v17496_v15 = vcombine.high %v2106_v14, %v2110_v11  ;;  %v2150_v14 = vld [vmem:[%s18230_s11 + $0x3b20] sm:$0xff] }
 0xe60   : > { %15236 = vmatprep.subr.bf16.mxu1 %v17584_v22  ;;  %v2114_v22 = vld [vmem:[%s18230_s11 + $0x3a00] sm:$0xff] }
 0xe61   : > { %v17503_v44 = vcombine.low %v2114_v22, %v2118_v24  ;;  %v2274_v11 = vld [vmem:[%s18230_s11 + $0x3f00] sm:$0xff] }
 0xe65   : > { %15073 = vmatpush1.bf16.xpose.msra.mxu0 %v17455_v29  ;;  %v17623_v29 = vcombine.low %v2234_v12, %v2238_v19  ;;  %v2278_v12 = vld [vmem:[%s18230_s11 + $0x3f20] sm:$0xff] }
 0xe66   : > { %15074 = vmatprep.subr.bf16.mxu0 %v17464_v39  ;;  %v17632_v39 = vcombine.high %v2242_v40, %v2246_v25 }
 0xe67   : > { %15237 = vmatpush1.bf16.xpose.msra.mxu1 %v17583_v30  ;;  %v17504_v30 = vcombine.high %v2114_v22, %v2118_v24  ;;  %v2158_v22 = vld [vmem:[%s18230_s11 + $0x3b60] sm:$0xff] }
 0xe68   : > { %15238 = vmatprep.subr.bf16.mxu1 %v17592_v47  ;;  %v2122_v47 = vld [vmem:[%s18230_s11 + $0x3a40] sm:$0xff] }
 0xe69   : > { %v17511_v53 = vcombine.low %v2122_v47, %v2126_v32  ;;  %v2282_v24 = vld [vmem:[%s18230_s11 + $0x3f40] sm:$0xff] }
 0xe6d   : > { %15075 = vmatpush1.bf16.xpose.msra.mxu0 %v17463_v37  ;;  %v17631_v37 = vcombine.low %v2242_v40, %v2246_v25  ;;  %v2286_v40 = vld [vmem:[%s18230_s11 + $0x3f60] sm:$0xff] }
 0xe6e   : > { %15076 = vmatprep.subr.bf16.mxu0 %v17472_v45  ;;  %v17640_v45 = vcombine.high %v2250_v33, %v2254_v43 }
 0xe6f   : > { %15239 = vmatpush1.bf16.xpose.msra.mxu1 %v17591_v38  ;;  %v17512_v38 = vcombine.high %v2122_v47, %v2126_v32  ;;  %v2166_v47 = vld [vmem:[%s18230_s11 + $0x3ba0] sm:$0xff] }
 0xe70   : > { %15240 = vmatprep.subr.bf16.mxu1 %v17600_v36  ;;  %v2130_v36 = vld [vmem:[%s18230_s11 + $0x3a80] sm:$0xff] }
 0xe71   : > { %v17519_v58 = vcombine.low %v2130_v36, %v2134_v46  ;;  %v2290_v32 = vld [vmem:[%s18230_s11 + $0x3f80] sm:$0xff] }
 0xe75   : > { %15077 = vmatpush1.bf16.xpose.msra.mxu0 %v17471_v54  ;;  %v17639_v54 = vcombine.low %v2250_v33, %v2254_v43  ;;  %v2294_v33 = vld [vmem:[%s18230_s11 + $0x3fa0] sm:$0xff] }
 0xe76   : > { %15078 = vmatprep.subr.bf16.mxu0 %v17480_v48  ;;  %v17648_v48 = vcombine.high %v2258_v3, %v2262_v51 }
 0xe77   : > { %15241 = vmatpush1.bf16.xpose.msra.mxu1 %v17599_v60  ;;  %v17520_v60 = vcombine.high %v2130_v36, %v2134_v46  ;;  %v2174_v36 = vld [vmem:[%s18230_s11 + $0x3be0] sm:$0xff] }
 0xe78   : > { %15242 = vmatprep.subr.bf16.mxu1 %v17608_v49  ;;  %v2138_v49 = vld [vmem:[%s18230_s11 + $0x3ac0] sm:$0xff] }
 0xe79   : > { %v17527_v19 = vcombine.low %v2138_v49, %v2142_v55  ;;  %v2298_v46 = vld [vmem:[%s18230_s11 + $0x3fc0] sm:$0xff] }
 0xe7d   : > { %15079 = vmatpush1.bf16.xpose.msra.mxu0 %v17479_v62  ;;  %v17647_v62 = vcombine.low %v2258_v3, %v2262_v51  ;;  %v2302_v3 = vld [vmem:[%s18230_s11 + $0x3fe0] sm:$0xff] }
 0xe7e   : > { %15080 = vmatprep.subr.bf16.mxu0 %v17488_v35  ;;  %v17656_v35 = vcombine.high %v2266_v63, %v2270_v0 }
 0xe7f   : > { %15243 = vmatpush1.bf16.xpose.msra.mxu1 %v17607_v1  ;;  %v17528_v1 = vcombine.high %v2138_v49, %v2142_v55  ;;  %v2055_v49 = vld [vmem:[%s18230_s11 + $0x3828] sm:$0xff] }
 0xe80   : > { %15244 = vmatprep.subr.bf16.mxu1 %v17616_v28  ;;  %v2146_v28 = vld [vmem:[%s18230_s11 + $0x3b00] sm:$0xff]  ;;  %v2179_v55 = vld [vmem:[%s18230_s11 + $0x3c08] sm:$0xff] }
 0xe81   : > { %v17535_v25 = vcombine.low %v2146_v28, %v2150_v14 }
 0xe85   : > { %15081 = vmatpush1.bf16.xpose.msra.mxu0 %v17487_v5  ;;  %v17655_v5 = vcombine.low %v2266_v63, %v2270_v0  ;;  %v2183_v63 = vld [vmem:[%s18230_s11 + $0x3c28] sm:$0xff] }
 0xe86   : > { %15082 = vmatprep.subr.bf16.mxu0 %v17496_v15  ;;  %v17664_v15 = vcombine.high %v2274_v11, %v2278_v12 }
 0xe87   : > { %15245 = vmatpush1.bf16.xpose.msra.mxu1 %v17615_v8  ;;  %v17536_v8 = vcombine.high %v2146_v28, %v2150_v14  ;;  %v2063_v28 = vld [vmem:[%s18230_s11 + $0x3868] sm:$0xff] }
 0xe88   : > { %15246 = vmatprep.subr.bf16.mxu1 %v17624_v18  ;;  %v2154_v18 = vld [vmem:[%s18230_s11 + $0x3b40] sm:$0xff]  ;;  %v2187_v14 = vld [vmem:[%s18230_s11 + $0x3c48] sm:$0xff] }
 0xe89   : > { %v17543_v43 = vcombine.low %v2154_v18, %v2158_v22 }
 0xe8d   : > { %15083 = vmatpush1.bf16.xpose.msra.mxu0 %v17495_v26  ;;  %v17663_v26 = vcombine.low %v2274_v11, %v2278_v12  ;;  %v2191_v11 = vld [vmem:[%s18230_s11 + $0x3c68] sm:$0xff] }
 0xe8e   : > { %15084 = vmatprep.subr.bf16.mxu0 %v17504_v30  ;;  %v17672_v30 = vcombine.high %v2282_v24, %v2286_v40 }
 0xe8f   : > { %15247 = vmatpush1.bf16.xpose.msra.mxu1 %v17623_v29  ;;  %v17544_v29 = vcombine.high %v2154_v18, %v2158_v22  ;;  %v2071_v18 = vld [vmem:[%s18230_s11 + $0x38a8] sm:$0xff] }
 0xe90   : > { %15248 = vmatprep.subr.bf16.mxu1 %v17632_v39  ;;  %v2162_v39 = vld [vmem:[%s18230_s11 + $0x3b80] sm:$0xff]  ;;  %v2195_v22 = vld [vmem:[%s18230_s11 + $0x3c88] sm:$0xff] }
 0xe91   : > { %v17551_v51 = vcombine.low %v2162_v39, %v2166_v47 }
 0xe95   : > { %15085 = vmatpush1.bf16.xpose.msra.mxu0 %v17503_v44  ;;  %v17671_v44 = vcombine.low %v2282_v24, %v2286_v40  ;;  %v2199_v24 = vld [vmem:[%s18230_s11 + $0x3ca8] sm:$0xff] }
 0xe96   : > { %15086 = vmatprep.subr.bf16.mxu0 %v17512_v38  ;;  %v17680_v38 = vcombine.high %v2290_v32, %v2294_v33 }
 0xe97   : > { %15249 = vmatpush1.bf16.xpose.msra.mxu1 %v17631_v37  ;;  %v17552_v37 = vcombine.high %v2162_v39, %v2166_v47  ;;  %v2203_v39 = vld [vmem:[%s18230_s11 + $0x3cc8] sm:$0xff] }
 0xe98   : > { %15250 = vmatprep.subr.bf16.mxu1 %v17640_v45  ;;  %v2170_v45 = vld [vmem:[%s18230_s11 + $0x3bc0] sm:$0xff]  ;;  %v2207_v47 = vld [vmem:[%s18230_s11 + $0x3ce8] sm:$0xff] }
 0xe99   : > { %v17559_v0 = vcombine.low %v2170_v45, %v2174_v36 }
 0xe9d   : > { %15087 = vmatpush1.bf16.xpose.msra.mxu0 %v17511_v53  ;;  %v17679_v53 = vcombine.low %v2290_v32, %v2294_v33  ;;  %v17585_v33 = vcombine.low %v2195_v22, %v2199_v24 }
 0xe9e   : > { %15088 = vmatprep.subr.bf16.mxu0 %v17520_v60  ;;  %v17688_v60 = vcombine.high %v2298_v46, %v2302_v3 }
 0xe9f   : > { %15251 = vmatpush1.bf16.xpose.msra.mxu1 %v17639_v54  ;;  %v17560_v54 = vcombine.high %v2170_v45, %v2174_v36  ;;  %v2215_v45 = vld [vmem:[%s18230_s11 + $0x3d28] sm:$0xff] }
 0xea0   : > { %15252 = vmatprep.subr.bf16.mxu1 %v17648_v48  ;;  %v2051_v48 = vld [vmem:[%s18230_s11 + $0x3808] sm:$0xff] }
 0xea1   : > { %v17441_v12 = vcombine.low %v2051_v48, %v2055_v49 }
 0xea5   : > { %15089 = vmatpush1.bf16.xpose.msra.mxu0 %v17519_v58  ;;  %v17687_v58 = vcombine.low %v2298_v46, %v2302_v3  ;;  %v17593_v46 = vcombine.low %v2203_v39, %v2207_v47 }
 0xea6   : > { %15090 = vmatprep.subr.bf16.mxu0 %v17528_v1  ;;  %v17570_v1 = vcombine.high %v2179_v55, %v2183_v63 }
 0xea7   : > { %15253 = vmatpush1.bf16.xpose.msra.mxu1 %v17647_v62  ;;  %v17442_v62 = vcombine.high %v2051_v48, %v2055_v49  ;;  %v2223_v48 = vld [vmem:[%s18230_s11 + $0x3d68] sm:$0xff] }
 0xea8   : > { %15254 = vmatprep.subr.bf16.mxu1 %v17656_v35  ;;  %v2059_v35 = vld [vmem:[%s18230_s11 + $0x3848] sm:$0xff] }
 0xea9   : > { %v17449_v40 = vcombine.low %v2059_v35, %v2063_v28 }
 0xead   : > { %15091 = vmatpush1.bf16.xpose.msra.mxu0 %v17527_v19  ;;  %v17569_v19 = vcombine.low %v2179_v55, %v2183_v63 }
 0xeae   : > { %15092 = vmatprep.subr.bf16.mxu0 %v17536_v8  ;;  %v17578_v8 = vcombine.high %v2187_v14, %v2191_v11 }
 0xeaf   : > { %15255 = vmatpush1.bf16.xpose.msra.mxu1 %v17655_v5  ;;  %v17450_v5 = vcombine.high %v2059_v35, %v2063_v28  ;;  %v2231_v35 = vld [vmem:[%s18230_s11 + $0x3da8] sm:$0xff] }
 0xeb0   : > { %15256 = vmatprep.subr.bf16.mxu1 %v17664_v15  ;;  %v2067_v15 = vld [vmem:[%s18230_s11 + $0x3888] sm:$0xff] }
 0xeb1   : > { %v17457_v32 = vcombine.low %v2067_v15, %v2071_v18 }
 0xeb5   : > { %15093 = vmatpush1.bf16.xpose.msra.mxu0 %v17535_v25  ;;  %v17577_v25 = vcombine.low %v2187_v14, %v2191_v11 }
 0xeb6   : > { %15094 = vmatprep.subr.bf16.mxu0 %v17544_v29  ;;  %v17586_v29 = vcombine.high %v2195_v22, %v2199_v24 }
 0xeb7   : > { %15257 = vmatpush1.bf16.xpose.msra.mxu1 %v17663_v26  ;;  %v17458_v26 = vcombine.high %v2067_v15, %v2071_v18  ;;  %v2239_v15 = vld [vmem:[%s18230_s11 + $0x3de8] sm:$0xff] }
 0xeb8   : > { %15258 = vmatprep.subr.bf16.mxu1 %v17672_v30  ;;  %v2079_v30 = vld [vmem:[%s18230_s11 + $0x38e8] sm:$0xff] }
 0xebd   : > { %15095 = vmatpush1.bf16.xpose.msra.mxu0 %v17543_v43 }
 0xebe   : > { %15096 = vmatprep.subr.bf16.mxu0 %v17552_v37  ;;  %v2087_v37 = vld [vmem:[%s18230_s11 + $0x3928] sm:$0xff] }
 0xebf   : > { %15259 = vmatpush1.bf16.xpose.msra.mxu1 %v17671_v44  ;;  %v2083_v44 = vld [vmem:[%s18230_s11 + $0x3908] sm:$0xff] }
 0xec0   : > { %15260 = vmatprep.subr.bf16.mxu1 %v17680_v38  ;;  %v2211_v38 = vld [vmem:[%s18230_s11 + $0x3d08] sm:$0xff]  ;;  %v17474_v3 = vcombine.high %v2083_v44, %v2087_v37  ;;  %v17473_v49 = vcombine.low %v2083_v44, %v2087_v37 }
 0xec1   : > { %v17601_v55 = vcombine.low %v2211_v38, %v2215_v45  ;;  %v2255_v44 = vld [vmem:[%s18230_s11 + $0x3e68] sm:$0xff] }
 0xec5   : > { %15097 = vmatpush1.bf16.xpose.msra.mxu0 %v17551_v51  ;;  %v17602_v51 = vcombine.high %v2211_v38, %v2215_v45 }
 0xec6   : > { %15098 = vmatprep.subr.bf16.mxu0 %v17560_v54  ;;  %v2095_v54 = vld [vmem:[%s18230_s11 + $0x3968] sm:$0xff] }
 0xec7   : > { %15261 = vmatpush1.bf16.xpose.msra.mxu1 %v17679_v53  ;;  %v2091_v53 = vld [vmem:[%s18230_s11 + $0x3948] sm:$0xff] }
 0xec8   : > { %15262 = vmatprep.subr.bf16.mxu1 %v17688_v60  ;;  %v2219_v60 = vld [vmem:[%s18230_s11 + $0x3d48] sm:$0xff]  ;;  %v17482_v63 = vcombine.high %v2091_v53, %v2095_v54  ;;  %v17481_v28 = vcombine.low %v2091_v53, %v2095_v54 }
 0xec9   : > { %v17609_v14 = vcombine.low %v2219_v60, %v2223_v48  ;;  %v2263_v53 = vld [vmem:[%s18230_s11 + $0x3ea8] sm:$0xff] }
 0xecd   : > { %15099 = vmatpush1.bf16.xpose.msra.mxu0 %v17559_v0  ;;  %v17610_v0 = vcombine.high %v2219_v60, %v2223_v48 }
 0xece   : > { %15109 = vmatprep.subr.bf16.mxu0 %v17442_v62  ;;  %v2103_v62 = vld [vmem:[%s18230_s11 + $0x39a8] sm:$0xff] }
 0xecf   : > { %15263 = vmatpush1.bf16.xpose.msra.mxu1 %v17687_v58  ;;  %v2099_v58 = vld [vmem:[%s18230_s11 + $0x3988] sm:$0xff] }
 0xed0   : > { %15273 = vmatprep.subr.bf16.mxu1 %v17570_v1  ;;  %v2227_v1 = vld [vmem:[%s18230_s11 + $0x3d88] sm:$0xff]  ;;  %v17490_v11 = vcombine.high %v2099_v58, %v2103_v62  ;;  %v17489_v18 = vcombine.low %v2099_v58, %v2103_v62 }
 0xed1   : > { %v17617_v22 = vcombine.low %v2227_v1, %v2231_v35  ;;  %v2271_v58 = vld [vmem:[%s18230_s11 + $0x3ee8] sm:$0xff] }
 0xed4   : > { %15101 = vmatmul.mubr.bf16.vlgmr.msra.gmra.mrb[28].mxu0 %v18335_v23 }
 0xed5   : > { %15110 = vmatpush1.bf16.xpose.msra.mxu0 %v17441_v12  ;;  %15141 = vmatprep.mubr.bf16.mxu0 %v18341_v31  ;;  %v17618_v12 = vcombine.high %v2227_v1, %v2231_v35  ;;  %v20473_v1 = vld [vmem:[%s18236_s6 + $0x18] sm:$0xff] }
 0xed6   : > { %15265 = vmatmul.mubr.bf16.vlgmr.msra.gmra.mrb[28].mxu1 %v18335_v23  ;;  %15111 = vmatprep.subr.bf16.mxu0 %v17450_v5  ;;  %v2075_v23 = vld [vmem:[%s18230_s11 + $0x38c8] sm:$0xff] }
 0xed7   : > { %15274 = vmatpush1.bf16.xpose.msra.mxu1 %v17569_v19  ;;  %15305 = vmatprep.mubr.bf16.mxu1 %v18341_v31  ;;  %v17466_v43 = vcombine.high %v2075_v23, %v2079_v30  ;;  %v17594_v31 = vcombine.high %v2203_v39, %v2207_v47  ;;  %v17465_v36 = vcombine.low %v2075_v23, %v2079_v30  ;;  %v2107_v19 = vld [vmem:[%s18230_s11 + $0x39c8] sm:$0xff] }
 0xed8   : > { %15275 = vmatprep.subr.bf16.mxu1 %v17578_v8  ;;  %v2111_v5 = vld [vmem:[%s18230_s11 + $0x39e8] sm:$0xff] }
 0xed9   : > { %v2235_v8 = vld [vmem:[%s18230_s11 + $0x3dc8] sm:$0xff]  ;;  %v17498_v24 = vcombine.high %v2107_v19, %v2111_v5  ;;  %v17497_v30 = vcombine.low %v2107_v19, %v2111_v5  ;;  %v12715_v19 = vrot.slane %v20473_v1, %v18693_v7  ;;  %v12723_v5 = vrot.slane %v20473_v1, %v18696_v9 }
 0xeda   : > { %v2247_v23 = vld [vmem:[%s18230_s11 + $0x3e28] sm:$0xff]  ;;  %v17625_v39 = vcombine.low %v2235_v8, %v2239_v15 }
 0xedd   : > { %15112 = vmatpush1.bf16.xpose.msra.mxu0 %v17449_v40  ;;  %v17626_v40 = vcombine.high %v2235_v8, %v2239_v15  ;;  %v2147_v15 = vld [vmem:[%s18230_s11 + $0x3b08] sm:$0xff] }
 0xede   : > { %15113 = vmatprep.subr.bf16.mxu0 %v17458_v26  ;;  %v2119_v26 = vld [vmem:[%s18230_s11 + $0x3a28] sm:$0xff] }
 0xedf   : > { %15276 = vmatpush1.bf16.xpose.msra.mxu1 %v17577_v25  ;;  %v2115_v25 = vld [vmem:[%s18230_s11 + $0x3a08] sm:$0xff] }
 0xee0   : > { %15277 = vmatprep.subr.bf16.mxu1 %v17586_v29  ;;  %v2243_v29 = vld [vmem:[%s18230_s11 + $0x3e08] sm:$0xff]  ;;  %v17506_v47 = vcombine.high %v2115_v25, %v2119_v26  ;;  %v17505_v37 = vcombine.low %v2115_v25, %v2119_v26 }
 0xee1   : > { %v17633_v38 = vcombine.low %v2243_v29, %v2247_v23  ;;  %v2279_v25 = vld [vmem:[%s18230_s11 + $0x3f28] sm:$0xff] }
 0xee5   : > { %15114 = vmatpush1.bf16.xpose.msra.mxu0 %v17457_v32  ;;  %v17634_v32 = vcombine.high %v2243_v29, %v2247_v23 }
 0xee6   : > { %15115 = vmatprep.subr.bf16.mxu0 %v17466_v43  ;;  %v2127_v43 = vld [vmem:[%s18230_s11 + $0x3a68] sm:$0xff] }
 0xee7   : > { %15278 = vmatpush1.bf16.xpose.msra.mxu1 %v17585_v33  ;;  %v2123_v33 = vld [vmem:[%s18230_s11 + $0x3a48] sm:$0xff] }
 0xee8   : > { %15279 = vmatprep.subr.bf16.mxu1 %v17594_v31  ;;  %v2251_v31 = vld [vmem:[%s18230_s11 + $0x3e48] sm:$0xff]  ;;  %v17514_v45 = vcombine.high %v2123_v33, %v2127_v43  ;;  %v17513_v54 = vcombine.low %v2123_v33, %v2127_v43 }
 0xee9   : > { %v17641_v60 = vcombine.low %v2251_v31, %v2255_v44 }
 0xeed   : > { %15116 = vmatpush1.bf16.xpose.msra.mxu0 %v17465_v36  ;;  %v17642_v36 = vcombine.high %v2251_v31, %v2255_v44 }
 0xeee   : > { %15117 = vmatprep.subr.bf16.mxu0 %v17474_v3  ;;  %v2135_v3 = vld [vmem:[%s18230_s11 + $0x3aa8] sm:$0xff] }
 0xeef   : > { %15280 = vmatpush1.bf16.xpose.msra.mxu1 %v17593_v46  ;;  %v2131_v46 = vld [vmem:[%s18230_s11 + $0x3a88] sm:$0xff] }
 0xef0   : > { %15281 = vmatprep.subr.bf16.mxu1 %v17602_v51  ;;  %v2259_v51 = vld [vmem:[%s18230_s11 + $0x3e88] sm:$0xff]  ;;  %v17522_v48 = vcombine.high %v2131_v46, %v2135_v3  ;;  %v17521_v62 = vcombine.low %v2131_v46, %v2135_v3 }
 0xef1   : > { %v17649_v35 = vcombine.low %v2259_v51, %v2263_v53 }
 0xef5   : > { %15118 = vmatpush1.bf16.xpose.msra.mxu0 %v17473_v49  ;;  %v17650_v49 = vcombine.high %v2259_v51, %v2263_v53  ;;  %v2283_v51 = vld [vmem:[%s18230_s11 + $0x3f48] sm:$0xff] }
 0xef6   : > { %15119 = vmatprep.subr.bf16.mxu0 %v17482_v63  ;;  %v2143_v63 = vld [vmem:[%s18230_s11 + $0x3ae8] sm:$0xff] }
 0xef7   : > { %15282 = vmatpush1.bf16.xpose.msra.mxu1 %v17601_v55  ;;  %v2139_v55 = vld [vmem:[%s18230_s11 + $0x3ac8] sm:$0xff] }
 0xef8   : > { %15283 = vmatprep.subr.bf16.mxu1 %v17610_v0  ;;  %v2267_v0 = vld [vmem:[%s18230_s11 + $0x3ec8] sm:$0xff] }
 0xef9   : > { %v2287_v53 = vld [vmem:[%s18230_s11 + $0x3f68] sm:$0xff] }
 0xefd   : > { %15120 = vmatpush1.bf16.xpose.msra.mxu0 %v17481_v28  ;;  %v17530_v28 = vcombine.high %v2139_v55, %v2143_v63 }
 0xefe   : > { %15121 = vmatprep.subr.bf16.mxu0 %v17490_v11  ;;  %v12711_v11 = vrot.slane %v20473_v1, %v18684_v2  ;;  %v2275_v2 = vld [vmem:[%s18230_s11 + $0x3f08] sm:$0xff] }
 0xeff   : > { %15284 = vmatpush1.bf16.xpose.msra.mxu1 %v17609_v14  ;;  %v17658_v14 = vcombine.high %v2267_v0, %v2271_v58 }
 0xf00   : > { %15285 = vmatprep.subr.bf16.mxu1 %v17618_v12  ;;  %v12719_v12 = vrot.slane %v20473_v1, %v18690_v6 }
 0xf05   : > { %15122 = vmatpush1.bf16.xpose.msra.mxu0 %v17489_v18  ;;  %v2151_v18 = vld [vmem:[%s18230_s11 + $0x3b28] sm:$0xff] }
 0xf06   : > { %15123 = vmatprep.subr.bf16.mxu0 %v17498_v24  ;;  %v17538_v33 = vcombine.high %v2147_v15, %v2151_v18 }
 0xf07   : > { %15286 = vmatpush1.bf16.xpose.msra.mxu1 %v17617_v22 }
 0xf08   : > { %15287 = vmatprep.subr.bf16.mxu1 %v17626_v40 }
 0xf0d   : > { %15124 = vmatpush1.bf16.xpose.msra.mxu0 %v17497_v30  ;;  %v17529_v30 = vcombine.low %v2139_v55, %v2143_v63  ;;  %v17674_v55 = vcombine.high %v2283_v51, %v2287_v53  ;;  %v2163_v63 = vld [vmem:[%s18230_s11 + $0x3b88] sm:$0xff] }
 0xf0e   : > { %15125 = vmatprep.subr.bf16.mxu0 %v17506_v47 }
 0xf0f   : > { %15288 = vmatpush1.bf16.xpose.msra.mxu1 %v17625_v39 }
 0xf10   : > { %15289 = vmatprep.subr.bf16.mxu1 %v17634_v32  ;;  %v17657_v32 = vcombine.low %v2267_v0, %v2271_v58  ;;  %v2167_v0 = vld [vmem:[%s18230_s11 + $0x3ba8] sm:$0xff] }
 0xf11   : > { %v2291_v58 = vld [vmem:[%s18230_s11 + $0x3f88] sm:$0xff] }
 0xf15   : > { %15126 = vmatpush1.bf16.xpose.msra.mxu0 %v17505_v37  ;;  %v17666_v37 = vcombine.high %v2275_v2, %v2279_v25 }
 0xf16   : > { %15127 = vmatprep.subr.bf16.mxu0 %v17514_v45 }
 0xf17   : > { %15290 = vmatpush1.bf16.xpose.msra.mxu1 %v17633_v38 }
 0xf18   : > { %15291 = vmatprep.subr.bf16.mxu1 %v17642_v36 }
 0xf1d   : > { %15128 = vmatpush1.bf16.xpose.msra.mxu0 %v17513_v54 }
 0xf1e   : > { %15129 = vmatprep.subr.bf16.mxu0 %v17522_v48  ;;  %v17665_v48 = vcombine.low %v2275_v2, %v2279_v25  ;;  %v2056_v2 = vld [vmem:[%s18230_s11 + $0x3830] sm:$0xff] }
 0xf1f   : > { %15292 = vmatpush1.bf16.xpose.msra.mxu1 %v17641_v60  ;;  %v17537_v60 = vcombine.low %v2147_v15, %v2151_v18  ;;  %v17553_v15 = vcombine.low %v2163_v63, %v2167_v0  ;;  %v2180_v25 = vld [vmem:[%s18230_s11 + $0x3c10] sm:$0xff] }
 0xf20   : > { %15293 = vmatprep.subr.bf16.mxu1 %v17650_v49 }
 0xf25   : > { %15130 = vmatpush1.bf16.xpose.msra.mxu0 %v17521_v62  ;;  %v2295_v62 = vld [vmem:[%s18230_s11 + $0x3fa8] sm:$0xff] }
 0xf26   : > { %15131 = vmatprep.subr.bf16.mxu0 %v17530_v28  ;;  %v17673_v28 = vcombine.low %v2283_v51, %v2287_v53  ;;  %v17681_v18 = vcombine.low %v2291_v58, %v2295_v62  ;;  %v2208_v51 = vld [vmem:[%s18230_s11 + $0x3cf0] sm:$0xff] }
 0xf27   : > { %15294 = vmatpush1.bf16.xpose.msra.mxu1 %v17649_v35  ;;  %v14897_v8 = vpop.f32.mrb[24].mxu0 }
 0xf28   : > { %15295 = vmatprep.subr.bf16.mxu1 %v17658_v14  ;;  %v17724_v22 = vadd.f32 %v14897_v8, %v12711_v11  ;;  %v14899_v40 = vpop.f32.mrb[25].mxu0  ;;  %v17554_v14 = vcombine.high %v2163_v63, %v2167_v0  ;;  %v17682_v11 = vcombine.high %v2291_v58, %v2295_v62  ;;  %v2303_v8 = vld [vmem:[%s18230_s11 + $0x3fe8] sm:$0xff]  ;;  %v2216_v63 = vld [vmem:[%s18230_s11 + $0x3d30] sm:$0xff] }
 0xf29   : > { %v15061_v24 = vpop.f32.mrb[24].mxu1  ;;  %v17725_v29 = vadd.f32 %v14899_v40, %v12715_v19  ;;  %v14901_v23 = vpop.f32.mrb[26].mxu0  ;;  %v2175_v19 = vld [vmem:[%s18230_s11 + $0x3be8] sm:$0xff]  ;;  %v2052_v40 = vld [vmem:[%s18230_s11 + $0x3810] sm:$0xff] }
 0xf2a   : > { %v17726_v26 = vadd.f32 %v15061_v24, %v12719_v12  ;;  %v15063_v6 = vpop.f32.mrb[25].mxu1  ;;  %v15519_v7 = vmul.f32 %v17724_v22, %v18705_v17  ;;  %v14902_v9 = vpop.f32.mrb[27].mxu0  ;;  %v2171_v12 = vld [vmem:[%s18230_s11 + $0x3bc8] sm:$0xff]  ;;  %v17444_v23 = vcombine.high %v2052_v40, %v2056_v2 }
 0xf2b   : > { %v17727_v39 = vadd.f32 %v15063_v6, %v12723_v5  ;;  %v15065_v47 = vpop.f32.mrb[26].mxu1  ;;  %v15520_v31 = vmul.f32 %v17725_v29, %v18712_v21  ;;  %v2159_v21 = vld [vmem:[%s18230_s11 + $0x3b68] sm:$0xff]  ;;  %v17562_v22 = vcombine.high %v2171_v12, %v2175_v19  ;;  %v17561_v29 = vcombine.low %v2171_v12, %v2175_v19  ;;  %v2192_v9 = vld [vmem:[%s18230_s11 + $0x3c70] sm:$0xff] }
 0xf2c   : > { %v15521_v43 = vmul.f32 %v17726_v26, %v18709_v20  ;;  %v15066_v44 = vpop.f32.mrb[27].mxu1  ;;  %v15527_v38 = vsel %vm15447_vm0, %v15519_v7, 0.0  ;;  %v2155_v20 = vld [vmem:[%s18230_s11 + $0x3b48] sm:$0xff]  ;;  %v2184_v26 = vld [vmem:[%s18230_s11 + $0x3c30] sm:$0xff] }
 0xf2d   : > { %v15528_v45 = vsel %vm15447_vm0, %v15520_v31, 0.0  ;;  %v15522_v17 = vmul.f32 %v17727_v39, %v18719_v34  ;;  %15132 = vmatpush1.bf16.xpose.msra.mxu0 %v17529_v30  ;;  %v17546_v49 = vcombine.high %v2155_v20, %v2159_v21  ;;  %v17545_v35 = vcombine.low %v2155_v20, %v2159_v21  ;;  %v2299_v5 = vld [vmem:[%s18230_s11 + $0x3fc8] sm:$0xff]  ;;  %v2060_v7 = vld [vmem:[%s18230_s11 + $0x3850] sm:$0xff] }
 0xf2e   : > { %v15529_v36 = vadd.f32 %v15528_v45, %v15527_v38  ;;  %15133 = vmatprep.subr.bf16.mxu0 %v17538_v33  ;;  %v15530_v46 = vsel %vm15447_vm0, %v15521_v43, 0.0  ;;  %v17690_v24 = vcombine.high %v2299_v5, %v2303_v8  ;;  %v17689_v6 = vcombine.low %v2299_v5, %v2303_v8  ;;  %v2064_v39 = vld [vmem:[%s18230_s11 + $0x3870] sm:$0xff] }
 0xf2f   : > { %15296 = vmatpush1.bf16.xpose.msra.mxu1 %v17657_v32  ;;  %v15532_v54 = vsel %vm15447_vm0, %v15522_v17, 0.0  ;;  %v17572_v30 = vcombine.high %v2180_v25, %v2184_v26  ;;  %v2188_v47 = vld [vmem:[%s18230_s11 + $0x3c50] sm:$0xff]  ;;  %v17443_v32 = vcombine.low %v2052_v40, %v2056_v2  ;;  %v17571_v33 = vcombine.low %v2180_v25, %v2184_v26 }
 0xf30   : > { %15297 = vmatprep.subr.bf16.mxu1 %v17666_v37  ;;  %v15531_v3 = vadd.f32 %v15530_v46, %v15529_v36  ;;  %v17452_v43 = vcombine.high %v2060_v7, %v2064_v39  ;;  %v17580_v31 = vcombine.high %v2188_v47, %v2192_v9  ;;  %v2068_v44 = vld [vmem:[%s18230_s11 + $0x3890] sm:$0xff]  ;;  %v17451_v17 = vcombine.low %v2060_v7, %v2064_v39 }
 0xf31   : > { %v2072_v37 = vld [vmem:[%s18230_s11 + $0x38b0] sm:$0xff]  ;;  %v17579_v36 = vcombine.low %v2188_v47, %v2192_v9 }
 0xf32   : > { %v20499_v34 = vadd.f32 %v15532_v54, %v15531_v3  ;;  %v2196_v38 = vld [vmem:[%s18230_s11 + $0x3c90] sm:$0xff]  ;;  %v17460_v46 = vcombine.high %v2068_v44, %v2072_v37  ;;  %v17459_v53 = vcombine.low %v2068_v44, %v2072_v37 }
 0xf33   : > { %v2200_v45 = vld [vmem:[%s18230_s11 + $0x3cb0] sm:$0xff] }
 0xf34   : > { %v17588_v20 = vcombine.high %v2196_v38, %v2200_v45  ;;  %v2080_v21 = vld [vmem:[%s18230_s11 + $0x38f0] sm:$0xff]  ;;  %v17587_v54 = vcombine.low %v2196_v38, %v2200_v45 }
 0xf35   : > { %15134 = vmatpush1.bf16.xpose.msra.mxu0 %v17537_v60  ;;  %v2204_v3 = vld [vmem:[%s18230_s11 + $0x3cd0] sm:$0xff] }
 0xf36   : > { %15135 = vmatprep.subr.bf16.mxu0 %v17546_v49  ;;  %v2088_v49 = vld [vmem:[%s18230_s11 + $0x3930] sm:$0xff]  ;;  %v17595_v58 = vcombine.low %v2204_v3, %v2208_v51 }
 0xf37   : > { %15298 = vmatpush1.bf16.xpose.msra.mxu1 %v17665_v48  ;;  %v2084_v48 = vld [vmem:[%s18230_s11 + $0x3910] sm:$0xff] }
 0xf38   : > { %15299 = vmatprep.subr.bf16.mxu1 %v17674_v55  ;;  %v2212_v55 = vld [vmem:[%s18230_s11 + $0x3d10] sm:$0xff]  ;;  %v17476_v62 = vcombine.high %v2084_v48, %v2088_v49  ;;  %v17475_v19 = vcombine.low %v2084_v48, %v2088_v49 }
 0xf39   : > { %v2224_v12 = vld [vmem:[%s18230_s11 + $0x3d70] sm:$0xff]  ;;  %v17603_v5 = vcombine.low %v2212_v55, %v2216_v63 }
 0xf3a   : > { %v2232_v40 = vld [vmem:[%s18230_s11 + $0x3db0] sm:$0xff] }
 0xf3b   : > { %v2240_v7 = vld [vmem:[%s18230_s11 + $0x3df0] sm:$0xff] }
 0xf3c   : > { %v2248_v44 = vld [vmem:[%s18230_s11 + $0x3e30] sm:$0xff] }
 0xf3d   : > { %15136 = vmatpush1.bf16.xpose.msra.mxu0 %v17545_v35  ;;  %v17604_v35 = vcombine.high %v2212_v55, %v2216_v63  ;;  %v2264_v48 = vld [vmem:[%s18230_s11 + $0x3eb0] sm:$0xff] }
 0xf3e   : > { %15137 = vmatprep.subr.bf16.mxu0 %v17554_v14  ;;  %v2096_v14 = vld [vmem:[%s18230_s11 + $0x3970] sm:$0xff] }
 0xf3f   : > { %15300 = vmatpush1.bf16.xpose.msra.mxu1 %v17673_v28  ;;  %v2092_v28 = vld [vmem:[%s18230_s11 + $0x3950] sm:$0xff] }
 0xf40   : > { %15301 = vmatprep.subr.bf16.mxu1 %v17682_v11  ;;  %v2220_v11 = vld [vmem:[%s18230_s11 + $0x3d50] sm:$0xff]  ;;  %v17484_v8 = vcombine.high %v2092_v28, %v2096_v14  ;;  %v17483_v2 = vcombine.low %v2092_v28, %v2096_v14 }
 0xf41   : > { %v17611_v25 = vcombine.low %v2220_v11, %v2224_v12  ;;  %v2272_v28 = vld [vmem:[%s18230_s11 + $0x3ef0] sm:$0xff] }
 0xf45   : > { %15138 = vmatpush1.bf16.xpose.msra.mxu0 %v17553_v15  ;;  %v17612_v15 = vcombine.high %v2220_v11, %v2224_v12 }
 0xf46   : > { %15139 = vmatprep.subr.bf16.mxu0 %v17562_v22  ;;  %v2104_v22 = vld [vmem:[%s18230_s11 + $0x39b0] sm:$0xff] }
 0xf47   : > { %15302 = vmatpush1.bf16.xpose.msra.mxu1 %v17681_v18  ;;  %v2100_v18 = vld [vmem:[%s18230_s11 + $0x3990] sm:$0xff] }
 0xf48   : > { %15303 = vmatprep.subr.bf16.mxu1 %v17690_v24  ;;  %v2228_v24 = vld [vmem:[%s18230_s11 + $0x3d90] sm:$0xff]  ;;  %v17492_v26 = vcombine.high %v2100_v18, %v2104_v22  ;;  %v17491_v39 = vcombine.low %v2100_v18, %v2104_v22 }
 0xf49   : > { %v17619_v47 = vcombine.low %v2228_v24, %v2232_v40  ;;  %v2280_v18 = vld [vmem:[%s18230_s11 + $0x3f30] sm:$0xff] }
 0xf4d   : > { %15140 = vmatpush1.bf16.xpose.msra.mxu0 %v17561_v29  ;;  %v17620_v29 = vcombine.high %v2228_v24, %v2232_v40 }
 0xf4e   : > { %15150 = vmatprep.subr.bf16.mxu0 %v17444_v23  ;;  %v2112_v23 = vld [vmem:[%s18230_s11 + $0x39f0] sm:$0xff] }
 0xf4f   : > { %15304 = vmatpush1.bf16.xpose.msra.mxu1 %v17689_v6  ;;  %v2108_v6 = vld [vmem:[%s18230_s11 + $0x39d0] sm:$0xff] }
 0xf50   : > { %15314 = vmatprep.subr.bf16.mxu1 %v17572_v30  ;;  %v2236_v30 = vld [vmem:[%s18230_s11 + $0x3dd0] sm:$0xff]  ;;  %v17500_v9 = vcombine.high %v2108_v6, %v2112_v23  ;;  %v17499_v37 = vcombine.low %v2108_v6, %v2112_v23 }
 0xf51   : > { %v17627_v38 = vcombine.low %v2236_v30, %v2240_v7  ;;  %v2288_v6 = vld [vmem:[%s18230_s11 + $0x3f70] sm:$0xff] }
 0xf54   : > { %15142 = vmatmul.mubr.bf16.vlgmr.msra.gmra.mrb[28].mxu0 %v18416_v42 }
 0xf55   : > { %15151 = vmatpush1.bf16.xpose.msra.mxu0 %v17443_v32  ;;  %15182 = vmatprep.mubr.bf16.mxu0 %v18423_v50  ;;  %v17628_v32 = vcombine.high %v2236_v30, %v2240_v7 }
 0xf56   : > { %15306 = vmatmul.mubr.bf16.vlgmr.msra.gmra.mrb[28].mxu1 %v18416_v42  ;;  %15152 = vmatprep.subr.bf16.mxu0 %v17452_v43  ;;  %v2076_v42 = vld [vmem:[%s18230_s11 + $0x38d0] sm:$0xff] }
 0xf57   : > { %15315 = vmatpush1.bf16.xpose.msra.mxu1 %v17571_v33  ;;  %15346 = vmatprep.mubr.bf16.mxu1 %v18423_v50  ;;  %v17468_v60 = vcombine.high %v2076_v42, %v2080_v21  ;;  %v17596_v50 = vcombine.high %v2204_v3, %v2208_v51  ;;  %v17467_v0 = vcombine.low %v2076_v42, %v2080_v21  ;;  %v2116_v33 = vld [vmem:[%s18230_s11 + $0x3a10] sm:$0xff] }
 0xf58   : > { %15316 = vmatprep.subr.bf16.mxu1 %v17580_v31  ;;  %v2120_v43 = vld [vmem:[%s18230_s11 + $0x3a30] sm:$0xff] }
 0xf59   : > { %v2244_v31 = vld [vmem:[%s18230_s11 + $0x3e10] sm:$0xff]  ;;  %v17508_v45 = vcombine.high %v2116_v33, %v2120_v43  ;;  %v17507_v21 = vcombine.low %v2116_v33, %v2120_v43 }
 0xf5a   : > { %v2256_v42 = vld [vmem:[%s18230_s11 + $0x3e70] sm:$0xff]  ;;  %v17635_v3 = vcombine.low %v2244_v31, %v2248_v44 }
 0xf5b   : > { %v2296_v33 = vld [vmem:[%s18230_s11 + $0x3fb0] sm:$0xff] }
 0xf5d   : > { %15153 = vmatpush1.bf16.xpose.msra.mxu0 %v17451_v17  ;;  %v17636_v17 = vcombine.high %v2244_v31, %v2248_v44 }
 0xf5e   : > { %15154 = vmatprep.subr.bf16.mxu0 %v17460_v46  ;;  %v2128_v46 = vld [vmem:[%s18230_s11 + $0x3a70] sm:$0xff] }
 0xf5f   : > { %15317 = vmatpush1.bf16.xpose.msra.mxu1 %v17579_v36  ;;  %v2124_v36 = vld [vmem:[%s18230_s11 + $0x3a50] sm:$0xff] }
 0xf60   : > { %15318 = vmatprep.subr.bf16.mxu1 %v17588_v20  ;;  %v2252_v20 = vld [vmem:[%s18230_s11 + $0x3e50] sm:$0xff]  ;;  %v17516_v51 = vcombine.high %v2124_v36, %v2128_v46  ;;  %v17515_v49 = vcombine.low %v2124_v36, %v2128_v46 }
 0xf61   : > { %v17643_v55 = vcombine.low %v2252_v20, %v2256_v42  ;;  %v2304_v36 = vld [vmem:[%s18230_s11 + $0x3ff0] sm:$0xff] }
 0xf65   : > { %15155 = vmatpush1.bf16.xpose.msra.mxu0 %v17459_v53  ;;  %v17644_v53 = vcombine.high %v2252_v20, %v2256_v42 }
 0xf66   : > { %15156 = vmatprep.subr.bf16.mxu0 %v17468_v60  ;;  %v2136_v60 = vld [vmem:[%s18230_s11 + $0x3ab0] sm:$0xff] }
 0xf67   : > { %15319 = vmatpush1.bf16.xpose.msra.mxu1 %v17587_v54  ;;  %v2132_v54 = vld [vmem:[%s18230_s11 + $0x3a90] sm:$0xff] }
 0xf68   : > { %15320 = vmatprep.subr.bf16.mxu1 %v17596_v50  ;;  %v2260_v50 = vld [vmem:[%s18230_s11 + $0x3e90] sm:$0xff]  ;;  %v17524_v63 = vcombine.high %v2132_v54, %v2136_v60  ;;  %v17523_v14 = vcombine.low %v2132_v54, %v2136_v60  ;;  %v2185_v54 = vld [vmem:[%s18230_s11 + $0x3c38] sm:$0xff] }
 0xf69   : > { %v17651_v11 = vcombine.low %v2260_v50, %v2264_v48 }
 0xf6d   : > { %15157 = vmatpush1.bf16.xpose.msra.mxu0 %v17467_v0  ;;  %v17652_v0 = vcombine.high %v2260_v50, %v2264_v48 }
 0xf6e   : > { %15158 = vmatprep.subr.bf16.mxu0 %v17476_v62  ;;  %v2144_v62 = vld [vmem:[%s18230_s11 + $0x3af0] sm:$0xff] }
 0xf6f   : > { %15321 = vmatpush1.bf16.xpose.msra.mxu1 %v17595_v58  ;;  %v2140_v58 = vld [vmem:[%s18230_s11 + $0x3ad0] sm:$0xff] }
 0xf70   : > { %15322 = vmatprep.subr.bf16.mxu1 %v17604_v35  ;;  %v2268_v35 = vld [vmem:[%s18230_s11 + $0x3ed0] sm:$0xff]  ;;  %v17532_v12 = vcombine.high %v2140_v58, %v2144_v62  ;;  %v17531_v22 = vcombine.low %v2140_v58, %v2144_v62  ;;  %v2193_v58 = vld [vmem:[%s18230_s11 + $0x3c78] sm:$0xff] }
 0xf71   : > { %v17659_v24 = vcombine.low %v2268_v35, %v2272_v28 }
 0xf75   : > { %15159 = vmatpush1.bf16.xpose.msra.mxu0 %v17475_v19  ;;  %v17660_v19 = vcombine.high %v2268_v35, %v2272_v28 }
 0xf76   : > { %15160 = vmatprep.subr.bf16.mxu0 %v17484_v8  ;;  %v2152_v8 = vld [vmem:[%s18230_s11 + $0x3b30] sm:$0xff] }
 0xf77   : > { %15323 = vmatpush1.bf16.xpose.msra.mxu1 %v17603_v5  ;;  %v2148_v5 = vld [vmem:[%s18230_s11 + $0x3b10] sm:$0xff] }
 0xf78   : > { %15324 = vmatprep.subr.bf16.mxu1 %v17612_v15  ;;  %v2276_v15 = vld [vmem:[%s18230_s11 + $0x3f10] sm:$0xff]  ;;  %v17540_v40 = vcombine.high %v2148_v5, %v2152_v8  ;;  %v17539_v23 = vcombine.low %v2148_v5, %v2152_v8  ;;  %v2201_v5 = vld [vmem:[%s18230_s11 + $0x3cb8] sm:$0xff] }
 0xf79   : > { %v17667_v30 = vcombine.low %v2276_v15, %v2280_v18 }
 0xf7d   : > { %15161 = vmatpush1.bf16.xpose.msra.mxu0 %v17483_v2  ;;  %v17668_v2 = vcombine.high %v2276_v15, %v2280_v18 }
 0xf7e   : > { %15162 = vmatprep.subr.bf16.mxu0 %v17492_v26  ;;  %v2160_v26 = vld [vmem:[%s18230_s11 + $0x3b70] sm:$0xff] }
 0xf7f   : > { %15325 = vmatpush1.bf16.xpose.msra.mxu1 %v17611_v25  ;;  %v2156_v25 = vld [vmem:[%s18230_s11 + $0x3b50] sm:$0xff] }
 0xf80   : > { %15326 = vmatprep.subr.bf16.mxu1 %v17620_v29  ;;  %v2284_v29 = vld [vmem:[%s18230_s11 + $0x3f50] sm:$0xff]  ;;  %v17548_v7 = vcombine.high %v2156_v25, %v2160_v26  ;;  %v17547_v43 = vcombine.low %v2156_v25, %v2160_v26 }
 0xf81   : > { %v17675_v31 = vcombine.low %v2284_v29, %v2288_v6 }
 0xf85   : > { %15163 = vmatpush1.bf16.xpose.msra.mxu0 %v17491_v39  ;;  %v17676_v39 = vcombine.high %v2284_v29, %v2288_v6  ;;  %v2085_v6 = vld [vmem:[%s18230_s11 + $0x3918] sm:$0xff] }
 0xf86   : > { %15164 = vmatprep.subr.bf16.mxu0 %v17500_v9  ;;  %v2168_v9 = vld [vmem:[%s18230_s11 + $0x3bb0] sm:$0xff] }
 0xf87   : > { %15327 = vmatpush1.bf16.xpose.msra.mxu1 %v17619_v47  ;;  %v2164_v47 = vld [vmem:[%s18230_s11 + $0x3b90] sm:$0xff] }
 0xf88   : > { %15328 = vmatprep.subr.bf16.mxu1 %v17628_v32  ;;  %v2292_v32 = vld [vmem:[%s18230_s11 + $0x3f90] sm:$0xff]  ;;  %v17556_v44 = vcombine.high %v2164_v47, %v2168_v9  ;;  %v17555_v46 = vcombine.low %v2164_v47, %v2168_v9 }
 0xf89   : > { %v17683_v20 = vcombine.low %v2292_v32, %v2296_v33 }
 0xf8d   : > { %15165 = vmatpush1.bf16.xpose.msra.mxu0 %v17499_v37  ;;  %v17684_v37 = vcombine.high %v2292_v32, %v2296_v33  ;;  %v2093_v33 = vld [vmem:[%s18230_s11 + $0x3958] sm:$0xff] }
 0xf8e   : > { %15166 = vmatprep.subr.bf16.mxu0 %v17508_v45  ;;  %v2176_v45 = vld [vmem:[%s18230_s11 + $0x3bf0] sm:$0xff] }
 0xf8f   : > { %15329 = vmatpush1.bf16.xpose.msra.mxu1 %v17627_v38  ;;  %v2172_v38 = vld [vmem:[%s18230_s11 + $0x3bd0] sm:$0xff] }
 0xf90   : > { %15330 = vmatprep.subr.bf16.mxu1 %v17636_v17  ;;  %v2300_v17 = vld [vmem:[%s18230_s11 + $0x3fd0] sm:$0xff]  ;;  %v17564_v42 = vcombine.high %v2172_v38, %v2176_v45  ;;  %v17563_v60 = vcombine.low %v2172_v38, %v2176_v45 }
 0xf91   : > { %v17691_v50 = vcombine.low %v2300_v17, %v2304_v36 }
 0xf95   : > { %15167 = vmatpush1.bf16.xpose.msra.mxu0 %v17507_v21  ;;  %v17692_v21 = vcombine.high %v2300_v17, %v2304_v36  ;;  %v2101_v36 = vld [vmem:[%s18230_s11 + $0x3998] sm:$0xff] }
 0xf96   : > { %15168 = vmatprep.subr.bf16.mxu0 %v17516_v51  ;;  %v2057_v51 = vld [vmem:[%s18230_s11 + $0x3838] sm:$0xff] }
 0xf97   : > { %15331 = vmatpush1.bf16.xpose.msra.mxu1 %v17635_v3  ;;  %v2053_v3 = vld [vmem:[%s18230_s11 + $0x3818] sm:$0xff] }
 0xf98   : > { %15332 = vmatprep.subr.bf16.mxu1 %v17644_v53  ;;  %v2181_v53 = vld [vmem:[%s18230_s11 + $0x3c18] sm:$0xff]  ;;  %v17446_v48 = vcombine.high %v2053_v3, %v2057_v51  ;;  %v17445_v62 = vcombine.low %v2053_v3, %v2057_v51 }
 0xf99   : > { %v17573_v35 = vcombine.low %v2181_v53, %v2185_v54 }
 0xf9d   : > { %15169 = vmatpush1.bf16.xpose.msra.mxu0 %v17515_v49  ;;  %v17574_v49 = vcombine.high %v2181_v53, %v2185_v54  ;;  %v2109_v54 = vld [vmem:[%s18230_s11 + $0x39d8] sm:$0xff] }
 0xf9e   : > { %15170 = vmatprep.subr.bf16.mxu0 %v17524_v63  ;;  %v2065_v63 = vld [vmem:[%s18230_s11 + $0x3878] sm:$0xff] }
 0xf9f   : > { %15333 = vmatpush1.bf16.xpose.msra.mxu1 %v17643_v55  ;;  %v2061_v55 = vld [vmem:[%s18230_s11 + $0x3858] sm:$0xff] }
 0xfa0   : > { %15334 = vmatprep.subr.bf16.mxu1 %v17652_v0  ;;  %v2189_v0 = vld [vmem:[%s18230_s11 + $0x3c58] sm:$0xff]  ;;  %v17454_v28 = vcombine.high %v2061_v55, %v2065_v63  ;;  %v17453_v8 = vcombine.low %v2061_v55, %v2065_v63 }
 0xfa1   : > { %v17581_v15 = vcombine.low %v2189_v0, %v2193_v58 }
 0xfa5   : > { %15171 = vmatpush1.bf16.xpose.msra.mxu0 %v17523_v14  ;;  %v17582_v14 = vcombine.high %v2189_v0, %v2193_v58  ;;  %v2117_v58 = vld [vmem:[%s18230_s11 + $0x3a18] sm:$0xff] }
 0xfa6   : > { %15172 = vmatprep.subr.bf16.mxu0 %v17532_v12  ;;  %v2073_v12 = vld [vmem:[%s18230_s11 + $0x38b8] sm:$0xff] }
 0xfa7   : > { %15335 = vmatpush1.bf16.xpose.msra.mxu1 %v17651_v11  ;;  %v2069_v11 = vld [vmem:[%s18230_s11 + $0x3898] sm:$0xff] }
 0xfa8   : > { %15336 = vmatprep.subr.bf16.mxu1 %v17660_v19  ;;  %v2197_v19 = vld [vmem:[%s18230_s11 + $0x3c98] sm:$0xff]  ;;  %v17462_v18 = vcombine.high %v2069_v11, %v2073_v12  ;;  %v17461_v25 = vcombine.low %v2069_v11, %v2073_v12 }
 0xfa9   : > { %v17589_v26 = vcombine.low %v2197_v19, %v2201_v5 }
 0xfad   : > { %15173 = vmatpush1.bf16.xpose.msra.mxu0 %v17531_v22  ;;  %v17590_v22 = vcombine.high %v2197_v19, %v2201_v5  ;;  %v2125_v5 = vld [vmem:[%s18230_s11 + $0x3a58] sm:$0xff] }
 0xfae   : > { %15174 = vmatprep.subr.bf16.mxu0 %v17540_v40  ;;  %v2205_v40 = vld [vmem:[%s18230_s11 + $0x3cd8] sm:$0xff] }
 0xfaf   : > { %15337 = vmatpush1.bf16.xpose.msra.mxu1 %v17659_v24  ;;  %v2081_v24 = vld [vmem:[%s18230_s11 + $0x38f8] sm:$0xff] }
 0xfb0   : > { %15338 = vmatprep.subr.bf16.mxu1 %v17668_v2  ;;  %v2209_v2 = vld [vmem:[%s18230_s11 + $0x3cf8] sm:$0xff] }
 0xfb1   : > { %v17597_v47 = vcombine.low %v2205_v40, %v2209_v2 }
 0xfb5   : > { %15175 = vmatpush1.bf16.xpose.msra.mxu0 %v17539_v23  ;;  %v2089_v23 = vld [vmem:[%s18230_s11 + $0x3938] sm:$0xff] }
 0xfb6   : > { %15176 = vmatprep.subr.bf16.mxu0 %v17548_v7  ;;  %v2217_v7 = vld [vmem:[%s18230_s11 + $0x3d38] sm:$0xff]  ;;  %v17478_v9 = vcombine.high %v2085_v6, %v2089_v23 }
 0xfb7   : > { %15339 = vmatpush1.bf16.xpose.msra.mxu1 %v17667_v30  ;;  %v2213_v30 = vld [vmem:[%s18230_s11 + $0x3d18] sm:$0xff] }
 0xfb8   : > { %15340 = vmatprep.subr.bf16.mxu1 %v17676_v39  ;;  %v17606_v32 = vcombine.high %v2213_v30, %v2217_v7  ;;  %v17605_v38 = vcombine.low %v2213_v30, %v2217_v7  ;;  %v2141_v7 = vld [vmem:[%s18230_s11 + $0x3ad8] sm:$0xff] }
 0xfbd   : > { %15177 = vmatpush1.bf16.xpose.msra.mxu0 %v17547_v43  ;;  %v2097_v43 = vld [vmem:[%s18230_s11 + $0x3978] sm:$0xff] }
 0xfbe   : > { %15178 = vmatprep.subr.bf16.mxu0 %v17556_v44  ;;  %v2225_v44 = vld [vmem:[%s18230_s11 + $0x3d78] sm:$0xff]  ;;  %v17486_v45 = vcombine.high %v2093_v33, %v2097_v43 }
 0xfbf   : > { %15341 = vmatpush1.bf16.xpose.msra.mxu1 %v17675_v31  ;;  %v2221_v31 = vld [vmem:[%s18230_s11 + $0x3d58] sm:$0xff] }
 0xfc0   : > { %15342 = vmatprep.subr.bf16.mxu1 %v17684_v37  ;;  %v17477_v37 = vcombine.low %v2085_v6, %v2089_v23  ;;  %v17614_v17 = vcombine.high %v2221_v31, %v2225_v44  ;;  %v17613_v3 = vcombine.low %v2221_v31, %v2225_v44  ;;  %v2149_v44 = vld [vmem:[%s18230_s11 + $0x3b18] sm:$0xff] }
 0xfc5   : > { %15179 = vmatpush1.bf16.xpose.msra.mxu0 %v17555_v46  ;;  %v2105_v46 = vld [vmem:[%s18230_s11 + $0x39b8] sm:$0xff] }
 0xfc6   : > { %15180 = vmatprep.subr.bf16.mxu0 %v17564_v42  ;;  %v2233_v42 = vld [vmem:[%s18230_s11 + $0x3db8] sm:$0xff]  ;;  %v17494_v51 = vcombine.high %v2101_v36, %v2105_v46 }
 0xfc7   : > { %15343 = vmatpush1.bf16.xpose.msra.mxu1 %v17683_v20  ;;  %v2229_v20 = vld [vmem:[%s18230_s11 + $0x3d98] sm:$0xff] }
 0xfc8   : > { %15344 = vmatprep.subr.bf16.mxu1 %v17692_v21  ;;  %v17485_v21 = vcombine.low %v2093_v33, %v2097_v43  ;;  %v17622_v53 = vcombine.high %v2229_v20, %v2233_v42  ;;  %v17621_v55 = vcombine.low %v2229_v20, %v2233_v42  ;;  %v2157_v42 = vld [vmem:[%s18230_s11 + $0x3b58] sm:$0xff] }
 0xfcd   : > { %15181 = vmatpush1.bf16.xpose.msra.mxu0 %v17563_v60  ;;  %v2113_v60 = vld [vmem:[%s18230_s11 + $0x39f8] sm:$0xff] }
 0xfce   : > { %15191 = vmatprep.subr.bf16.mxu0 %v17446_v48  ;;  %v2241_v48 = vld [vmem:[%s18230_s11 + $0x3df8] sm:$0xff]  ;;  %v17502_v63 = vcombine.high %v2109_v54, %v2113_v60 }
 0xfcf   : > { %15345 = vmatpush1.bf16.xpose.msra.mxu1 %v17691_v50  ;;  %v2237_v50 = vld [vmem:[%s18230_s11 + $0x3dd8] sm:$0xff] }
 0xfd0   : > { %15355 = vmatprep.subr.bf16.mxu1 %v17574_v49  ;;  %v17493_v49 = vcombine.low %v2101_v36, %v2105_v46  ;;  %v17630_v0 = vcombine.high %v2237_v50, %v2241_v48  ;;  %v17629_v11 = vcombine.low %v2237_v50, %v2241_v48  ;;  %v2165_v48 = vld [vmem:[%s18230_s11 + $0x3b98] sm:$0xff] }
 0xfd4   : > { %15183 = vmatmul.mubr.bf16.vlgmr.msra.gmra.mrb[28].mxu0 %v18493_v61 }
 0xfd5   : > { %15192 = vmatpush1.bf16.xpose.msra.mxu0 %v17445_v62  ;;  %15223 = vmatprep.mubr.bf16.mxu0 %v18499_v4  ;;  %v2121_v62 = vld [vmem:[%s18230_s11 + $0x3a38] sm:$0xff] }
 0xfd6   : > { %15347 = vmatmul.mubr.bf16.vlgmr.msra.gmra.mrb[28].mxu1 %v18493_v61  ;;  %15193 = vmatprep.subr.bf16.mxu0 %v17454_v28  ;;  %v2077_v61 = vld [vmem:[%s18230_s11 + $0x38d8] sm:$0xff]  ;;  %v17510_v12 = vcombine.high %v2117_v58, %v2121_v62 }
 0xfd7   : > { %15356 = vmatpush1.bf16.xpose.msra.mxu1 %v17573_v35  ;;  %15387 = vmatprep.mubr.bf16.mxu1 %v18499_v4  ;;  %v17470_v29 = vcombine.high %v2077_v61, %v2081_v24  ;;  %v17598_v4 = vcombine.high %v2205_v40, %v2209_v2  ;;  %v17469_v39 = vcombine.low %v2077_v61, %v2081_v24  ;;  %v2245_v35 = vld [vmem:[%s18230_s11 + $0x3e18] sm:$0xff] }
 0xfd8   : > { %15357 = vmatprep.subr.bf16.mxu1 %v17582_v14  ;;  %v2249_v28 = vld [vmem:[%s18230_s11 + $0x3e38] sm:$0xff]  ;;  %v17501_v14 = vcombine.low %v2109_v54, %v2113_v60 }
 0xfd9   : > { %v17638_v19 = vcombine.high %v2245_v35, %v2249_v28  ;;  %v17637_v61 = vcombine.low %v2245_v35, %v2249_v28  ;;  %v2133_v2 = vld [vmem:[%s18230_s11 + $0x3a98] sm:$0xff] }
 0xfda   : > { %v2173_v28 = vld [vmem:[%s18230_s11 + $0x3bd8] sm:$0xff] }
 0xfdd   : > { %15194 = vmatpush1.bf16.xpose.msra.mxu0 %v17453_v8  ;;  %v2129_v8 = vld [vmem:[%s18230_s11 + $0x3a78] sm:$0xff] }
 0xfde   : > { %15195 = vmatprep.subr.bf16.mxu0 %v17462_v18  ;;  %v2257_v18 = vld [vmem:[%s18230_s11 + $0x3e78] sm:$0xff]  ;;  %v17518_v24 = vcombine.high %v2125_v5, %v2129_v8 }
 0xfdf   : > { %15358 = vmatpush1.bf16.xpose.msra.mxu1 %v17581_v15  ;;  %v2253_v15 = vld [vmem:[%s18230_s11 + $0x3e58] sm:$0xff] }
 0xfe0   : > { %15359 = vmatprep.subr.bf16.mxu1 %v17590_v22  ;;  %v17509_v22 = vcombine.low %v2117_v58, %v2121_v62  ;;  %v17646_v40 = vcombine.high %v2253_v15, %v2257_v18  ;;  %v17645_v6 = vcombine.low %v2253_v15, %v2257_v18 }
 0xfe5   : > { %15196 = vmatpush1.bf16.xpose.msra.mxu0 %v17461_v25  ;;  %v2137_v25 = vld [vmem:[%s18230_s11 + $0x3ab8] sm:$0xff] }
 0xfe6   : > { %15197 = vmatprep.subr.bf16.mxu0 %v17470_v29  ;;  %v2265_v29 = vld [vmem:[%s18230_s11 + $0x3eb8] sm:$0xff]  ;;  %v17526_v23 = vcombine.high %v2133_v2, %v2137_v25 }
 0xfe7   : > { %15360 = vmatpush1.bf16.xpose.msra.mxu1 %v17589_v26  ;;  %v2261_v26 = vld [vmem:[%s18230_s11 + $0x3e98] sm:$0xff] }
 0xfe8   : > { %15361 = vmatprep.subr.bf16.mxu1 %v17598_v4  ;;  %v17517_v4 = vcombine.low %v2125_v5, %v2129_v8  ;;  %v17654_v30 = vcombine.high %v2261_v26, %v2265_v29  ;;  %v17653_v33 = vcombine.low %v2261_v26, %v2265_v29 }
 0xfed   : > { %15198 = vmatpush1.bf16.xpose.msra.mxu0 %v17469_v39  ;;  %v2145_v39 = vld [vmem:[%s18230_s11 + $0x3af8] sm:$0xff] }
 0xfee   : > { %15199 = vmatprep.subr.bf16.mxu0 %v17478_v9  ;;  %v2273_v9 = vld [vmem:[%s18230_s11 + $0x3ef8] sm:$0xff]  ;;  %v17534_v43 = vcombine.high %v2141_v7, %v2145_v39 }
 0xfef   : > { %15362 = vmatpush1.bf16.xpose.msra.mxu1 %v17597_v47  ;;  %v2269_v47 = vld [vmem:[%s18230_s11 + $0x3ed8] sm:$0xff] }
 0xff0   : > { %15363 = vmatprep.subr.bf16.mxu1 %v17606_v32  ;;  %v17525_v32 = vcombine.low %v2133_v2, %v2137_v25  ;;  %v17662_v31 = vcombine.high %v2269_v47, %v2273_v9  ;;  %v17661_v36 = vcombine.low %v2269_v47, %v2273_v9  ;;  %v12739_v2 = vrot.slane %v20473_v1, %v19009_v59 }
 0xff5   : > { %15200 = vmatpush1.bf16.xpose.msra.mxu0 %v17477_v37  ;;  %v2153_v37 = vld [vmem:[%s18230_s11 + $0x3b38] sm:$0xff] }
 0xff6   : > { %15201 = vmatprep.subr.bf16.mxu0 %v17486_v45  ;;  %v2281_v45 = vld [vmem:[%s18230_s11 + $0x3f38] sm:$0xff]  ;;  %v17542_v46 = vcombine.high %v2149_v44, %v2153_v37 }
 0xff7   : > { %15364 = vmatpush1.bf16.xpose.msra.mxu1 %v17605_v38  ;;  %v2277_v38 = vld [vmem:[%s18230_s11 + $0x3f18] sm:$0xff] }
 0xff8   : > { %15365 = vmatprep.subr.bf16.mxu1 %v17614_v17  ;;  %v17533_v17 = vcombine.low %v2141_v7, %v2145_v39  ;;  %v17670_v20 = vcombine.high %v2277_v38, %v2281_v45  ;;  %v17669_v54 = vcombine.low %v2277_v38, %v2281_v45 }
 0xffd   : > { %15202 = vmatpush1.bf16.xpose.msra.mxu0 %v17485_v21  ;;  %v2161_v21 = vld [vmem:[%s18230_s11 + $0x3b78] sm:$0xff] }
 0xffe   : > { %15203 = vmatprep.subr.bf16.mxu0 %v17494_v51  ;;  %v2289_v51 = vld [vmem:[%s18230_s11 + $0x3f78] sm:$0xff]  ;;  %v17550_v60 = vcombine.high %v2157_v42, %v2161_v21 }
 0xfff   : > { %15366 = vmatpush1.bf16.xpose.msra.mxu1 %v17613_v3  ;;  %v2285_v3 = vld [vmem:[%s18230_s11 + $0x3f58] sm:$0xff] }
0x1000   : > { %15367 = vmatprep.subr.bf16.mxu1 %v17622_v53  ;;  %v17541_v53 = vcombine.low %v2149_v44, %v2153_v37  ;;  %v17678_v50 = vcombine.high %v2285_v3, %v2289_v51  ;;  %v17677_v58 = vcombine.low %v2285_v3, %v2289_v51 }
0x1005   : > { %15204 = vmatpush1.bf16.xpose.msra.mxu0 %v17493_v49  ;;  %v2169_v49 = vld [vmem:[%s18230_s11 + $0x3bb8] sm:$0xff] }
0x1006   : > { %15205 = vmatprep.subr.bf16.mxu0 %v17502_v63  ;;  %v2297_v63 = vld [vmem:[%s18230_s11 + $0x3fb8] sm:$0xff]  ;;  %v17558_v62 = vcombine.high %v2165_v48, %v2169_v49 }
0x1007   : > { %15368 = vmatpush1.bf16.xpose.msra.mxu1 %v17621_v55  ;;  %v2293_v55 = vld [vmem:[%s18230_s11 + $0x3f98] sm:$0xff] }
0x1008   : > { %15369 = vmatprep.subr.bf16.mxu1 %v17630_v0  ;;  %v17549_v0 = vcombine.low %v2157_v42, %v2161_v21  ;;  %v17686_v35 = vcombine.high %v2293_v55, %v2297_v63  ;;  %v17685_v5 = vcombine.low %v2293_v55, %v2297_v63 }
0x100d   : > { %15206 = vmatpush1.bf16.xpose.msra.mxu0 %v17501_v14  ;;  %v2177_v14 = vld [vmem:[%s18230_s11 + $0x3bf8] sm:$0xff] }
0x100e   : > { %15207 = vmatprep.subr.bf16.mxu0 %v17510_v12  ;;  %v2305_v12 = vld [vmem:[%s18230_s11 + $0x3ff8] sm:$0xff]  ;;  %v17566_v8 = vcombine.high %v2173_v28, %v2177_v14  ;;  %v17565_v18 = vcombine.low %v2173_v28, %v2177_v14 }
0x100f   : > { %15370 = vmatpush1.bf16.xpose.msra.mxu1 %v17629_v11  ;;  %v2301_v11 = vld [vmem:[%s18230_s11 + $0x3fd8] sm:$0xff] }
0x1010   : > { %15371 = vmatprep.subr.bf16.mxu1 %v17638_v19  ;;  %v17557_v19 = vcombine.low %v2165_v48, %v2169_v49  ;;  %v17694_v15 = vcombine.high %v2301_v11, %v2305_v12 }
0x1015   : > { %15208 = vmatpush1.bf16.xpose.msra.mxu0 %v17509_v22  ;;  %v17693_v22 = vcombine.low %v2301_v11, %v2305_v12 }
0x1016   : > { %15209 = vmatprep.subr.bf16.mxu0 %v17518_v24  ;;  %v12735_v24 = vrot.slane %v20473_v1, %v19003_v56 }
0x1017   : > { %15372 = vmatpush1.bf16.xpose.msra.mxu1 %v17637_v61  ;;  %v12727_v61 = vrot.slane %v20473_v1, %v18998_v52 }
0x1018   : > { %15373 = vmatprep.subr.bf16.mxu1 %v17646_v40  ;;  %v12731_v40 = vrot.slane %v20473_v1, %v19006_v57 }
0x101d   : > { %15210 = vmatpush1.bf16.xpose.msra.mxu0 %v17517_v4 }
0x101e   : > { %15211 = vmatprep.subr.bf16.mxu0 %v17526_v23 }
0x101f   : > { %15374 = vmatpush1.bf16.xpose.msra.mxu1 %v17645_v6 }
0x1020   : > { %15375 = vmatprep.subr.bf16.mxu1 %v17654_v30 }
0x1025   : > { %15212 = vmatpush1.bf16.xpose.msra.mxu0 %v17525_v32 }
0x1026   : > { %15213 = vmatprep.subr.bf16.mxu0 %v17534_v43 }
0x1027   : > { %15376 = vmatpush1.bf16.xpose.msra.mxu1 %v17653_v33 }
0x1028   : > { %15377 = vmatprep.subr.bf16.mxu1 %v17662_v31 }
0x102d   : > { %15214 = vmatpush1.bf16.xpose.msra.mxu0 %v17533_v17 }
0x102e   : > { %15215 = vmatprep.subr.bf16.mxu0 %v17542_v46 }
0x102f   : > { %15378 = vmatpush1.bf16.xpose.msra.mxu1 %v17661_v36 }
0x1030   : > { %15379 = vmatprep.subr.bf16.mxu1 %v17670_v20 }
0x1035   : > { %15216 = vmatpush1.bf16.xpose.msra.mxu0 %v17541_v53 }
0x1036   : > { %15217 = vmatprep.subr.bf16.mxu0 %v17550_v60 }
0x1037   : > { %15380 = vmatpush1.bf16.xpose.msra.mxu1 %v17669_v54 }
0x1038   : > { %15381 = vmatprep.subr.bf16.mxu1 %v17678_v50 }
0x103d   : > { %15218 = vmatpush1.bf16.xpose.msra.mxu0 %v17549_v0 }
0x103e   : > { %15219 = vmatprep.subr.bf16.mxu0 %v17558_v62 }
0x103f   : > { %15382 = vmatpush1.bf16.xpose.msra.mxu1 %v17677_v58 }
0x1040   : > { %15383 = vmatprep.subr.bf16.mxu1 %v17686_v35 }
0x1045   : > { %15220 = vmatpush1.bf16.xpose.msra.mxu0 %v17557_v19 }
0x1046   : > { %15221 = vmatprep.subr.bf16.mxu0 %v17566_v8 }
0x1047   : > { %15384 = vmatpush1.bf16.xpose.msra.mxu1 %v17685_v5 }
0x1048   : > { %15385 = vmatprep.subr.bf16.mxu1 %v17694_v15 }
0x104d   : > { %15222 = vmatpush1.bf16.xpose.msra.mxu0 %v17565_v18 }
0x104f   : > { %15386 = vmatpush1.bf16.xpose.msra.mxu1 %v17693_v22 }
0x1054   : > { %15224 = vmatmul.mubr.bf16.vlgmr.msra.gmra.mrb[28].mxu0 %v18569_v13 }
0x1056   : > { %15388 = vmatmul.mubr.bf16.vlgmr.msra.gmra.mrb[28].mxu1 %v18569_v13 }
0x1127   : > { %v15225_v25 = vpop.f32.mrb[28].mxu0 }
0x1128   : > { %v17728_v26 = vadd.f32 %v15225_v25, %v12727_v61  ;;  %v15227_v4 = vpop.f32.mrb[29].mxu0 }
0x1129   : > { %v15389_v29 = vpop.f32.mrb[28].mxu1  ;;  %v17729_v23 = vadd.f32 %v15227_v4, %v12731_v40  ;;  %v15229_v13 = vpop.f32.mrb[30].mxu0 }
0x112a   : > { %v17730_v6 = vadd.f32 %v15389_v29, %v12735_v24  ;;  %v15391_v30 = vpop.f32.mrb[29].mxu1  ;;  %v15523_v7 = vmul.f32 %v17728_v26, %v19019_v41  ;;  %v15230_v56 = vpop.f32.mrb[31].mxu0 }
0x112b   : > { %v17731_v52 = vadd.f32 %v15391_v30, %v12739_v2  ;;  %v15393_v39 = vpop.f32.mrb[30].mxu1  ;;  %v15524_v47 = vmul.f32 %v17729_v23, %v19023_v10 }
0x112c   : > { %v15394_v57 = vpop.f32.mrb[31].mxu1  ;;  %v15534_v9 = vsel %vm15447_vm0, %v15523_v7, 0.0  ;;  %v15525_v59 = vmul.f32 %v17730_v6, %v19028_v16 }
0x112d   : > { %v15535_v1 = vadd.f32 %v15534_v9, %v20499_v34  ;;  %v15536_v32 = vsel %vm15447_vm0, %v15524_v47, 0.0  ;;  %v15526_v33 = vmul.f32 %v17731_v52, %v19033_v27 }
0x112e   : > { %v15538_v41 = vsel %vm15447_vm0, %v15525_v59, 0.0 }
0x112f   : > { %v15537_v43 = vadd.f32 %v15536_v32, %v15535_v1  ;;  %v15540_v44 = vsel %vm15447_vm0, %v15526_v33, 0.0 }
0x1131   : > { %v15539_v31 = vadd.f32 %v15538_v41, %v15537_v43 }
0x1133   : > { %v15541_v37 = vadd.f32 %v15540_v44, %v15539_v31 }
0x1135   : > { %15542 = vadd.xlane.f32.xlu1 %v15541_v37 }
0x11c2   : > { %v15543_v10 = vpop.xlane.xlu1 %15542 }
0x11c3   : > { %15544 = vst.msk [vmem:[%s19061_s22 + $0x3] sm:$0x1] %vm15465_vm1, %v15543_v10 }
0x11c4 PF: > { %p17_p8 = scmp.ge.s32.totalorder %s18130_s20, 6   ;;  %s20691_s15 = smov %s18067_s16 }
0x11c5   : > { %s20692_s16 = smov %s18071_s17  ;;  %s20693_s17 = smov %s18140_s23 }
0x11c6   : > { %s20694_s18 = smov %s18130_s20  ;;  %19 = sbr.rel (!%p17_p8) target bundleno = 5 (0x5), region = 89 }
0x11cd   :  { %15564 = vsyncpa [#allocation3], 1 }
0x11ce   :  { %15566 = vsyncpa [#allocation3 + $0x1], 1 }
0x11cf   :  { %15567 = vsyncpa [#allocation5], 1 }
0x11d0   :  { %15569 = vsyncpa [#allocation5 + $0x1], 1 }

</bundles_post_ra>
